<compile_context>
chip_gen: v6e
topology: v6e:2x2x1
jax: 0.10.0
libtpu: 0.0.40
codegen_flags: <defaults>
</compile_context>

<pallas_src>
import numpy as np
import jax
import jax.numpy as jnp
from jax.experimental import pallas as pl
from jax.experimental.pallas import tpu as pltpu

MULTIRES = 10
PE_DIM = 3 + 3 * 2 * MULTIRES        # 63 (include_input + sin/cos of 10 freqs)
W_HID = 256
TN = 256                             # row tile (MXU M dimension)


# ---------------------------------------------------------------------------
# Positional encoding (glue, plain JAX)
# ---------------------------------------------------------------------------
def embed(x, multires=MULTIRES):
    """gamma(x) = [x, sin(2^0 x), cos(2^0 x), ..., sin(2^(L-1) x), cos(2^(L-1) x)]."""
    freqs = 2.0 ** jnp.arange(multires, dtype=jnp.float32)   # log-sampled bands
    parts = [x]
    for f in freqs:
        parts.append(jnp.sin(x * f))
        parts.append(jnp.cos(x * f))
    return jnp.concatenate(parts, axis=-1)


# ---------------------------------------------------------------------------
# Pallas kernel: the full NeRF2 MLP for one tile of TN rows (bf16 MXU, f32 acc)
# ---------------------------------------------------------------------------
def nerf2_mlp_kernel(pts_ref, vt_ref,
                     w0_ref, b0_ref, wh_ref, bh_ref,
                     w5x_ref, w5p_ref, b5_ref,
                     wfa_ref, bfa_ref,
                     ws0f_ref, ws0v_ref, bs0_ref,
                     ws1_ref, bs1_ref, wso_ref, bso_ref,
                     out_ref):
    pts = pts_ref[...]    # (TN, 64)  bf16: cols 0:63  = gamma(pts), col 63 zero
    vt = vt_ref[...]      # (TN, 128) bf16: cols 0:63  = gamma(view), 63:66 = tx, rest zero

    def mm(a, b):
        # bf16 x bf16 -> single MXU pass, f32 accumulation
        return jnp.dot(a, b, preferred_element_type=jnp.float32)

    def act(y):
        return jnp.maximum(y, 0.0).astype(jnp.bfloat16)

    # --- attenuation MLP: 8 layers; skip-concat of gamma(pts) after layer 4 is a
    #     split matmul at layer 5 (no in-kernel concatenate) ---
    x = act(mm(pts, w0_ref[...]) + b0_ref[...])                        # layer 0
    for j in range(4):                                                 # layers 1..4
        x = act(mm(x, wh_ref[j]) + bh_ref[j])
    x = act(mm(x, w5x_ref[...]) + mm(pts, w5p_ref[...]) + b5_ref[...])  # layer 5 (skip)
    for j in range(4, 6):                                              # layers 6..7
        x = act(mm(x, wh_ref[j]) + bh_ref[j])

    # --- fused feature layer + attenuation head: one (TN,256)x(256,384) matmul ---
    fa = mm(x, wfa_ref[...]) + bfa_ref[...]                            # (TN, 384) f32
    feature = fa[:, :W_HID].astype(jnp.bfloat16)                       # no activation
    attn4 = fa[:, W_HID:W_HID + 4]                                     # cols 0:2 = attn (+bias)

    # --- signal MLP: concat([feature, view, tx]) as a split matmul ---
    s = act(mm(feature, ws0f_ref[...]) + mm(vt, ws0v_ref[...]) + bs0_ref[...])  # (TN,256)
    s = act(mm(s, ws1_ref[...]) + bs1_ref[...])                                 # (TN,128)
    sig4 = mm(s, wso_ref[...]) + bso_ref[...]                           # cols 2:4 = signal (+bias)

    out_ref[...] = attn4 + sig4                                         # [attn(2) | signal(2)]


# ---------------------------------------------------------------------------
# Parameters (deterministic, PyTorch-Linear-like init)
# ---------------------------------------------------------------------------
def init_params(key):
    def linear(k, fin, fout):
        k1, k2 = jax.random.split(k)
        bound = 1.0 / np.sqrt(fin)
        Wm = jax.random.uniform(k1, (fin, fout), jnp.float32, -bound, bound)
        b = jax.random.uniform(k2, (1, fout), jnp.float32, -bound, bound)
        return Wm, b

    keys = jax.random.split(key, 13)
    attn_dims = [(PE_DIM, W_HID)] + [
        (W_HID + PE_DIM, W_HID) if i == 4 else (W_HID, W_HID) for i in range(7)]
    p = {}
    p["attn"] = [linear(keys[i], fi, fo) for i, (fi, fo) in enumerate(attn_dims)]
    p["attn_out"] = linear(keys[8], W_HID, 2)
    p["feat"] = linear(keys[9], W_HID, W_HID)
    p["sig"] = [linear(keys[10], PE_DIM + 3 + W_HID, W_HID),
                linear(keys[11], W_HID, W_HID // 2)]
    p["sig_out"] = linear(keys[12], W_HID // 2, 2)
    return p


def pad_params(p):
    """Pack/pad the weights for the kernel: bf16 matrices, f32 biases, zero rows
    mirroring the zero-padded input lanes, attn head fused into the feature layer."""
    f32, bf16 = jnp.float32, jnp.bfloat16
    ws = []

    # layer 0: gamma(pts) padded 63 -> 64 rows
    W0, b0 = p["attn"][0]
    ws += [jnp.zeros((64, W_HID), f32).at[:PE_DIM].set(W0).astype(bf16), b0]

    # uniform hidden layers 1,2,3,4,6,7 stacked into one array
    hid_idx = [1, 2, 3, 4, 6, 7]
    wh = jnp.stack([p["attn"][i][0] for i in hid_idx]).astype(bf16)     # (6,256,256)
    bh = jnp.stack([p["attn"][i][1] for i in hid_idx])                  # (6,1,256) f32
    ws += [wh, bh]

    # skip layer 5: input was [gamma(pts)(63), x(256)] -> split weights
    W5, b5 = p["attn"][5]                                               # (319,256)
    w5x = W5[PE_DIM:].astype(bf16)                                      # (256,256)
    w5p = jnp.zeros((64, W_HID), f32).at[:PE_DIM].set(W5[:PE_DIM]).astype(bf16)
    ws += [w5x, w5p, b5]

    # fused feature layer + attenuation head: cols 0:256 feature, 256:258 attn
    Wf, bf_ = p["feat"]
    Wa, ba = p["attn_out"]
    wfa = (jnp.zeros((W_HID, W_HID + 128), f32)
           .at[:, :W_HID].set(Wf).at[:, W_HID:W_HID + 2].set(Wa)).astype(bf16)
    bfa = (jnp.zeros((1, W_HID + 128), f32)
           .at[:, :W_HID].set(bf_).at[:, W_HID:W_HID + 2].set(ba))
    ws += [wfa, bfa]

    # signal layer 0: input was [feature(256), view(63), tx(3)] -> split weights
    Ws0, bs0 = p["sig"][0]                                              # (322,256)
    ws0f = Ws0[:W_HID].astype(bf16)                                     # (256,256)
    ws0v = jnp.zeros((128, W_HID), f32).at[:PE_DIM + 3].set(Ws0[W_HID:]).astype(bf16)
    ws += [ws0f, ws0v, bs0]

    # signal layer 1
    Ws1, bs1 = p["sig"][1]                                              # (256,128)
    ws += [Ws1.astype(bf16), bs1]

    # signal output head -> columns 2:4 of the 4-wide output
    Wso, bso = p["sig_out"]                                             # (128,2)
    ws += [jnp.zeros((W_HID // 2, 4), f32).at[:, 2:].set(Wso).astype(bf16),
           jnp.zeros((1, 4), f32).at[:, 2:].set(bso)]
    return ws


# ---------------------------------------------------------------------------
# Pallas forward wrapper
# ---------------------------------------------------------------------------
@jax.jit
def nerf2_pallas(pts, view, tx, *ws):
    B, R, V, S, _ = pts.shape
    N = B * R * V * S
    pts_e = embed(pts.reshape(N, 3))     # (N, 63)
    view_e = embed(view.reshape(N, 3))   # (N, 63)
    tx_f = tx.reshape(N, 3)              # (N, 3)   (is_embeded['tx'] = False -> identity)

    # fused lane-padded bf16 input slabs (single concatenate, no zeros().at[].set())
    pts_pad = jnp.concatenate(
        [pts_e, jnp.zeros((N, 64 - PE_DIM), jnp.float32)], axis=-1).astype(jnp.bfloat16)
    vt_pad = jnp.concatenate(
        [view_e, tx_f, jnp.zeros((N, 128 - PE_DIM - 3), jnp.float32)], axis=-1
    ).astype(jnp.bfloat16)

    n_tiles = pl.cdiv(N, TN)
    Np = n_tiles * TN
    if Np != N:                                     # pad rows; extra rows discarded below
        pts_pad = jnp.pad(pts_pad, ((0, Np - N), (0, 0)))
        vt_pad = jnp.pad(vt_pad, ((0, Np - N), (0, 0)))

    in_specs = [pl.BlockSpec((TN, 64), lambda i: (i, 0)),
                pl.BlockSpec((TN, 128), lambda i: (i, 0))]
    # weights: full-array blocks with a constant block index (stay resident in VMEM)
    in_specs += [pl.BlockSpec(w.shape, lambda i, nd=w.ndim: (0,) * nd) for w in ws]

    out = pl.pallas_call(
        nerf2_mlp_kernel,
        out_shape=jax.ShapeDtypeStruct((Np, 4), jnp.float32),
        grid=(n_tiles,),
        in_specs=in_specs,
        out_specs=pl.BlockSpec((TN, 4), lambda i: (i, 0)),
        compiler_params=pltpu.CompilerParams(
            dimension_semantics=("parallel",),
            vmem_limit_bytes=32 * 1024 * 1024),
    )(pts_pad, vt_pad, *ws)
    return out[:N].reshape(B, R, V, S, 4)


# ---------------------------------------------------------------------------
# Pure-JAX reference (mirrors the PyTorch forward exactly, unpadded/unfused).
# bf16=True uses the same bf16-operand / f32-accumulate quantization as the kernel.
# ---------------------------------------------------------------------------
def nerf2_reference(pts, view, tx, p, bf16=False):
    if bf16:
        def mm(a, b):
            return jnp.dot(a.astype(jnp.bfloat16), b.astype(jnp.bfloat16),
                           preferred_element_type=jnp.float32)
    else:
        def mm(a, b):
            return jnp.dot(a, b, preferred_element_type=jnp.float32,
                           precision=jax.lax.Precision.HIGHEST)

    B, R, V, S, _ = pts.shape
    N = B * R * V * S
    pts_e = embed(pts.reshape(N, 3))
    view_e = embed(view.reshape(N, 3))
    tx_f = tx.reshape(N, 3)
    x = pts_e
    for i in range(8):
        Wm, b = p["attn"][i]
        x = jnp.maximum(mm(x, Wm) + b, 0.0)
        if i == 4:                                    # skips = [4]
            x = jnp.concatenate([pts_e, x], axis=-1)
    attn = mm(x, p["attn_out"][0]) + p["attn_out"][1]
    feature = mm(x, p["feat"][0]) + p["feat"][1]
    x = jnp.concatenate([feature, view_e, tx_f], axis=-1)
    for i in range(2):
        Wm, b = p["sig"][i]
        x = jnp.maximum(mm(x, Wm) + b, 0.0)
    signal = mm(x, p["sig_out"][0]) + p["sig_out"][1]
    out = jnp.concatenate([attn, signal], axis=-1)
    return out.reshape(B, R, V, S, 4)


if __name__ == "__main__":
    key = jax.random.PRNGKey(0)
    kp, k1, k2, k3 = jax.random.split(key, 4)

    # small shapes: batch=2, n_rx=4, n_views=4, n_samples=16  ->  N = 512 rows (2 tiles)
    B, R, V, S = 2, 4, 4, 16
    pts = jax.random.uniform(k1, (B, R, V, S, 3), jnp.float32, -1.0, 1.0)
    view = jax.random.uniform(k2, (B, R, V, S, 3), jnp.float32, -1.0, 1.0)
    tx = jax.random.uniform(k3, (B, R, V, S, 3), jnp.float32, -1.0, 1.0)

    params = init_params(kp)
    ws = pad_params(params)

    out = nerf2_pallas(pts, view, tx, *ws)
    out = jax.block_until_ready(out)
    assert out.shape == (B, R, V, S, 4)

    # exact-structure reference using the same bf16-matmul quantization as the kernel
    ref_bf16 = nerf2_reference(pts, view, tx, params, bf16=True)
    np.testing.assert_allclose(np.asarray(out), np.asarray(ref_bf16), rtol=1e-2, atol=1e-2)

    # loose sanity check against the full-f32 reference (bf16 rounding only)
    ref_f32 = nerf2_reference(pts, view, tx, params, bf16=False)
    np.testing.assert_allclose(np.asarray(out), np.asarray(ref_f32), rtol=5e-2, atol=5e-2)

    print("KERNEL_OK")
</pallas_src>

<mosaic_0001>
module attributes {stable_mosaic.version = 11 : i64} {
  func.func @nerf2_mlp_kernel(%arg0: i32, %arg1: memref<256x64xbf16, #tpu.memory_space<vmem>>, %arg2: memref<256x128xbf16, #tpu.memory_space<vmem>>, %arg3: memref<64x256xbf16, #tpu.memory_space<vmem>>, %arg4: memref<1x256xf32, #tpu.memory_space<vmem>>, %arg5: memref<6x256x256xbf16, #tpu.memory_space<vmem>>, %arg6: memref<6x1x256xf32, #tpu.memory_space<vmem>>, %arg7: memref<256x256xbf16, #tpu.memory_space<vmem>>, %arg8: memref<64x256xbf16, #tpu.memory_space<vmem>>, %arg9: memref<1x256xf32, #tpu.memory_space<vmem>>, %arg10: memref<256x384xbf16, #tpu.memory_space<vmem>>, %arg11: memref<1x384xf32, #tpu.memory_space<vmem>>, %arg12: memref<256x256xbf16, #tpu.memory_space<vmem>>, %arg13: memref<128x256xbf16, #tpu.memory_space<vmem>>, %arg14: memref<1x256xf32, #tpu.memory_space<vmem>>, %arg15: memref<256x128xbf16, #tpu.memory_space<vmem>>, %arg16: memref<1x128xf32, #tpu.memory_space<vmem>>, %arg17: memref<128x4xbf16, #tpu.memory_space<vmem>>, %arg18: memref<1x4xf32, #tpu.memory_space<vmem>>, %arg19: memref<256x4xf32, #tpu.memory_space<vmem>>) attributes {dimension_semantics = [#tpu.dimension_semantics<parallel>], iteration_bounds = array<i64: 2>, scalar_prefetch = 0 : i64, scratch_operands = 0 : i64, tpu.core_type = #tpu.core_type<tc>, window_params = [{transform_indices = @transform_0, window_bounds = array<i64: 256, 64>}, {transform_indices = @transform_1, window_bounds = array<i64: 256, 128>}, {pipeline_mode = #tpu.pipeline_mode<synchronous>, transform_indices = @transform_2, window_bounds = array<i64: 64, 256>}, {pipeline_mode = #tpu.pipeline_mode<synchronous>, transform_indices = @transform_3, window_bounds = array<i64: 1, 256>}, {pipeline_mode = #tpu.pipeline_mode<synchronous>, transform_indices = @transform_4, window_bounds = array<i64: 6, 256, 256>}, {pipeline_mode = #tpu.pipeline_mode<synchronous>, transform_indices = @transform_5, window_bounds = array<i64: 6, 1, 256>}, {pipeline_mode = #tpu.pipeline_mode<synchronous>, transform_indices = @transform_6, window_bounds = array<i64: 256, 256>}, {pipeline_mode = #tpu.pipeline_mode<synchronous>, transform_indices = @transform_7, window_bounds = array<i64: 64, 256>}, {pipeline_mode = #tpu.pipeline_mode<synchronous>, transform_indices = @transform_8, window_bounds = array<i64: 1, 256>}, {pipeline_mode = #tpu.pipeline_mode<synchronous>, transform_indices = @transform_9, window_bounds = array<i64: 256, 384>}, {pipeline_mode = #tpu.pipeline_mode<synchronous>, transform_indices = @transform_10, window_bounds = array<i64: 1, 384>}, {pipeline_mode = #tpu.pipeline_mode<synchronous>, transform_indices = @transform_11, window_bounds = array<i64: 256, 256>}, {pipeline_mode = #tpu.pipeline_mode<synchronous>, transform_indices = @transform_12, window_bounds = array<i64: 128, 256>}, {pipeline_mode = #tpu.pipeline_mode<synchronous>, transform_indices = @transform_13, window_bounds = array<i64: 1, 256>}, {pipeline_mode = #tpu.pipeline_mode<synchronous>, transform_indices = @transform_14, window_bounds = array<i64: 256, 128>}, {pipeline_mode = #tpu.pipeline_mode<synchronous>, transform_indices = @transform_15, window_bounds = array<i64: 1, 128>}, {pipeline_mode = #tpu.pipeline_mode<synchronous>, transform_indices = @transform_16, window_bounds = array<i64: 128, 4>}, {pipeline_mode = #tpu.pipeline_mode<synchronous>, transform_indices = @transform_17, window_bounds = array<i64: 1, 4>}, {transform_indices = @transform_18, window_bounds = array<i64: 256, 4>}]} {
    %c0 = arith.constant 0 : index
    %c0_0 = arith.constant 0 : index
    %0 = vector.load %arg1[%c0, %c0_0] : memref<256x64xbf16, #tpu.memory_space<vmem>>, vector<256x64xbf16>
    %c0_1 = arith.constant 0 : index
    %c0_2 = arith.constant 0 : index
    %1 = vector.load %arg2[%c0_1, %c0_2] : memref<256x128xbf16, #tpu.memory_space<vmem>>, vector<256x128xbf16>
    %c0_3 = arith.constant 0 : index
    %c0_4 = arith.constant 0 : index
    %2 = vector.load %arg3[%c0_3, %c0_4] : memref<64x256xbf16, #tpu.memory_space<vmem>>, vector<64x256xbf16>
    %cst = arith.constant dense<0.000000e+00> : vector<256x256xf32>
    %3 = tpu.matmul %0, %2, %cst {dimension_numbers = #tpu.dot_dimension_numbers<[1], [0], [0], [1], [0, 0, 1, 1], [], []>} : vector<256x64xbf16>, vector<64x256xbf16>, vector<256x256xf32> -> vector<256x256xf32>
    %c0_5 = arith.constant 0 : index
    %c0_6 = arith.constant 0 : index
    %4 = vector.load %arg4[%c0_5, %c0_6] : memref<1x256xf32, #tpu.memory_space<vmem>>, vector<1x256xf32>
    %5 = vector.broadcast %4 : vector<1x256xf32> to vector<256x256xf32>
    %6 = arith.addf %3, %5 : vector<256x256xf32>
    %cst_7 = arith.constant 0.000000e+00 : f32
    %7 = vector.broadcast %cst_7 : f32 to vector<256x256xf32>
    %8 = arith.maximumf %6, %7 : vector<256x256xf32>
    %9 = arith.truncf %8 : vector<256x256xf32> to vector<256x256xbf16>
    %c0_8 = arith.constant 0 : index
    %c0_9 = arith.constant 0 : index
    %c0_10 = arith.constant 0 : index
    %10 = vector.load %arg5[%c0_8, %c0_9, %c0_10] : memref<6x256x256xbf16, #tpu.memory_space<vmem>>, vector<1x256x256xbf16>
    %11 = vector.shape_cast %10 : vector<1x256x256xbf16> to vector<256x256xbf16>
    %cst_11 = arith.constant dense<0.000000e+00> : vector<256x256xf32>
    %12 = tpu.matmul %9, %11, %cst_11 {dimension_numbers = #tpu.dot_dimension_numbers<[1], [0], [0], [1], [0, 0, 1, 1], [], []>} : vector<256x256xbf16>, vector<256x256xbf16>, vector<256x256xf32> -> vector<256x256xf32>
    %c0_12 = arith.constant 0 : index
    %c0_13 = arith.constant 0 : index
    %c0_14 = arith.constant 0 : index
    %13 = vector.load %arg6[%c0_12, %c0_13, %c0_14] : memref<6x1x256xf32, #tpu.memory_space<vmem>>, vector<1x1x256xf32>
    %14 = vector.shape_cast %13 : vector<1x1x256xf32> to vector<1x256xf32>
    %15 = vector.broadcast %14 : vector<1x256xf32> to vector<256x256xf32>
    %16 = arith.addf %12, %15 : vector<256x256xf32>
    %cst_15 = arith.constant 0.000000e+00 : f32
    %17 = vector.broadcast %cst_15 : f32 to vector<256x256xf32>
    %18 = arith.maximumf %16, %17 : vector<256x256xf32>
    %19 = arith.truncf %18 : vector<256x256xf32> to vector<256x256xbf16>
    %c1 = arith.constant 1 : index
    %c0_16 = arith.constant 0 : index
    %c0_17 = arith.constant 0 : index
    %20 = vector.load %arg5[%c1, %c0_16, %c0_17] : memref<6x256x256xbf16, #tpu.memory_space<vmem>>, vector<1x256x256xbf16>
    %21 = vector.shape_cast %20 : vector<1x256x256xbf16> to vector<256x256xbf16>
    %cst_18 = arith.constant dense<0.000000e+00> : vector<256x256xf32>
    %22 = tpu.matmul %19, %21, %cst_18 {dimension_numbers = #tpu.dot_dimension_numbers<[1], [0], [0], [1], [0, 0, 1, 1], [], []>} : vector<256x256xbf16>, vector<256x256xbf16>, vector<256x256xf32> -> vector<256x256xf32>
    %c1_19 = arith.constant 1 : index
    %c0_20 = arith.constant 0 : index
    %c0_21 = arith.constant 0 : index
    %23 = vector.load %arg6[%c1_19, %c0_20, %c0_21] : memref<6x1x256xf32, #tpu.memory_space<vmem>>, vector<1x1x256xf32>
    %24 = vector.shape_cast %23 : vector<1x1x256xf32> to vector<1x256xf32>
    %25 = vector.broadcast %24 : vector<1x256xf32> to vector<256x256xf32>
    %26 = arith.addf %22, %25 : vector<256x256xf32>
    %cst_22 = arith.constant 0.000000e+00 : f32
    %27 = vector.broadcast %cst_22 : f32 to vector<256x256xf32>
    %28 = arith.maximumf %26, %27 : vector<256x256xf32>
    %29 = arith.truncf %28 : vector<256x256xf32> to vector<256x256xbf16>
    %c2 = arith.constant 2 : index
    %c0_23 = arith.constant 0 : index
    %c0_24 = arith.constant 0 : index
    %30 = vector.load %arg5[%c2, %c0_23, %c0_24] : memref<6x256x256xbf16, #tpu.memory_space<vmem>>, vector<1x256x256xbf16>
    %31 = vector.shape_cast %30 : vector<1x256x256xbf16> to vector<256x256xbf16>
    %cst_25 = arith.constant dense<0.000000e+00> : vector<256x256xf32>
    %32 = tpu.matmul %29, %31, %cst_25 {dimension_numbers = #tpu.dot_dimension_numbers<[1], [0], [0], [1], [0, 0, 1, 1], [], []>} : vector<256x256xbf16>, vector<256x256xbf16>, vector<256x256xf32> -> vector<256x256xf32>
    %c2_26 = arith.constant 2 : index
    %c0_27 = arith.constant 0 : index
    %c0_28 = arith.constant 0 : index
    %33 = vector.load %arg6[%c2_26, %c0_27, %c0_28] : memref<6x1x256xf32, #tpu.memory_space<vmem>>, vector<1x1x256xf32>
    %34 = vector.shape_cast %33 : vector<1x1x256xf32> to vector<1x256xf32>
    %35 = vector.broadcast %34 : vector<1x256xf32> to vector<256x256xf32>
    %36 = arith.addf %32, %35 : vector<256x256xf32>
    %cst_29 = arith.constant 0.000000e+00 : f32
    %37 = vector.broadcast %cst_29 : f32 to vector<256x256xf32>
    %38 = arith.maximumf %36, %37 : vector<256x256xf32>
    %39 = arith.truncf %38 : vector<256x256xf32> to vector<256x256xbf16>
    %c3 = arith.constant 3 : index
    %c0_30 = arith.constant 0 : index
    %c0_31 = arith.constant 0 : index
    %40 = vector.load %arg5[%c3, %c0_30, %c0_31] : memref<6x256x256xbf16, #tpu.memory_space<vmem>>, vector<1x256x256xbf16>
    %41 = vector.shape_cast %40 : vector<1x256x256xbf16> to vector<256x256xbf16>
    %cst_32 = arith.constant dense<0.000000e+00> : vector<256x256xf32>
    %42 = tpu.matmul %39, %41, %cst_32 {dimension_numbers = #tpu.dot_dimension_numbers<[1], [0], [0], [1], [0, 0, 1, 1], [], []>} : vector<256x256xbf16>, vector<256x256xbf16>, vector<256x256xf32> -> vector<256x256xf32>
    %c3_33 = arith.constant 3 : index
    %c0_34 = arith.constant 0 : index
    %c0_35 = arith.constant 0 : index
    %43 = vector.load %arg6[%c3_33, %c0_34, %c0_35] : memref<6x1x256xf32, #tpu.memory_space<vmem>>, vector<1x1x256xf32>
    %44 = vector.shape_cast %43 : vector<1x1x256xf32> to vector<1x256xf32>
    %45 = vector.broadcast %44 : vector<1x256xf32> to vector<256x256xf32>
    %46 = arith.addf %42, %45 : vector<256x256xf32>
    %cst_36 = arith.constant 0.000000e+00 : f32
    %47 = vector.broadcast %cst_36 : f32 to vector<256x256xf32>
    %48 = arith.maximumf %46, %47 : vector<256x256xf32>
    %49 = arith.truncf %48 : vector<256x256xf32> to vector<256x256xbf16>
    %c0_37 = arith.constant 0 : index
    %c0_38 = arith.constant 0 : index
    %50 = vector.load %arg7[%c0_37, %c0_38] : memref<256x256xbf16, #tpu.memory_space<vmem>>, vector<256x256xbf16>
    %cst_39 = arith.constant dense<0.000000e+00> : vector<256x256xf32>
    %51 = tpu.matmul %49, %50, %cst_39 {dimension_numbers = #tpu.dot_dimension_numbers<[1], [0], [0], [1], [0, 0, 1, 1], [], []>} : vector<256x256xbf16>, vector<256x256xbf16>, vector<256x256xf32> -> vector<256x256xf32>
    %c0_40 = arith.constant 0 : index
    %c0_41 = arith.constant 0 : index
    %52 = vector.load %arg8[%c0_40, %c0_41] : memref<64x256xbf16, #tpu.memory_space<vmem>>, vector<64x256xbf16>
    %cst_42 = arith.constant dense<0.000000e+00> : vector<256x256xf32>
    %53 = tpu.matmul %0, %52, %cst_42 {dimension_numbers = #tpu.dot_dimension_numbers<[1], [0], [0], [1], [0, 0, 1, 1], [], []>} : vector<256x64xbf16>, vector<64x256xbf16>, vector<256x256xf32> -> vector<256x256xf32>
    %54 = arith.addf %51, %53 : vector<256x256xf32>
    %c0_43 = arith.constant 0 : index
    %c0_44 = arith.constant 0 : index
    %55 = vector.load %arg9[%c0_43, %c0_44] : memref<1x256xf32, #tpu.memory_space<vmem>>, vector<1x256xf32>
    %56 = vector.broadcast %55 : vector<1x256xf32> to vector<256x256xf32>
    %57 = arith.addf %54, %56 : vector<256x256xf32>
    %cst_45 = arith.constant 0.000000e+00 : f32
    %58 = vector.broadcast %cst_45 : f32 to vector<256x256xf32>
    %59 = arith.maximumf %57, %58 : vector<256x256xf32>
    %60 = arith.truncf %59 : vector<256x256xf32> to vector<256x256xbf16>
    %c4 = arith.constant 4 : index
    %c0_46 = arith.constant 0 : index
    %c0_47 = arith.constant 0 : index
    %61 = vector.load %arg5[%c4, %c0_46, %c0_47] : memref<6x256x256xbf16, #tpu.memory_space<vmem>>, vector<1x256x256xbf16>
    %62 = vector.shape_cast %61 : vector<1x256x256xbf16> to vector<256x256xbf16>
    %cst_48 = arith.constant dense<0.000000e+00> : vector<256x256xf32>
    %63 = tpu.matmul %60, %62, %cst_48 {dimension_numbers = #tpu.dot_dimension_numbers<[1], [0], [0], [1], [0, 0, 1, 1], [], []>} : vector<256x256xbf16>, vector<256x256xbf16>, vector<256x256xf32> -> vector<256x256xf32>
    %c4_49 = arith.constant 4 : index
    %c0_50 = arith.constant 0 : index
    %c0_51 = arith.constant 0 : index
    %64 = vector.load %arg6[%c4_49, %c0_50, %c0_51] : memref<6x1x256xf32, #tpu.memory_space<vmem>>, vector<1x1x256xf32>
    %65 = vector.shape_cast %64 : vector<1x1x256xf32> to vector<1x256xf32>
    %66 = vector.broadcast %65 : vector<1x256xf32> to vector<256x256xf32>
    %67 = arith.addf %63, %66 : vector<256x256xf32>
    %cst_52 = arith.constant 0.000000e+00 : f32
    %68 = vector.broadcast %cst_52 : f32 to vector<256x256xf32>
    %69 = arith.maximumf %67, %68 : vector<256x256xf32>
    %70 = arith.truncf %69 : vector<256x256xf32> to vector<256x256xbf16>
    %c5 = arith.constant 5 : index
    %c0_53 = arith.constant 0 : index
    %c0_54 = arith.constant 0 : index
    %71 = vector.load %arg5[%c5, %c0_53, %c0_54] : memref<6x256x256xbf16, #tpu.memory_space<vmem>>, vector<1x256x256xbf16>
    %72 = vector.shape_cast %71 : vector<1x256x256xbf16> to vector<256x256xbf16>
    %cst_55 = arith.constant dense<0.000000e+00> : vector<256x256xf32>
    %73 = tpu.matmul %70, %72, %cst_55 {dimension_numbers = #tpu.dot_dimension_numbers<[1], [0], [0], [1], [0, 0, 1, 1], [], []>} : vector<256x256xbf16>, vector<256x256xbf16>, vector<256x256xf32> -> vector<256x256xf32>
    %c5_56 = arith.constant 5 : index
    %c0_57 = arith.constant 0 : index
    %c0_58 = arith.constant 0 : index
    %74 = vector.load %arg6[%c5_56, %c0_57, %c0_58] : memref<6x1x256xf32, #tpu.memory_space<vmem>>, vector<1x1x256xf32>
    %75 = vector.shape_cast %74 : vector<1x1x256xf32> to vector<1x256xf32>
    %76 = vector.broadcast %75 : vector<1x256xf32> to vector<256x256xf32>
    %77 = arith.addf %73, %76 : vector<256x256xf32>
    %cst_59 = arith.constant 0.000000e+00 : f32
    %78 = vector.broadcast %cst_59 : f32 to vector<256x256xf32>
    %79 = arith.maximumf %77, %78 : vector<256x256xf32>
    %80 = arith.truncf %79 : vector<256x256xf32> to vector<256x256xbf16>
    %c0_60 = arith.constant 0 : index
    %c0_61 = arith.constant 0 : index
    %81 = vector.load %arg10[%c0_60, %c0_61] : memref<256x384xbf16, #tpu.memory_space<vmem>>, vector<256x384xbf16>
    %cst_62 = arith.constant dense<0.000000e+00> : vector<256x384xf32>
    %82 = tpu.matmul %80, %81, %cst_62 {dimension_numbers = #tpu.dot_dimension_numbers<[1], [0], [0], [1], [0, 0, 1, 1], [], []>} : vector<256x256xbf16>, vector<256x384xbf16>, vector<256x384xf32> -> vector<256x384xf32>
    %c0_63 = arith.constant 0 : index
    %c0_64 = arith.constant 0 : index
    %83 = vector.load %arg11[%c0_63, %c0_64] : memref<1x384xf32, #tpu.memory_space<vmem>>, vector<1x384xf32>
    %84 = vector.broadcast %83 : vector<1x384xf32> to vector<256x384xf32>
    %85 = arith.addf %82, %84 : vector<256x384xf32>
    %86 = vector.extract_strided_slice %85 {offsets = [0, 0], sizes = [256, 256], strides = [1, 1]} : vector<256x384xf32> to vector<256x256xf32>
    %87 = arith.truncf %86 : vector<256x256xf32> to vector<256x256xbf16>
    %88 = vector.extract_strided_slice %85 {offsets = [0, 256], sizes = [256, 4], strides = [1, 1]} : vector<256x384xf32> to vector<256x4xf32>
    %c0_65 = arith.constant 0 : index
    %c0_66 = arith.constant 0 : index
    %89 = vector.load %arg12[%c0_65, %c0_66] : memref<256x256xbf16, #tpu.memory_space<vmem>>, vector<256x256xbf16>
    %cst_67 = arith.constant dense<0.000000e+00> : vector<256x256xf32>
    %90 = tpu.matmul %87, %89, %cst_67 {dimension_numbers = #tpu.dot_dimension_numbers<[1], [0], [0], [1], [0, 0, 1, 1], [], []>} : vector<256x256xbf16>, vector<256x256xbf16>, vector<256x256xf32> -> vector<256x256xf32>
    %c0_68 = arith.constant 0 : index
    %c0_69 = arith.constant 0 : index
    %91 = vector.load %arg13[%c0_68, %c0_69] : memref<128x256xbf16, #tpu.memory_space<vmem>>, vector<128x256xbf16>
    %cst_70 = arith.constant dense<0.000000e+00> : vector<256x256xf32>
    %92 = tpu.matmul %1, %91, %cst_70 {dimension_numbers = #tpu.dot_dimension_numbers<[1], [0], [0], [1], [0, 0, 1, 1], [], []>} : vector<256x128xbf16>, vector<128x256xbf16>, vector<256x256xf32> -> vector<256x256xf32>
    %93 = arith.addf %90, %92 : vector<256x256xf32>
    %c0_71 = arith.constant 0 : index
    %c0_72 = arith.constant 0 : index
    %94 = vector.load %arg14[%c0_71, %c0_72] : memref<1x256xf32, #tpu.memory_space<vmem>>, vector<1x256xf32>
    %95 = vector.broadcast %94 : vector<1x256xf32> to vector<256x256xf32>
    %96 = arith.addf %93, %95 : vector<256x256xf32>
    %cst_73 = arith.constant 0.000000e+00 : f32
    %97 = vector.broadcast %cst_73 : f32 to vector<256x256xf32>
    %98 = arith.maximumf %96, %97 : vector<256x256xf32>
    %99 = arith.truncf %98 : vector<256x256xf32> to vector<256x256xbf16>
    %c0_74 = arith.constant 0 : index
    %c0_75 = arith.constant 0 : index
    %100 = vector.load %arg15[%c0_74, %c0_75] : memref<256x128xbf16, #tpu.memory_space<vmem>>, vector<256x128xbf16>
    %cst_76 = arith.constant dense<0.000000e+00> : vector<256x128xf32>
    %101 = tpu.matmul %99, %100, %cst_76 {dimension_numbers = #tpu.dot_dimension_numbers<[1], [0], [0], [1], [0, 0, 1, 1], [], []>} : vector<256x256xbf16>, vector<256x128xbf16>, vector<256x128xf32> -> vector<256x128xf32>
    %c0_77 = arith.constant 0 : index
    %c0_78 = arith.constant 0 : index
    %102 = vector.load %arg16[%c0_77, %c0_78] : memref<1x128xf32, #tpu.memory_space<vmem>>, vector<1x128xf32>
    %103 = vector.broadcast %102 : vector<1x128xf32> to vector<256x128xf32>
    %104 = arith.addf %101, %103 : vector<256x128xf32>
    %cst_79 = arith.constant 0.000000e+00 : f32
    %105 = vector.broadcast %cst_79 : f32 to vector<256x128xf32>
    %106 = arith.maximumf %104, %105 : vector<256x128xf32>
    %107 = arith.truncf %106 : vector<256x128xf32> to vector<256x128xbf16>
    %c0_80 = arith.constant 0 : index
    %c0_81 = arith.constant 0 : index
    %108 = vector.load %arg17[%c0_80, %c0_81] : memref<128x4xbf16, #tpu.memory_space<vmem>>, vector<128x4xbf16>
    %cst_82 = arith.constant dense<0.000000e+00> : vector<256x4xf32>
    %109 = tpu.matmul %107, %108, %cst_82 {dimension_numbers = #tpu.dot_dimension_numbers<[1], [0], [0], [1], [0, 0, 1, 1], [], []>} : vector<256x128xbf16>, vector<128x4xbf16>, vector<256x4xf32> -> vector<256x4xf32>
    %c0_83 = arith.constant 0 : index
    %c0_84 = arith.constant 0 : index
    %110 = vector.load %arg18[%c0_83, %c0_84] : memref<1x4xf32, #tpu.memory_space<vmem>>, vector<1x4xf32>
    %111 = vector.broadcast %110 : vector<1x4xf32> to vector<256x4xf32>
    %112 = arith.addf %109, %111 : vector<256x4xf32>
    %113 = arith.addf %88, %112 : vector<256x4xf32>
    %c0_85 = arith.constant 0 : index
    %c0_86 = arith.constant 0 : index
    %114 = vector.load %arg19[%c0_85, %c0_86] : memref<256x4xf32, #tpu.memory_space<vmem>>, vector<256x4xf32>
    tpu.vector_store %arg19[%c0_85, %c0_86], %113 {strides = array<i32>} : memref<256x4xf32, #tpu.memory_space<vmem>>, vector<256x4xf32>,
    return
  }
  func.func @transform_0(%arg0: i32) -> (i32, i32) {
    %c0_i32 = arith.constant 0 : i32
    %c0_i32_0 = arith.constant 0 : i32
    return %arg0, %c0_i32 : i32, i32
  }
  func.func @transform_1(%arg0: i32) -> (i32, i32) {
    %c0_i32 = arith.constant 0 : i32
    %c0_i32_0 = arith.constant 0 : i32
    return %arg0, %c0_i32 : i32, i32
  }
  func.func @transform_2(%arg0: i32) -> (i32, i32) {
    %c0_i32 = arith.constant 0 : i32
    %c0_i32_0 = arith.constant 0 : i32
    %c0_i32_1 = arith.constant 0 : i32
    return %c0_i32, %c0_i32_0 : i32, i32
  }
  func.func @transform_3(%arg0: i32) -> (i32, i32) {
    %c0_i32 = arith.constant 0 : i32
    %c0_i32_0 = arith.constant 0 : i32
    %c0_i32_1 = arith.constant 0 : i32
    return %c0_i32, %c0_i32_0 : i32, i32
  }
  func.func @transform_4(%arg0: i32) -> (i32, i32, i32) {
    %c0_i32 = arith.constant 0 : i32
    %c0_i32_0 = arith.constant 0 : i32
    %c0_i32_1 = arith.constant 0 : i32
    %c0_i32_2 = arith.constant 0 : i32
    return %c0_i32, %c0_i32_0, %c0_i32_1 : i32, i32, i32
  }
  func.func @transform_5(%arg0: i32) -> (i32, i32, i32) {
    %c0_i32 = arith.constant 0 : i32
    %c0_i32_0 = arith.constant 0 : i32
    %c0_i32_1 = arith.constant 0 : i32
    %c0_i32_2 = arith.constant 0 : i32
    return %c0_i32, %c0_i32_0, %c0_i32_1 : i32, i32, i32
  }
  func.func @transform_6(%arg0: i32) -> (i32, i32) {
    %c0_i32 = arith.constant 0 : i32
    %c0_i32_0 = arith.constant 0 : i32
    %c0_i32_1 = arith.constant 0 : i32
    return %c0_i32, %c0_i32_0 : i32, i32
  }
  func.func @transform_7(%arg0: i32) -> (i32, i32) {
    %c0_i32 = arith.constant 0 : i32
    %c0_i32_0 = arith.constant 0 : i32
    %c0_i32_1 = arith.constant 0 : i32
    return %c0_i32, %c0_i32_0 : i32, i32
  }
  func.func @transform_8(%arg0: i32) -> (i32, i32) {
    %c0_i32 = arith.constant 0 : i32
    %c0_i32_0 = arith.constant 0 : i32
    %c0_i32_1 = arith.constant 0 : i32
    return %c0_i32, %c0_i32_0 : i32, i32
  }
  func.func @transform_9(%arg0: i32) -> (i32, i32) {
    %c0_i32 = arith.constant 0 : i32
    %c0_i32_0 = arith.constant 0 : i32
    %c0_i32_1 = arith.constant 0 : i32
    return %c0_i32, %c0_i32_0 : i32, i32
  }
  func.func @transform_10(%arg0: i32) -> (i32, i32) {
    %c0_i32 = arith.constant 0 : i32
    %c0_i32_0 = arith.constant 0 : i32
    %c0_i32_1 = arith.constant 0 : i32
    return %c0_i32, %c0_i32_0 : i32, i32
  }
  func.func @transform_11(%arg0: i32) -> (i32, i32) {
    %c0_i32 = arith.constant 0 : i32
    %c0_i32_0 = arith.constant 0 : i32
    %c0_i32_1 = arith.constant 0 : i32
    return %c0_i32, %c0_i32_0 : i32, i32
  }
  func.func @transform_12(%arg0: i32) -> (i32, i32) {
    %c0_i32 = arith.constant 0 : i32
    %c0_i32_0 = arith.constant 0 : i32
    %c0_i32_1 = arith.constant 0 : i32
    return %c0_i32, %c0_i32_0 : i32, i32
  }
  func.func @transform_13(%arg0: i32) -> (i32, i32) {
    %c0_i32 = arith.constant 0 : i32
    %c0_i32_0 = arith.constant 0 : i32
    %c0_i32_1 = arith.constant 0 : i32
    return %c0_i32, %c0_i32_0 : i32, i32
  }
  func.func @transform_14(%arg0: i32) -> (i32, i32) {
    %c0_i32 = arith.constant 0 : i32
    %c0_i32_0 = arith.constant 0 : i32
    %c0_i32_1 = arith.constant 0 : i32
    return %c0_i32, %c0_i32_0 : i32, i32
  }
  func.func @transform_15(%arg0: i32) -> (i32, i32) {
    %c0_i32 = arith.constant 0 : i32
    %c0_i32_0 = arith.constant 0 : i32
    %c0_i32_1 = arith.constant 0 : i32
    return %c0_i32, %c0_i32_0 : i32, i32
  }
  func.func @transform_16(%arg0: i32) -> (i32, i32) {
    %c0_i32 = arith.constant 0 : i32
    %c0_i32_0 = arith.constant 0 : i32
    %c0_i32_1 = arith.constant 0 : i32
    return %c0_i32, %c0_i32_0 : i32, i32
  }
  func.func @transform_17(%arg0: i32) -> (i32, i32) {
    %c0_i32 = arith.constant 0 : i32
    %c0_i32_0 = arith.constant 0 : i32
    %c0_i32_1 = arith.constant 0 : i32
    return %c0_i32, %c0_i32_0 : i32, i32
  }
  func.func @transform_18(%arg0: i32) -> (i32, i32) {
    %c0_i32 = arith.constant 0 : i32
    %c0_i32_0 = arith.constant 0 : i32
    return %arg0, %c0_i32 : i32, i32
  }
}

</mosaic_0001>

<bundles_post_ra>
// kernel: nerf2_pallas.1
= control target key start
LH: loop header
LB: loop body
LE: loop exit
PB: predicated region body
PF: predicated region fallthrough
CT: control target
= control target key end

     0   :  { %s8882_s27 = smov 0   ;;  %s11473_s0 = inlined_call_operand.vmem [shape: bf16[512,64], index: 0, kind: input, shape index: {}]   ;;  %s11474_s1 = inlined_call_operand.vmem [shape: bf16[512,128], index: 1, kind: input, shape index: {}]   ;;  %s11475_s2 = inlined_call_operand.vmem [shape: bf16[64,256], index: 2, kind: input, shape index: {}]   ;;  %s11476_s3 = inlined_call_operand.vmem [shape: f32[1,256], index: 3, kind: input, shape index: {}]   ;;  %s11477_s4 = inlined_call_operand.vmem [shape: bf16[6,256,256], index: 4, kind: input, shape index: {}]   ;;  %s11478_s5 = inlined_call_operand.vmem [shape: f32[6,1,256], index: 5, kind: input, shape index: {}]   ;;  %s11479_s6 = inlined_call_operand.vmem [shape: bf16[256,256], index: 6, kind: input, shape index: {}]   ;;  %s11480_s7 = inlined_call_operand.vmem [shape: bf16[64,256], index: 7, kind: input, shape index: {}]   ;;  %s11481_s8 = inlined_call_operand.vmem [shape: f32[1,256], index: 8, kind: input, shape index: {}]   ;;  %s11482_s9 = inlined_call_operand.vmem [shape: bf16[256,384], index: 9, kind: input, shape index: {}]   ;;  %s11483_s10 = inlined_call_operand.vmem [shape: f32[1,384], index: 10, kind: input, shape index: {}]   ;;  %s11484_s11 = inlined_call_operand.vmem [shape: bf16[256,256], index: 11, kind: input, shape index: {}]   ;;  %s11485_s12 = inlined_call_operand.vmem [shape: bf16[128,256], index: 12, kind: input, shape index: {}]   ;;  %s11486_s13 = inlined_call_operand.vmem [shape: f32[1,256], index: 13, kind: input, shape index: {}]   ;;  %s11487_s14 = inlined_call_operand.vmem [shape: bf16[256,128], index: 14, kind: input, shape index: {}]   ;;  %s11488_s15 = inlined_call_operand.vmem [shape: f32[1,128], index: 15, kind: input, shape index: {}]   ;;  %s11489_s16 = inlined_call_operand.vmem [shape: bf16[128,4], index: 16, kind: input, shape index: {}]   ;;  %s11490_s17 = inlined_call_operand.vmem [shape: f32[1,4], index: 17, kind: input, shape index: {}]   ;;  %s11491_s18 = inlined_call_operand.vmem [shape: f32[512,4], index: 18, kind: output, shape index: {}]  }
   0x1   :  { %11495 = sst [smem:[#allocation38_spill]] %s11473_s0 }
   0x2   :  { %11496 = sst [smem:[#allocation39_spill]] %s11474_s1 }
   0x3   :  { %11497 = sst [smem:[#allocation40_spill]] %s11475_s2 }
   0x4 LB: > { %11498 = sst [smem:[#allocation2_spill]] %s8784_s27  ;;  %s7284_s28 = sadd.s32 4294967295, %s8784_s27   ;;  %s8784_s27 = sphi %s8882_s27, %s28_s27  }
   0x5   : > { %p7288_p0 = scmp.ge.s32.totalorder %s8784_s27, 1  ;;  %p524_p1 = scmp.lt.s32.totalorder %s8784_s27, 3 }
   0x7   : > { %p525_p2 = pnand %p7288_p0, %p524_p1 }
   0x9   : > { %528 = sbr.rel (%p525_p2) target bundleno = 2630 (0xa46), region = 92 }
   0xe   : > { %s11499_s0 = sld [smem:[#allocation40_spill]]  ;;  %s7289_s19 = sshll.u32 %s7284_s28, 5  ;;  %v8786_v2 = vmov 0   ;;  %vm806_vm0 = vcmask 523264   ;;  %v8237_v11 = vld [vmem:[%s11477_s4 + $0x74] ss:$8 sps:$4 sm:$0xff]  }
   0xf   : > { %887 = vmatprep.mubr.bf16.mxu0 %v8786_v2  ;;  %p584_p3 = scmp.lt.s32.totalorder %s7289_s19, 63  ;;  %s11500_s30 = sld [smem:[#allocation38_spill]]  ;;  %v8239_v12 = vld [vmem:[%s11477_s4 + $0x70] ss:$8 sps:$4 sm:$0xff]   ;;  %v8240_v13 = vld [vmem:[%s11477_s4 + $0x64] ss:$8 sps:$4 sm:$0xff]   ;;  %1348 = vmatprep.subr.bf16.mxu1 %v8237_v11 }
  0x10   : > { %1349 = vmatpush1.bf16.msra.mxu1 %v8239_v12  ;;  %v8242_v14 = vld [vmem:[%s11477_s4 + $0x60] ss:$8 sps:$4 sm:$0xff]   ;;  %v8243_v15 = vld [vmem:[%s11477_s4 + $0x54] ss:$8 sps:$4 sm:$0xff]   ;;  %v8245_v17 = vld [vmem:[%s11477_s4 + $0x50] ss:$8 sps:$4 sm:$0xff]  }
  0x11   : > { %s11574_s19 = smov (!%p584_p3, %s7289_s19), 63  ;;  %1350 = vmatprep.subr.bf16.mxu1 %v8240_v13  ;;  %v8246_v18 = vld [vmem:[%s11477_s4 + $0x44] ss:$8 sps:$4 sm:$0xff]   ;;  %v8248_v19 = vld [vmem:[%s11477_s4 + $0x40] ss:$8 sps:$4 sm:$0xff]   ;;  %s11501_s22 = sld [smem:[#allocation39_spill]] }
  0x12   : > { %s7290_s26 = sshll.u32 %s11574_s19, 2  ;;  %v8249_v20 = vld [vmem:[%s11477_s4 + $0x34] ss:$8 sps:$4 sm:$0xff]   ;;  %v8251_v22 = vld [vmem:[%s11477_s4 + $0x30] ss:$8 sps:$4 sm:$0xff]   ;;  %vm7183_vm1 = vcmask 31744  }
  0x13   : > { %v8252_v23 = vld [vmem:[%s11477_s4 + $0x24] ss:$8 sps:$4 sm:$0xff]   ;;  %v8254_v24 = vld [vmem:[%s11477_s4 + $0x20] ss:$8 sps:$4 sm:$0xff]   ;;  %v8255_v25 = vld [vmem:[%s11477_s4 + $0x14] ss:$8 sps:$4 sm:$0xff]  }
  0x14   : > { %v8209_v0 = vld [vmem:[%s11499_s0 + $0x34] ss:$8 sps:$4 sm:$0xff]   ;;  %v8211_v1 = vld [vmem:[%s11499_s0 + $0x30] ss:$8 sps:$4 sm:$0xff]   ;;  %v8212_v3 = vld [vmem:[%s11499_s0 + $0x24] ss:$8 sps:$4 sm:$0xff]   ;;  %1351 = vmatpush1.bf16.msra.mxu1 %v8242_v14 }
  0x15   : > { %863 = vmatprep.subr.bf16.mxu0 %v8209_v0  ;;  %v8214_v4 = vld [vmem:[%s11499_s0 + $0x20] ss:$8 sps:$4 sm:$0xff]   ;;  %v8215_v5 = vld [vmem:[%s11499_s0 + $0x14] ss:$8 sps:$4 sm:$0xff]   ;;  %s8914_s1 = scalar_lea.vmem %s11500_s30, %s7290_s26  ;;  %v8217_v6 = vld [vmem:[%s11499_s0 + $0x10] ss:$8 sps:$4 sm:$0xff]   ;;  %1352 = vmatprep.subr.bf16.mxu1 %v8243_v15 }
  0x16   : > { %864 = vmatpush1.bf16.msra.mxu0 %v8211_v1  ;;  %v8218_v7 = vld [vmem:[%s11499_s0 + $0x4] ss:$8 sps:$4 sm:$0xff]   ;;  %v8220_v8 = vld [vmem:[%s11499_s0] ss:$8 sps:$4 sm:$0xff]   ;;  %v8223_v16 = vld [vmem:[%s8914_s1 + $0x10] sm:$0xff]   ;;  %v676_v1 = vlaneseq }
  0x17   : > { %865 = vmatprep.subr.bf16.mxu0 %v8212_v3  ;;  %v8221_v9 = vld [vmem:[%s8914_s1] sm:$0xff]   ;;  %v8222_v10 = vld [vmem:[%s8914_s1 + $0x8] sm:$0xff]   ;;  %v8224_v21 = vld [vmem:[%s8914_s1 + $0x18] sm:$0xff]   ;;  %s9073_s2 = scalar_lea.vmem %s11501_s22, %s7290_s26  ;;  %s7294_s22 = sshll.u32 %s11574_s19, 3 }
  0x18   : > { %1353 = vmatpush1.bf16.msra.mxu1 %v8245_v17  ;;  %v8225_v26 = vld [vmem:[%s8914_s1 + $0x20] sm:$0xff]   ;;  %v8257_v27 = vld [vmem:[%s11477_s4 + $0x10] ss:$8 sps:$4 sm:$0xff]   ;;  %v8261_v30 = vld [vmem:[%s11477_s4 + $0xf4] ss:$8 sps:$4 sm:$0xff]   ;;  %v9099_v3 = vshrl.u32 %v676_v1, 7  ;;  %s11301_s23 = scalar_lea.vmem %s11491_s18, %s7294_s22 }
  0x19   : > { %1354 = vmatprep.subr.bf16.mxu1 %v8246_v18  ;;  %v8258_v28 = vld [vmem:[%s11477_s4 + $0x4] ss:$8 sps:$4 sm:$0xff]   ;;  %v8260_v29 = vld [vmem:[%s11477_s4] ss:$8 sps:$4 sm:$0xff]   ;;  %v8263_v32 = vld [vmem:[%s11477_s4 + $0xf0] ss:$8 sps:$4 sm:$0xff]  }
  0x1a   : > { %866 = vmatpush1.bf16.msra.mxu0 %v8214_v4  ;;  %v8226_v31 = vld [vmem:[%s8914_s1 + $0x28] sm:$0xff]   ;;  %v8267_v35 = vld [vmem:[%s11477_s4 + $0xd4] ss:$8 sps:$4 sm:$0xff]   ;;  %v8269_v37 = vld [vmem:[%s11477_s4 + $0xd0] ss:$8 sps:$4 sm:$0xff]   ;;  %v9102_v4 = vsub.s32 1, %v9099_v3 }
  0x1b   : > { %867 = vmatprep.subr.bf16.mxu0 %v8215_v5  ;;  %v8264_v33 = vld [vmem:[%s11477_s4 + $0xe4] ss:$8 sps:$4 sm:$0xff]   ;;  %v8266_v34 = vld [vmem:[%s11477_s4 + $0xe0] ss:$8 sps:$4 sm:$0xff]   ;;  %v8227_v36 = vld [vmem:[%s8914_s1 + $0x30] sm:$0xff]  }
  0x1c   : > { %1355 = vmatpush1.bf16.msra.mxu1 %v8248_v19  ;;  %v8270_v38 = vld [vmem:[%s11477_s4 + $0xc4] ss:$8 sps:$4 sm:$0xff]   ;;  %v8272_v39 = vld [vmem:[%s11477_s4 + $0xc0] ss:$8 sps:$4 sm:$0xff]   ;;  %v8273_v40 = vld [vmem:[%s11477_s4 + $0xb4] ss:$8 sps:$4 sm:$0xff]  }
  0x1d   : > { %1356 = vmatprep.subr.bf16.mxu1 %v8249_v20  ;;  %v8228_v41 = vld [vmem:[%s8914_s1 + $0x38] sm:$0xff]   ;;  %v8229_v43 = vld [vmem:[%s8914_s1 + $0x40] sm:$0xff]   ;;  %v8230_v46 = vld [vmem:[%s8914_s1 + $0x48] sm:$0xff]  }
  0x1e   : > { %868 = vmatpush1.bf16.msra.mxu0 %v8217_v6  ;;  %v8275_v42 = vld [vmem:[%s11477_s4 + $0xb0] ss:$8 sps:$4 sm:$0xff]   ;;  %v8276_v44 = vld [vmem:[%s11477_s4 + $0xa4] ss:$8 sps:$4 sm:$0xff]   ;;  %v8278_v45 = vld [vmem:[%s11477_s4 + $0xa0] ss:$8 sps:$4 sm:$0xff]  }
  0x1f   : > { %869 = vmatprep.subr.bf16.mxu0 %v8218_v7  ;;  %v8279_v47 = vld [vmem:[%s11477_s4 + $0x94] ss:$8 sps:$4 sm:$0xff]   ;;  %v8281_v48 = vld [vmem:[%s11477_s4 + $0x90] ss:$8 sps:$4 sm:$0xff]   ;;  %v8282_v49 = vld [vmem:[%s11477_s4 + $0x84] ss:$8 sps:$4 sm:$0xff]  }
  0x20   : > { %1357 = vmatpush1.bf16.msra.mxu1 %v8251_v22  ;;  %v8284_v50 = vld [vmem:[%s11477_s4 + $0x80] ss:$8 sps:$4 sm:$0xff]   ;;  %v8231_v51 = vld [vmem:[%s8914_s1 + $0x50] sm:$0xff]   ;;  %v8232_v52 = vld [vmem:[%s8914_s1 + $0x58] sm:$0xff]   ;;  %v9111_v7 = vsub.s32 0, %v9099_v3 }
  0x21   : > { %1358 = vmatprep.subr.bf16.mxu1 %v8252_v23  ;;  %v8233_v53 = vld [vmem:[%s8914_s1 + $0x60] sm:$0xff]   ;;  %v8234_v54 = vld [vmem:[%s8914_s1 + $0x68] sm:$0xff]   ;;  %v8235_v55 = vld [vmem:[%s8914_s1 + $0x70] sm:$0xff]  }
  0x22   : > { %870 = vmatpush1.bf16.msra.mxu0 %v8220_v8  ;;  %v8236_v56 = vld [vmem:[%s8914_s1 + $0x78] sm:$0xff]   ;;  %v8288_v59 = vld [vmem:[%s11477_s4 + $0x160] ss:$8 sps:$4 sm:$0xff]   ;;  %v8290_v60 = vld [vmem:[%s11477_s4 + $0x164] ss:$8 sps:$4 sm:$0xff]  }
  0x23   : > { %v8285_v57 = vld [vmem:[%s11477_s4 + $0x170] ss:$8 sps:$4 sm:$0xff]   ;;  %v8287_v58 = vld [vmem:[%s11477_s4 + $0x174] ss:$8 sps:$4 sm:$0xff]   ;;  %v8294_v63 = vld [vmem:[%s11477_s4 + $0x140] ss:$8 sps:$4 sm:$0xff]  }
  0x24   : > { %1359 = vmatpush1.bf16.msra.mxu1 %v8254_v24  ;;  %1843 = vmatprep.subr.bf16.mxu0 %v8287_v58  ;;  %v8291_v61 = vld [vmem:[%s11477_s4 + $0x150] ss:$8 sps:$4 sm:$0xff]   ;;  %v8293_v62 = vld [vmem:[%s11477_s4 + $0x154] ss:$8 sps:$4 sm:$0xff]   ;;  %v8296_v0 = vld [vmem:[%s11477_s4 + $0x144] ss:$8 sps:$4 sm:$0xff]  }
  0x25   : > { %7319 = vmatmul.mubr.msk.bf16.vlgmr.msra.gmra.mxu0 %vm806_vm0, %v8221_v9  ;;  %1360 = vmatprep.subr.bf16.mxu1 %v8255_v25  ;;  %v8297_v5 = vld [vmem:[%s11477_s4 + $0x130] ss:$8 sps:$4 sm:$0xff]   ;;  %v8299_v6 = vld [vmem:[%s11477_s4 + $0x134] ss:$8 sps:$4 sm:$0xff]   ;;  %v674_v8 = vld [vmem:[%s11476_s3] sm:$0x3] }
  0x26   : > { %897 = vmatprep.mubr.bf16.mxu0 %v8786_v2  ;;  %1844 = vmatpush1.bf16.msra.mxu0 %v8285_v57  ;;  %v8300_v11 = vld [vmem:[%s11477_s4 + $0x120] ss:$8 sps:$4 sm:$0xff]   ;;  %v8302_v12 = vld [vmem:[%s11477_s4 + $0x124] ss:$8 sps:$4 sm:$0xff]   ;;  %v9126_v13 = vrot.slane %v674_v8, %v9111_v7  ;;  %v8303_v20 = vld [vmem:[%s11477_s4 + $0x110] ss:$8 sps:$4 sm:$0xff]  }
  0x27   : > { %1845 = vmatprep.subr.bf16.mxu0 %v8290_v60  ;;  %v8308_v23 = vld [vmem:[%s11477_s4 + $0x104] ss:$8 sps:$4 sm:$0xff]  }
  0x28   : > { %1361 = vmatpush1.bf16.msra.mxu1 %v8257_v27  ;;  %v8320_v58 = vld [vmem:[%s11477_s4 + $0x1c4] ss:$8 sps:$4 sm:$0xff]  }
  0x29   : > { %1362 = vmatprep.subr.bf16.mxu1 %v8258_v28  ;;  %v8306_v28 = vld [vmem:[%s11477_s4 + $0x100] ss:$8 sps:$4 sm:$0xff]  }
  0x2a   : > { %1846 = vmatpush1.bf16.msra.mxu0 %v8288_v59 }
  0x2b   : > { %1847 = vmatprep.subr.bf16.mxu0 %v8293_v62 }
  0x2c   : > { %1363 = vmatpush1.bf16.msra.mxu1 %v8260_v29 }
  0x2d   : > { %7320 = vmatmul.mubr.msk.bf16.gmra.mxu0 %vm806_vm0, %v8222_v10  ;;  %1364 = vmatprep.subr.bf16.mxu1 %v8261_v30  ;;  %v9117_v10 = vrot.slane %v674_v8, %v9102_v4 }
  0x2e   : > { %907 = vmatprep.mubr.bf16.mxu0 %v8786_v2  ;;  %1848 = vmatpush1.bf16.msra.mxu0 %v8291_v61 }
  0x2f   : > { %1849 = vmatprep.subr.bf16.mxu0 %v8296_v0  ;;  %v8318_v0 = vld [vmem:[%s11477_s4 + $0x1c0] ss:$8 sps:$4 sm:$0xff]  }
  0x30   : > { %1365 = vmatpush2.bf16.msra.mxu1 %v8263_v32 }
  0x31   : > { %1366 = vmatprep.subr.bf16.mxu1 %v8264_v33 }
  0x32   : > { %1850 = vmatpush1.bf16.msra.mxu0 %v8294_v63 }
  0x33   : > { %1851 = vmatprep.subr.bf16.mxu0 %v8299_v6  ;;  %v8323_v6 = vld [vmem:[%s11477_s4 + $0x1b4] ss:$8 sps:$4 sm:$0xff]  }
  0x34   : > { %1367 = vmatpush2.bf16.msra.mxu1 %v8266_v34 }
  0x35   : > { %7321 = vmatmul.mubr.msk.bf16.gmra.mxu0 %vm806_vm0, %v8223_v16  ;;  %1368 = vmatprep.subr.bf16.mxu1 %v8267_v35 }
  0x36   : > { %917 = vmatprep.mubr.bf16.mxu0 %v8786_v2  ;;  %1852 = vmatpush1.bf16.msra.mxu0 %v8297_v5 }
  0x37   : > { %1853 = vmatprep.subr.bf16.mxu0 %v8302_v12 }
  0x38   : > { %1369 = vmatpush2.bf16.msra.mxu1 %v8269_v37  ;;  %v8309_v37 = vld [vmem:[%s11477_s4 + $0x1f0] ss:$8 sps:$4 sm:$0xff]  }
  0x39   : > { %1370 = vmatprep.subr.bf16.mxu1 %v8270_v38 }
  0x3a   : > { %1854 = vmatpush1.bf16.msra.mxu0 %v8300_v11 }
  0x3c   : > { %1371 = vmatpush2.bf16.msra.mxu1 %v8272_v39 }
  0x3d   : > { %7322 = vmatmul.mubr.msk.bf16.gmra.mxu0 %vm806_vm0, %v8224_v21  ;;  %1372 = vmatprep.subr.bf16.mxu1 %v8273_v40  ;;  %v8305_v21 = vld [vmem:[%s11477_s4 + $0x114] ss:$8 sps:$4 sm:$0xff]   ;;  %v8314_v40 = vld [vmem:[%s11477_s4 + $0x1e4] ss:$8 sps:$4 sm:$0xff]  }
  0x3e   : > { %927 = vmatprep.mubr.bf16.mxu0 %v8786_v2  ;;  %1855 = vmatprep.subr.bf16.mxu0 %v8305_v21 }
  0x3f   : > { %1856 = vmatpush1.bf16.msra.mxu0 %v8303_v20 }
  0x40   : > { %1373 = vmatpush2.bf16.msra.mxu1 %v8275_v42  ;;  %1857 = vmatprep.subr.bf16.mxu0 %v8308_v23 }
  0x41   : > { %1374 = vmatprep.subr.bf16.mxu1 %v8276_v44 }
  0x43   : > { %1858 = vmatpush1.bf16.msra.mxu0 %v8306_v28 }
  0x44   : > { %1375 = vmatpush2.bf16.msra.mxu1 %v8278_v45 }
  0x45   : > { %7323 = vmatmul.mubr.msk.bf16.gmra.mxu0 %vm806_vm0, %v8225_v26  ;;  %1376 = vmatprep.subr.bf16.mxu1 %v8279_v47 }
  0x46   : > { %937 = vmatprep.mubr.bf16.mxu0 %v8786_v2 }
  0x48   : > { %1377 = vmatpush2.bf16.msra.mxu1 %v8281_v48 }
  0x49   : > { %1378 = vmatprep.subr.bf16.mxu1 %v8282_v49  ;;  %v8317_v49 = vld [vmem:[%s11477_s4 + $0x1d4] ss:$8 sps:$4 sm:$0xff]  }
  0x4c   : > { %1379 = vmatpush2.bf16.msra.mxu1 %v8284_v50 }
  0x4d   : > { %7324 = vmatmul.mubr.msk.bf16.gmra.mxu0 %vm806_vm0, %v8226_v31  ;;  %v8311_v31 = vld [vmem:[%s11477_s4 + $0x1f4] ss:$8 sps:$4 sm:$0xff]  }
  0x4e   : > { %947 = vmatprep.mubr.bf16.mxu0 %v8786_v2  ;;  %1859 = vmatprep.subr.bf16.mxu0 %v8311_v31 }
  0x4f   : > { %1860 = vmatpush2.bf16.msra.mxu0 %v8309_v37 }
  0x50   : > { %1861 = vmatprep.subr.bf16.mxu0 %v8314_v40 }
  0x55   : > { %7325 = vmatmul.mubr.msk.bf16.gmra.mxu0 %vm806_vm0, %v8227_v36 }
  0x56   : > { %957 = vmatprep.mubr.bf16.mxu0 %v8786_v2 }
  0x5d   : > { %7326 = vmatmul.mubr.msk.bf16.gmra.mxu0 %vm806_vm0, %v8228_v41 }
  0x5e   : > { %967 = vmatprep.mubr.bf16.mxu0 %v8786_v2 }
  0x65   : > { %7327 = vmatmul.mubr.msk.bf16.gmra.mxu0 %vm806_vm0, %v8229_v43 }
  0x66   : > { %977 = vmatprep.mubr.bf16.mxu0 %v8786_v2 }
  0x6d   : > { %7328 = vmatmul.mubr.msk.bf16.gmra.mxu0 %vm806_vm0, %v8230_v46  ;;  %v8312_v46 = vld [vmem:[%s11477_s4 + $0x1e0] ss:$8 sps:$4 sm:$0xff]  }
  0x6e   : > { %987 = vmatprep.mubr.bf16.mxu0 %v8786_v2  ;;  %1862 = vmatpush2.bf16.msra.mxu0 %v8312_v46 }
  0x6f   : > { %1863 = vmatprep.subr.bf16.mxu0 %v8317_v49 }
  0x75   : > { %7329 = vmatmul.mubr.msk.bf16.gmra.mxu0 %vm806_vm0, %v8231_v51 }
  0x76   : > { %997 = vmatprep.mubr.bf16.mxu0 %v8786_v2 }
  0x7d   : > { %7330 = vmatmul.mubr.msk.bf16.gmra.mxu0 %vm806_vm0, %v8232_v52 }
  0x7e   : > { %1007 = vmatprep.mubr.bf16.mxu0 %v8786_v2 }
  0x85   : > { %7331 = vmatmul.mubr.msk.bf16.gmra.mxu0 %vm806_vm0, %v8233_v53 }
  0x86   : > { %1017 = vmatprep.mubr.bf16.mxu0 %v8786_v2 }
  0x8d   : > { %7332 = vmatmul.mubr.msk.bf16.gmra.mxu0 %vm806_vm0, %v8234_v54 }
  0x8e   : > { %1027 = vmatprep.mubr.bf16.mxu0 %v8786_v2 }
  0x95   : > { %7333 = vmatmul.mubr.msk.bf16.gmra.mxu0 %vm806_vm0, %v8235_v55  ;;  %v8315_v55 = vld [vmem:[%s11477_s4 + $0x1d0] ss:$8 sps:$4 sm:$0xff]  }
  0x96   : > { %1037 = vmatprep.mubr.bf16.mxu0 %v8786_v2  ;;  %1864 = vmatpush2.bf16.msra.mxu0 %v8315_v55 }
  0x97   : > { %1865 = vmatprep.subr.bf16.mxu0 %v8320_v58 }
  0x9a   : > { %1866 = vmatpush2.bf16.msra.mxu0 %v8318_v0 }
  0x9b   : > { %1867 = vmatprep.subr.bf16.mxu0 %v8323_v6 }
  0x9d   : > { %7334 = vmatmul.mubr.msk.bf16.gmra.mxu0 %vm806_vm0, %v8236_v56 }
  0xe5   : > { %v889_v9 = vpop.f32.mrf.mxu0 }
  0xe6   : > { %v890_v18 = vadd.f32 %v889_v9, %v9126_v13 }
  0xe7   : > { %v891_v14 = vpop.f32.mrf.mxu0 }
  0xe8   : > { %v892_v16 = vadd.f32 %v891_v14, %v9117_v10  ;;  %v1048_v29 = vmax.f32 %v890_v18, 0.0  ;;  %v8326_v18 = vld [vmem:[%s11477_s4 + $0x1a4] ss:$8 sps:$4 sm:$0xff]  }
  0xe9   : > { %v893_v15 = vpop.f32.mrf.mxu0 }
  0xea   : > { %v894_v17 = vadd.f32 %v893_v15, %v9126_v13  ;;  %v1049_v26 = vmax.f32 %v892_v16, 0.0  ;;  %v8321_v15 = vld [vmem:[%s11477_s4 + $0x1b0] ss:$8 sps:$4 sm:$0xff]  }
  0xeb   : > { %v895_v19 = vpop.f32.mrf.mxu0  ;;  %1868 = vmatpush2.bf16.msra.mxu0 %v8321_v15 }
  0xec   : > { %v896_v22 = vadd.f32 %v895_v19, %v9117_v10  ;;  %v1050_v24 = vmax.f32 %v894_v17, 0.0  ;;  %1869 = vmatprep.subr.bf16.mxu0 %v8326_v18 }
  0xed   : > { %v899_v25 = vpop.f32.mrf.mxu0 }
  0xee   : > { %v1051_v27 = vmax.f32 %v896_v22, 0.0  ;;  %v1112_v33 = vpack.c.bf16 %v1050_v24, %v1048_v29  ;;  %v900_v38 = vadd.f32 %v899_v25, %v9126_v13  ;;  %v8324_v24 = vld [vmem:[%s11477_s4 + $0x1a0] ss:$8 sps:$4 sm:$0xff]  }
  0xef   : > { %v901_v30 = vpop.f32.mrf.mxu0  ;;  %1870 = vmatpush2.bf16.msra.mxu0 %v8324_v24 }
  0xf0   : > { %v1113_v32 = vpack.c.bf16 %v1051_v27, %v1049_v26  ;;  %v902_v35 = vadd.f32 %v901_v30, %v9117_v10  ;;  %v1052_v47 = vmax.f32 %v900_v38, 0.0  ;;  %v8329_v27 = vld [vmem:[%s11477_s4 + $0x194] ss:$8 sps:$4 sm:$0xff]  }
  0xf1   : > { %v903_v34 = vpop.f32.mrf.mxu0  ;;  %1871 = vmatprep.subr.bf16.mxu0 %v8329_v27 }
  0xf2   : > { %v904_v36 = vadd.f32 %v903_v34, %v9126_v13  ;;  %1380 = vmatprep.mubr.bf16.mxu1 %v1113_v32  ;;  %v1053_v44 = vmax.f32 %v902_v35, 0.0 }
  0xf3   : > { %v905_v39 = vpop.f32.mrf.mxu0  ;;  %1381 = vmatmul.mubr.bf16.vlgmr.msra.gmra.mxu1 %v1112_v33  ;;  %v8327_v33 = vld [vmem:[%s11477_s4 + $0x190] ss:$8 sps:$4 sm:$0xff]  }
  0xf4   : > { %v906_v41 = vadd.f32 %v905_v39, %v9117_v10  ;;  %v1054_v42 = vmax.f32 %v904_v36, 0.0  ;;  %1872 = vmatpush2.bf16.msra.mxu0 %v8327_v33 }
  0xf5   : > { %v909_v43 = vpop.f32.mrf.mxu0 }
  0xf6   : > { %v1055_v45 = vmax.f32 %v906_v41, 0.0  ;;  %v1114_v51 = vpack.c.bf16 %v1054_v42, %v1052_v47  ;;  %v910_v56 = vadd.f32 %v909_v43, %v9126_v13 }
  0xf7   : > { %v911_v48 = vpop.f32.mrf.mxu0 }
  0xf8   : > { %v1115_v50 = vpack.c.bf16 %v1055_v45, %v1053_v44  ;;  %v912_v53 = vadd.f32 %v911_v48, %v9117_v10  ;;  %v1056_v1 = vmax.f32 %v910_v56, 0.0 }
  0xf9   : > { %v913_v52 = vpop.f32.mrf.mxu0 }
  0xfa   : > { %v914_v54 = vadd.f32 %v913_v52, %v9126_v13  ;;  %1390 = vmatprep.mubr.bf16.mxu1 %v1115_v50  ;;  %v1057_v62 = vmax.f32 %v912_v53, 0.0 }
  0xfb   : > { %v915_v57 = vpop.f32.mrf.mxu0  ;;  %1391 = vmatmul.mubr.bf16.gmra.mxu1 %v1114_v51 }
  0xfc   : > { %v916_v59 = vadd.f32 %v915_v57, %v9117_v10  ;;  %v1058_v60 = vmax.f32 %v914_v54, 0.0 }
  0xfd   : > { %v919_v61 = vpop.f32.mrf.mxu0 }
  0xfe   : > { %v1059_v63 = vmax.f32 %v916_v59, 0.0  ;;  %v1116_v9 = vpack.c.bf16 %v1058_v60, %v1056_v1  ;;  %v920_v16 = vadd.f32 %v919_v61, %v9126_v13 }
  0xff   : > { %v921_v5 = vpop.f32.mrf.mxu0 }
 0x100   : > { %v1117_v8 = vpack.c.bf16 %v1059_v63, %v1057_v62  ;;  %v922_v12 = vadd.f32 %v921_v5, %v9117_v10  ;;  %v1060_v25 = vmax.f32 %v920_v16, 0.0 }
 0x101   : > { %v923_v11 = vpop.f32.mrf.mxu0 }
 0x102   : > { %v924_v14 = vadd.f32 %v923_v11, %v9126_v13  ;;  %1400 = vmatprep.mubr.bf16.mxu1 %v1117_v8  ;;  %v1061_v22 = vmax.f32 %v922_v12, 0.0 }
 0x103   : > { %v925_v17 = vpop.f32.mrf.mxu0  ;;  %1401 = vmatmul.mubr.bf16.gmra.mxu1 %v1116_v9 }
 0x104   : > { %v926_v19 = vadd.f32 %v925_v17, %v9117_v10  ;;  %v1062_v20 = vmax.f32 %v924_v14, 0.0 }
 0x105   : > { %v929_v21 = vpop.f32.mrf.mxu0 }
 0x106   : > { %v1063_v23 = vmax.f32 %v926_v19, 0.0  ;;  %v1118_v29 = vpack.c.bf16 %v1062_v20, %v1060_v25  ;;  %v930_v34 = vadd.f32 %v929_v21, %v9126_v13 }
 0x107   : > { %v931_v26 = vpop.f32.mrf.mxu0 }
 0x108   : > { %v1119_v28 = vpack.c.bf16 %v1063_v23, %v1061_v22  ;;  %v932_v31 = vadd.f32 %v931_v26, %v9117_v10  ;;  %v1064_v41 = vmax.f32 %v930_v34, 0.0 }
 0x109   : > { %v933_v30 = vpop.f32.mrf.mxu0 }
 0x10a   : > { %v934_v32 = vadd.f32 %v933_v30, %v9126_v13  ;;  %1410 = vmatprep.mubr.bf16.mxu1 %v1119_v28  ;;  %v1065_v39 = vmax.f32 %v932_v31, 0.0 }
 0x10b   : > { %v935_v35 = vpop.f32.mrf.mxu0  ;;  %1411 = vmatmul.mubr.bf16.gmra.mxu1 %v1118_v29 }
 0x10c   : > { %v936_v36 = vadd.f32 %v935_v35, %v9117_v10  ;;  %v1066_v37 = vmax.f32 %v934_v32, 0.0 }
 0x10d   : > { %v939_v38 = vpop.f32.mrf.mxu0 }
 0x10e   : > { %v1067_v40 = vmax.f32 %v936_v36, 0.0  ;;  %v1120_v44 = vpack.c.bf16 %v1066_v37, %v1064_v41  ;;  %v940_v48 = vadd.f32 %v939_v38, %v9126_v13 }
 0x10f   : > { %v941_v42 = vpop.f32.mrf.mxu0 }
 0x110   : > { %v1121_v43 = vpack.c.bf16 %v1067_v40, %v1065_v39  ;;  %v942_v46 = vadd.f32 %v941_v42, %v9117_v10  ;;  %v1068_v55 = vmax.f32 %v940_v48, 0.0 }
 0x111   : > { %v943_v45 = vpop.f32.mrf.mxu0 }
 0x112   : > { %v944_v47 = vadd.f32 %v943_v45, %v9126_v13  ;;  %1420 = vmatprep.mubr.bf16.mxu1 %v1121_v43  ;;  %v1069_v53 = vmax.f32 %v942_v46, 0.0 }
 0x113   : > { %v945_v49 = vpop.f32.mrf.mxu0  ;;  %1421 = vmatmul.mubr.bf16.gmra.mxu1 %v1120_v44 }
 0x114   : > { %v946_v50 = vadd.f32 %v945_v49, %v9117_v10  ;;  %v1070_v51 = vmax.f32 %v944_v47, 0.0 }
 0x115   : > { %v949_v52 = vpop.f32.mrf.mxu0 }
 0x116   : > { %v1071_v54 = vmax.f32 %v946_v50, 0.0  ;;  %v1122_v58 = vpack.c.bf16 %v1070_v51, %v1068_v55  ;;  %v950_v62 = vadd.f32 %v949_v52, %v9126_v13 }
 0x117   : > { %v951_v56 = vpop.f32.mrf.mxu0 }
 0x118   : > { %v1123_v57 = vpack.c.bf16 %v1071_v54, %v1069_v53  ;;  %v952_v60 = vadd.f32 %v951_v56, %v9117_v10  ;;  %v1072_v9 = vmax.f32 %v950_v62, 0.0  ;;  %v8332_v62 = vld [vmem:[%s11477_s4 + $0x184] ss:$8 sps:$4 sm:$0xff]  }
 0x119   : > { %v953_v59 = vpop.f32.mrf.mxu0  ;;  %1873 = vmatprep.subr.bf16.mxu0 %v8332_v62 }
 0x11a   : > { %v954_v61 = vadd.f32 %v953_v59, %v9126_v13  ;;  %1430 = vmatprep.mubr.bf16.mxu1 %v1123_v57  ;;  %v1073_v6 = vmax.f32 %v952_v60, 0.0 }
 0x11b   : > { %v955_v63 = vpop.f32.mrf.mxu0  ;;  %1431 = vmatmul.mubr.bf16.gmra.mxu1 %v1122_v58 }
 0x11c   : > { %v956_v0 = vadd.f32 %v955_v63, %v9117_v10  ;;  %v1074_v1 = vmax.f32 %v954_v61, 0.0 }
 0x11d   : > { %v959_v5 = vpop.f32.mrf.mxu0 }
 0x11e   : > { %v1075_v8 = vmax.f32 %v956_v0, 0.0  ;;  %v1124_v14 = vpack.c.bf16 %v1074_v1, %v1072_v9  ;;  %v960_v18 = vadd.f32 %v959_v5, %v9126_v13  ;;  %v8330_v0 = vld [vmem:[%s11477_s4 + $0x180] ss:$8 sps:$4 sm:$0xff]  }
 0x11f   : > { %v961_v11 = vpop.f32.mrf.mxu0  ;;  %1874 = vmatpush2.bf16.msra.mxu0 %v8330_v0 }
 0x120   : > { %v1125_v12 = vpack.c.bf16 %v1075_v8, %v1073_v6  ;;  %v962_v16 = vadd.f32 %v961_v11, %v9117_v10  ;;  %v1076_v25 = vmax.f32 %v960_v18, 0.0 }
 0x121   : > { %v963_v15 = vpop.f32.mrf.mxu0 }
 0x122   : > { %v964_v17 = vadd.f32 %v963_v15, %v9126_v13  ;;  %1440 = vmatprep.mubr.bf16.mxu1 %v1125_v12  ;;  %v1077_v23 = vmax.f32 %v962_v16, 0.0 }
 0x123   : > { %v965_v19 = vpop.f32.mrf.mxu0  ;;  %1441 = vmatmul.mubr.bf16.gmra.mxu1 %v1124_v14 }
 0x124   : > { %v966_v20 = vadd.f32 %v965_v19, %v9117_v10  ;;  %v1078_v21 = vmax.f32 %v964_v17, 0.0 }
 0x125   : > { %v969_v22 = vpop.f32.mrf.mxu0 }
 0x126   : > { %v1079_v24 = vmax.f32 %v966_v20, 0.0  ;;  %v1126_v28 = vpack.c.bf16 %v1078_v21, %v1076_v25  ;;  %v970_v32 = vadd.f32 %v969_v22, %v9126_v13 }
 0x127   : > { %v971_v26 = vpop.f32.mrf.mxu0 }
 0x128   : > { %v1127_v27 = vpack.c.bf16 %v1079_v24, %v1077_v23  ;;  %v972_v30 = vadd.f32 %v971_v26, %v9117_v10  ;;  %v1080_v39 = vmax.f32 %v970_v32, 0.0 }
 0x129   : > { %v973_v29 = vpop.f32.mrf.mxu0 }
 0x12a   : > { %v974_v31 = vadd.f32 %v973_v29, %v9126_v13  ;;  %1450 = vmatprep.mubr.bf16.mxu1 %v1127_v27  ;;  %v1081_v37 = vmax.f32 %v972_v30, 0.0 }
 0x12b   : > { %v975_v33 = vpop.f32.mrf.mxu0  ;;  %1451 = vmatmul.mubr.bf16.gmra.mxu1 %v1126_v28 }
 0x12c   : > { %v976_v34 = vadd.f32 %v975_v33, %v9117_v10  ;;  %v1082_v35 = vmax.f32 %v974_v31, 0.0 }
 0x12d   : > { %v979_v36 = vpop.f32.mrf.mxu0 }
 0x12e   : > { %v1083_v38 = vmax.f32 %v976_v34, 0.0  ;;  %v1128_v42 = vpack.c.bf16 %v1082_v35, %v1080_v39  ;;  %v980_v46 = vadd.f32 %v979_v36, %v9126_v13 }
 0x12f   : > { %v981_v40 = vpop.f32.mrf.mxu0 }
 0x130   : > { %v1129_v41 = vpack.c.bf16 %v1083_v38, %v1081_v37  ;;  %v982_v44 = vadd.f32 %v981_v40, %v9117_v10  ;;  %v1084_v53 = vmax.f32 %v980_v46, 0.0 }
 0x131   : > { %v983_v43 = vpop.f32.mrf.mxu0 }
 0x132   : > { %v984_v45 = vadd.f32 %v983_v43, %v9126_v13  ;;  %1460 = vmatprep.mubr.bf16.mxu1 %v1129_v41  ;;  %v1085_v51 = vmax.f32 %v982_v44, 0.0 }
 0x133   : > { %v985_v47 = vpop.f32.mrf.mxu0  ;;  %1461 = vmatmul.mubr.bf16.gmra.mxu1 %v1128_v42 }
 0x134   : > { %v986_v48 = vadd.f32 %v985_v47, %v9117_v10  ;;  %v1086_v49 = vmax.f32 %v984_v45, 0.0 }
 0x135   : > { %v989_v50 = vpop.f32.mrf.mxu0 }
 0x136   : > { %v1087_v52 = vmax.f32 %v986_v48, 0.0  ;;  %v1130_v56 = vpack.c.bf16 %v1086_v49, %v1084_v53  ;;  %v990_v60 = vadd.f32 %v989_v50, %v9126_v13 }
 0x137   : > { %v991_v54 = vpop.f32.mrf.mxu0 }
 0x138   : > { %v1131_v55 = vpack.c.bf16 %v1087_v52, %v1085_v51  ;;  %v992_v58 = vadd.f32 %v991_v54, %v9117_v10  ;;  %v1088_v9 = vmax.f32 %v990_v60, 0.0 }
 0x139   : > { %v993_v57 = vpop.f32.mrf.mxu0 }
 0x13a   : > { %v994_v59 = vadd.f32 %v993_v57, %v9126_v13  ;;  %1470 = vmatprep.mubr.bf16.mxu1 %v1131_v55  ;;  %v1089_v6 = vmax.f32 %v992_v58, 0.0 }
 0x13b   : > { %v995_v61 = vpop.f32.mrf.mxu0  ;;  %1471 = vmatmul.mubr.bf16.gmra.mxu1 %v1130_v56 }
 0x13c   : > { %v996_v63 = vadd.f32 %v995_v61, %v9117_v10  ;;  %v1090_v1 = vmax.f32 %v994_v59, 0.0 }
 0x13d   : > { %v999_v5 = vpop.f32.mrf.mxu0 }
 0x13e   : > { %v1091_v8 = vmax.f32 %v996_v63, 0.0  ;;  %v1132_v14 = vpack.c.bf16 %v1090_v1, %v1088_v9  ;;  %v1000_v18 = vadd.f32 %v999_v5, %v9126_v13 }
 0x13f   : > { %v1001_v11 = vpop.f32.mrf.mxu0 }
 0x140   : > { %v1133_v12 = vpack.c.bf16 %v1091_v8, %v1089_v6  ;;  %v1002_v16 = vadd.f32 %v1001_v11, %v9117_v10  ;;  %v1092_v25 = vmax.f32 %v1000_v18, 0.0 }
 0x141   : > { %v1003_v15 = vpop.f32.mrf.mxu0 }
 0x142   : > { %v1004_v17 = vadd.f32 %v1003_v15, %v9126_v13  ;;  %1480 = vmatprep.mubr.bf16.mxu1 %v1133_v12  ;;  %v1093_v23 = vmax.f32 %v1002_v16, 0.0 }
 0x143   : > { %v1005_v19 = vpop.f32.mrf.mxu0  ;;  %1481 = vmatmul.mubr.bf16.gmra.mxu1 %v1132_v14 }
 0x144   : > { %v1006_v20 = vadd.f32 %v1005_v19, %v9117_v10  ;;  %v1094_v21 = vmax.f32 %v1004_v17, 0.0 }
 0x145   : > { %v1009_v22 = vpop.f32.mrf.mxu0 }
 0x146   : > { %v1095_v24 = vmax.f32 %v1006_v20, 0.0  ;;  %v1134_v28 = vpack.c.bf16 %v1094_v21, %v1092_v25  ;;  %v1010_v32 = vadd.f32 %v1009_v22, %v9126_v13  ;;  %v8333_v25 = vld [vmem:[%s11477_s4 + $0x270] ss:$8 sps:$4 sm:$0xff]  }
 0x147   : > { %v1011_v26 = vpop.f32.mrf.mxu0 }
 0x148   : > { %v1135_v27 = vpack.c.bf16 %v1095_v24, %v1093_v23  ;;  %v1012_v30 = vadd.f32 %v1011_v26, %v9117_v10  ;;  %v1096_v39 = vmax.f32 %v1010_v32, 0.0  ;;  %v8338_v26 = vld [vmem:[%s11477_s4 + $0x264] ss:$8 sps:$4 sm:$0xff]   ;;  %v8347_v32 = vld [vmem:[%s11477_s4 + $0x234] ss:$8 sps:$4 sm:$0xff]  }
 0x149   : > { %v1013_v29 = vpop.f32.mrf.mxu0 }
 0x14a   : > { %v1014_v31 = vadd.f32 %v1013_v29, %v9126_v13  ;;  %1490 = vmatprep.mubr.bf16.mxu1 %v1135_v27  ;;  %v1097_v37 = vmax.f32 %v1012_v30, 0.0  ;;  %v8339_v27 = vld [vmem:[%s11477_s4 + $0x250] ss:$8 sps:$4 sm:$0xff]   ;;  %v8342_v29 = vld [vmem:[%s11477_s4 + $0x240] ss:$8 sps:$4 sm:$0xff]  }
 0x14b   : > { %v1015_v33 = vpop.f32.mrf.mxu0  ;;  %1491 = vmatmul.mubr.bf16.gmra.mxu1 %v1134_v28  ;;  %v8341_v28 = vld [vmem:[%s11477_s4 + $0x254] ss:$8 sps:$4 sm:$0xff]   ;;  %v8344_v30 = vld [vmem:[%s11477_s4 + $0x244] ss:$8 sps:$4 sm:$0xff]  }
 0x14c   : > { %v1016_v34 = vadd.f32 %v1015_v33, %v9117_v10  ;;  %v1098_v35 = vmax.f32 %v1014_v31, 0.0  ;;  %v8345_v31 = vld [vmem:[%s11477_s4 + $0x230] ss:$8 sps:$4 sm:$0xff]   ;;  %v1176_v33 = vld [vmem:[%s11478_s5] sm:$0x3] }
 0x14d   : > { %v1019_v36 = vpop.f32.mrf.mxu0 }
 0x14e   : > { %v1099_v38 = vmax.f32 %v1016_v34, 0.0  ;;  %v1136_v42 = vpack.c.bf16 %v1098_v35, %v1096_v39  ;;  %v1020_v46 = vadd.f32 %v1019_v36, %v9126_v13  ;;  %v9286_v35 = vrot.slane %v1176_v33, %v9102_v4  ;;  %v8348_v36 = vld [vmem:[%s11477_s4 + $0x220] ss:$8 sps:$4 sm:$0xff]  }
 0x14f   : > { %v1021_v40 = vpop.f32.mrf.mxu0 }
 0x150   : > { %v1137_v41 = vpack.c.bf16 %v1099_v38, %v1097_v37  ;;  %v1022_v44 = vadd.f32 %v1021_v40, %v9117_v10  ;;  %v1100_v53 = vmax.f32 %v1020_v46, 0.0  ;;  %v8350_v37 = vld [vmem:[%s11477_s4 + $0x224] ss:$8 sps:$4 sm:$0xff]   ;;  %v9295_v38 = vrot.slane %v1176_v33, %v9111_v7  ;;  %v8353_v46 = vld [vmem:[%s11477_s4 + $0x214] ss:$8 sps:$4 sm:$0xff]  }
 0x151   : > { %v1023_v43 = vpop.f32.mrf.mxu0 }
 0x152   : > { %v1024_v45 = vadd.f32 %v1023_v43, %v9126_v13  ;;  %1500 = vmatprep.mubr.bf16.mxu1 %v1137_v41  ;;  %v1101_v51 = vmax.f32 %v1022_v44, 0.0 }
 0x153   : > { %v1025_v47 = vpop.f32.mrf.mxu0  ;;  %1501 = vmatmul.mubr.bf16.gmra.mxu1 %v1136_v42 }
 0x154   : > { %v1026_v48 = vadd.f32 %v1025_v47, %v9117_v10  ;;  %v1102_v49 = vmax.f32 %v1024_v45, 0.0  ;;  %v8351_v45 = vld [vmem:[%s11477_s4 + $0x210] ss:$8 sps:$4 sm:$0xff]  }
 0x155   : > { %v1029_v50 = vpop.f32.mrf.mxu0 }
 0x156   : > { %v1103_v52 = vmax.f32 %v1026_v48, 0.0  ;;  %v1138_v56 = vpack.c.bf16 %v1102_v49, %v1100_v53  ;;  %v1030_v60 = vadd.f32 %v1029_v50, %v9126_v13  ;;  %v8356_v48 = vld [vmem:[%s11477_s4 + $0x204] ss:$8 sps:$4 sm:$0xff]   ;;  %v8354_v53 = vld [vmem:[%s11477_s4 + $0x200] ss:$8 sps:$4 sm:$0xff]  }
 0x157   : > { %v1031_v54 = vpop.f32.mrf.mxu0 }
 0x158   : > { %v1139_v55 = vpack.c.bf16 %v1103_v52, %v1101_v51  ;;  %v1032_v58 = vadd.f32 %v1031_v54, %v9117_v10  ;;  %v1104_v6 = vmax.f32 %v1030_v60, 0.0 }
 0x159   : > { %v1033_v57 = vpop.f32.mrf.mxu0 }
 0x15a   : > { %v1034_v59 = vadd.f32 %v1033_v57, %v9126_v13  ;;  %1510 = vmatprep.mubr.bf16.mxu1 %v1139_v55  ;;  %v1105_v1 = vmax.f32 %v1032_v58, 0.0 }
 0x15b   : > { %v1035_v61 = vpop.f32.mrf.mxu0  ;;  %1511 = vmatmul.mubr.bf16.gmra.mxu1 %v1138_v56  ;;  %v8359_v56 = vld [vmem:[%s11477_s4 + $0x2f4] ss:$8 sps:$4 sm:$0xff]  }
 0x15c   : > { %v1036_v62 = vadd.f32 %v1035_v61, %v9117_v10  ;;  %v1106_v63 = vmax.f32 %v1034_v59, 0.0 }
 0x15d   : > { %v1039_v0 = vpop.f32.mrf.mxu0 }
 0x15e   : > { %v1107_v5 = vmax.f32 %v1036_v62, 0.0  ;;  %v1140_v11 = vpack.c.bf16 %v1106_v63, %v1104_v6  ;;  %v1040_v16 = vadd.f32 %v1039_v0, %v9126_v13  ;;  %v8357_v62 = vld [vmem:[%s11477_s4 + $0x2f0] ss:$8 sps:$4 sm:$0xff]  }
 0x15f   : > { %v1041_v8 = vpop.f32.mrf.mxu0 }
 0x160   : > { %v1141_v9 = vpack.c.bf16 %v1107_v5, %v1105_v1  ;;  %v1042_v14 = vadd.f32 %v1041_v8, %v9117_v10  ;;  %v1108_v22 = vmax.f32 %v1040_v16, 0.0  ;;  %v8362_v1 = vld [vmem:[%s11477_s4 + $0x2e4] ss:$8 sps:$4 sm:$0xff]   ;;  %v8365_v16 = vld [vmem:[%s11477_s4 + $0x2d4] ss:$8 sps:$4 sm:$0xff]  }
 0x161   : > { %v1043_v12 = vpop.f32.mrf.mxu0 }
 0x162   : > { %v1044_v15 = vadd.f32 %v1043_v12, %v9126_v13  ;;  %1520 = vmatprep.mubr.bf16.mxu1 %v1141_v9  ;;  %v1109_v20 = vmax.f32 %v1042_v14, 0.0  ;;  %v8335_v13 = vld [vmem:[%s11477_s4 + $0x274] ss:$8 sps:$4 sm:$0xff]   ;;  %v8360_v12 = vld [vmem:[%s11477_s4 + $0x2e0] ss:$8 sps:$4 sm:$0xff]  }
 0x163   : > { %v1045_v17 = vpop.f32.mrf.mxu0  ;;  %1521 = vmatmul.mubr.bf16.gmra.mxu1 %v1140_v11  ;;  %2338 = vmatprep.subr.bf16.mxu1 %v8335_v13 }
 0x164   : > { %v1046_v18 = vadd.f32 %v1045_v17, %v9117_v10  ;;  %v1110_v19 = vmax.f32 %v1044_v15, 0.0  ;;  %2339 = vmatpush1.bf16.msra.mxu1 %v8333_v25  ;;  %v8336_v10 = vld [vmem:[%s11477_s4 + $0x260] ss:$8 sps:$4 sm:$0xff]   ;;  %v8368_v25 = vld [vmem:[%s11477_s4 + $0x2c4] ss:$8 sps:$4 sm:$0xff]  }
 0x165   : > { %2340 = vmatprep.subr.bf16.mxu1 %v8338_v26 }
 0x166   : > { %v1111_v21 = vmax.f32 %v1046_v18, 0.0  ;;  %v1142_v24 = vpack.c.bf16 %v1110_v19, %v1108_v22  ;;  %v8363_v22 = vld [vmem:[%s11477_s4 + $0x2d0] ss:$8 sps:$4 sm:$0xff]  }
 0x168   : > { %v1143_v23 = vpack.c.bf16 %v1111_v21, %v1109_v20  ;;  %2341 = vmatpush1.bf16.msra.mxu1 %v8336_v10 }
 0x169   : > { %2342 = vmatprep.subr.bf16.mxu1 %v8341_v28 }
 0x16a   : > { %1530 = vmatprep.mubr.bf16.mxu1 %v1143_v23 }
 0x16b   : > { %1531 = vmatmul.mubr.bf16.gmra.mxu1 %v1142_v24 }
 0x16c   : > { %2343 = vmatpush1.bf16.msra.mxu1 %v8339_v27 }
 0x16d   : > { %2344 = vmatprep.subr.bf16.mxu1 %v8344_v30 }
 0x170   : > { %2345 = vmatpush1.bf16.msra.mxu1 %v8342_v29  ;;  %v8366_v29 = vld [vmem:[%s11477_s4 + $0x2c0] ss:$8 sps:$4 sm:$0xff]  }
 0x171   : > { %2346 = vmatprep.subr.bf16.mxu1 %v8347_v32  ;;  %v8371_v32 = vld [vmem:[%s11477_s4 + $0x2b4] ss:$8 sps:$4 sm:$0xff]  }
 0x174   : > { %2347 = vmatpush1.bf16.msra.mxu1 %v8345_v31 }
 0x175   : > { %2348 = vmatprep.subr.bf16.mxu1 %v8350_v37 }
 0x178   : > { %2349 = vmatpush1.bf16.msra.mxu1 %v8348_v36 }
 0x179   : > { %2350 = vmatprep.subr.bf16.mxu1 %v8353_v46 }
 0x17c   : > { %2351 = vmatpush1.bf16.msra.mxu1 %v8351_v45 }
 0x17d   : > { %2352 = vmatprep.subr.bf16.mxu1 %v8356_v48 }
 0x180   : > { %2353 = vmatpush1.bf16.msra.mxu1 %v8354_v53 }
 0x181   : > { %2354 = vmatprep.subr.bf16.mxu1 %v8359_v56 }
 0x184   : > { %2355 = vmatpush2.bf16.msra.mxu1 %v8357_v62 }
 0x185   : > { %2356 = vmatprep.subr.bf16.mxu1 %v8362_v1 }
 0x188   : > { %2357 = vmatpush2.bf16.msra.mxu1 %v8360_v12 }
 0x189   : > { %2358 = vmatprep.subr.bf16.mxu1 %v8365_v16 }
 0x18c   : > { %2359 = vmatpush2.bf16.msra.mxu1 %v8363_v22 }
 0x18d   : > { %2360 = vmatprep.subr.bf16.mxu1 %v8368_v25 }
 0x190   : > { %2361 = vmatpush2.bf16.msra.mxu1 %v8366_v29 }
 0x191   : > { %2362 = vmatprep.subr.bf16.mxu1 %v8371_v32 }
 0x1b3   : > { %v1382_v34 = vpop.f32.mrf.mxu1 }
 0x1b4   : > { %v1383_v43 = vadd.f32 %v1382_v34, %v9295_v38 }
 0x1b5   : > { %v1384_v39 = vpop.f32.mrf.mxu1 }
 0x1b6   : > { %v1385_v41 = vadd.f32 %v1384_v39, %v9286_v35  ;;  %v1541_v54 = vmax.f32 %v1383_v43, 0.0  ;;  %v8374_v43 = vld [vmem:[%s11477_s4 + $0x2a4] ss:$8 sps:$4 sm:$0xff]  }
 0x1b7   : > { %v1386_v40 = vpop.f32.mrf.mxu1 }
 0x1b8   : > { %v1387_v42 = vadd.f32 %v1386_v40, %v9295_v38  ;;  %v1542_v51 = vmax.f32 %v1385_v41, 0.0  ;;  %v8369_v40 = vld [vmem:[%s11477_s4 + $0x2b0] ss:$8 sps:$4 sm:$0xff]  }
 0x1b9   : > { %v1388_v44 = vpop.f32.mrf.mxu1  ;;  %2363 = vmatpush2.bf16.msra.mxu1 %v8369_v40 }
 0x1ba   : > { %v1389_v47 = vadd.f32 %v1388_v44, %v9286_v35  ;;  %v1543_v49 = vmax.f32 %v1387_v42, 0.0  ;;  %2364 = vmatprep.subr.bf16.mxu1 %v8374_v43 }
 0x1bb   : > { %v1392_v50 = vpop.f32.mrf.mxu1 }
 0x1bc   : > { %v1544_v52 = vmax.f32 %v1389_v47, 0.0  ;;  %v1605_v58 = vpack.c.bf16 %v1543_v49, %v1541_v54  ;;  %v1393_v63 = vadd.f32 %v1392_v50, %v9295_v38  ;;  %v8372_v49 = vld [vmem:[%s11477_s4 + $0x2a0] ss:$8 sps:$4 sm:$0xff]  }
 0x1bd   : > { %v1394_v55 = vpop.f32.mrf.mxu1  ;;  %2365 = vmatpush2.bf16.msra.mxu1 %v8372_v49 }
 0x1be   : > { %v1606_v57 = vpack.c.bf16 %v1544_v52, %v1542_v51  ;;  %v1395_v60 = vadd.f32 %v1394_v55, %v9286_v35  ;;  %v1545_v14 = vmax.f32 %v1393_v63, 0.0  ;;  %v8377_v52 = vld [vmem:[%s11477_s4 + $0x294] ss:$8 sps:$4 sm:$0xff]  }
 0x1bf   : > { %v1396_v59 = vpop.f32.mrf.mxu1  ;;  %2366 = vmatprep.subr.bf16.mxu1 %v8377_v52 }
 0x1c0   : > { %v1397_v61 = vadd.f32 %v1396_v59, %v9295_v38  ;;  %1875 = vmatprep.mubr.bf16.mxu0 %v1606_v57  ;;  %v1546_v9 = vmax.f32 %v1395_v60, 0.0 }
 0x1c1   : > { %v1398_v0 = vpop.f32.mrf.mxu1  ;;  %1876 = vmatmul.mubr.bf16.vlgmr.msra.gmra.mxu0 %v1605_v58  ;;  %v8375_v58 = vld [vmem:[%s11477_s4 + $0x290] ss:$8 sps:$4 sm:$0xff]  }
 0x1c2   : > { %v1399_v5 = vadd.f32 %v1398_v0, %v9286_v35  ;;  %v1547_v6 = vmax.f32 %v1397_v61, 0.0  ;;  %2367 = vmatpush2.bf16.msra.mxu1 %v8375_v58 }
 0x1c3   : > { %v1402_v8 = vpop.f32.mrf.mxu1 }
 0x1c4   : > { %v1548_v11 = vmax.f32 %v1399_v5, 0.0  ;;  %v1607_v18 = vpack.c.bf16 %v1547_v6, %v1545_v14  ;;  %v1403_v23 = vadd.f32 %v1402_v8, %v9295_v38 }
 0x1c5   : > { %v1404_v15 = vpop.f32.mrf.mxu1 }
 0x1c6   : > { %v1608_v17 = vpack.c.bf16 %v1548_v11, %v1546_v9  ;;  %v1405_v20 = vadd.f32 %v1404_v15, %v9286_v35  ;;  %v1549_v30 = vmax.f32 %v1403_v23, 0.0 }
 0x1c7   : > { %v1406_v19 = vpop.f32.mrf.mxu1 }
 0x1c8   : > { %v1407_v21 = vadd.f32 %v1406_v19, %v9295_v38  ;;  %1885 = vmatprep.mubr.bf16.mxu0 %v1608_v17  ;;  %v1550_v27 = vmax.f32 %v1405_v20, 0.0 }
 0x1c9   : > { %v1408_v24 = vpop.f32.mrf.mxu1  ;;  %1886 = vmatmul.mubr.bf16.gmra.mxu0 %v1607_v18 }
 0x1ca   : > { %v1409_v13 = vadd.f32 %v1408_v24, %v9286_v35  ;;  %v1551_v10 = vmax.f32 %v1407_v21, 0.0 }
 0x1cb   : > { %v1412_v26 = vpop.f32.mrf.mxu1 }
 0x1cc   : > { %v1552_v28 = vmax.f32 %v1409_v13, 0.0  ;;  %v1609_v34 = vpack.c.bf16 %v1551_v10, %v1549_v30  ;;  %v1413_v41 = vadd.f32 %v1412_v26, %v9295_v38 }
 0x1cd   : > { %v1414_v31 = vpop.f32.mrf.mxu1 }
 0x1ce   : > { %v1610_v33 = vpack.c.bf16 %v1552_v28, %v1550_v27  ;;  %v1415_v37 = vadd.f32 %v1414_v31, %v9286_v35  ;;  %v1553_v50 = vmax.f32 %v1413_v41, 0.0 }
 0x1cf   : > { %v1416_v36 = vpop.f32.mrf.mxu1 }
 0x1d0   : > { %v1417_v39 = vadd.f32 %v1416_v36, %v9295_v38  ;;  %1895 = vmatprep.mubr.bf16.mxu0 %v1610_v33  ;;  %v1554_v47 = vmax.f32 %v1415_v37, 0.0 }
 0x1d1   : > { %v1418_v42 = vpop.f32.mrf.mxu1  ;;  %1896 = vmatmul.mubr.bf16.gmra.mxu0 %v1609_v34 }
 0x1d2   : > { %v1419_v44 = vadd.f32 %v1418_v42, %v9286_v35  ;;  %v1555_v45 = vmax.f32 %v1417_v39, 0.0 }
 0x1d3   : > { %v1422_v46 = vpop.f32.mrf.mxu1 }
 0x1d4   : > { %v1556_v48 = vmax.f32 %v1419_v44, 0.0  ;;  %v1611_v54 = vpack.c.bf16 %v1555_v45, %v1553_v50  ;;  %v1423_v59 = vadd.f32 %v1422_v46, %v9295_v38 }
 0x1d5   : > { %v1424_v51 = vpop.f32.mrf.mxu1 }
 0x1d6   : > { %v1612_v53 = vpack.c.bf16 %v1556_v48, %v1554_v47  ;;  %v1425_v56 = vadd.f32 %v1424_v51, %v9286_v35  ;;  %v1557_v5 = vmax.f32 %v1423_v59, 0.0 }
 0x1d7   : > { %v1426_v55 = vpop.f32.mrf.mxu1 }
 0x1d8   : > { %v1427_v57 = vadd.f32 %v1426_v55, %v9295_v38  ;;  %1905 = vmatprep.mubr.bf16.mxu0 %v1612_v53  ;;  %v1558_v0 = vmax.f32 %v1425_v56, 0.0 }
 0x1d9   : > { %v1428_v60 = vpop.f32.mrf.mxu1  ;;  %1906 = vmatmul.mubr.bf16.gmra.mxu0 %v1611_v54 }
 0x1da   : > { %v1429_v61 = vadd.f32 %v1428_v60, %v9286_v35  ;;  %v1559_v62 = vmax.f32 %v1427_v57, 0.0 }
 0x1db   : > { %v1432_v63 = vpop.f32.mrf.mxu1 }
 0x1dc   : > { %v1560_v1 = vmax.f32 %v1429_v61, 0.0  ;;  %v1613_v9 = vpack.c.bf16 %v1559_v62, %v1557_v5  ;;  %v1433_v15 = vadd.f32 %v1432_v63, %v9295_v38 }
 0x1dd   : > { %v1434_v6 = vpop.f32.mrf.mxu1 }
 0x1de   : > { %v1614_v8 = vpack.c.bf16 %v1560_v1, %v1558_v0  ;;  %v1435_v12 = vadd.f32 %v1434_v6, %v9286_v35  ;;  %v1561_v22 = vmax.f32 %v1433_v15, 0.0 }
 0x1df   : > { %v1436_v11 = vpop.f32.mrf.mxu1 }
 0x1e0   : > { %v1437_v14 = vadd.f32 %v1436_v11, %v9295_v38  ;;  %1915 = vmatprep.mubr.bf16.mxu0 %v1614_v8  ;;  %v1562_v20 = vmax.f32 %v1435_v12, 0.0 }
 0x1e1   : > { %v1438_v16 = vpop.f32.mrf.mxu1  ;;  %1916 = vmatmul.mubr.bf16.gmra.mxu0 %v1613_v9 }
 0x1e2   : > { %v1439_v17 = vadd.f32 %v1438_v16, %v9286_v35  ;;  %v1563_v18 = vmax.f32 %v1437_v14, 0.0 }
 0x1e3   : > { %v1442_v19 = vpop.f32.mrf.mxu1 }
 0x1e4   : > { %v1564_v21 = vmax.f32 %v1439_v17, 0.0  ;;  %v1615_v25 = vpack.c.bf16 %v1563_v18, %v1561_v22  ;;  %v1443_v27 = vadd.f32 %v1442_v19, %v9295_v38 }
 0x1e5   : > { %v1444_v23 = vpop.f32.mrf.mxu1 }
 0x1e6   : > { %v1616_v24 = vpack.c.bf16 %v1564_v21, %v1562_v20  ;;  %v1445_v10 = vadd.f32 %v1444_v23, %v9286_v35  ;;  %v1565_v34 = vmax.f32 %v1443_v27, 0.0  ;;  %v8380_v27 = vld [vmem:[%s11477_s4 + $0x284] ss:$8 sps:$4 sm:$0xff]  }
 0x1e7   : > { %v1446_v13 = vpop.f32.mrf.mxu1  ;;  %2368 = vmatprep.subr.bf16.mxu1 %v8380_v27 }
 0x1e8   : > { %v1447_v26 = vadd.f32 %v1446_v13, %v9295_v38  ;;  %1925 = vmatprep.mubr.bf16.mxu0 %v1616_v24  ;;  %v1566_v32 = vmax.f32 %v1445_v10, 0.0 }
 0x1e9   : > { %v1448_v28 = vpop.f32.mrf.mxu1  ;;  %1926 = vmatmul.mubr.bf16.gmra.mxu0 %v1615_v25 }
 0x1ea   : > { %v1449_v29 = vadd.f32 %v1448_v28, %v9286_v35  ;;  %v1567_v30 = vmax.f32 %v1447_v26, 0.0 }
 0x1eb   : > { %v1452_v31 = vpop.f32.mrf.mxu1 }
 0x1ec   : > { %v1568_v33 = vmax.f32 %v1449_v29, 0.0  ;;  %v1617_v39 = vpack.c.bf16 %v1567_v30, %v1565_v34  ;;  %v1453_v43 = vadd.f32 %v1452_v31, %v9295_v38  ;;  %v8378_v29 = vld [vmem:[%s11477_s4 + $0x280] ss:$8 sps:$4 sm:$0xff]  }
 0x1ed   : > { %v1454_v36 = vpop.f32.mrf.mxu1  ;;  %2369 = vmatpush2.bf16.msra.mxu1 %v8378_v29 }
 0x1ee   : > { %v1618_v37 = vpack.c.bf16 %v1568_v33, %v1566_v32  ;;  %v1455_v41 = vadd.f32 %v1454_v36, %v9286_v35  ;;  %v1569_v50 = vmax.f32 %v1453_v43, 0.0 }
 0x1ef   : > { %v1456_v40 = vpop.f32.mrf.mxu1 }
 0x1f0   : > { %v1457_v42 = vadd.f32 %v1456_v40, %v9295_v38  ;;  %1935 = vmatprep.mubr.bf16.mxu0 %v1618_v37  ;;  %v1570_v48 = vmax.f32 %v1455_v41, 0.0 }
 0x1f1   : > { %v1458_v44 = vpop.f32.mrf.mxu1  ;;  %1936 = vmatmul.mubr.bf16.gmra.mxu0 %v1617_v39 }
 0x1f2   : > { %v1459_v45 = vadd.f32 %v1458_v44, %v9286_v35  ;;  %v1571_v46 = vmax.f32 %v1457_v42, 0.0 }
 0x1f3   : > { %v1462_v47 = vpop.f32.mrf.mxu1 }
 0x1f4   : > { %v1572_v49 = vmax.f32 %v1459_v45, 0.0  ;;  %v1619_v53 = vpack.c.bf16 %v1571_v46, %v1569_v50  ;;  %v1463_v57 = vadd.f32 %v1462_v47, %v9295_v38 }
 0x1f5   : > { %v1464_v51 = vpop.f32.mrf.mxu1 }
 0x1f6   : > { %v1620_v52 = vpack.c.bf16 %v1572_v49, %v1570_v48  ;;  %v1465_v55 = vadd.f32 %v1464_v51, %v9286_v35  ;;  %v1573_v0 = vmax.f32 %v1463_v57, 0.0 }
 0x1f7   : > { %v1466_v54 = vpop.f32.mrf.mxu1 }
 0x1f8   : > { %v1467_v56 = vadd.f32 %v1466_v54, %v9295_v38  ;;  %1945 = vmatprep.mubr.bf16.mxu0 %v1620_v52  ;;  %v1574_v62 = vmax.f32 %v1465_v55, 0.0 }
 0x1f9   : > { %v1468_v58 = vpop.f32.mrf.mxu1  ;;  %1946 = vmatmul.mubr.bf16.gmra.mxu0 %v1619_v53 }
 0x1fa   : > { %v1469_v59 = vadd.f32 %v1468_v58, %v9286_v35  ;;  %v1575_v60 = vmax.f32 %v1467_v56, 0.0 }
 0x1fb   : > { %v1472_v61 = vpop.f32.mrf.mxu1 }
 0x1fc   : > { %v1576_v63 = vmax.f32 %v1469_v59, 0.0  ;;  %v1621_v6 = vpack.c.bf16 %v1575_v60, %v1573_v0  ;;  %v1473_v12 = vadd.f32 %v1472_v61, %v9295_v38 }
 0x1fd   : > { %v1474_v1 = vpop.f32.mrf.mxu1 }
 0x1fe   : > { %v1622_v5 = vpack.c.bf16 %v1576_v63, %v1574_v62  ;;  %v1475_v9 = vadd.f32 %v1474_v1, %v9286_v35  ;;  %v1577_v20 = vmax.f32 %v1473_v12, 0.0 }
 0x1ff   : > { %v1476_v8 = vpop.f32.mrf.mxu1 }
 0x200   : > { %v1477_v11 = vadd.f32 %v1476_v8, %v9295_v38  ;;  %1955 = vmatprep.mubr.bf16.mxu0 %v1622_v5  ;;  %v1578_v18 = vmax.f32 %v1475_v9, 0.0 }
 0x201   : > { %v1478_v14 = vpop.f32.mrf.mxu1  ;;  %1956 = vmatmul.mubr.bf16.gmra.mxu0 %v1621_v6 }
 0x202   : > { %v1479_v15 = vadd.f32 %v1478_v14, %v9286_v35  ;;  %v1579_v16 = vmax.f32 %v1477_v11, 0.0 }
 0x203   : > { %v1482_v17 = vpop.f32.mrf.mxu1 }
 0x204   : > { %v1580_v19 = vmax.f32 %v1479_v15, 0.0  ;;  %v1623_v23 = vpack.c.bf16 %v1579_v16, %v1577_v20  ;;  %v1483_v10 = vadd.f32 %v1482_v17, %v9295_v38 }
 0x205   : > { %v1484_v21 = vpop.f32.mrf.mxu1 }
 0x206   : > { %v1624_v22 = vpack.c.bf16 %v1580_v19, %v1578_v18  ;;  %v1485_v25 = vadd.f32 %v1484_v21, %v9286_v35  ;;  %v1581_v34 = vmax.f32 %v1483_v10, 0.0 }
 0x207   : > { %v1486_v24 = vpop.f32.mrf.mxu1 }
 0x208   : > { %v1487_v13 = vadd.f32 %v1486_v24, %v9295_v38  ;;  %1965 = vmatprep.mubr.bf16.mxu0 %v1624_v22  ;;  %v1582_v32 = vmax.f32 %v1485_v25, 0.0 }
 0x209   : > { %v1488_v26 = vpop.f32.mrf.mxu1  ;;  %1966 = vmatmul.mubr.bf16.gmra.mxu0 %v1623_v23 }
 0x20a   : > { %v1489_v28 = vadd.f32 %v1488_v26, %v9286_v35  ;;  %v1583_v30 = vmax.f32 %v1487_v13, 0.0 }
 0x20b   : > { %v1492_v31 = vpop.f32.mrf.mxu1 }
 0x20c   : > { %v1584_v33 = vmax.f32 %v1489_v28, 0.0  ;;  %v1625_v39 = vpack.c.bf16 %v1583_v30, %v1581_v34  ;;  %v1493_v43 = vadd.f32 %v1492_v31, %v9295_v38 }
 0x20d   : > { %v1494_v36 = vpop.f32.mrf.mxu1 }
 0x20e   : > { %v1626_v37 = vpack.c.bf16 %v1584_v33, %v1582_v32  ;;  %v1495_v41 = vadd.f32 %v1494_v36, %v9286_v35  ;;  %v1585_v50 = vmax.f32 %v1493_v43, 0.0 }
 0x20f   : > { %v1496_v40 = vpop.f32.mrf.mxu1 }
 0x210   : > { %v1497_v42 = vadd.f32 %v1496_v40, %v9295_v38  ;;  %1975 = vmatprep.mubr.bf16.mxu0 %v1626_v37  ;;  %v1586_v48 = vmax.f32 %v1495_v41, 0.0 }
 0x211   : > { %v1498_v44 = vpop.f32.mrf.mxu1  ;;  %1976 = vmatmul.mubr.bf16.gmra.mxu0 %v1625_v39 }
 0x212   : > { %v1499_v45 = vadd.f32 %v1498_v44, %v9286_v35  ;;  %v1587_v46 = vmax.f32 %v1497_v42, 0.0 }
 0x213   : > { %v1502_v47 = vpop.f32.mrf.mxu1 }
 0x214   : > { %v1588_v49 = vmax.f32 %v1499_v45, 0.0  ;;  %v1627_v53 = vpack.c.bf16 %v1587_v46, %v1585_v50  ;;  %v1503_v57 = vadd.f32 %v1502_v47, %v9295_v38  ;;  %v8381_v50 = vld [vmem:[%s11477_s4 + $0x370] ss:$8 sps:$4 sm:$0xff]  }
 0x215   : > { %v1504_v51 = vpop.f32.mrf.mxu1 }
 0x216   : > { %v1628_v52 = vpack.c.bf16 %v1588_v49, %v1586_v48  ;;  %v1505_v55 = vadd.f32 %v1504_v51, %v9286_v35  ;;  %v1589_v0 = vmax.f32 %v1503_v57, 0.0  ;;  %v8386_v51 = vld [vmem:[%s11477_s4 + $0x364] ss:$8 sps:$4 sm:$0xff]   ;;  %v8395_v57 = vld [vmem:[%s11477_s4 + $0x334] ss:$8 sps:$4 sm:$0xff]  }
 0x217   : > { %v1506_v54 = vpop.f32.mrf.mxu1 }
 0x218   : > { %v1507_v56 = vadd.f32 %v1506_v54, %v9295_v38  ;;  %1985 = vmatprep.mubr.bf16.mxu0 %v1628_v52  ;;  %v1590_v62 = vmax.f32 %v1505_v55, 0.0  ;;  %v8387_v52 = vld [vmem:[%s11477_s4 + $0x350] ss:$8 sps:$4 sm:$0xff]   ;;  %v8390_v54 = vld [vmem:[%s11477_s4 + $0x340] ss:$8 sps:$4 sm:$0xff]  }
 0x219   : > { %v1508_v58 = vpop.f32.mrf.mxu1  ;;  %1986 = vmatmul.mubr.bf16.gmra.mxu0 %v1627_v53  ;;  %v8389_v53 = vld [vmem:[%s11477_s4 + $0x354] ss:$8 sps:$4 sm:$0xff]   ;;  %v8392_v55 = vld [vmem:[%s11477_s4 + $0x344] ss:$8 sps:$4 sm:$0xff]  }
 0x21a   : > { %v1509_v59 = vadd.f32 %v1508_v58, %v9286_v35  ;;  %v1591_v60 = vmax.f32 %v1507_v56, 0.0  ;;  %v8393_v56 = vld [vmem:[%s11477_s4 + $0x330] ss:$8 sps:$4 sm:$0xff]   ;;  %v7399_v58 = vld [vmem:[%s11478_s5 + $0x2] sm:$0x3] }
 0x21b   : > { %v1512_v61 = vpop.f32.mrf.mxu1 }
 0x21c   : > { %v1592_v63 = vmax.f32 %v1509_v59, 0.0  ;;  %v1629_v6 = vpack.c.bf16 %v1591_v60, %v1589_v0  ;;  %v1513_v12 = vadd.f32 %v1512_v61, %v9295_v38  ;;  %v9455_v60 = vrot.slane %v7399_v58, %v9102_v4  ;;  %v8396_v61 = vld [vmem:[%s11477_s4 + $0x320] ss:$8 sps:$4 sm:$0xff]  }
 0x21d   : > { %v1514_v1 = vpop.f32.mrf.mxu1 }
 0x21e   : > { %v1630_v5 = vpack.c.bf16 %v1592_v63, %v1590_v62  ;;  %v1515_v9 = vadd.f32 %v1514_v1, %v9286_v35  ;;  %v1593_v20 = vmax.f32 %v1513_v12, 0.0  ;;  %v8398_v62 = vld [vmem:[%s11477_s4 + $0x324] ss:$8 sps:$4 sm:$0xff]   ;;  %v9464_v63 = vrot.slane %v7399_v58, %v9111_v7  ;;  %v8401_v12 = vld [vmem:[%s11477_s4 + $0x314] ss:$8 sps:$4 sm:$0xff]  }
 0x21f   : > { %v1516_v8 = vpop.f32.mrf.mxu1 }
 0x220   : > { %v1517_v11 = vadd.f32 %v1516_v8, %v9295_v38  ;;  %1995 = vmatprep.mubr.bf16.mxu0 %v1630_v5  ;;  %v1594_v18 = vmax.f32 %v1515_v9, 0.0 }
 0x221   : > { %v1518_v14 = vpop.f32.mrf.mxu1  ;;  %1996 = vmatmul.mubr.bf16.gmra.mxu0 %v1629_v6 }
 0x222   : > { %v1519_v15 = vadd.f32 %v1518_v14, %v9286_v35  ;;  %v1595_v16 = vmax.f32 %v1517_v11, 0.0  ;;  %v8399_v11 = vld [vmem:[%s11477_s4 + $0x310] ss:$8 sps:$4 sm:$0xff]  }
 0x223   : > { %v1522_v17 = vpop.f32.mrf.mxu1 }
 0x224   : > { %v1596_v19 = vmax.f32 %v1519_v15, 0.0  ;;  %v1631_v23 = vpack.c.bf16 %v1595_v16, %v1593_v20  ;;  %v1523_v10 = vadd.f32 %v1522_v17, %v9295_v38  ;;  %v8404_v15 = vld [vmem:[%s11477_s4 + $0x304] ss:$8 sps:$4 sm:$0xff]   ;;  %v8402_v20 = vld [vmem:[%s11477_s4 + $0x300] ss:$8 sps:$4 sm:$0xff]  }
 0x225   : > { %v1524_v21 = vpop.f32.mrf.mxu1 }
 0x226   : > { %v1632_v22 = vpack.c.bf16 %v1596_v19, %v1594_v18  ;;  %v1525_v25 = vadd.f32 %v1524_v21, %v9286_v35  ;;  %v1597_v32 = vmax.f32 %v1523_v10, 0.0 }
 0x227   : > { %v1526_v24 = vpop.f32.mrf.mxu1 }
 0x228   : > { %v1527_v13 = vadd.f32 %v1526_v24, %v9295_v38  ;;  %2005 = vmatprep.mubr.bf16.mxu0 %v1632_v22  ;;  %v1598_v30 = vmax.f32 %v1525_v25, 0.0 }
 0x229   : > { %v1528_v26 = vpop.f32.mrf.mxu1  ;;  %2006 = vmatmul.mubr.bf16.gmra.mxu0 %v1631_v23  ;;  %v8407_v23 = vld [vmem:[%s11477_s4 + $0x3f4] ss:$8 sps:$4 sm:$0xff]  }
 0x22a   : > { %v1529_v27 = vadd.f32 %v1528_v26, %v9286_v35  ;;  %v1599_v28 = vmax.f32 %v1527_v13, 0.0 }
 0x22b   : > { %v1532_v29 = vpop.f32.mrf.mxu1 }
 0x22c   : > { %v1600_v31 = vmax.f32 %v1529_v27, 0.0  ;;  %v1633_v36 = vpack.c.bf16 %v1599_v28, %v1597_v32  ;;  %v1533_v41 = vadd.f32 %v1532_v29, %v9295_v38  ;;  %v8405_v27 = vld [vmem:[%s11477_s4 + $0x3f0] ss:$8 sps:$4 sm:$0xff]  }
 0x22d   : > { %v1534_v33 = vpop.f32.mrf.mxu1 }
 0x22e   : > { %v1634_v34 = vpack.c.bf16 %v1600_v31, %v1598_v30  ;;  %v1535_v39 = vadd.f32 %v1534_v33, %v9286_v35  ;;  %v1601_v47 = vmax.f32 %v1533_v41, 0.0  ;;  %v8410_v30 = vld [vmem:[%s11477_s4 + $0x3e4] ss:$8 sps:$4 sm:$0xff]   ;;  %v8413_v41 = vld [vmem:[%s11477_s4 + $0x3d4] ss:$8 sps:$4 sm:$0xff]  }
 0x22f   : > { %v1536_v37 = vpop.f32.mrf.mxu1 }
 0x230   : > { %v1537_v40 = vadd.f32 %v1536_v37, %v9295_v38  ;;  %2015 = vmatprep.mubr.bf16.mxu0 %v1634_v34  ;;  %v1602_v45 = vmax.f32 %v1535_v39, 0.0  ;;  %v8383_v38 = vld [vmem:[%s11477_s4 + $0x374] ss:$8 sps:$4 sm:$0xff]   ;;  %v8408_v37 = vld [vmem:[%s11477_s4 + $0x3e0] ss:$8 sps:$4 sm:$0xff]  }
 0x231   : > { %v1538_v42 = vpop.f32.mrf.mxu1  ;;  %2016 = vmatmul.mubr.bf16.gmra.mxu0 %v1633_v36  ;;  %2833 = vmatprep.subr.bf16.mxu0 %v8383_v38 }
 0x232   : > { %v1539_v43 = vadd.f32 %v1538_v42, %v9286_v35  ;;  %v1603_v44 = vmax.f32 %v1537_v40, 0.0  ;;  %2834 = vmatpush1.bf16.msra.mxu0 %v8381_v50  ;;  %v8384_v35 = vld [vmem:[%s11477_s4 + $0x360] ss:$8 sps:$4 sm:$0xff]   ;;  %v8416_v50 = vld [vmem:[%s11477_s4 + $0x3c4] ss:$8 sps:$4 sm:$0xff]  }
 0x233   : > { %2835 = vmatprep.subr.bf16.mxu0 %v8386_v51 }
 0x234   : > { %v1604_v46 = vmax.f32 %v1539_v43, 0.0  ;;  %v1635_v49 = vpack.c.bf16 %v1603_v44, %v1601_v47  ;;  %v8411_v47 = vld [vmem:[%s11477_s4 + $0x3d0] ss:$8 sps:$4 sm:$0xff]  }
 0x236   : > { %v1636_v48 = vpack.c.bf16 %v1604_v46, %v1602_v45  ;;  %2836 = vmatpush1.bf16.msra.mxu0 %v8384_v35 }
 0x237   : > { %2837 = vmatprep.subr.bf16.mxu0 %v8389_v53 }
 0x238   : > { %2025 = vmatprep.mubr.bf16.mxu0 %v1636_v48 }
 0x239   : > { %2026 = vmatmul.mubr.bf16.gmra.mxu0 %v1635_v49 }
 0x23a   : > { %2838 = vmatpush1.bf16.msra.mxu0 %v8387_v52 }
 0x23b   : > { %2839 = vmatprep.subr.bf16.mxu0 %v8392_v55 }
 0x23e   : > { %2840 = vmatpush1.bf16.msra.mxu0 %v8390_v54  ;;  %v8414_v54 = vld [vmem:[%s11477_s4 + $0x3c0] ss:$8 sps:$4 sm:$0xff]  }
 0x23f   : > { %2841 = vmatprep.subr.bf16.mxu0 %v8395_v57  ;;  %v8419_v57 = vld [vmem:[%s11477_s4 + $0x3b4] ss:$8 sps:$4 sm:$0xff]  }
 0x242   : > { %2842 = vmatpush1.bf16.msra.mxu0 %v8393_v56 }
 0x243   : > { %2843 = vmatprep.subr.bf16.mxu0 %v8398_v62 }
 0x246   : > { %2844 = vmatpush1.bf16.msra.mxu0 %v8396_v61 }
 0x247   : > { %2845 = vmatprep.subr.bf16.mxu0 %v8401_v12 }
 0x24a   : > { %2846 = vmatpush1.bf16.msra.mxu0 %v8399_v11 }
 0x24b   : > { %2847 = vmatprep.subr.bf16.mxu0 %v8404_v15 }
 0x24e   : > { %2848 = vmatpush1.bf16.msra.mxu0 %v8402_v20 }
 0x24f   : > { %2849 = vmatprep.subr.bf16.mxu0 %v8407_v23 }
 0x252   : > { %2850 = vmatpush2.bf16.msra.mxu0 %v8405_v27 }
 0x253   : > { %2851 = vmatprep.subr.bf16.mxu0 %v8410_v30 }
 0x256   : > { %2852 = vmatpush2.bf16.msra.mxu0 %v8408_v37 }
 0x257   : > { %2853 = vmatprep.subr.bf16.mxu0 %v8413_v41 }
 0x25a   : > { %2854 = vmatpush2.bf16.msra.mxu0 %v8411_v47 }
 0x25b   : > { %2855 = vmatprep.subr.bf16.mxu0 %v8416_v50 }
 0x25e   : > { %2856 = vmatpush2.bf16.msra.mxu0 %v8414_v54 }
 0x25f   : > { %2857 = vmatprep.subr.bf16.mxu0 %v8419_v57 }
 0x281   : > { %v1877_v59 = vpop.f32.mrf.mxu0 }
 0x282   : > { %v1878_v8 = vadd.f32 %v1877_v59, %v9464_v63 }
 0x283   : > { %v1879_v0 = vpop.f32.mrf.mxu0 }
 0x284   : > { %v1880_v5 = vadd.f32 %v1879_v0, %v9455_v60  ;;  %v2036_v21 = vmax.f32 %v1878_v8, 0.0  ;;  %v8422_v8 = vld [vmem:[%s11477_s4 + $0x3a4] ss:$8 sps:$4 sm:$0xff]  }
 0x285   : > { %v1881_v1 = vpop.f32.mrf.mxu0 }
 0x286   : > { %v1882_v6 = vadd.f32 %v1881_v1, %v9464_v63  ;;  %v2037_v18 = vmax.f32 %v1880_v5, 0.0  ;;  %v8417_v1 = vld [vmem:[%s11477_s4 + $0x3b0] ss:$8 sps:$4 sm:$0xff]  }
 0x287   : > { %v1883_v9 = vpop.f32.mrf.mxu0  ;;  %2858 = vmatpush2.bf16.msra.mxu0 %v8417_v1 }
 0x288   : > { %v1884_v14 = vadd.f32 %v1883_v9, %v9455_v60  ;;  %v2038_v16 = vmax.f32 %v1882_v6, 0.0  ;;  %2859 = vmatprep.subr.bf16.mxu0 %v8422_v8 }
 0x289   : > { %v1887_v17 = vpop.f32.mrf.mxu0 }
 0x28a   : > { %v2039_v19 = vmax.f32 %v1884_v14, 0.0  ;;  %v2100_v25 = vpack.c.bf16 %v2038_v16, %v2036_v21  ;;  %v1888_v28 = vadd.f32 %v1887_v17, %v9464_v63  ;;  %v8420_v16 = vld [vmem:[%s11477_s4 + $0x3a0] ss:$8 sps:$4 sm:$0xff]  }
 0x28b   : > { %v1889_v22 = vpop.f32.mrf.mxu0  ;;  %2860 = vmatpush2.bf16.msra.mxu0 %v8420_v16 }
 0x28c   : > { %v2101_v24 = vpack.c.bf16 %v2039_v19, %v2037_v18  ;;  %v1890_v10 = vadd.f32 %v1889_v22, %v9455_v60  ;;  %v2040_v39 = vmax.f32 %v1888_v28, 0.0  ;;  %v8425_v19 = vld [vmem:[%s11477_s4 + $0x394] ss:$8 sps:$4 sm:$0xff]  }
 0x28d   : > { %v1891_v13 = vpop.f32.mrf.mxu0  ;;  %2861 = vmatprep.subr.bf16.mxu0 %v8425_v19 }
 0x28e   : > { %v1892_v26 = vadd.f32 %v1891_v13, %v9464_v63  ;;  %2370 = vmatprep.mubr.bf16.mxu1 %v2101_v24  ;;  %v2041_v34 = vmax.f32 %v1890_v10, 0.0 }
 0x28f   : > { %v1893_v29 = vpop.f32.mrf.mxu0  ;;  %2371 = vmatmul.mubr.bf16.vlgmr.msra.gmra.mxu1 %v2100_v25  ;;  %v8423_v25 = vld [vmem:[%s11477_s4 + $0x390] ss:$8 sps:$4 sm:$0xff]  }
 0x290   : > { %v1894_v31 = vadd.f32 %v1893_v29, %v9455_v60  ;;  %v2042_v32 = vmax.f32 %v1892_v26, 0.0  ;;  %2862 = vmatpush2.bf16.msra.mxu0 %v8423_v25 }
 0x291   : > { %v1897_v33 = vpop.f32.mrf.mxu0 }
 0x292   : > { %v2043_v36 = vmax.f32 %v1894_v31, 0.0  ;;  %v2102_v43 = vpack.c.bf16 %v2042_v32, %v2040_v39  ;;  %v1898_v48 = vadd.f32 %v1897_v33, %v9464_v63 }
 0x293   : > { %v1899_v40 = vpop.f32.mrf.mxu0 }
 0x294   : > { %v2103_v42 = vpack.c.bf16 %v2043_v36, %v2041_v34  ;;  %v1900_v45 = vadd.f32 %v1899_v40, %v9455_v60  ;;  %v2044_v55 = vmax.f32 %v1898_v48, 0.0 }
 0x295   : > { %v1901_v44 = vpop.f32.mrf.mxu0 }
 0x296   : > { %v1902_v46 = vadd.f32 %v1901_v44, %v9464_v63  ;;  %2380 = vmatprep.mubr.bf16.mxu1 %v2103_v42  ;;  %v2045_v52 = vmax.f32 %v1900_v45, 0.0 }
 0x297   : > { %v1903_v49 = vpop.f32.mrf.mxu0  ;;  %2381 = vmatmul.mubr.bf16.gmra.mxu1 %v2102_v43 }
 0x298   : > { %v1904_v38 = vadd.f32 %v1903_v49, %v9455_v60  ;;  %v2046_v35 = vmax.f32 %v1902_v46, 0.0 }
 0x299   : > { %v1907_v51 = vpop.f32.mrf.mxu0 }
 0x29a   : > { %v2047_v53 = vmax.f32 %v1904_v38, 0.0  ;;  %v2104_v59 = vpack.c.bf16 %v2046_v35, %v2044_v55  ;;  %v1908_v5 = vadd.f32 %v1907_v51, %v9464_v63 }
 0x29b   : > { %v1909_v56 = vpop.f32.mrf.mxu0 }
 0x29c   : > { %v2105_v58 = vpack.c.bf16 %v2047_v53, %v2045_v52  ;;  %v1910_v62 = vadd.f32 %v1909_v56, %v9455_v60  ;;  %v2048_v17 = vmax.f32 %v1908_v5, 0.0 }
 0x29d   : > { %v1911_v61 = vpop.f32.mrf.mxu0 }
 0x29e   : > { %v1912_v0 = vadd.f32 %v1911_v61, %v9464_v63  ;;  %2390 = vmatprep.mubr.bf16.mxu1 %v2105_v58  ;;  %v2049_v14 = vmax.f32 %v1910_v62, 0.0 }
 0x29f   : > { %v1913_v6 = vpop.f32.mrf.mxu0  ;;  %2391 = vmatmul.mubr.bf16.gmra.mxu1 %v2104_v59 }
 0x2a0   : > { %v1914_v9 = vadd.f32 %v1913_v6, %v9455_v60  ;;  %v2050_v11 = vmax.f32 %v1912_v0, 0.0 }
 0x2a1   : > { %v1917_v12 = vpop.f32.mrf.mxu0 }
 0x2a2   : > { %v2051_v15 = vmax.f32 %v1914_v9, 0.0  ;;  %v2106_v21 = vpack.c.bf16 %v2050_v11, %v2048_v17  ;;  %v1918_v13 = vadd.f32 %v1917_v12, %v9464_v63 }
 0x2a3   : > { %v1919_v18 = vpop.f32.mrf.mxu0 }
 0x2a4   : > { %v2107_v20 = vpack.c.bf16 %v2051_v15, %v2049_v14  ;;  %v1920_v23 = vadd.f32 %v1919_v18, %v9455_v60  ;;  %v2052_v31 = vmax.f32 %v1918_v13, 0.0 }
 0x2a5   : > { %v1921_v22 = vpop.f32.mrf.mxu0 }
 0x2a6   : > { %v1922_v24 = vadd.f32 %v1921_v22, %v9464_v63  ;;  %2400 = vmatprep.mubr.bf16.mxu1 %v2107_v20  ;;  %v2053_v29 = vmax.f32 %v1920_v23, 0.0 }
 0x2a7   : > { %v1923_v10 = vpop.f32.mrf.mxu0  ;;  %2401 = vmatmul.mubr.bf16.gmra.mxu1 %v2106_v21 }
 0x2a8   : > { %v1924_v26 = vadd.f32 %v1923_v10, %v9455_v60  ;;  %v2054_v27 = vmax.f32 %v1922_v24, 0.0 }
 0x2a9   : > { %v1927_v28 = vpop.f32.mrf.mxu0 }
 0x2aa   : > { %v2055_v30 = vmax.f32 %v1924_v26, 0.0  ;;  %v2108_v34 = vpack.c.bf16 %v2054_v27, %v2052_v31  ;;  %v1928_v40 = vadd.f32 %v1927_v28, %v9464_v63 }
 0x2ab   : > { %v1929_v32 = vpop.f32.mrf.mxu0 }
 0x2ac   : > { %v2109_v33 = vpack.c.bf16 %v2055_v30, %v2053_v29  ;;  %v1930_v37 = vadd.f32 %v1929_v32, %v9455_v60  ;;  %v2056_v47 = vmax.f32 %v1928_v40, 0.0 }
 0x2ad   : > { %v1931_v36 = vpop.f32.mrf.mxu0 }
 0x2ae   : > { %v1932_v39 = vadd.f32 %v1931_v36, %v9464_v63  ;;  %2410 = vmatprep.mubr.bf16.mxu1 %v2109_v33  ;;  %v2057_v45 = vmax.f32 %v1930_v37, 0.0 }
 0x2af   : > { %v1933_v41 = vpop.f32.mrf.mxu0  ;;  %2411 = vmatmul.mubr.bf16.gmra.mxu1 %v2108_v34 }
 0x2b0   : > { %v1934_v42 = vadd.f32 %v1933_v41, %v9455_v60  ;;  %v2058_v43 = vmax.f32 %v1932_v39, 0.0 }
 0x2b1   : > { %v1937_v44 = vpop.f32.mrf.mxu0 }
 0x2b2   : > { %v2059_v46 = vmax.f32 %v1934_v42, 0.0  ;;  %v2110_v50 = vpack.c.bf16 %v2058_v43, %v2056_v47  ;;  %v1938_v52 = vadd.f32 %v1937_v44, %v9464_v63 }
 0x2b3   : > { %v1939_v48 = vpop.f32.mrf.mxu0 }
 0x2b4   : > { %v2111_v49 = vpack.c.bf16 %v2059_v46, %v2057_v45  ;;  %v1940_v35 = vadd.f32 %v1939_v48, %v9455_v60  ;;  %v2060_v59 = vmax.f32 %v1938_v52, 0.0  ;;  %v8428_v52 = vld [vmem:[%s11477_s4 + $0x384] ss:$8 sps:$4 sm:$0xff]  }
 0x2b5   : > { %v1941_v38 = vpop.f32.mrf.mxu0  ;;  %2863 = vmatprep.subr.bf16.mxu0 %v8428_v52 }
 0x2b6   : > { %v1942_v51 = vadd.f32 %v1941_v38, %v9464_v63  ;;  %2420 = vmatprep.mubr.bf16.mxu1 %v2111_v49  ;;  %v2061_v57 = vmax.f32 %v1940_v35, 0.0 }
 0x2b7   : > { %v1943_v53 = vpop.f32.mrf.mxu0  ;;  %2421 = vmatmul.mubr.bf16.gmra.mxu1 %v2110_v50 }
 0x2b8   : > { %v1944_v54 = vadd.f32 %v1943_v53, %v9455_v60  ;;  %v2062_v55 = vmax.f32 %v1942_v51, 0.0 }
 0x2b9   : > { %v1947_v56 = vpop.f32.mrf.mxu0 }
 0x2ba   : > { %v2063_v58 = vmax.f32 %v1944_v54, 0.0  ;;  %v2112_v0 = vpack.c.bf16 %v2062_v55, %v2060_v59  ;;  %v1948_v8 = vadd.f32 %v1947_v56, %v9464_v63  ;;  %v8426_v54 = vld [vmem:[%s11477_s4 + $0x380] ss:$8 sps:$4 sm:$0xff]  }
 0x2bb   : > { %v1949_v61 = vpop.f32.mrf.mxu0  ;;  %2864 = vmatpush2.bf16.msra.mxu0 %v8426_v54 }
 0x2bc   : > { %v2113_v62 = vpack.c.bf16 %v2063_v58, %v2061_v57  ;;  %v1950_v5 = vadd.f32 %v1949_v61, %v9455_v60  ;;  %v2064_v17 = vmax.f32 %v1948_v8, 0.0 }
 0x2bd   : > { %v1951_v1 = vpop.f32.mrf.mxu0 }
 0x2be   : > { %v1952_v6 = vadd.f32 %v1951_v1, %v9464_v63  ;;  %2430 = vmatprep.mubr.bf16.mxu1 %v2113_v62  ;;  %v2065_v15 = vmax.f32 %v1950_v5, 0.0 }
 0x2bf   : > { %v1953_v9 = vpop.f32.mrf.mxu0  ;;  %2431 = vmatmul.mubr.bf16.gmra.mxu1 %v2112_v0 }
 0x2c0   : > { %v1954_v11 = vadd.f32 %v1953_v9, %v9455_v60  ;;  %v2066_v12 = vmax.f32 %v1952_v6, 0.0 }
 0x2c1   : > { %v1957_v14 = vpop.f32.mrf.mxu0 }
 0x2c2   : > { %v2067_v16 = vmax.f32 %v1954_v11, 0.0  ;;  %v2114_v20 = vpack.c.bf16 %v2066_v12, %v2064_v17  ;;  %v1958_v24 = vadd.f32 %v1957_v14, %v9464_v63 }
 0x2c3   : > { %v1959_v18 = vpop.f32.mrf.mxu0 }
 0x2c4   : > { %v2115_v19 = vpack.c.bf16 %v2067_v16, %v2065_v15  ;;  %v1960_v22 = vadd.f32 %v1959_v18, %v9455_v60  ;;  %v2068_v29 = vmax.f32 %v1958_v24, 0.0 }
 0x2c5   : > { %v1961_v21 = vpop.f32.mrf.mxu0 }
 0x2c6   : > { %v1962_v23 = vadd.f32 %v1961_v21, %v9464_v63  ;;  %2440 = vmatprep.mubr.bf16.mxu1 %v2115_v19  ;;  %v2069_v27 = vmax.f32 %v1960_v22, 0.0 }
 0x2c7   : > { %v1963_v25 = vpop.f32.mrf.mxu0  ;;  %2441 = vmatmul.mubr.bf16.gmra.mxu1 %v2114_v20 }
 0x2c8   : > { %v1964_v13 = vadd.f32 %v1963_v25, %v9455_v60  ;;  %v2070_v10 = vmax.f32 %v1962_v23, 0.0 }
 0x2c9   : > { %v1967_v26 = vpop.f32.mrf.mxu0 }
 0x2ca   : > { %v2071_v28 = vmax.f32 %v1964_v13, 0.0  ;;  %v2116_v32 = vpack.c.bf16 %v2070_v10, %v2068_v29  ;;  %v1968_v37 = vadd.f32 %v1967_v26, %v9464_v63 }
 0x2cb   : > { %v1969_v30 = vpop.f32.mrf.mxu0 }
 0x2cc   : > { %v2117_v31 = vpack.c.bf16 %v2071_v28, %v2069_v27  ;;  %v1970_v34 = vadd.f32 %v1969_v30, %v9455_v60  ;;  %v2072_v45 = vmax.f32 %v1968_v37, 0.0 }
 0x2cd   : > { %v1971_v33 = vpop.f32.mrf.mxu0 }
 0x2ce   : > { %v1972_v36 = vadd.f32 %v1971_v33, %v9464_v63  ;;  %2450 = vmatprep.mubr.bf16.mxu1 %v2117_v31  ;;  %v2073_v43 = vmax.f32 %v1970_v34, 0.0 }
 0x2cf   : > { %v1973_v39 = vpop.f32.mrf.mxu0  ;;  %2451 = vmatmul.mubr.bf16.gmra.mxu1 %v2116_v32 }
 0x2d0   : > { %v1974_v40 = vadd.f32 %v1973_v39, %v9455_v60  ;;  %v2074_v41 = vmax.f32 %v1972_v36, 0.0 }
 0x2d1   : > { %v1977_v42 = vpop.f32.mrf.mxu0 }
 0x2d2   : > { %v2075_v44 = vmax.f32 %v1974_v40, 0.0  ;;  %v2118_v48 = vpack.c.bf16 %v2074_v41, %v2072_v45  ;;  %v1978_v35 = vadd.f32 %v1977_v42, %v9464_v63 }
 0x2d3   : > { %v1979_v46 = vpop.f32.mrf.mxu0 }
 0x2d4   : > { %v2119_v47 = vpack.c.bf16 %v2075_v44, %v2073_v43  ;;  %v1980_v50 = vadd.f32 %v1979_v46, %v9455_v60  ;;  %v2076_v59 = vmax.f32 %v1978_v35, 0.0 }
 0x2d5   : > { %v1981_v49 = vpop.f32.mrf.mxu0 }
 0x2d6   : > { %v1982_v38 = vadd.f32 %v1981_v49, %v9464_v63  ;;  %2460 = vmatprep.mubr.bf16.mxu1 %v2119_v47  ;;  %v2077_v57 = vmax.f32 %v1980_v50, 0.0 }
 0x2d7   : > { %v1983_v51 = vpop.f32.mrf.mxu0  ;;  %2461 = vmatmul.mubr.bf16.gmra.mxu1 %v2118_v48 }
 0x2d8   : > { %v1984_v53 = vadd.f32 %v1983_v51, %v9455_v60  ;;  %v2078_v55 = vmax.f32 %v1982_v38, 0.0 }
 0x2d9   : > { %v1987_v56 = vpop.f32.mrf.mxu0 }
 0x2da   : > { %v2079_v58 = vmax.f32 %v1984_v53, 0.0  ;;  %v2120_v0 = vpack.c.bf16 %v2078_v55, %v2076_v59  ;;  %v1988_v8 = vadd.f32 %v1987_v56, %v9464_v63 }
 0x2db   : > { %v1989_v61 = vpop.f32.mrf.mxu0 }
 0x2dc   : > { %v2121_v62 = vpack.c.bf16 %v2079_v58, %v2077_v57  ;;  %v1990_v5 = vadd.f32 %v1989_v61, %v9455_v60  ;;  %v2080_v17 = vmax.f32 %v1988_v8, 0.0 }
 0x2dd   : > { %v1991_v1 = vpop.f32.mrf.mxu0 }
 0x2de   : > { %v1992_v6 = vadd.f32 %v1991_v1, %v9464_v63  ;;  %2470 = vmatprep.mubr.bf16.mxu1 %v2121_v62  ;;  %v2081_v15 = vmax.f32 %v1990_v5, 0.0 }
 0x2df   : > { %v1993_v9 = vpop.f32.mrf.mxu0  ;;  %2471 = vmatmul.mubr.bf16.gmra.mxu1 %v2120_v0 }
 0x2e0   : > { %v1994_v11 = vadd.f32 %v1993_v9, %v9455_v60  ;;  %v2082_v12 = vmax.f32 %v1992_v6, 0.0 }
 0x2e1   : > { %v1997_v14 = vpop.f32.mrf.mxu0 }
 0x2e2   : > { %v2083_v16 = vmax.f32 %v1994_v11, 0.0  ;;  %v2122_v20 = vpack.c.bf16 %v2082_v12, %v2080_v17  ;;  %v1998_v24 = vadd.f32 %v1997_v14, %v9464_v63  ;;  %v8429_v17 = vld [vmem:[%s11480_s7 + $0x30] ss:$8 sps:$4 sm:$0xff]  }
 0x2e3   : > { %v1999_v18 = vpop.f32.mrf.mxu0 }
 0x2e4   : > { %v2123_v19 = vpack.c.bf16 %v2083_v16, %v2081_v15  ;;  %v2000_v22 = vadd.f32 %v1999_v18, %v9455_v60  ;;  %v2084_v29 = vmax.f32 %v1998_v24, 0.0  ;;  %v8444_v18 = vld [vmem:[%s11480_s7 + $0x20] ss:$8 sps:$4 sm:$0xff]  }
 0x2e5   : > { %v2001_v21 = vpop.f32.mrf.mxu0 }
 0x2e6   : > { %v2002_v23 = vadd.f32 %v2001_v21, %v9464_v63  ;;  %2480 = vmatprep.mubr.bf16.mxu1 %v2123_v19  ;;  %v2085_v27 = vmax.f32 %v2000_v22, 0.0  ;;  %v8446_v19 = vld [vmem:[%s11480_s7 + $0x24] ss:$8 sps:$4 sm:$0xff]  }
 0x2e7   : > { %v2003_v25 = vpop.f32.mrf.mxu0  ;;  %2481 = vmatmul.mubr.bf16.gmra.mxu1 %v2122_v20  ;;  %v7464_v20 = vld [vmem:[%s11478_s5 + $0x4] sm:$0x3] }
 0x2e8   : > { %v2004_v13 = vadd.f32 %v2003_v25, %v9455_v60  ;;  %v2086_v10 = vmax.f32 %v2002_v23, 0.0  ;;  %v9610_v22 = vrot.slane %v7464_v20, %v9102_v4  ;;  %v9613_v23 = vrot.slane %v7464_v20, %v9111_v7  ;;  %v8447_v20 = vld [vmem:[%s11479_s6 + $0x30] ss:$8 sps:$4 sm:$0xff]  }
 0x2e9   : > { %v2007_v26 = vpop.f32.mrf.mxu0 }
 0x2ea   : > { %v2087_v28 = vmax.f32 %v2004_v13, 0.0  ;;  %v2124_v32 = vpack.c.bf16 %v2086_v10, %v2084_v29  ;;  %v2008_v37 = vadd.f32 %v2007_v26, %v9464_v63  ;;  %v8459_v29 = vld [vmem:[%s11480_s7 + $0x10] ss:$8 sps:$4 sm:$0xff]  }
 0x2eb   : > { %v2009_v30 = vpop.f32.mrf.mxu0 }
 0x2ec   : > { %v2125_v31 = vpack.c.bf16 %v2087_v28, %v2085_v27  ;;  %v2010_v34 = vadd.f32 %v2009_v30, %v9455_v60  ;;  %v2088_v45 = vmax.f32 %v2008_v37, 0.0 }
 0x2ed   : > { %v2011_v33 = vpop.f32.mrf.mxu0 }
 0x2ee   : > { %v2012_v36 = vadd.f32 %v2011_v33, %v9464_v63  ;;  %2490 = vmatprep.mubr.bf16.mxu1 %v2125_v31  ;;  %v2089_v43 = vmax.f32 %v2010_v34, 0.0 }
 0x2ef   : > { %v2013_v39 = vpop.f32.mrf.mxu0  ;;  %2491 = vmatmul.mubr.bf16.gmra.mxu1 %v2124_v32  ;;  %v8461_v32 = vld [vmem:[%s11480_s7 + $0x14] ss:$8 sps:$4 sm:$0xff]  }
 0x2f0   : > { %v2014_v40 = vadd.f32 %v2013_v39, %v9455_v60  ;;  %v2090_v41 = vmax.f32 %v2012_v36, 0.0 }
 0x2f1   : > { %v2017_v42 = vpop.f32.mrf.mxu0 }
 0x2f2   : > { %v2091_v44 = vmax.f32 %v2014_v40, 0.0  ;;  %v2126_v48 = vpack.c.bf16 %v2090_v41, %v2088_v45  ;;  %v2018_v35 = vadd.f32 %v2017_v42, %v9464_v63  ;;  %v8432_v40 = vld [vmem:[%s11479_s6 + $0x70] ss:$8 sps:$4 sm:$0xff]   ;;  %v8474_v41 = vld [vmem:[%s11480_s7] ss:$8 sps:$4 sm:$0xff]  }
 0x2f3   : > { %v2019_v46 = vpop.f32.mrf.mxu0  ;;  %v8476_v45 = vld [vmem:[%s11480_s7 + $0x4] ss:$8 sps:$4 sm:$0xff]  }
 0x2f4   : > { %v2127_v47 = vpack.c.bf16 %v2091_v44, %v2089_v43  ;;  %v2020_v50 = vadd.f32 %v2019_v46, %v9455_v60  ;;  %v2092_v57 = vmax.f32 %v2018_v35, 0.0  ;;  %v8437_v44 = vld [vmem:[%s11479_s6 + $0x64] ss:$8 sps:$4 sm:$0xff]  }
 0x2f5   : > { %v2021_v49 = vpop.f32.mrf.mxu0 }
 0x2f6   : > { %v2022_v38 = vadd.f32 %v2021_v49, %v9464_v63  ;;  %2500 = vmatprep.mubr.bf16.mxu1 %v2127_v47  ;;  %v2093_v55 = vmax.f32 %v2020_v50, 0.0 }
 0x2f7   : > { %v2023_v51 = vpop.f32.mrf.mxu0  ;;  %2501 = vmatmul.mubr.bf16.gmra.mxu1 %v2126_v48 }
 0x2f8   : > { %v2024_v52 = vadd.f32 %v2023_v51, %v9455_v60  ;;  %v2094_v53 = vmax.f32 %v2022_v38, 0.0  ;;  %v8435_v38 = vld [vmem:[%s11479_s6 + $0x60] ss:$8 sps:$4 sm:$0xff]  }
 0x2f9   : > { %v2027_v54 = vpop.f32.mrf.mxu0 }
 0x2fa   : > { %v2095_v56 = vmax.f32 %v2024_v52, 0.0  ;;  %v2128_v61 = vpack.c.bf16 %v2094_v53, %v2092_v57  ;;  %v2028_v5 = vadd.f32 %v2027_v54, %v9464_v63  ;;  %v8440_v52 = vld [vmem:[%s11479_s6 + $0x54] ss:$8 sps:$4 sm:$0xff]   ;;  %v8761_v57 = vld [vmem:[%s8914_s1] sm:$0xff]  }
 0x2fb   : > { %v2029_v58 = vpop.f32.mrf.mxu0 }
 0x2fc   : > { %v2129_v59 = vpack.c.bf16 %v2095_v56, %v2093_v55  ;;  %v2030_v0 = vadd.f32 %v2029_v58, %v9455_v60  ;;  %v2096_v14 = vmax.f32 %v2028_v5, 0.0 }
 0x2fd   : > { %v2031_v62 = vpop.f32.mrf.mxu0 }
 0x2fe   : > { %v2032_v1 = vadd.f32 %v2031_v62, %v9464_v63  ;;  %2510 = vmatprep.mubr.bf16.mxu1 %v2129_v59  ;;  %v2097_v11 = vmax.f32 %v2030_v0, 0.0  ;;  %v8431_v63 = vld [vmem:[%s11480_s7 + $0x34] ss:$8 sps:$4 sm:$0xff]   ;;  %v8438_v59 = vld [vmem:[%s11479_s6 + $0x50] ss:$8 sps:$4 sm:$0xff]  }
 0x2ff   : > { %v2033_v6 = vpop.f32.mrf.mxu0  ;;  %2511 = vmatmul.mubr.bf16.gmra.mxu1 %v2128_v61  ;;  %3210 = vmatprep.subr.bf16.mxu1 %v8431_v63  ;;  %v8443_v0 = vld [vmem:[%s11479_s6 + $0x44] ss:$8 sps:$4 sm:$0xff]  }
 0x300   : > { %v2034_v8 = vadd.f32 %v2033_v6, %v9455_v60  ;;  %v2098_v9 = vmax.f32 %v2032_v1, 0.0  ;;  %v8434_v60 = vld [vmem:[%s11479_s6 + $0x74] ss:$8 sps:$4 sm:$0xff]   ;;  %3211 = vmatpush1.bf16.msra.mxu1 %v8429_v17 }
 0x301   : > { %3555 = vmatprep.subr.bf16.mxu0 %v8434_v60  ;;  %3212 = vmatprep.subr.bf16.mxu1 %v8446_v19 }
 0x302   : > { %v2099_v12 = vmax.f32 %v2034_v8, 0.0  ;;  %v2130_v16 = vpack.c.bf16 %v2098_v9, %v2096_v14 }
 0x304   : > { %v2131_v15 = vpack.c.bf16 %v2099_v12, %v2097_v11  ;;  %3213 = vmatpush1.bf16.msra.mxu1 %v8444_v18  ;;  %v8441_v11 = vld [vmem:[%s11479_s6 + $0x40] ss:$8 sps:$4 sm:$0xff]  }
 0x305   : > { %3214 = vmatprep.subr.bf16.mxu1 %v8461_v32  ;;  %v8762_v18 = vld [vmem:[%s8914_s1 + $0x8] sm:$0xff]   ;;  %v8455_v32 = vld [vmem:[%s11479_s6 + $0x14] ss:$8 sps:$4 sm:$0xff]  }
 0x306   : > { %2520 = vmatprep.mubr.bf16.mxu1 %v2131_v15  ;;  %v8449_v15 = vld [vmem:[%s11479_s6 + $0x34] ss:$8 sps:$4 sm:$0xff]  }
 0x307   : > { %2521 = vmatmul.mubr.bf16.gmra.mxu1 %v2130_v16 }
 0x308   : > { %3234 = vmatprep.mubr.bf16.mxu1 %v8786_v2  ;;  %3215 = vmatpush1.bf16.msra.mxu1 %v8459_v29  ;;  %v8450_v29 = vld [vmem:[%s11479_s6 + $0x20] ss:$8 sps:$4 sm:$0xff]  }
 0x309   : > { %3216 = vmatprep.subr.bf16.mxu1 %v8476_v45 }
 0x30c   : > { %3217 = vmatpush1.bf16.msra.mxu1 %v8474_v41  ;;  %v8453_v41 = vld [vmem:[%s11479_s6 + $0x10] ss:$8 sps:$4 sm:$0xff]  }
 0x30f   : > { %7570 = vmatmul.mubr.msk.bf16.vlgmr.msra.gmra.mxu1 %vm806_vm0, %v8761_v57 }
 0x310   : > { %3244 = vmatprep.mubr.bf16.mxu1 %v8786_v2 }
 0x317   : > { %7571 = vmatmul.mubr.msk.bf16.gmra.mxu1 %vm806_vm0, %v8762_v18 }
 0x318   : > { %3254 = vmatprep.mubr.bf16.mxu1 %v8786_v2 }
 0x34f   : > { %v2372_v21 = vpop.f32.mrf.mxu1 }
 0x350   : > { %v2373_v26 = vadd.f32 %v2372_v21, %v9613_v23 }
 0x351   : > { %v2374_v24 = vpop.f32.mrf.mxu1 }
 0x352   : > { %v2375_v13 = vadd.f32 %v2374_v24, %v9610_v22  ;;  %v2531_v36 = vmax.f32 %v2373_v26, 0.0 }
 0x353   : > { %v2376_v25 = vpop.f32.mrf.mxu1 }
 0x354   : > { %v2377_v10 = vadd.f32 %v2376_v25, %v9613_v23  ;;  %v2532_v33 = vmax.f32 %v2375_v13, 0.0  ;;  %v8452_v25 = vld [vmem:[%s11479_s6 + $0x24] ss:$8 sps:$4 sm:$0xff]  }
 0x355   : > { %v2378_v27 = vpop.f32.mrf.mxu1 }
 0x356   : > { %v2379_v28 = vadd.f32 %v2378_v27, %v9610_v22  ;;  %v2533_v30 = vmax.f32 %v2377_v10, 0.0 }
 0x357   : > { %v2382_v31 = vpop.f32.mrf.mxu1 }
 0x358   : > { %v2534_v34 = vmax.f32 %v2379_v28, 0.0  ;;  %v2595_v42 = vpack.c.bf16 %v2533_v30, %v2531_v36  ;;  %v2383_v48 = vadd.f32 %v2382_v31, %v9613_v23 }
 0x359   : > { %v2384_v37 = vpop.f32.mrf.mxu1 }
 0x35a   : > { %v2596_v39 = vpack.c.bf16 %v2534_v34, %v2532_v33  ;;  %v2385_v46 = vadd.f32 %v2384_v37, %v9610_v22  ;;  %v2535_v55 = vmax.f32 %v2383_v48, 0.0 }
 0x35b   : > { %v2386_v43 = vpop.f32.mrf.mxu1 }
 0x35c   : > { %v2387_v47 = vadd.f32 %v2386_v43, %v9613_v23  ;;  %2865 = vmatprep.mubr.bf16.mxu0 %v2596_v39  ;;  %v2536_v53 = vmax.f32 %v2385_v46, 0.0  ;;  %v8763_v39 = vld [vmem:[%s8914_s1 + $0x10] sm:$0xff]  }
 0x35d   : > { %v2388_v49 = vpop.f32.mrf.mxu1  ;;  %2866 = vmatmul.mubr.bf16.vlgmr.msra.gmra.mxu0 %v2595_v42  ;;  %7572 = vmatmul.mubr.msk.bf16.gmra.mxu1 %vm806_vm0, %v8763_v39 }
 0x35e   : > { %v2389_v50 = vadd.f32 %v2388_v49, %v9610_v22  ;;  %3556 = vmatpush1.bf16.msra.mxu0 %v8432_v40  ;;  %v2537_v35 = vmax.f32 %v2387_v47, 0.0  ;;  %3264 = vmatprep.mubr.bf16.mxu1 %v8786_v2 }
 0x35f   : > { %v2392_v51 = vpop.f32.mrf.mxu1  ;;  %3557 = vmatprep.subr.bf16.mxu0 %v8437_v44  ;;  %v8458_v44 = vld [vmem:[%s11479_s6 + $0x4] ss:$8 sps:$4 sm:$0xff]  }
 0x360   : > { %v2538_v54 = vmax.f32 %v2389_v50, 0.0  ;;  %v2597_v61 = vpack.c.bf16 %v2537_v35, %v2535_v55  ;;  %v2393_v6 = vadd.f32 %v2392_v51, %v9613_v23  ;;  %v8456_v50 = vld [vmem:[%s11479_s6] ss:$8 sps:$4 sm:$0xff]   ;;  %v8464_v51 = vld [vmem:[%s11479_s6 + $0xf4] ss:$8 sps:$4 sm:$0xff]  }
 0x361   : > { %v2394_v56 = vpop.f32.mrf.mxu1 }
 0x362   : > { %v2598_v58 = vpack.c.bf16 %v2538_v54, %v2536_v53  ;;  %3558 = vmatpush1.bf16.msra.mxu0 %v8435_v38  ;;  %v2395_v1 = vadd.f32 %v2394_v56, %v9610_v22  ;;  %v2539_v63 = vmax.f32 %v2393_v6, 0.0  ;;  %v8764_v56 = vld [vmem:[%s8914_s1 + $0x18] sm:$0xff]  }
 0x363   : > { %v2396_v62 = vpop.f32.mrf.mxu1  ;;  %3559 = vmatprep.subr.bf16.mxu0 %v8440_v52 }
 0x364   : > { %v2397_v5 = vadd.f32 %v2396_v62, %v9613_v23  ;;  %2875 = vmatprep.mubr.bf16.mxu0 %v2598_v58  ;;  %v2540_v16 = vmax.f32 %v2395_v1, 0.0  ;;  %v8462_v58 = vld [vmem:[%s11479_s6 + $0xf0] ss:$8 sps:$4 sm:$0xff]   ;;  %v8467_v62 = vld [vmem:[%s11479_s6 + $0xe4] ss:$8 sps:$4 sm:$0xff]  }
 0x365   : > { %v2398_v8 = vpop.f32.mrf.mxu1  ;;  %2876 = vmatmul.mubr.bf16.gmra.mxu0 %v2597_v61  ;;  %7573 = vmatmul.mubr.msk.bf16.gmra.mxu1 %vm806_vm0, %v8764_v56 }
 0x366   : > { %v2399_v9 = vadd.f32 %v2398_v8, %v9610_v22  ;;  %3560 = vmatpush1.bf16.msra.mxu0 %v8438_v59  ;;  %v2541_v12 = vmax.f32 %v2397_v5, 0.0  ;;  %3274 = vmatprep.mubr.bf16.mxu1 %v8786_v2 }
 0x367   : > { %v2402_v14 = vpop.f32.mrf.mxu1  ;;  %3561 = vmatprep.subr.bf16.mxu0 %v8443_v0 }
 0x368   : > { %v2542_v17 = vmax.f32 %v2399_v9, 0.0  ;;  %v2599_v21 = vpack.c.bf16 %v2541_v12, %v2539_v63  ;;  %v2403_v26 = vadd.f32 %v2402_v14, %v9613_v23  ;;  %v8465_v9 = vld [vmem:[%s11479_s6 + $0xe0] ss:$8 sps:$4 sm:$0xff]   ;;  %v8470_v14 = vld [vmem:[%s11479_s6 + $0xd4] ss:$8 sps:$4 sm:$0xff]  }
 0x369   : > { %v2404_v60 = vpop.f32.mrf.mxu1 }
 0x36a   : > { %v2600_v19 = vpack.c.bf16 %v2542_v17, %v2540_v16  ;;  %3562 = vmatpush1.bf16.msra.mxu0 %v8441_v11  ;;  %v2405_v13 = vadd.f32 %v2404_v60, %v9610_v22  ;;  %v2543_v36 = vmax.f32 %v2403_v26, 0.0  ;;  %v8765_v60 = vld [vmem:[%s8914_s1 + $0x20] sm:$0xff]  }
 0x36b   : > { %v2406_v24 = vpop.f32.mrf.mxu1  ;;  %3563 = vmatprep.subr.bf16.mxu0 %v8449_v15 }
 0x36c   : > { %v2407_v10 = vadd.f32 %v2406_v24, %v9613_v23  ;;  %2885 = vmatprep.mubr.bf16.mxu0 %v2600_v19  ;;  %v2544_v33 = vmax.f32 %v2405_v13, 0.0  ;;  %v8468_v19 = vld [vmem:[%s11479_s6 + $0xd0] ss:$8 sps:$4 sm:$0xff]   ;;  %v8473_v24 = vld [vmem:[%s11479_s6 + $0xc4] ss:$8 sps:$4 sm:$0xff]  }
 0x36d   : > { %v2408_v27 = vpop.f32.mrf.mxu1  ;;  %2886 = vmatmul.mubr.bf16.gmra.mxu0 %v2599_v21  ;;  %7574 = vmatmul.mubr.msk.bf16.gmra.mxu1 %vm806_vm0, %v8765_v60 }
 0x36e   : > { %v2409_v28 = vadd.f32 %v2408_v27, %v9610_v22  ;;  %3564 = vmatpush1.bf16.msra.mxu0 %v8447_v20  ;;  %v2545_v30 = vmax.f32 %v2407_v10, 0.0  ;;  %3284 = vmatprep.mubr.bf16.mxu1 %v8786_v2 }
 0x36f   : > { %v2412_v31 = vpop.f32.mrf.mxu1  ;;  %3565 = vmatprep.subr.bf16.mxu0 %v8452_v25 }
 0x370   : > { %v2546_v34 = vmax.f32 %v2409_v28, 0.0  ;;  %v2601_v42 = vpack.c.bf16 %v2545_v30, %v2543_v36  ;;  %v2413_v47 = vadd.f32 %v2412_v31, %v9613_v23  ;;  %v8471_v28 = vld [vmem:[%s11479_s6 + $0xc0] ss:$8 sps:$4 sm:$0xff]   ;;  %v8479_v31 = vld [vmem:[%s11479_s6 + $0xb4] ss:$8 sps:$4 sm:$0xff]  }
 0x371   : > { %v2414_v37 = vpop.f32.mrf.mxu1 }
 0x372   : > { %v2602_v40 = vpack.c.bf16 %v2546_v34, %v2544_v33  ;;  %3566 = vmatpush1.bf16.msra.mxu0 %v8450_v29  ;;  %v2415_v45 = vadd.f32 %v2414_v37, %v9610_v22  ;;  %v2547_v54 = vmax.f32 %v2413_v47, 0.0  ;;  %v8766_v37 = vld [vmem:[%s8914_s1 + $0x28] sm:$0xff]  }
 0x373   : > { %v2416_v43 = vpop.f32.mrf.mxu1  ;;  %3567 = vmatprep.subr.bf16.mxu0 %v8455_v32 }
 0x374   : > { %v2417_v46 = vadd.f32 %v2416_v43, %v9613_v23  ;;  %2895 = vmatprep.mubr.bf16.mxu0 %v2602_v40  ;;  %v2548_v52 = vmax.f32 %v2415_v45, 0.0  ;;  %v8477_v40 = vld [vmem:[%s11479_s6 + $0xb0] ss:$8 sps:$4 sm:$0xff]   ;;  %v8482_v43 = vld [vmem:[%s11479_s6 + $0xa4] ss:$8 sps:$4 sm:$0xff]  }
 0x375   : > { %v2418_v48 = vpop.f32.mrf.mxu1  ;;  %2896 = vmatmul.mubr.bf16.gmra.mxu0 %v2601_v42  ;;  %7575 = vmatmul.mubr.msk.bf16.gmra.mxu1 %vm806_vm0, %v8766_v37  ;;  %v8488_v37 = vld [vmem:[%s11479_s6 + $0x84] ss:$8 sps:$4 sm:$0xff]  }
 0x376   : > { %v2419_v49 = vadd.f32 %v2418_v48, %v9610_v22  ;;  %3568 = vmatpush1.bf16.msra.mxu0 %v8453_v41  ;;  %v2549_v38 = vmax.f32 %v2417_v46, 0.0  ;;  %3294 = vmatprep.mubr.bf16.mxu1 %v8786_v2 }
 0x377   : > { %v2422_v35 = vpop.f32.mrf.mxu1  ;;  %3569 = vmatprep.subr.bf16.mxu0 %v8458_v44 }
 0x378   : > { %v2550_v53 = vmax.f32 %v2419_v49, 0.0  ;;  %v2603_v59 = vpack.c.bf16 %v2549_v38, %v2547_v54  ;;  %v2423_v5 = vadd.f32 %v2422_v35, %v9613_v23  ;;  %v8480_v49 = vld [vmem:[%s11479_s6 + $0xa0] ss:$8 sps:$4 sm:$0xff]   ;;  %v8485_v35 = vld [vmem:[%s11479_s6 + $0x94] ss:$8 sps:$4 sm:$0xff]  }
 0x379   : > { %v2424_v55 = vpop.f32.mrf.mxu1 }
 0x37a   : > { %v2604_v57 = vpack.c.bf16 %v2550_v53, %v2548_v52  ;;  %3570 = vmatpush1.bf16.msra.mxu0 %v8456_v50  ;;  %v2425_v0 = vadd.f32 %v2424_v55, %v9610_v22  ;;  %v2551_v17 = vmax.f32 %v2423_v5, 0.0  ;;  %v8767_v55 = vld [vmem:[%s8914_s1 + $0x30] sm:$0xff]  }
 0x37b   : > { %v2426_v61 = vpop.f32.mrf.mxu1  ;;  %3571 = vmatprep.subr.bf16.mxu0 %v8464_v51 }
 0x37c   : > { %v2427_v1 = vadd.f32 %v2426_v61, %v9613_v23  ;;  %2905 = vmatprep.mubr.bf16.mxu0 %v2604_v57  ;;  %v2552_v15 = vmax.f32 %v2425_v0, 0.0  ;;  %v8483_v57 = vld [vmem:[%s11479_s6 + $0x90] ss:$8 sps:$4 sm:$0xff]  }
 0x37d   : > { %v2428_v6 = vpop.f32.mrf.mxu1  ;;  %2906 = vmatmul.mubr.bf16.gmra.mxu0 %v2603_v59  ;;  %7576 = vmatmul.mubr.msk.bf16.gmra.mxu1 %vm806_vm0, %v8767_v55 }
 0x37e   : > { %v2429_v8 = vadd.f32 %v2428_v6, %v9610_v22  ;;  %3572 = vmatpush2.bf16.msra.mxu0 %v8462_v58  ;;  %v2553_v11 = vmax.f32 %v2427_v1, 0.0  ;;  %3304 = vmatprep.mubr.bf16.mxu1 %v8786_v2 }
 0x37f   : > { %v2432_v12 = vpop.f32.mrf.mxu1  ;;  %3573 = vmatprep.subr.bf16.mxu0 %v8467_v62 }
 0x380   : > { %v2554_v16 = vmax.f32 %v2429_v8, 0.0  ;;  %v2605_v20 = vpack.c.bf16 %v2553_v11, %v2551_v17  ;;  %v2433_v10 = vadd.f32 %v2432_v12, %v9613_v23 }
 0x381   : > { %v2434_v63 = vpop.f32.mrf.mxu1 }
 0x382   : > { %v2606_v18 = vpack.c.bf16 %v2554_v16, %v2552_v15  ;;  %3574 = vmatpush2.bf16.msra.mxu0 %v8465_v9  ;;  %v2435_v25 = vadd.f32 %v2434_v63, %v9610_v22  ;;  %v2555_v34 = vmax.f32 %v2433_v10, 0.0  ;;  %v8768_v15 = vld [vmem:[%s8914_s1 + $0x38] sm:$0xff]  }
 0x383   : > { %v2436_v21 = vpop.f32.mrf.mxu1  ;;  %3575 = vmatprep.subr.bf16.mxu0 %v8470_v14 }
 0x384   : > { %v2437_v13 = vadd.f32 %v2436_v21, %v9613_v23  ;;  %2915 = vmatprep.mubr.bf16.mxu0 %v2606_v18  ;;  %v2556_v32 = vmax.f32 %v2435_v25, 0.0 }
 0x385   : > { %v2438_v26 = vpop.f32.mrf.mxu1  ;;  %2916 = vmatmul.mubr.bf16.gmra.mxu0 %v2605_v20  ;;  %7577 = vmatmul.mubr.msk.bf16.gmra.mxu1 %vm806_vm0, %v8768_v15 }
 0x386   : > { %v2439_v27 = vadd.f32 %v2438_v26, %v9610_v22  ;;  %3576 = vmatpush2.bf16.msra.mxu0 %v8468_v19  ;;  %v2557_v29 = vmax.f32 %v2437_v13, 0.0  ;;  %3314 = vmatprep.mubr.bf16.mxu1 %v8786_v2 }
 0x387   : > { %v2442_v30 = vpop.f32.mrf.mxu1  ;;  %3577 = vmatprep.subr.bf16.mxu0 %v8473_v24 }
 0x388   : > { %v2558_v33 = vmax.f32 %v2439_v27, 0.0  ;;  %v2607_v41 = vpack.c.bf16 %v2557_v29, %v2555_v34  ;;  %v2443_v46 = vadd.f32 %v2442_v30, %v9613_v23 }
 0x389   : > { %v2444_v36 = vpop.f32.mrf.mxu1 }
 0x38a   : > { %v2608_v39 = vpack.c.bf16 %v2558_v33, %v2556_v32  ;;  %3578 = vmatpush2.bf16.msra.mxu0 %v8471_v28  ;;  %v2445_v44 = vadd.f32 %v2444_v36, %v9610_v22  ;;  %v2559_v53 = vmax.f32 %v2443_v46, 0.0  ;;  %v8769_v28 = vld [vmem:[%s8914_s1 + $0x40] sm:$0xff]  }
 0x38b   : > { %v2446_v42 = vpop.f32.mrf.mxu1  ;;  %3579 = vmatprep.subr.bf16.mxu0 %v8479_v31 }
 0x38c   : > { %v2447_v45 = vadd.f32 %v2446_v42, %v9613_v23  ;;  %2925 = vmatprep.mubr.bf16.mxu0 %v2608_v39  ;;  %v2560_v51 = vmax.f32 %v2445_v44, 0.0 }
 0x38d   : > { %v2448_v47 = vpop.f32.mrf.mxu1  ;;  %2926 = vmatmul.mubr.bf16.gmra.mxu0 %v2607_v41  ;;  %7578 = vmatmul.mubr.msk.bf16.gmra.mxu1 %vm806_vm0, %v8769_v28 }
 0x38e   : > { %v2449_v48 = vadd.f32 %v2448_v47, %v9610_v22  ;;  %3580 = vmatpush2.bf16.msra.mxu0 %v8477_v40  ;;  %v2561_v50 = vmax.f32 %v2447_v45, 0.0  ;;  %3324 = vmatprep.mubr.bf16.mxu1 %v8786_v2  ;;  %v8486_v40 = vld [vmem:[%s11479_s6 + $0x80] ss:$8 sps:$4 sm:$0xff]  }
 0x38f   : > { %v2452_v38 = vpop.f32.mrf.mxu1  ;;  %3581 = vmatprep.subr.bf16.mxu0 %v8482_v43  ;;  %v8770_v47 = vld [vmem:[%s8914_s1 + $0x48] sm:$0xff]  }
 0x390   : > { %v2562_v52 = vmax.f32 %v2449_v48, 0.0  ;;  %v2609_v58 = vpack.c.bf16 %v2561_v50, %v2559_v53  ;;  %v2453_v0 = vadd.f32 %v2452_v38, %v9613_v23 }
 0x391   : > { %v2454_v54 = vpop.f32.mrf.mxu1 }
 0x392   : > { %v2610_v56 = vpack.c.bf16 %v2562_v52, %v2560_v51  ;;  %3582 = vmatpush2.bf16.msra.mxu0 %v8480_v49  ;;  %v2455_v61 = vadd.f32 %v2454_v54, %v9610_v22  ;;  %v2563_v12 = vmax.f32 %v2453_v0, 0.0 }
 0x393   : > { %v2456_v59 = vpop.f32.mrf.mxu1  ;;  %3583 = vmatprep.subr.bf16.mxu0 %v8485_v35 }
 0x394   : > { %v2457_v62 = vadd.f32 %v2456_v59, %v9613_v23  ;;  %2935 = vmatprep.mubr.bf16.mxu0 %v2610_v56  ;;  %v2564_v9 = vmax.f32 %v2455_v61, 0.0  ;;  %v8771_v61 = vld [vmem:[%s8914_s1 + $0x50] sm:$0xff]  }
 0x395   : > { %v2458_v1 = vpop.f32.mrf.mxu1  ;;  %2936 = vmatmul.mubr.bf16.gmra.mxu0 %v2609_v58  ;;  %7579 = vmatmul.mubr.msk.bf16.gmra.mxu1 %vm806_vm0, %v8770_v47 }
 0x396   : > { %v2459_v5 = vadd.f32 %v2458_v1, %v9610_v22  ;;  %3584 = vmatpush2.bf16.msra.mxu0 %v8483_v57  ;;  %v2565_v6 = vmax.f32 %v2457_v62, 0.0  ;;  %3334 = vmatprep.mubr.bf16.mxu1 %v8786_v2 }
 0x397   : > { %v2462_v8 = vpop.f32.mrf.mxu1  ;;  %3585 = vmatprep.subr.bf16.mxu0 %v8488_v37 }
 0x398   : > { %v2566_v11 = vmax.f32 %v2459_v5, 0.0  ;;  %v2611_v17 = vpack.c.bf16 %v2565_v6, %v2563_v12  ;;  %v2463_v19 = vadd.f32 %v2462_v8, %v9613_v23 }
 0x399   : > { %v2464_v14 = vpop.f32.mrf.mxu1 }
 0x39a   : > { %v2612_v16 = vpack.c.bf16 %v2566_v11, %v2564_v9  ;;  %v2465_v60 = vadd.f32 %v2464_v14, %v9610_v22  ;;  %v2567_v26 = vmax.f32 %v2463_v19, 0.0  ;;  %3586 = vmatpush2.bf16.msra.mxu0 %v8486_v40 }
 0x39b   : > { %v2466_v63 = vpop.f32.mrf.mxu1 }
 0x39c   : > { %v2467_v18 = vadd.f32 %v2466_v63, %v9613_v23  ;;  %2945 = vmatprep.mubr.bf16.mxu0 %v2612_v16  ;;  %v2568_v13 = vmax.f32 %v2465_v60, 0.0  ;;  %v8772_v60 = vld [vmem:[%s8914_s1 + $0x58] sm:$0xff]  }
 0x39d   : > { %v2468_v20 = vpop.f32.mrf.mxu1  ;;  %2946 = vmatmul.mubr.bf16.gmra.mxu0 %v2611_v17  ;;  %7580 = vmatmul.mubr.msk.bf16.gmra.mxu1 %vm806_vm0, %v8771_v61  ;;  %v8775_v61 = vld [vmem:[%s8914_s1 + $0x70] sm:$0xff]  }
 0x39e   : > { %v2469_v21 = vadd.f32 %v2468_v20, %v9610_v22  ;;  %v2569_v24 = vmax.f32 %v2467_v18, 0.0  ;;  %3344 = vmatprep.mubr.bf16.mxu1 %v8786_v2 }
 0x39f   : > { %v2472_v25 = vpop.f32.mrf.mxu1 }
 0x3a0   : > { %v2570_v10 = vmax.f32 %v2469_v21, 0.0  ;;  %v2613_v30 = vpack.c.bf16 %v2569_v24, %v2567_v26  ;;  %v2473_v34 = vadd.f32 %v2472_v25, %v9613_v23 }
 0x3a1   : > { %v2474_v27 = vpop.f32.mrf.mxu1 }
 0x3a2   : > { %v2614_v29 = vpack.c.bf16 %v2570_v10, %v2568_v13  ;;  %v2475_v32 = vadd.f32 %v2474_v27, %v9610_v22  ;;  %v2571_v45 = vmax.f32 %v2473_v34, 0.0 }
 0x3a3   : > { %v2476_v31 = vpop.f32.mrf.mxu1 }
 0x3a4   : > { %v2477_v33 = vadd.f32 %v2476_v31, %v9613_v23  ;;  %2955 = vmatprep.mubr.bf16.mxu0 %v2614_v29  ;;  %v2572_v43 = vmax.f32 %v2475_v32, 0.0  ;;  %v8773_v32 = vld [vmem:[%s8914_s1 + $0x60] sm:$0xff]  }
 0x3a5   : > { %v2478_v36 = vpop.f32.mrf.mxu1  ;;  %2956 = vmatmul.mubr.bf16.gmra.mxu0 %v2613_v30  ;;  %7581 = vmatmul.mubr.msk.bf16.gmra.mxu1 %vm806_vm0, %v8772_v60 }
 0x3a6   : > { %v2479_v39 = vadd.f32 %v2478_v36, %v9610_v22  ;;  %v2573_v41 = vmax.f32 %v2477_v33, 0.0  ;;  %3354 = vmatprep.mubr.bf16.mxu1 %v8786_v2 }
 0x3a7   : > { %v2482_v42 = vpop.f32.mrf.mxu1 }
 0x3a8   : > { %v2574_v44 = vmax.f32 %v2479_v39, 0.0  ;;  %v2615_v49 = vpack.c.bf16 %v2573_v41, %v2571_v45  ;;  %v2483_v51 = vadd.f32 %v2482_v42, %v9613_v23 }
 0x3a9   : > { %v2484_v46 = vpop.f32.mrf.mxu1 }
 0x3aa   : > { %v2616_v48 = vpack.c.bf16 %v2574_v44, %v2572_v43  ;;  %v2485_v38 = vadd.f32 %v2484_v46, %v9610_v22  ;;  %v2575_v58 = vmax.f32 %v2483_v51, 0.0 }
 0x3ab   : > { %v2486_v50 = vpop.f32.mrf.mxu1 }
 0x3ac   : > { %v2487_v35 = vadd.f32 %v2486_v50, %v9613_v23  ;;  %2965 = vmatprep.mubr.bf16.mxu0 %v2616_v48  ;;  %v2576_v56 = vmax.f32 %v2485_v38, 0.0 }
 0x3ad   : > { %v2488_v52 = vpop.f32.mrf.mxu1  ;;  %2966 = vmatmul.mubr.bf16.gmra.mxu0 %v2615_v49  ;;  %7582 = vmatmul.mubr.msk.bf16.gmra.mxu1 %vm806_vm0, %v8773_v32  ;;  %v8774_v49 = vld [vmem:[%s8914_s1 + $0x68] sm:$0xff]  }
 0x3ae   : > { %v2489_v53 = vadd.f32 %v2488_v52, %v9610_v22  ;;  %v2577_v54 = vmax.f32 %v2487_v35, 0.0  ;;  %3364 = vmatprep.mubr.bf16.mxu1 %v8786_v2 }
 0x3af   : > { %v2492_v55 = vpop.f32.mrf.mxu1 }
 0x3b0   : > { %v2578_v57 = vmax.f32 %v2489_v53, 0.0  ;;  %v2617_v0 = vpack.c.bf16 %v2577_v54, %v2575_v58  ;;  %v2493_v8 = vadd.f32 %v2492_v55, %v9613_v23 }
 0x3b1   : > { %v2494_v59 = vpop.f32.mrf.mxu1 }
 0x3b2   : > { %v2618_v62 = vpack.c.bf16 %v2578_v57, %v2576_v56  ;;  %v2495_v5 = vadd.f32 %v2494_v59, %v9610_v22  ;;  %v2579_v17 = vmax.f32 %v2493_v8, 0.0  ;;  %v8495_v8 = vld [vmem:[%s11477_s4 + $0x450] ss:$8 sps:$4 sm:$0xff]  }
 0x3b3   : > { %v2496_v1 = vpop.f32.mrf.mxu1 }
 0x3b4   : > { %v2497_v6 = vadd.f32 %v2496_v1, %v9613_v23  ;;  %2975 = vmatprep.mubr.bf16.mxu0 %v2618_v62  ;;  %v2580_v15 = vmax.f32 %v2495_v5, 0.0  ;;  %v8776_v1 = vld [vmem:[%s8914_s1 + $0x78] sm:$0xff]   ;;  %v8492_v5 = vld [vmem:[%s11477_s4 + $0x460] ss:$8 sps:$4 sm:$0xff]  }
 0x3b5   : > { %v2498_v9 = vpop.f32.mrf.mxu1  ;;  %2976 = vmatmul.mubr.bf16.gmra.mxu0 %v2617_v0  ;;  %7583 = vmatmul.mubr.msk.bf16.gmra.mxu1 %vm806_vm0, %v8774_v49 }
 0x3b6   : > { %v2499_v11 = vadd.f32 %v2498_v9, %v9610_v22  ;;  %v2581_v12 = vmax.f32 %v2497_v6, 0.0  ;;  %3374 = vmatprep.mubr.bf16.mxu1 %v8786_v2  ;;  %v8494_v6 = vld [vmem:[%s11477_s4 + $0x464] ss:$8 sps:$4 sm:$0xff]   ;;  %v8497_v9 = vld [vmem:[%s11477_s4 + $0x454] ss:$8 sps:$4 sm:$0xff]  }
 0x3b7   : > { %v2502_v14 = vpop.f32.mrf.mxu1 }
 0x3b8   : > { %v2582_v16 = vmax.f32 %v2499_v11, 0.0  ;;  %v2619_v19 = vpack.c.bf16 %v2581_v12, %v2579_v17  ;;  %v2503_v25 = vadd.f32 %v2502_v14, %v9613_v23  ;;  %v8498_v11 = vld [vmem:[%s11477_s4 + $0x440] ss:$8 sps:$4 sm:$0xff]   ;;  %v8500_v12 = vld [vmem:[%s11477_s4 + $0x444] ss:$8 sps:$4 sm:$0xff]  }
 0x3b9   : > { %v2504_v63 = vpop.f32.mrf.mxu1  ;;  %v7529_v14 = vld [vmem:[%s11478_s5 + $0x6] sm:$0x3]  ;;  %v8501_v17 = vld [vmem:[%s11477_s4 + $0x430] ss:$8 sps:$4 sm:$0xff]  }
 0x3ba   : > { %v2620_v18 = vpack.c.bf16 %v2582_v16, %v2580_v15  ;;  %v2505_v21 = vadd.f32 %v2504_v63, %v9610_v22  ;;  %v2583_v30 = vmax.f32 %v2503_v25, 0.0  ;;  %v9859_v16 = vrot.slane %v7529_v14, %v9102_v4  ;;  %v8503_v63 = vld [vmem:[%s11477_s4 + $0x434] ss:$8 sps:$4 sm:$0xff]   ;;  %v8506_v25 = vld [vmem:[%s11477_s4 + $0x424] ss:$8 sps:$4 sm:$0xff]  }
 0x3bb   : > { %v2506_v20 = vpop.f32.mrf.mxu1  ;;  %v9868_v60 = vrot.slane %v7529_v14, %v9111_v7 }
 0x3bc   : > { %v2507_v24 = vadd.f32 %v2506_v20, %v9613_v23  ;;  %2985 = vmatprep.mubr.bf16.mxu0 %v2620_v18  ;;  %v2584_v28 = vmax.f32 %v2505_v21, 0.0 }
 0x3bd   : > { %v2508_v13 = vpop.f32.mrf.mxu1  ;;  %2986 = vmatmul.mubr.bf16.gmra.mxu0 %v2619_v19  ;;  %7584 = vmatmul.mubr.msk.bf16.gmra.mxu1 %vm806_vm0, %v8775_v61  ;;  %v8521_v61 = vld [vmem:[%s11477_s4 + $0x4d4] ss:$8 sps:$4 sm:$0xff]  }
 0x3be   : > { %v2509_v10 = vadd.f32 %v2508_v13, %v9610_v22  ;;  %v2585_v26 = vmax.f32 %v2507_v24, 0.0  ;;  %3384 = vmatprep.mubr.bf16.mxu1 %v8786_v2  ;;  %v8504_v24 = vld [vmem:[%s11477_s4 + $0x420] ss:$8 sps:$4 sm:$0xff]  }
 0x3bf   : > { %v2512_v27 = vpop.f32.mrf.mxu1 }
 0x3c0   : > { %v2586_v29 = vmax.f32 %v2509_v10, 0.0  ;;  %v2621_v34 = vpack.c.bf16 %v2585_v26, %v2583_v30  ;;  %v2513_v40 = vadd.f32 %v2512_v27, %v9613_v23  ;;  %v8509_v26 = vld [vmem:[%s11477_s4 + $0x414] ss:$8 sps:$4 sm:$0xff]   ;;  %v8507_v30 = vld [vmem:[%s11477_s4 + $0x410] ss:$8 sps:$4 sm:$0xff]  }
 0x3c1   : > { %v2514_v31 = vpop.f32.mrf.mxu1 }
 0x3c2   : > { %v2622_v33 = vpack.c.bf16 %v2586_v29, %v2584_v28  ;;  %v2515_v37 = vadd.f32 %v2514_v31, %v9610_v22  ;;  %v2587_v47 = vmax.f32 %v2513_v40, 0.0 }
 0x3c3   : > { %v2516_v36 = vpop.f32.mrf.mxu1 }
 0x3c4   : > { %v2517_v39 = vadd.f32 %v2516_v36, %v9613_v23  ;;  %2995 = vmatprep.mubr.bf16.mxu0 %v2622_v33  ;;  %v2588_v45 = vmax.f32 %v2515_v37, 0.0  ;;  %v8512_v33 = vld [vmem:[%s11477_s4 + $0x404] ss:$8 sps:$4 sm:$0xff]  }
 0x3c5   : > { %v2518_v41 = vpop.f32.mrf.mxu1  ;;  %2996 = vmatmul.mubr.bf16.gmra.mxu0 %v2621_v34  ;;  %7585 = vmatmul.mubr.msk.bf16.gmra.mxu1 %vm806_vm0, %v8776_v1 }
 0x3c6   : > { %v2519_v42 = vadd.f32 %v2518_v41, %v9610_v22  ;;  %v2589_v43 = vmax.f32 %v2517_v39, 0.0  ;;  %v8510_v41 = vld [vmem:[%s11477_s4 + $0x400] ss:$8 sps:$4 sm:$0xff]  }
 0x3c7   : > { %v2522_v44 = vpop.f32.mrf.mxu1 }
 0x3c8   : > { %v2590_v46 = vmax.f32 %v2519_v42, 0.0  ;;  %v2623_v38 = vpack.c.bf16 %v2589_v43, %v2587_v47  ;;  %v2523_v53 = vadd.f32 %v2522_v44, %v9613_v23  ;;  %v8515_v44 = vld [vmem:[%s11477_s4 + $0x4f4] ss:$8 sps:$4 sm:$0xff]  }
 0x3c9   : > { %v2524_v48 = vpop.f32.mrf.mxu1 }
 0x3ca   : > { %v2624_v50 = vpack.c.bf16 %v2590_v46, %v2588_v45  ;;  %v2525_v51 = vadd.f32 %v2524_v48, %v9610_v22  ;;  %v2591_v59 = vmax.f32 %v2523_v53, 0.0 }
 0x3cb   : > { %v2526_v35 = vpop.f32.mrf.mxu1 }
 0x3cc   : > { %v2527_v52 = vadd.f32 %v2526_v35, %v9613_v23  ;;  %3005 = vmatprep.mubr.bf16.mxu0 %v2624_v50  ;;  %v2592_v57 = vmax.f32 %v2525_v51, 0.0  ;;  %v8491_v23 = vld [vmem:[%s11477_s4 + $0x474] ss:$8 sps:$4 sm:$0xff]   ;;  %v8513_v50 = vld [vmem:[%s11477_s4 + $0x4f0] ss:$8 sps:$4 sm:$0xff]  }
 0x3cd   : > { %v2528_v54 = vpop.f32.mrf.mxu1  ;;  %3006 = vmatmul.mubr.bf16.gmra.mxu0 %v2623_v38  ;;  %4126 = vmatprep.subr.bf16.mxu1 %v8491_v23  ;;  %v8518_v51 = vld [vmem:[%s11477_s4 + $0x4e4] ss:$8 sps:$4 sm:$0xff]  }
 0x3ce   : > { %v2529_v55 = vadd.f32 %v2528_v54, %v9610_v22  ;;  %v2593_v56 = vmax.f32 %v2527_v52, 0.0  ;;  %v8489_v22 = vld [vmem:[%s11477_s4 + $0x470] ss:$8 sps:$4 sm:$0xff]  }
 0x3cf   : > { %4127 = vmatpush1.bf16.msra.mxu1 %v8489_v22 }
 0x3d0   : > { %v2594_v58 = vmax.f32 %v2529_v55, 0.0  ;;  %v2625_v0 = vpack.c.bf16 %v2593_v56, %v2591_v59  ;;  %4128 = vmatprep.subr.bf16.mxu1 %v8494_v6 }
 0x3d2   : > { %v2626_v62 = vpack.c.bf16 %v2594_v58, %v2592_v57  ;;  %v8516_v57 = vld [vmem:[%s11477_s4 + $0x4e0] ss:$8 sps:$4 sm:$0xff]  }
 0x3d3   : > { %4129 = vmatpush1.bf16.msra.mxu1 %v8492_v5  ;;  %v8519_v5 = vld [vmem:[%s11477_s4 + $0x4d0] ss:$8 sps:$4 sm:$0xff]  }
 0x3d4   : > { %3015 = vmatprep.mubr.bf16.mxu0 %v2626_v62  ;;  %4130 = vmatprep.subr.bf16.mxu1 %v8497_v9  ;;  %v8524_v9 = vld [vmem:[%s11477_s4 + $0x4c4] ss:$8 sps:$4 sm:$0xff]  }
 0x3d5   : > { %3016 = vmatmul.mubr.bf16.gmra.mxu0 %v2625_v0 }
 0x3d7   : > { %4131 = vmatpush1.bf16.msra.mxu1 %v8495_v8 }
 0x3d8   : > { %4132 = vmatprep.subr.bf16.mxu1 %v8500_v12 }
 0x3db   : > { %4133 = vmatpush1.bf16.msra.mxu1 %v8498_v11 }
 0x3dc   : > { %4134 = vmatprep.subr.bf16.mxu1 %v8503_v63  ;;  %v8522_v63 = vld [vmem:[%s11477_s4 + $0x4c0] ss:$8 sps:$4 sm:$0xff]  }
 0x3df   : > { %4135 = vmatpush1.bf16.msra.mxu1 %v8501_v17 }
 0x3e0   : > { %4136 = vmatprep.subr.bf16.mxu1 %v8506_v25 }
 0x3e3   : > { %4137 = vmatpush1.bf16.msra.mxu1 %v8504_v24 }
 0x3e4   : > { %4138 = vmatprep.subr.bf16.mxu1 %v8509_v26  ;;  %v8525_v26 = vld [vmem:[%s11477_s4 + $0x4b0] ss:$8 sps:$4 sm:$0xff]  }
 0x3e7   : > { %4139 = vmatpush1.bf16.msra.mxu1 %v8507_v30 }
 0x3e8   : > { %4140 = vmatprep.subr.bf16.mxu1 %v8512_v33 }
 0x3eb   : > { %4141 = vmatpush1.bf16.msra.mxu1 %v8510_v41 }
 0x3ec   : > { %4142 = vmatprep.subr.bf16.mxu1 %v8515_v44 }
 0x3ef   : > { %4143 = vmatpush2.bf16.msra.mxu1 %v8513_v50 }
 0x3f0   : > { %4144 = vmatprep.subr.bf16.mxu1 %v8518_v51 }
 0x3f3   : > { %4145 = vmatpush2.bf16.msra.mxu1 %v8516_v57 }
 0x3f4   : > { %4146 = vmatprep.subr.bf16.mxu1 %v8521_v61 }
 0x3f7   : > { %4147 = vmatpush2.bf16.msra.mxu1 %v8519_v5 }
 0x3f8   : > { %4148 = vmatprep.subr.bf16.mxu1 %v8524_v9 }
 0x3fb   : > { %4149 = vmatpush2.bf16.msra.mxu1 %v8522_v63 }
 0x41d   : > { %v2867_v15 = vpop.f32.mrf.mxu0 }
 0x41e   : > { %v2868_v13 = vadd.f32 %v2867_v15, %v9868_v60 }
 0x41f   : > { %v2869_v18 = vpop.f32.mrf.mxu0 }
 0x420   : > { %v2870_v20 = vadd.f32 %v2869_v18, %v9859_v16  ;;  %v3026_v34 = vmax.f32 %v2868_v13, 0.0 }
 0x421   : > { %v2871_v19 = vpop.f32.mrf.mxu0 }
 0x422   : > { %v2872_v21 = vadd.f32 %v2871_v19, %v9868_v60  ;;  %v3027_v31 = vmax.f32 %v2870_v20, 0.0  ;;  %v8527_v20 = vld [vmem:[%s11477_s4 + $0x4b4] ss:$8 sps:$4 sm:$0xff]  }
 0x423   : > { %v2873_v10 = vpop.f32.mrf.mxu0  ;;  %4150 = vmatprep.subr.bf16.mxu1 %v8527_v20 }
 0x424   : > { %v2874_v27 = vadd.f32 %v2873_v10, %v9859_v16  ;;  %v3028_v28 = vmax.f32 %v2872_v21, 0.0  ;;  %4151 = vmatpush2.bf16.msra.mxu1 %v8525_v26 }
 0x425   : > { %v2877_v29 = vpop.f32.mrf.mxu0 }
 0x426   : > { %v3029_v32 = vmax.f32 %v2874_v27, 0.0  ;;  %v3090_v39 = vpack.c.bf16 %v3028_v28, %v3026_v34  ;;  %v2878_v45 = vadd.f32 %v2877_v29, %v9868_v60  ;;  %v8530_v29 = vld [vmem:[%s11477_s4 + $0x4a4] ss:$8 sps:$4 sm:$0xff]  }
 0x427   : > { %v2879_v36 = vpop.f32.mrf.mxu0  ;;  %4152 = vmatprep.subr.bf16.mxu1 %v8530_v29 }
 0x428   : > { %v3091_v37 = vpack.c.bf16 %v3029_v32, %v3027_v31  ;;  %v2880_v42 = vadd.f32 %v2879_v36, %v9859_v16  ;;  %v3030_v52 = vmax.f32 %v2878_v45, 0.0  ;;  %v8528_v36 = vld [vmem:[%s11477_s4 + $0x4a0] ss:$8 sps:$4 sm:$0xff]  }
 0x429   : > { %v2881_v40 = vpop.f32.mrf.mxu0  ;;  %4153 = vmatpush2.bf16.msra.mxu1 %v8528_v36 }
 0x42a   : > { %v2882_v43 = vadd.f32 %v2881_v40, %v9868_v60  ;;  %3587 = vmatprep.mubr.bf16.mxu0 %v3091_v37  ;;  %v3031_v38 = vmax.f32 %v2880_v42, 0.0  ;;  %v8533_v40 = vld [vmem:[%s11477_s4 + $0x494] ss:$8 sps:$4 sm:$0xff]  }
 0x42b   : > { %v2883_v46 = vpop.f32.mrf.mxu0  ;;  %3588 = vmatmul.mubr.bf16.vlgmr.msra.gmra.mxu0 %v3090_v39  ;;  %4154 = vmatprep.subr.bf16.mxu1 %v8533_v40 }
 0x42c   : > { %v2884_v47 = vadd.f32 %v2883_v46, %v9859_v16  ;;  %v3032_v48 = vmax.f32 %v2882_v43, 0.0  ;;  %v8531_v46 = vld [vmem:[%s11477_s4 + $0x490] ss:$8 sps:$4 sm:$0xff]  }
 0x42d   : > { %v2887_v49 = vpop.f32.mrf.mxu0  ;;  %4155 = vmatpush2.bf16.msra.mxu1 %v8531_v46 }
 0x42e   : > { %v3033_v35 = vmax.f32 %v2884_v47, 0.0  ;;  %v3092_v55 = vpack.c.bf16 %v3032_v48, %v3030_v52  ;;  %v2888_v62 = vadd.f32 %v2887_v49, %v9868_v60 }
 0x42f   : > { %v2889_v53 = vpop.f32.mrf.mxu0 }
 0x430   : > { %v3093_v54 = vpack.c.bf16 %v3033_v35, %v3031_v38  ;;  %v2890_v58 = vadd.f32 %v2889_v53, %v9859_v16  ;;  %v3034_v11 = vmax.f32 %v2888_v62, 0.0 }
 0x431   : > { %v2891_v56 = vpop.f32.mrf.mxu0 }
 0x432   : > { %v2892_v59 = vadd.f32 %v2891_v56, %v9868_v60  ;;  %3597 = vmatprep.mubr.bf16.mxu0 %v3093_v54  ;;  %v3035_v6 = vmax.f32 %v2890_v58, 0.0 }
 0x433   : > { %v2893_v0 = vpop.f32.mrf.mxu0  ;;  %3598 = vmatmul.mubr.bf16.gmra.mxu0 %v3092_v55 }
 0x434   : > { %v2894_v1 = vadd.f32 %v2893_v0, %v9859_v16  ;;  %v3036_v22 = vmax.f32 %v2892_v59, 0.0 }
 0x435   : > { %v2897_v23 = vpop.f32.mrf.mxu0 }
 0x436   : > { %v3037_v8 = vmax.f32 %v2894_v1, 0.0  ;;  %v3094_v15 = vpack.c.bf16 %v3036_v22, %v3034_v11  ;;  %v2898_v21 = vadd.f32 %v2897_v23, %v9868_v60 }
 0x437   : > { %v2899_v12 = vpop.f32.mrf.mxu0 }
 0x438   : > { %v3095_v14 = vpack.c.bf16 %v3037_v8, %v3035_v6  ;;  %v2900_v18 = vadd.f32 %v2899_v12, %v9859_v16  ;;  %v3038_v30 = vmax.f32 %v2898_v21, 0.0 }
 0x439   : > { %v2901_v17 = vpop.f32.mrf.mxu0 }
 0x43a   : > { %v2902_v19 = vadd.f32 %v2901_v17, %v9868_v60  ;;  %3607 = vmatprep.mubr.bf16.mxu0 %v3095_v14  ;;  %v3039_v27 = vmax.f32 %v2900_v18, 0.0 }
 0x43b   : > { %v2903_v24 = vpop.f32.mrf.mxu0  ;;  %3608 = vmatmul.mubr.bf16.gmra.mxu0 %v3094_v15 }
 0x43c   : > { %v2904_v25 = vadd.f32 %v2903_v24, %v9859_v16  ;;  %v3040_v13 = vmax.f32 %v2902_v19, 0.0 }
 0x43d   : > { %v2907_v10 = vpop.f32.mrf.mxu0 }
 0x43e   : > { %v3041_v28 = vmax.f32 %v2904_v25, 0.0  ;;  %v3096_v33 = vpack.c.bf16 %v3040_v13, %v3038_v30  ;;  %v2908_v41 = vadd.f32 %v2907_v10, %v9868_v60 }
 0x43f   : > { %v2909_v31 = vpop.f32.mrf.mxu0 }
 0x440   : > { %v3097_v32 = vpack.c.bf16 %v3041_v28, %v3039_v27  ;;  %v2910_v37 = vadd.f32 %v2909_v31, %v9859_v16  ;;  %v3042_v49 = vmax.f32 %v2908_v41, 0.0 }
 0x441   : > { %v2911_v34 = vpop.f32.mrf.mxu0 }
 0x442   : > { %v2912_v39 = vadd.f32 %v2911_v34, %v9868_v60  ;;  %3617 = vmatprep.mubr.bf16.mxu0 %v3097_v32  ;;  %v3043_v47 = vmax.f32 %v2910_v37, 0.0 }
 0x443   : > { %v2913_v42 = vpop.f32.mrf.mxu0  ;;  %3618 = vmatmul.mubr.bf16.gmra.mxu0 %v3096_v33 }
 0x444   : > { %v2914_v43 = vadd.f32 %v2913_v42, %v9859_v16  ;;  %v3044_v44 = vmax.f32 %v2912_v39, 0.0 }
 0x445   : > { %v2917_v45 = vpop.f32.mrf.mxu0 }
 0x446   : > { %v3045_v48 = vmax.f32 %v2914_v43, 0.0  ;;  %v3098_v35 = vpack.c.bf16 %v3044_v44, %v3042_v49  ;;  %v2918_v54 = vadd.f32 %v2917_v45, %v9868_v60 }
 0x447   : > { %v2919_v50 = vpop.f32.mrf.mxu0 }
 0x448   : > { %v3099_v38 = vpack.c.bf16 %v3045_v48, %v3043_v47  ;;  %v2920_v52 = vadd.f32 %v2919_v50, %v9859_v16  ;;  %v3046_v62 = vmax.f32 %v2918_v54, 0.0 }
 0x449   : > { %v2921_v51 = vpop.f32.mrf.mxu0 }
 0x44a   : > { %v2922_v53 = vadd.f32 %v2921_v51, %v9868_v60  ;;  %3627 = vmatprep.mubr.bf16.mxu0 %v3099_v38  ;;  %v3047_v59 = vmax.f32 %v2920_v52, 0.0 }
 0x44b   : > { %v2923_v55 = vpop.f32.mrf.mxu0  ;;  %3628 = vmatmul.mubr.bf16.gmra.mxu0 %v3098_v35 }
 0x44c   : > { %v2924_v56 = vadd.f32 %v2923_v55, %v9859_v16  ;;  %v3048_v57 = vmax.f32 %v2922_v53, 0.0 }
 0x44d   : > { %v2927_v58 = vpop.f32.mrf.mxu0 }
 0x44e   : > { %v3049_v61 = vmax.f32 %v2924_v56, 0.0  ;;  %v3100_v22 = vpack.c.bf16 %v3048_v57, %v3046_v62  ;;  %v2928_v8 = vadd.f32 %v2927_v58, %v9868_v60  ;;  %v9970_v57 = vpop.f32.mrf.mxu1 }
 0x44f   : > { %v2929_v0 = vpop.f32.mrf.mxu0 }
 0x450   : > { %v3101_v1 = vpack.c.bf16 %v3049_v61, %v3047_v59  ;;  %v2930_v5 = vadd.f32 %v2929_v0, %v9859_v16  ;;  %v3050_v63 = vmax.f32 %v2928_v8, 0.0 }
 0x451   : > { %v2931_v23 = vpop.f32.mrf.mxu0 }
 0x452   : > { %v2932_v6 = vadd.f32 %v2931_v23, %v9868_v60  ;;  %3637 = vmatprep.mubr.bf16.mxu0 %v3101_v1  ;;  %v3051_v15 = vmax.f32 %v2930_v5, 0.0  ;;  %v9972_v23 = vpop.f32.mrf.mxu1 }
 0x453   : > { %v2933_v9 = vpop.f32.mrf.mxu0  ;;  %3638 = vmatmul.mubr.bf16.gmra.mxu0 %v3100_v22 }
 0x454   : > { %v2934_v11 = vadd.f32 %v2933_v9, %v9859_v16  ;;  %v3052_v12 = vmax.f32 %v2932_v6, 0.0 }
 0x455   : > { %v2937_v14 = vpop.f32.mrf.mxu0 }
 0x456   : > { %v3053_v17 = vmax.f32 %v2934_v11, 0.0  ;;  %v3102_v20 = vpack.c.bf16 %v3052_v12, %v3050_v63  ;;  %v2938_v13 = vadd.f32 %v2937_v14, %v9868_v60 }
 0x457   : > { %v2939_v18 = vpop.f32.mrf.mxu0 }
 0x458   : > { %v3103_v19 = vpack.c.bf16 %v3053_v17, %v3051_v15  ;;  %v2940_v24 = vadd.f32 %v2939_v18, %v9859_v16  ;;  %v3054_v31 = vmax.f32 %v2938_v13, 0.0  ;;  %v9978_v15 = vpop.f32.mrf.mxu1  ;;  %v8536_v17 = vld [vmem:[%s11477_s4 + $0x484] ss:$8 sps:$4 sm:$0xff]  }
 0x459   : > { %v2941_v21 = vpop.f32.mrf.mxu0  ;;  %4156 = vmatprep.subr.bf16.mxu1 %v8536_v17 }
 0x45a   : > { %v2942_v25 = vadd.f32 %v2941_v21, %v9868_v60  ;;  %3647 = vmatprep.mubr.bf16.mxu0 %v3103_v19  ;;  %v3055_v29 = vmax.f32 %v2940_v24, 0.0  ;;  %v8534_v19 = vld [vmem:[%s11477_s4 + $0x480] ss:$8 sps:$4 sm:$0xff]  }
 0x45b   : > { %v2943_v10 = vpop.f32.mrf.mxu0  ;;  %3648 = vmatmul.mubr.bf16.gmra.mxu0 %v3102_v20  ;;  %4157 = vmatpush2.bf16.msra.mxu1 %v8534_v19 }
 0x45c   : > { %v2944_v26 = vadd.f32 %v2943_v10, %v9859_v16  ;;  %v3056_v27 = vmax.f32 %v2942_v25, 0.0  ;;  %v9986_v10 = vpop.f32.mrf.mxu1 }
 0x45d   : > { %v2947_v28 = vpop.f32.mrf.mxu0 }
 0x45e   : > { %v3057_v30 = vmax.f32 %v2944_v26, 0.0  ;;  %v3104_v34 = vpack.c.bf16 %v3056_v27, %v3054_v31  ;;  %v2948_v40 = vadd.f32 %v2947_v28, %v9868_v60 }
 0x45f   : > { %v2949_v32 = vpop.f32.mrf.mxu0 }
 0x460   : > { %v3105_v33 = vpack.c.bf16 %v3057_v30, %v3055_v29  ;;  %v2950_v37 = vadd.f32 %v2949_v32, %v9859_v16  ;;  %v3058_v47 = vmax.f32 %v2948_v40, 0.0 }
 0x461   : > { %v2951_v36 = vpop.f32.mrf.mxu0 }
 0x462   : > { %v2952_v39 = vadd.f32 %v2951_v36, %v9868_v60  ;;  %3657 = vmatprep.mubr.bf16.mxu0 %v3105_v33  ;;  %v3059_v45 = vmax.f32 %v2950_v37, 0.0  ;;  %v9992_v33 = vpop.f32.mrf.mxu1 }
 0x463   : > { %v2953_v41 = vpop.f32.mrf.mxu0  ;;  %3658 = vmatmul.mubr.bf16.gmra.mxu0 %v3104_v34 }
 0x464   : > { %v2954_v42 = vadd.f32 %v2953_v41, %v9859_v16  ;;  %v3060_v43 = vmax.f32 %v2952_v39, 0.0 }
 0x465   : > { %v2957_v44 = vpop.f32.mrf.mxu0 }
 0x466   : > { %v3061_v46 = vmax.f32 %v2954_v42, 0.0  ;;  %v3106_v50 = vpack.c.bf16 %v3060_v43, %v3058_v47  ;;  %v2958_v52 = vadd.f32 %v2957_v44, %v9868_v60  ;;  %v9994_v43 = vpop.f32.mrf.mxu1 }
 0x467   : > { %v2959_v48 = vpop.f32.mrf.mxu0 }
 0x468   : > { %v3107_v49 = vpack.c.bf16 %v3061_v46, %v3059_v45  ;;  %v2960_v35 = vadd.f32 %v2959_v48, %v9859_v16  ;;  %v3062_v61 = vmax.f32 %v2958_v52, 0.0 }
 0x469   : > { %v2961_v38 = vpop.f32.mrf.mxu0 }
 0x46a   : > { %v2962_v51 = vadd.f32 %v2961_v38, %v9868_v60  ;;  %3667 = vmatprep.mubr.bf16.mxu0 %v3107_v49  ;;  %v3063_v58 = vmax.f32 %v2960_v35, 0.0  ;;  %v10000_v38 = vpop.f32.mrf.mxu1 }
 0x46b   : > { %v2963_v53 = vpop.f32.mrf.mxu0  ;;  %3668 = vmatmul.mubr.bf16.gmra.mxu0 %v3106_v50 }
 0x46c   : > { %v2964_v54 = vadd.f32 %v2963_v53, %v9859_v16  ;;  %v3064_v55 = vmax.f32 %v2962_v51, 0.0 }
 0x46d   : > { %v2967_v56 = vpop.f32.mrf.mxu0 }
 0x46e   : > { %v3065_v59 = vmax.f32 %v2964_v54, 0.0  ;;  %v3108_v1 = vpack.c.bf16 %v3064_v55, %v3062_v61  ;;  %v2968_v8 = vadd.f32 %v2967_v56, %v9868_v60 }
 0x46f   : > { %v2969_v62 = vpop.f32.mrf.mxu0 }
 0x470   : > { %v3109_v0 = vpack.c.bf16 %v3065_v59, %v3063_v58  ;;  %v2970_v5 = vadd.f32 %v2969_v62, %v9859_v16  ;;  %v3066_v20 = vmax.f32 %v2968_v8, 0.0  ;;  %v10002_v58 = vpop.f32.mrf.mxu1 }
 0x471   : > { %v2971_v22 = vpop.f32.mrf.mxu0 }
 0x472   : > { %v2972_v6 = vadd.f32 %v2971_v22, %v9868_v60  ;;  %3677 = vmatprep.mubr.bf16.mxu0 %v3109_v0  ;;  %v3067_v63 = vmax.f32 %v2970_v5, 0.0 }
 0x473   : > { %v2973_v9 = vpop.f32.mrf.mxu0  ;;  %3678 = vmatmul.mubr.bf16.gmra.mxu0 %v3108_v1 }
 0x474   : > { %v2974_v11 = vadd.f32 %v2973_v9, %v9859_v16  ;;  %v3068_v12 = vmax.f32 %v2972_v6, 0.0  ;;  %v10008_v6 = vpop.f32.mrf.mxu1 }
 0x475   : > { %v2977_v14 = vpop.f32.mrf.mxu0 }
 0x476   : > { %v3069_v18 = vmax.f32 %v2974_v11, 0.0  ;;  %v3110_v25 = vpack.c.bf16 %v3068_v12, %v3066_v20  ;;  %v2978_v28 = vadd.f32 %v2977_v14, %v9868_v60 }
 0x477   : > { %v2979_v21 = vpop.f32.mrf.mxu0 }
 0x478   : > { %v3111_v24 = vpack.c.bf16 %v3069_v18, %v3067_v63  ;;  %v2980_v26 = vadd.f32 %v2979_v21, %v9859_v16  ;;  %v3070_v37 = vmax.f32 %v2978_v28, 0.0  ;;  %v10010_v18 = vpop.f32.mrf.mxu1 }
 0x479   : > { %v2981_v13 = vpop.f32.mrf.mxu0 }
 0x47a   : > { %v2982_v27 = vadd.f32 %v2981_v13, %v9868_v60  ;;  %3687 = vmatprep.mubr.bf16.mxu0 %v3111_v24  ;;  %v3071_v34 = vmax.f32 %v2980_v26, 0.0 }
 0x47b   : > { %v2983_v29 = vpop.f32.mrf.mxu0  ;;  %3688 = vmatmul.mubr.bf16.gmra.mxu0 %v3110_v25 }
 0x47c   : > { %v2984_v30 = vadd.f32 %v2983_v29, %v9859_v16  ;;  %v3072_v31 = vmax.f32 %v2982_v27, 0.0  ;;  %v10016_v27 = vpop.f32.mrf.mxu1 }
 0x47d   : > { %v2987_v32 = vpop.f32.mrf.mxu0 }
 0x47e   : > { %v3073_v36 = vmax.f32 %v2984_v30, 0.0  ;;  %v3112_v41 = vpack.c.bf16 %v3072_v31, %v3070_v37  ;;  %v2988_v46 = vadd.f32 %v2987_v32, %v9868_v60  ;;  %v10018_v37 = vpop.f32.mrf.mxu1 }
 0x47f   : > { %v2989_v39 = vpop.f32.mrf.mxu0 }
 0x480   : > { %v3113_v40 = vpack.c.bf16 %v3073_v36, %v3071_v34  ;;  %v2990_v44 = vadd.f32 %v2989_v39, %v9859_v16  ;;  %v3074_v52 = vmax.f32 %v2988_v46, 0.0  ;;  %v10024_v46 = vpop.f32.mrf.mxu1 }
 0x481   : > { %v2991_v42 = vpop.f32.mrf.mxu0 }
 0x482   : > { %v2992_v45 = vadd.f32 %v2991_v42, %v9868_v60  ;;  %3697 = vmatprep.mubr.bf16.mxu0 %v3113_v40  ;;  %v3075_v35 = vmax.f32 %v2990_v44, 0.0 }
 0x483   : > { %v2993_v47 = vpop.f32.mrf.mxu0  ;;  %3698 = vmatmul.mubr.bf16.gmra.mxu0 %v3112_v41 }
 0x484   : > { %v2994_v48 = vadd.f32 %v2993_v47, %v9859_v16  ;;  %v3076_v49 = vmax.f32 %v2992_v45, 0.0 }
 0x485   : > { %v2997_v50 = vpop.f32.mrf.mxu0 }
 0x486   : > { %v3077_v51 = vmax.f32 %v2994_v48, 0.0  ;;  %v3114_v55 = vpack.c.bf16 %v3076_v49, %v3074_v52  ;;  %v2998_v62 = vadd.f32 %v2997_v50, %v9868_v60 }
 0x487   : > { %v2999_v53 = vpop.f32.mrf.mxu0 }
 0x488   : > { %v3115_v54 = vpack.c.bf16 %v3077_v51, %v3075_v35  ;;  %v3000_v59 = vadd.f32 %v2999_v53, %v9859_v16  ;;  %v3078_v11 = vmax.f32 %v2998_v62, 0.0  ;;  %v10026_v51 = vpop.f32.mrf.mxu1 }
 0x489   : > { %v3001_v56 = vpop.f32.mrf.mxu0 }
 0x48a   : > { %v3002_v61 = vadd.f32 %v3001_v56, %v9868_v60  ;;  %3707 = vmatprep.mubr.bf16.mxu0 %v3115_v54  ;;  %v3079_v8 = vmax.f32 %v3000_v59, 0.0  ;;  %v10028_v52 = vpop.f32.mrf.mxu1 }
 0x48b   : > { %v3003_v0 = vpop.f32.mrf.mxu0  ;;  %3708 = vmatmul.mubr.bf16.gmra.mxu0 %v3114_v55 }
 0x48c   : > { %v3004_v1 = vadd.f32 %v3003_v0, %v9859_v16  ;;  %v3080_v22 = vmax.f32 %v3002_v61, 0.0  ;;  %v10030_v53 = vpop.f32.mrf.mxu1 }
 0x48d   : > { %v3007_v5 = vpop.f32.mrf.mxu0 }
 0x48e   : > { %v3081_v9 = vmax.f32 %v3004_v1, 0.0  ;;  %v3116_v17 = vpack.c.bf16 %v3080_v22, %v3078_v11  ;;  %v3008_v21 = vadd.f32 %v3007_v5, %v9868_v60  ;;  %v8537_v1 = vld [vmem:[%s11477_s4 + $0x570] ss:$8 sps:$4 sm:$0xff]   ;;  %v8539_v22 = vld [vmem:[%s11477_s4 + $0x574] ss:$8 sps:$4 sm:$0xff]  }
 0x48f   : > { %v3009_v12 = vpop.f32.mrf.mxu0  ;;  %4621 = vmatprep.subr.bf16.mxu0 %v8539_v22  ;;  %v8542_v11 = vld [vmem:[%s11477_s4 + $0x564] ss:$8 sps:$4 sm:$0xff]  }
 0x490   : > { %v3117_v14 = vpack.c.bf16 %v3081_v9, %v3079_v8  ;;  %v3010_v19 = vadd.f32 %v3009_v12, %v9859_v16  ;;  %v3082_v30 = vmax.f32 %v3008_v21, 0.0  ;;  %4622 = vmatpush1.bf16.msra.mxu0 %v8537_v1  ;;  %v8540_v9 = vld [vmem:[%s11477_s4 + $0x560] ss:$8 sps:$4 sm:$0xff]  }
 0x491   : > { %v3011_v63 = vpop.f32.mrf.mxu0  ;;  %4623 = vmatprep.subr.bf16.mxu0 %v8542_v11  ;;  %v8546_v21 = vld [vmem:[%s11477_s4 + $0x540] ss:$8 sps:$4 sm:$0xff]   ;;  %v8555_v11 = vld [vmem:[%s11477_s4 + $0x510] ss:$8 sps:$4 sm:$0xff]  }
 0x492   : > { %v3012_v20 = vadd.f32 %v3011_v63, %v9868_v60  ;;  %3717 = vmatprep.mubr.bf16.mxu0 %v3117_v14  ;;  %v3083_v28 = vmax.f32 %v3010_v19, 0.0  ;;  %v8545_v63 = vld [vmem:[%s11477_s4 + $0x554] ss:$8 sps:$4 sm:$0xff]  }
 0x493   : > { %v3013_v24 = vpop.f32.mrf.mxu0  ;;  %3718 = vmatmul.mubr.bf16.gmra.mxu0 %v3116_v17  ;;  %v8543_v17 = vld [vmem:[%s11477_s4 + $0x550] ss:$8 sps:$4 sm:$0xff]  }
 0x494   : > { %v3014_v25 = vadd.f32 %v3013_v24, %v9859_v16  ;;  %v3084_v13 = vmax.f32 %v3012_v20, 0.0  ;;  %4624 = vmatpush1.bf16.msra.mxu0 %v8540_v9  ;;  %v8548_v24 = vld [vmem:[%s11477_s4 + $0x544] ss:$8 sps:$4 sm:$0xff]  }
 0x495   : > { %v3017_v26 = vpop.f32.mrf.mxu0  ;;  %4625 = vmatprep.subr.bf16.mxu0 %v8545_v63 }
 0x496   : > { %v3085_v29 = vmax.f32 %v3014_v25, 0.0  ;;  %v3118_v34 = vpack.c.bf16 %v3084_v13, %v3082_v30  ;;  %v3018_v41 = vadd.f32 %v3017_v26, %v9868_v60  ;;  %v3748_v26 = vld [vmem:[%s11481_s8] sm:$0x3] }
 0x497   : > { %v3019_v31 = vpop.f32.mrf.mxu0 }
 0x498   : > { %v3119_v32 = vpack.c.bf16 %v3085_v29, %v3083_v28  ;;  %v3020_v39 = vadd.f32 %v3019_v31, %v9859_v16  ;;  %v3086_v49 = vmax.f32 %v3018_v41, 0.0  ;;  %4626 = vmatpush1.bf16.msra.mxu0 %v8543_v17  ;;  %v10095_v31 = vrot.slane %v3748_v26, %v9102_v4 }
 0x499   : > { %v3021_v36 = vpop.f32.mrf.mxu0  ;;  %4627 = vmatprep.subr.bf16.mxu0 %v8548_v24 }
 0x49a   : > { %v3022_v40 = vadd.f32 %v3021_v36, %v9868_v60  ;;  %3727 = vmatprep.mubr.bf16.mxu0 %v3119_v32  ;;  %v3087_v47 = vmax.f32 %v3020_v39, 0.0  ;;  %v10032_v60 = vpop.f32.mrf.mxu1  ;;  %v8549_v32 = vld [vmem:[%s11477_s4 + $0x530] ss:$8 sps:$4 sm:$0xff]   ;;  %v10105_v39 = vrot.slane %v3748_v26, %v9111_v7 }
 0x49b   : > { %v3023_v42 = vpop.f32.mrf.mxu0  ;;  %3728 = vmatmul.mubr.bf16.gmra.mxu0 %v3118_v34  ;;  %v8551_v34 = vld [vmem:[%s11477_s4 + $0x534] ss:$8 sps:$4 sm:$0xff]  }
 0x49c   : > { %v3024_v44 = vadd.f32 %v3023_v42, %v9859_v16  ;;  %v3088_v45 = vmax.f32 %v3022_v40, 0.0  ;;  %v10034_v54 = vpop.f32.mrf.mxu1  ;;  %4628 = vmatpush1.bf16.msra.mxu0 %v8546_v21  ;;  %v8560_v21 = vld [vmem:[%s11477_s4 + $0x504] ss:$8 sps:$4 sm:$0xff]  }
 0x49d   : > { %4629 = vmatprep.subr.bf16.mxu0 %v8551_v34 }
 0x49e   : > { %v3089_v48 = vmax.f32 %v3024_v44, 0.0  ;;  %v3120_v35 = vpack.c.bf16 %v3088_v45, %v3086_v49  ;;  %v10036_v16 = vpop.f32.mrf.mxu1  ;;  %v8552_v45 = vld [vmem:[%s11477_s4 + $0x520] ss:$8 sps:$4 sm:$0xff]  }
 0x4a0   : > { %v3121_v50 = vpack.c.bf16 %v3089_v48, %v3087_v47  ;;  %v10038_v55 = vpop.f32.mrf.mxu1  ;;  %4630 = vmatpush1.bf16.msra.mxu0 %v8549_v32 }
 0x4a2   : > { %3737 = vmatprep.mubr.bf16.mxu0 %v3121_v50  ;;  %v10040_v56 = vpop.f32.mrf.mxu1 }
 0x4a3   : > { %3738 = vmatmul.mubr.bf16.gmra.mxu0 %v3120_v35 }
 0x4a4   : > { %v10042_v59 = vpop.f32.mrf.mxu1 }
 0x4a6   : > { %v10044_v61 = vpop.f32.mrf.mxu1 }
 0x4a8   : > { %v10046_v62 = vpop.f32.mrf.mxu1 }
 0x4aa   : > { %v10048_v0 = vpop.f32.mrf.mxu1 }
 0x4ac   : > { %v10056_v5 = vpop.f32.mrf.mxu1 }
 0x4ae   : > { %v10058_v8 = vpop.f32.mrf.mxu1 }
 0x4b0   : > { %v10066_v12 = vpop.f32.mrf.mxu1 }
 0x4b2   : > { %v10068_v14 = vpop.f32.mrf.mxu1 }
 0x4b4   : > { %v10076_v19 = vpop.f32.mrf.mxu1 }
 0x4b6   : > { %v10078_v20 = vpop.f32.mrf.mxu1 }
 0x4b8   : > { %v10086_v25 = vpop.f32.mrf.mxu1 }
 0x4ba   : > { %v10091_v29 = vpop.f32.mrf.mxu1 }
 0x4bc   : > { %v10111_v44 = vpop.f32.mrf.mxu1 }
 0x4be   : > { %v10124_v9 = vpop.f32.mrf.mxu1 }
 0x4eb   : > { %v3589_v13 = vpop.f32.mrf.mxu0 }
 0x4ec   : > { %v3590_v36 = vadd.f32 %v3589_v13, %v9970_v57 }
 0x4ed   : > { %v3591_v28 = vpop.f32.mrf.mxu0 }
 0x4ee   : > { %v3592_v30 = vadd.f32 %v3591_v28, %v9972_v23  ;;  %v8554_v23 = vld [vmem:[%s11477_s4 + $0x524] ss:$8 sps:$4 sm:$0xff]   ;;  %v3760_v49 = vadd.f32 %v10105_v39, %v3590_v36  ;;  %v10135_v36 = vpop.f32.mrf.mxu1 }
 0x4ef   : > { %v3593_v40 = vpop.f32.mrf.mxu0  ;;  %4631 = vmatprep.subr.bf16.mxu0 %v8554_v23 }
 0x4f0   : > { %v3594_v41 = vadd.f32 %v3593_v40, %v9978_v15  ;;  %v3761_v57 = vadd.f32 %v10095_v31, %v3592_v30  ;;  %v8557_v15 = vld [vmem:[%s11477_s4 + $0x514] ss:$8 sps:$4 sm:$0xff]   ;;  %4632 = vmatpush1.bf16.msra.mxu0 %v8552_v45  ;;  %v3824_v24 = vmax.f32 %v3760_v49, 0.0 }
 0x4f1   : > { %v3595_v42 = vpop.f32.mrf.mxu0  ;;  %4633 = vmatprep.subr.bf16.mxu0 %v8557_v15 }
 0x4f2   : > { %v3762_v47 = vadd.f32 %v10105_v39, %v3594_v41  ;;  %v3596_v48 = vadd.f32 %v3595_v42, %v9986_v10  ;;  %v3825_v10 = vmax.f32 %v3761_v57, 0.0 }
 0x4f3   : > { %v3599_v50 = vpop.f32.mrf.mxu0 }
 0x4f4   : > { %v3763_v35 = vadd.f32 %v10095_v31, %v3596_v48  ;;  %v3826_v1 = vmax.f32 %v3762_v47, 0.0  ;;  %v3600_v13 = vadd.f32 %v3599_v50, %v9992_v33  ;;  %4634 = vmatpush1.bf16.msra.mxu0 %v8555_v11  ;;  %v8563_v33 = vld [vmem:[%s11477_s4 + $0x5f4] ss:$8 sps:$4 sm:$0xff]   ;;  %v10148_v48 = vpop.f32.mrf.mxu1 }
 0x4f5   : > { %v3601_v22 = vpop.f32.mrf.mxu0  ;;  %4635 = vmatprep.subr.bf16.mxu0 %v8560_v21 }
 0x4f6   : > { %v3827_v17 = vmax.f32 %v3763_v35, 0.0  ;;  %v3602_v63 = vadd.f32 %v3601_v22, %v9994_v43  ;;  %v3888_v32 = vpack.c.bf16 %v3826_v1, %v3824_v24  ;;  %v8558_v43 = vld [vmem:[%s11477_s4 + $0x500] ss:$8 sps:$4 sm:$0xff]   ;;  %v8566_v35 = vld [vmem:[%s11477_s4 + $0x5e4] ss:$8 sps:$4 sm:$0xff]   ;;  %v10159_v24 = vpop.f32.mrf.mxu1 }
 0x4f7   : > { %v3603_v26 = vpop.f32.mrf.mxu0 }
 0x4f8   : > { %v3604_v28 = vadd.f32 %v3603_v26, %v10000_v38  ;;  %v3889_v30 = vpack.c.bf16 %v3827_v17, %v3825_v10  ;;  %v3765_v40 = vadd.f32 %v10095_v31, %v3602_v63  ;;  %v3764_v38 = vadd.f32 %v10105_v39, %v3600_v13  ;;  %4636 = vmatpush1.bf16.msra.mxu0 %v8558_v43 }
 0x4f9   : > { %v3605_v34 = vpop.f32.mrf.mxu0  ;;  %4637 = vmatprep.subr.bf16.mxu0 %v8563_v33 }
 0x4fa   : > { %v3766_v23 = vadd.f32 %v10105_v39, %v3604_v28  ;;  %v3606_v41 = vadd.f32 %v3605_v34, %v10002_v58  ;;  %4158 = vmatprep.mubr.bf16.mxu1 %v3889_v30  ;;  %v8561_v58 = vld [vmem:[%s11477_s4 + $0x5f0] ss:$8 sps:$4 sm:$0xff]   ;;  %v3829_v49 = vmax.f32 %v3765_v40, 0.0  ;;  %v3828_v1 = vmax.f32 %v3764_v38, 0.0  ;;  %v10172_v40 = vpop.f32.mrf.mxu1  ;;  %v8572_v38 = vld [vmem:[%s11477_s4 + $0x5c4] ss:$8 sps:$4 sm:$0xff]  }
 0x4fb   : > { %v3609_v42 = vpop.f32.mrf.mxu0  ;;  %4159 = vmatmul.mubr.bf16.vlgmr.msra.gmra.mxu1 %v3888_v32 }
 0x4fc   : > { %v3767_v45 = vadd.f32 %v10095_v31, %v3606_v41  ;;  %v3830_v57 = vmax.f32 %v3766_v23, 0.0  ;;  %v3610_v22 = vadd.f32 %v3609_v42, %v10008_v6  ;;  %4638 = vmatpush2.bf16.msra.mxu0 %v8561_v58  ;;  %v8569_v6 = vld [vmem:[%s11477_s4 + $0x5d4] ss:$8 sps:$4 sm:$0xff]  }
 0x4fd   : > { %v3611_v47 = vpop.f32.mrf.mxu0  ;;  %4639 = vmatprep.subr.bf16.mxu0 %v8566_v35 }
 0x4fe   : > { %v3831_v50 = vmax.f32 %v3767_v45, 0.0  ;;  %v3612_v15 = vadd.f32 %v3611_v47, %v10010_v18  ;;  %v3890_v63 = vpack.c.bf16 %v3830_v57, %v3828_v1  ;;  %v8564_v18 = vld [vmem:[%s11477_s4 + $0x5e0] ss:$8 sps:$4 sm:$0xff]  }
 0x4ff   : > { %v3613_v11 = vpop.f32.mrf.mxu0 }
 0x500   : > { %v3614_v10 = vadd.f32 %v3613_v11, %v10016_v27  ;;  %v3891_v17 = vpack.c.bf16 %v3831_v50, %v3829_v49  ;;  %v3769_v13 = vadd.f32 %v10095_v31, %v3612_v15  ;;  %v3768_v27 = vadd.f32 %v10105_v39, %v3610_v22  ;;  %4640 = vmatpush2.bf16.msra.mxu0 %v8564_v18  ;;  %v10183_v15 = vpop.f32.mrf.mxu1 }
 0x501   : > { %v3615_v21 = vpop.f32.mrf.mxu0  ;;  %4641 = vmatprep.subr.bf16.mxu0 %v8569_v6 }
 0x502   : > { %v3770_v26 = vadd.f32 %v10105_v39, %v3614_v10  ;;  %v3616_v28 = vadd.f32 %v3615_v21, %v10018_v37  ;;  %4168 = vmatprep.mubr.bf16.mxu1 %v3891_v17  ;;  %v8567_v37 = vld [vmem:[%s11477_s4 + $0x5d0] ss:$8 sps:$4 sm:$0xff]   ;;  %v3833_v23 = vmax.f32 %v3769_v13, 0.0  ;;  %v3832_v42 = vmax.f32 %v3768_v27, 0.0  ;;  %v10196_v21 = vpop.f32.mrf.mxu1 }
 0x503   : > { %v3619_v30 = vpop.f32.mrf.mxu0  ;;  %4169 = vmatmul.mubr.bf16.gmra.mxu1 %v3890_v63 }
 0x504   : > { %v3771_v32 = vadd.f32 %v10095_v31, %v3616_v28  ;;  %v3834_v34 = vmax.f32 %v3770_v26, 0.0  ;;  %v3620_v45 = vadd.f32 %v3619_v30, %v10024_v46  ;;  %4642 = vmatpush2.bf16.msra.mxu0 %v8567_v37  ;;  %v8575_v46 = vld [vmem:[%s11477_s4 + $0x5b4] ss:$8 sps:$4 sm:$0xff]   ;;  %v8578_v28 = vld [vmem:[%s11477_s4 + $0x5a4] ss:$8 sps:$4 sm:$0xff]  }
 0x505   : > { %v3621_v43 = vpop.f32.mrf.mxu0  ;;  %4643 = vmatprep.subr.bf16.mxu0 %v8572_v38 }
 0x506   : > { %v3835_v41 = vmax.f32 %v3771_v32, 0.0  ;;  %v3622_v33 = vadd.f32 %v3621_v43, %v10026_v51  ;;  %v3892_v49 = vpack.c.bf16 %v3834_v34, %v3832_v42  ;;  %v8570_v51 = vld [vmem:[%s11477_s4 + $0x5c0] ss:$8 sps:$4 sm:$0xff]  }
 0x507   : > { %v3623_v57 = vpop.f32.mrf.mxu0 }
 0x508   : > { %v3624_v47 = vadd.f32 %v3623_v57, %v10028_v52  ;;  %v3893_v58 = vpack.c.bf16 %v3835_v41, %v3833_v23  ;;  %v3773_v35 = vadd.f32 %v10095_v31, %v3622_v33  ;;  %v3772_v52 = vadd.f32 %v10105_v39, %v3620_v45  ;;  %4644 = vmatpush2.bf16.msra.mxu0 %v8570_v51  ;;  %v10207_v23 = vpop.f32.mrf.mxu1 }
 0x509   : > { %v3625_v50 = vpop.f32.mrf.mxu0  ;;  %4645 = vmatprep.subr.bf16.mxu0 %v8575_v46 }
 0x50a   : > { %v3774_v1 = vadd.f32 %v10105_v39, %v3624_v47  ;;  %v3626_v22 = vadd.f32 %v3625_v50, %v10030_v53  ;;  %4178 = vmatprep.mubr.bf16.mxu1 %v3893_v58  ;;  %v8573_v53 = vld [vmem:[%s11477_s4 + $0x5b0] ss:$8 sps:$4 sm:$0xff]   ;;  %v3837_v18 = vmax.f32 %v3773_v35, 0.0  ;;  %v3836_v6 = vmax.f32 %v3772_v52, 0.0  ;;  %v10220_v58 = vpop.f32.mrf.mxu1 }
 0x50b   : > { %v3629_v11 = vpop.f32.mrf.mxu0  ;;  %4179 = vmatmul.mubr.bf16.gmra.mxu1 %v3892_v49 }
 0x50c   : > { %v3775_v10 = vadd.f32 %v10095_v31, %v3626_v22  ;;  %v3838_v17 = vmax.f32 %v3774_v1, 0.0  ;;  %v3630_v27 = vadd.f32 %v3629_v11, %v10032_v60  ;;  %4646 = vmatpush2.bf16.msra.mxu0 %v8573_v53  ;;  %v8581_v60 = vld [vmem:[%s11477_s4 + $0x594] ss:$8 sps:$4 sm:$0xff]  }
 0x50d   : > { %v3631_v63 = vpop.f32.mrf.mxu0  ;;  %4647 = vmatprep.subr.bf16.mxu0 %v8578_v28 }
 0x50e   : > { %v3839_v13 = vmax.f32 %v3775_v10, 0.0  ;;  %v3632_v26 = vadd.f32 %v3631_v63, %v10034_v54  ;;  %v3894_v43 = vpack.c.bf16 %v3838_v17, %v3836_v6  ;;  %v8576_v54 = vld [vmem:[%s11477_s4 + $0x5a0] ss:$8 sps:$4 sm:$0xff]   ;;  %v10228_v17 = vpop.f32.mrf.mxu1 }
 0x50f   : > { %v3633_v30 = vpop.f32.mrf.mxu0 }
 0x510   : > { %v3634_v32 = vadd.f32 %v3633_v30, %v10036_v16  ;;  %v3895_v34 = vpack.c.bf16 %v3839_v13, %v3837_v18  ;;  %v3777_v41 = vadd.f32 %v10095_v31, %v3632_v26  ;;  %v3776_v16 = vadd.f32 %v10105_v39, %v3630_v27  ;;  %4648 = vmatpush2.bf16.msra.mxu0 %v8576_v54  ;;  %v10235_v28 = vpop.f32.mrf.mxu1 }
 0x511   : > { %v3635_v37 = vpop.f32.mrf.mxu0  ;;  %4649 = vmatprep.subr.bf16.mxu0 %v8581_v60 }
 0x512   : > { %v3778_v33 = vadd.f32 %v10105_v39, %v3634_v32  ;;  %v3636_v38 = vadd.f32 %v3635_v37, %v10038_v55  ;;  %4188 = vmatprep.mubr.bf16.mxu1 %v3895_v34  ;;  %v8579_v55 = vld [vmem:[%s11477_s4 + $0x590] ss:$8 sps:$4 sm:$0xff]   ;;  %v3841_v49 = vmax.f32 %v3777_v41, 0.0  ;;  %v3840_v35 = vmax.f32 %v3776_v16, 0.0 }
 0x513   : > { %v3639_v42 = vpop.f32.mrf.mxu0  ;;  %4189 = vmatmul.mubr.bf16.gmra.mxu1 %v3894_v43 }
 0x514   : > { %v3779_v45 = vadd.f32 %v10095_v31, %v3636_v38  ;;  %v3842_v57 = vmax.f32 %v3778_v33, 0.0  ;;  %v3640_v1 = vadd.f32 %v3639_v42, %v10040_v56  ;;  %4650 = vmatpush2.bf16.msra.mxu0 %v8579_v55  ;;  %v10240_v33 = vpop.f32.mrf.mxu1 }
 0x515   : > { %v3641_v47 = vpop.f32.mrf.mxu0 }
 0x516   : > { %v3843_v50 = vmax.f32 %v3779_v45, 0.0  ;;  %v3642_v51 = vadd.f32 %v3641_v47, %v10042_v59  ;;  %v3896_v11 = vpack.c.bf16 %v3842_v57, %v3840_v35  ;;  %v3780_v59 = vadd.f32 %v10105_v39, %v3640_v1  ;;  %v10247_v57 = vpop.f32.mrf.mxu1 }
 0x517   : > { %v3643_v22 = vpop.f32.mrf.mxu0 }
 0x518   : > { %v3644_v46 = vadd.f32 %v3643_v22, %v10044_v61  ;;  %v3897_v52 = vpack.c.bf16 %v3843_v50, %v3841_v49  ;;  %v3781_v63 = vadd.f32 %v10095_v31, %v3642_v51  ;;  %v3844_v32 = vmax.f32 %v3780_v59, 0.0 }
 0x519   : > { %v3645_v10 = vpop.f32.mrf.mxu0 }
 0x51a   : > { %v3782_v53 = vadd.f32 %v10105_v39, %v3644_v46  ;;  %v3646_v18 = vadd.f32 %v3645_v10, %v10046_v62  ;;  %4198 = vmatprep.mubr.bf16.mxu1 %v3897_v52  ;;  %v3845_v6 = vmax.f32 %v3781_v63, 0.0  ;;  %v10252_v52 = vpop.f32.mrf.mxu1 }
 0x51b   : > { %v3649_v13 = vpop.f32.mrf.mxu0  ;;  %4199 = vmatmul.mubr.bf16.gmra.mxu1 %v3896_v11 }
 0x51c   : > { %v3783_v56 = vadd.f32 %v10095_v31, %v3646_v18  ;;  %v3846_v61 = vmax.f32 %v3782_v53, 0.0  ;;  %v3650_v34 = vadd.f32 %v3649_v13, %v10048_v0  ;;  %v10259_v59 = vpop.f32.mrf.mxu1 }
 0x51d   : > { %v3651_v26 = vpop.f32.mrf.mxu0 }
 0x51e   : > { %v3847_v27 = vmax.f32 %v3783_v56, 0.0  ;;  %v3652_v30 = vadd.f32 %v3651_v26, %v10056_v5  ;;  %v3898_v54 = vpack.c.bf16 %v3846_v61, %v3844_v32  ;;  %v3784_v5 = vadd.f32 %v10105_v39, %v3650_v34 }
 0x51f   : > { %v3653_v43 = vpop.f32.mrf.mxu0 }
 0x520   : > { %v3654_v62 = vadd.f32 %v3653_v43, %v10058_v8  ;;  %v3899_v37 = vpack.c.bf16 %v3847_v27, %v3845_v6  ;;  %v3785_v38 = vadd.f32 %v10095_v31, %v3652_v30  ;;  %v3848_v50 = vmax.f32 %v3784_v5, 0.0  ;;  %v10264_v43 = vpop.f32.mrf.mxu1 }
 0x521   : > { %v3655_v41 = vpop.f32.mrf.mxu0 }
 0x522   : > { %v3786_v60 = vadd.f32 %v10105_v39, %v3654_v62  ;;  %v3656_v16 = vadd.f32 %v3655_v41, %v10066_v12  ;;  %4208 = vmatprep.mubr.bf16.mxu1 %v3899_v37  ;;  %v3849_v47 = vmax.f32 %v3785_v38, 0.0 }
 0x523   : > { %v3659_v42 = vpop.f32.mrf.mxu0  ;;  %4209 = vmatmul.mubr.bf16.gmra.mxu1 %v3898_v54 }
 0x524   : > { %v3787_v0 = vadd.f32 %v10095_v31, %v3656_v16  ;;  %v3850_v45 = vmax.f32 %v3786_v60, 0.0  ;;  %v3660_v51 = vadd.f32 %v3659_v42, %v10068_v14  ;;  %v10271_v60 = vpop.f32.mrf.mxu1 }
 0x525   : > { %v3661_v8 = vpop.f32.mrf.mxu0 }
 0x526   : > { %v3851_v55 = vmax.f32 %v3787_v0, 0.0  ;;  %v3662_v49 = vadd.f32 %v3661_v8, %v10076_v19  ;;  %v3900_v22 = vpack.c.bf16 %v3850_v45, %v3848_v50  ;;  %v3788_v19 = vadd.f32 %v10105_v39, %v3660_v51  ;;  %v10276_v50 = vpop.f32.mrf.mxu1 }
 0x527   : > { %v3663_v35 = vpop.f32.mrf.mxu0 }
 0x528   : > { %v3664_v12 = vadd.f32 %v3663_v35, %v10078_v20  ;;  %v3901_v1 = vpack.c.bf16 %v3851_v55, %v3849_v47  ;;  %v3789_v11 = vadd.f32 %v10095_v31, %v3662_v49  ;;  %v3852_v26 = vmax.f32 %v3788_v19, 0.0 }
 0x529   : > { %v3665_v46 = vpop.f32.mrf.mxu0 }
 0x52a   : > { %v3790_v10 = vadd.f32 %v10105_v39, %v3664_v12  ;;  %v3666_v63 = vadd.f32 %v3665_v46, %v10086_v25  ;;  %4218 = vmatprep.mubr.bf16.mxu1 %v3901_v1  ;;  %v3853_v13 = vmax.f32 %v3789_v11, 0.0  ;;  %v10283_v46 = vpop.f32.mrf.mxu1 }
 0x52b   : > { %v3669_v53 = vpop.f32.mrf.mxu0  ;;  %4219 = vmatmul.mubr.bf16.gmra.mxu1 %v3900_v22 }
 0x52c   : > { %v3791_v14 = vadd.f32 %v10095_v31, %v3666_v63  ;;  %v3854_v18 = vmax.f32 %v3790_v10, 0.0  ;;  %v3670_v6 = vadd.f32 %v3669_v53, %v10091_v29 }
 0x52d   : > { %v3671_v20 = vpop.f32.mrf.mxu0 }
 0x52e   : > { %v3855_v56 = vmax.f32 %v3791_v14, 0.0  ;;  %v3672_v61 = vadd.f32 %v3671_v20, %v10111_v44  ;;  %v3902_v32 = vpack.c.bf16 %v3854_v18, %v3852_v26  ;;  %v3792_v44 = vadd.f32 %v10105_v39, %v3670_v6 }
 0x52f   : > { %v3673_v27 = vpop.f32.mrf.mxu0 }
 0x530   : > { %v3674_v25 = vadd.f32 %v3673_v27, %v10124_v9  ;;  %v3903_v30 = vpack.c.bf16 %v3855_v56, %v3853_v13  ;;  %v3793_v62 = vadd.f32 %v10095_v31, %v3672_v61  ;;  %v3856_v0 = vmax.f32 %v3792_v44, 0.0  ;;  %v3368_v56 = vpop.f32.mrf.mxu1 }
 0x531   : > { %v3675_v34 = vpop.f32.mrf.mxu0 }
 0x532   : > { %v3794_v37 = vadd.f32 %v10105_v39, %v3674_v25  ;;  %v3676_v54 = vadd.f32 %v3675_v34, %v10135_v36  ;;  %4228 = vmatprep.mubr.bf16.mxu1 %v3903_v30  ;;  %v3857_v16 = vmax.f32 %v3793_v62, 0.0  ;;  %v8582_v25 = vld [vmem:[%s11477_s4 + $0x580] ss:$8 sps:$4 sm:$0xff]   ;;  %v3370_v34 = vpop.f32.mrf.mxu1 }
 0x533   : > { %v3679_v41 = vpop.f32.mrf.mxu0  ;;  %4229 = vmatmul.mubr.bf16.gmra.mxu1 %v3902_v32 }
 0x534   : > { %v3795_v29 = vadd.f32 %v10095_v31, %v3676_v54  ;;  %v3858_v38 = vmax.f32 %v3794_v37, 0.0  ;;  %v3680_v45 = vadd.f32 %v3679_v41, %v10148_v48 }
 0x535   : > { %v3681_v9 = vpop.f32.mrf.mxu0 }
 0x536   : > { %v3859_v5 = vmax.f32 %v3795_v29, 0.0  ;;  %v3682_v42 = vadd.f32 %v3681_v9, %v10159_v24  ;;  %v3904_v55 = vpack.c.bf16 %v3858_v38, %v3856_v0  ;;  %v3796_v24 = vadd.f32 %v10105_v39, %v3680_v45 }
 0x537   : > { %v3683_v8 = vpop.f32.mrf.mxu0 }
 0x538   : > { %v3684_v36 = vadd.f32 %v3683_v8, %v10172_v40  ;;  %v3905_v47 = vpack.c.bf16 %v3859_v5, %v3857_v16  ;;  %v3797_v51 = vadd.f32 %v10095_v31, %v3682_v42  ;;  %v3860_v19 = vmax.f32 %v3796_v24, 0.0  ;;  %v3372_v5 = vpop.f32.mrf.mxu1 }
 0x539   : > { %v3685_v49 = vpop.f32.mrf.mxu0 }
 0x53a   : > { %v3798_v35 = vadd.f32 %v10105_v39, %v3684_v36  ;;  %v3686_v12 = vadd.f32 %v3685_v49, %v10183_v15  ;;  %4238 = vmatprep.mubr.bf16.mxu1 %v3905_v47  ;;  %v3861_v11 = vmax.f32 %v3797_v51, 0.0 }
 0x53b   : > { %v3689_v1 = vpop.f32.mrf.mxu0  ;;  %4239 = vmatmul.mubr.bf16.gmra.mxu1 %v3904_v55 }
 0x53c   : > { %v3799_v48 = vadd.f32 %v10095_v31, %v3686_v12  ;;  %v3862_v22 = vmax.f32 %v3798_v35, 0.0  ;;  %v3690_v53 = vadd.f32 %v3689_v1, %v10196_v21  ;;  %v8584_v21 = vld [vmem:[%s11477_s4 + $0x584] ss:$8 sps:$4 sm:$0xff]  }
 0x53d   : > { %v3691_v40 = vpop.f32.mrf.mxu0  ;;  %4651 = vmatprep.subr.bf16.mxu0 %v8584_v21 }
 0x53e   : > { %v3863_v10 = vmax.f32 %v3799_v48, 0.0  ;;  %v3692_v63 = vadd.f32 %v3691_v40, %v10207_v23  ;;  %v3906_v20 = vpack.c.bf16 %v3862_v22, %v3860_v19  ;;  %v3800_v27 = vadd.f32 %v10105_v39, %v3690_v53  ;;  %4652 = vmatpush2.bf16.msra.mxu0 %v8582_v25 }
 0x53f   : > { %v3693_v14 = vpop.f32.mrf.mxu0 }
 0x540   : > { %v3694_v15 = vadd.f32 %v3693_v14, %v10220_v58  ;;  %v3907_v18 = vpack.c.bf16 %v3863_v10, %v3861_v11  ;;  %v3801_v61 = vadd.f32 %v10095_v31, %v3692_v63  ;;  %v3864_v54 = vmax.f32 %v3800_v27, 0.0 }
 0x541   : > { %v3695_v13 = vpop.f32.mrf.mxu0 }
 0x542   : > { %v3802_v26 = vadd.f32 %v10105_v39, %v3694_v15  ;;  %v3696_v6 = vadd.f32 %v3695_v13, %v10228_v17  ;;  %4248 = vmatprep.mubr.bf16.mxu1 %v3907_v18  ;;  %v3865_v17 = vmax.f32 %v3801_v61, 0.0 }
 0x543   : > { %v3699_v23 = vpop.f32.mrf.mxu0  ;;  %4249 = vmatmul.mubr.bf16.gmra.mxu1 %v3906_v20 }
 0x544   : > { %v3803_v58 = vadd.f32 %v10095_v31, %v3696_v6  ;;  %v3866_v30 = vmax.f32 %v3802_v26, 0.0  ;;  %v3700_v44 = vadd.f32 %v3699_v23, %v10235_v28 }
 0x545   : > { %v3701_v32 = vpop.f32.mrf.mxu0 }
 0x546   : > { %v3867_v62 = vmax.f32 %v3803_v58, 0.0  ;;  %v3702_v37 = vadd.f32 %v3701_v32, %v10240_v33  ;;  %v3908_v9 = vpack.c.bf16 %v3866_v30, %v3864_v54  ;;  %v3804_v33 = vadd.f32 %v10105_v39, %v3700_v44 }
 0x547   : > { %v3703_v41 = vpop.f32.mrf.mxu0 }
 0x548   : > { %v3704_v29 = vadd.f32 %v3703_v41, %v10247_v57  ;;  %v3909_v38 = vpack.c.bf16 %v3867_v62, %v3865_v17  ;;  %v3805_v42 = vadd.f32 %v10095_v31, %v3702_v37  ;;  %v3376_v57 = vpop.f32.mrf.mxu1  ;;  %v3868_v35 = vmax.f32 %v3804_v33, 0.0 }
 0x549   : > { %v3705_v16 = vpop.f32.mrf.mxu0 }
 0x54a   : > { %v3806_v0 = vadd.f32 %v10105_v39, %v3704_v29  ;;  %v3706_v45 = vadd.f32 %v3705_v16, %v10252_v52  ;;  %4258 = vmatprep.mubr.bf16.mxu1 %v3909_v38  ;;  %v3869_v55 = vmax.f32 %v3805_v42, 0.0  ;;  %v3378_v40 = vpop.f32.mrf.mxu1 }
 0x54b   : > { %v3709_v8 = vpop.f32.mrf.mxu0  ;;  %4259 = vmatmul.mubr.bf16.gmra.mxu1 %v3908_v9 }
 0x54c   : > { %v3807_v28 = vadd.f32 %v10095_v31, %v3706_v45  ;;  %v3870_v36 = vmax.f32 %v3806_v0, 0.0  ;;  %v3710_v12 = vadd.f32 %v3709_v8, %v10259_v59 }
 0x54d   : > { %v3711_v47 = vpop.f32.mrf.mxu0 }
 0x54e   : > { %v3871_v49 = vmax.f32 %v3807_v28, 0.0  ;;  %v3712_v51 = vadd.f32 %v3711_v47, %v10264_v43  ;;  %v3910_v48 = vpack.c.bf16 %v3870_v36, %v3868_v35  ;;  %v3808_v19 = vadd.f32 %v10105_v39, %v3710_v12 }
 0x54f   : > { %v3713_v24 = vpop.f32.mrf.mxu0 }
 0x550   : > { %v3714_v52 = vadd.f32 %v3713_v24, %v10271_v60  ;;  %v3911_v1 = vpack.c.bf16 %v3871_v49, %v3869_v55  ;;  %v3809_v11 = vadd.f32 %v10095_v31, %v3712_v51  ;;  %v3380_v60 = vpop.f32.mrf.mxu1  ;;  %v3872_v13 = vmax.f32 %v3808_v19, 0.0 }
 0x551   : > { %v3715_v22 = vpop.f32.mrf.mxu0 }
 0x552   : > { %v3810_v10 = vadd.f32 %v10105_v39, %v3714_v52  ;;  %v3716_v63 = vadd.f32 %v3715_v22, %v10276_v50  ;;  %4268 = vmatprep.mubr.bf16.mxu1 %v3911_v1  ;;  %v3873_v15 = vmax.f32 %v3809_v11, 0.0  ;;  %v3382_v21 = vpop.f32.mrf.mxu1 }
 0x553   : > { %v3719_v43 = vpop.f32.mrf.mxu0  ;;  %4269 = vmatmul.mubr.bf16.gmra.mxu1 %v3910_v48 }
 0x554   : > { %v3811_v59 = vadd.f32 %v10095_v31, %v3716_v63  ;;  %v3874_v53 = vmax.f32 %v3810_v10, 0.0  ;;  %v3720_v61 = vadd.f32 %v3719_v43, %v10283_v46  ;;  %v3386_v46 = vpop.f32.mrf.mxu1 }
 0x555   : > { %v3721_v14 = vpop.f32.mrf.mxu0 }
 0x556   : > { %v3875_v18 = vmax.f32 %v3811_v59, 0.0  ;;  %v3722_v20 = vadd.f32 %v3721_v14, %v3368_v56  ;;  %v3912_v50 = vpack.c.bf16 %v3874_v53, %v3872_v13  ;;  %v3812_v32 = vadd.f32 %v10105_v39, %v3720_v61  ;;  %v8585_v61 = vld [vmem:[%s11482_s9 + $0xa8] ss:$12 sps:$4 sm:$0xff]  }
 0x557   : > { %v3723_v26 = vpop.f32.mrf.mxu0 }
 0x558   : > { %v3724_v6 = vadd.f32 %v3723_v26, %v3370_v34  ;;  %v3913_v27 = vpack.c.bf16 %v3875_v18, %v3873_v15  ;;  %v3813_v58 = vadd.f32 %v10095_v31, %v3722_v20  ;;  %v3876_v41 = vmax.f32 %v3812_v32, 0.0  ;;  %v8587_v26 = vld [vmem:[%s11482_s9 + $0xac] ss:$12 sps:$4 sm:$0xff]  }
 0x559   : > { %v3725_v23 = vpop.f32.mrf.mxu0  ;;  %5247 = vmatprep.subr.bf16.mxu1 %v8587_v26  ;;  %v8633_v26 = vld [vmem:[%s11482_s9 + $0x128] ss:$12 sps:$4 sm:$0xff]  }
 0x55a   : > { %v3814_v25 = vadd.f32 %v10105_v39, %v3724_v6  ;;  %v3726_v30 = vadd.f32 %v3725_v23, %v3372_v5  ;;  %4278 = vmatprep.mubr.bf16.mxu1 %v3913_v27  ;;  %v3877_v34 = vmax.f32 %v3813_v58, 0.0  ;;  %v3388_v5 = vpop.f32.mrf.mxu1  ;;  %5248 = vmatpush1.bf16.msra.mxu1 %v8585_v61  ;;  %v8591_v6 = vld [vmem:[%s11482_s9 + $0x78] ss:$12 sps:$4 sm:$0xff]   ;;  %v8593_v27 = vld [vmem:[%s11482_s9 + $0x7c] ss:$12 sps:$4 sm:$0xff]  }
 0x55b   : > { %v3729_v17 = vpop.f32.mrf.mxu0  ;;  %4279 = vmatmul.mubr.bf16.gmra.mxu1 %v3912_v50  ;;  %v8594_v50 = vld [vmem:[%s11482_s9 + $0x60] ss:$12 sps:$4 sm:$0xff]   ;;  %v8596_v23 = vld [vmem:[%s11482_s9 + $0x64] ss:$12 sps:$4 sm:$0xff]  }
 0x55c   : > { %v3815_v56 = vadd.f32 %v10095_v31, %v3726_v30  ;;  %v3878_v62 = vmax.f32 %v3814_v25, 0.0  ;;  %v3730_v29 = vadd.f32 %v3729_v17, %v3376_v57  ;;  %v3390_v57 = vpop.f32.mrf.mxu1  ;;  %v8599_v58 = vld [vmem:[%s11482_s9 + $0x4c] ss:$12 sps:$4 sm:$0xff]   ;;  %v7650_v25 = vld [vmem:[%s11478_s5 + $0x8] sm:$0x3] }
 0x55d   : > { %v3731_v37 = vpop.f32.mrf.mxu0  ;;  %v10362_v32 = vrot.slane %v7650_v25, %v9102_v4  ;;  %v8600_v17 = vld [vmem:[%s11482_s9 + $0x30] ss:$12 sps:$4 sm:$0xff]  }
 0x55e   : > { %v3879_v54 = vmax.f32 %v3815_v56, 0.0  ;;  %v3732_v44 = vadd.f32 %v3731_v37, %v3378_v40  ;;  %v3914_v42 = vpack.c.bf16 %v3878_v62, %v3876_v41  ;;  %v3816_v28 = vadd.f32 %v10105_v39, %v3730_v29  ;;  %v3392_v11 = vpop.f32.mrf.mxu1  ;;  %v8602_v56 = vld [vmem:[%s11482_s9 + $0x34] ss:$12 sps:$4 sm:$0xff]   ;;  %v8603_v29 = vld [vmem:[%s11482_s9 + $0x18] ss:$12 sps:$4 sm:$0xff]  }
 0x55f   : > { %v3733_v38 = vpop.f32.mrf.mxu0  ;;  %v10371_v62 = vrot.slane %v7650_v25, %v9111_v7 }
 0x560   : > { %v3734_v9 = vadd.f32 %v3733_v38, %v3380_v60  ;;  %v3915_v16 = vpack.c.bf16 %v3879_v54, %v3877_v34  ;;  %v3817_v45 = vadd.f32 %v10095_v31, %v3732_v44  ;;  %v3880_v24 = vmax.f32 %v3816_v28, 0.0  ;;  %v8605_v38 = vld [vmem:[%s11482_s9 + $0x1c] ss:$12 sps:$4 sm:$0xff]  }
 0x561   : > { %v3735_v0 = vpop.f32.mrf.mxu0 }
 0x562   : > { %v3818_v33 = vadd.f32 %v10105_v39, %v3734_v9  ;;  %v3736_v8 = vadd.f32 %v3735_v0, %v3382_v21  ;;  %4288 = vmatprep.mubr.bf16.mxu1 %v3915_v16  ;;  %v3881_v51 = vmax.f32 %v3817_v45, 0.0  ;;  %v8597_v21 = vld [vmem:[%s11482_s9 + $0x48] ss:$12 sps:$4 sm:$0xff]   ;;  %v8608_v16 = vld [vmem:[%s11482_s9 + $0x4] ss:$12 sps:$4 sm:$0xff]  }
 0x563   : > { %v3739_v36 = vpop.f32.mrf.mxu0  ;;  %4289 = vmatmul.mubr.bf16.gmra.mxu1 %v3914_v42 }
 0x564   : > { %v3819_v47 = vadd.f32 %v10095_v31, %v3736_v8  ;;  %v3882_v55 = vmax.f32 %v3818_v33, 0.0  ;;  %v3740_v52 = vadd.f32 %v3739_v36, %v3386_v46  ;;  %v8606_v33 = vld [vmem:[%s11482_s9] ss:$12 sps:$4 sm:$0xff]   ;;  %v8615_v8 = vld [vmem:[%s11482_s9 + $0x170] ss:$12 sps:$4 sm:$0xff]  }
 0x565   : > { %v3741_v49 = vpop.f32.mrf.mxu0  ;;  %7888 = vmatprep.subr.bf16.mxu0 %v8615_v8 }
 0x566   : > { %v3883_v35 = vmax.f32 %v3819_v47, 0.0  ;;  %v3742_v12 = vadd.f32 %v3741_v49, %v3388_v5  ;;  %v3916_v40 = vpack.c.bf16 %v3882_v55, %v3880_v24  ;;  %v3820_v59 = vadd.f32 %v10105_v39, %v3740_v52  ;;  %v8611_v47 = vld [vmem:[%s11482_s9 + $0x16c] ss:$12 sps:$4 sm:$0xff]   ;;  %v8609_v52 = vld [vmem:[%s11482_s9 + $0x168] ss:$12 sps:$4 sm:$0xff]  }
 0x567   : > { %v3743_v1 = vpop.f32.mrf.mxu0 }
 0x568   : > { %v3744_v48 = vadd.f32 %v3743_v1, %v3390_v57  ;;  %v3917_v22 = vpack.c.bf16 %v3883_v35, %v3881_v51  ;;  %v3821_v63 = vadd.f32 %v10095_v31, %v3742_v12  ;;  %v3884_v18 = vmax.f32 %v3820_v59, 0.0  ;;  %v8616_v57 = vld [vmem:[%s11482_s9 + $0xb0] ss:$12 sps:$4 sm:$0xff]   ;;  %v8623_v35 = vld [vmem:[%s11482_s9 + $0x158] ss:$12 sps:$4 sm:$0xff]  }
 0x569   : > { %v3745_v10 = vpop.f32.mrf.mxu0 }
 0x56a   : > { %v3822_v19 = vadd.f32 %v10105_v39, %v3744_v48  ;;  %v3746_v43 = vadd.f32 %v3745_v10, %v3392_v11  ;;  %4298 = vmatprep.mubr.bf16.mxu1 %v3917_v22  ;;  %v3885_v60 = vmax.f32 %v3821_v63, 0.0  ;;  %v8590_v39 = vld [vmem:[%s11482_s9 + $0x94] ss:$12 sps:$4 sm:$0xff]   ;;  %v8624_v11 = vld [vmem:[%s11482_s9 + $0x98] ss:$12 sps:$4 sm:$0xff]  }
 0x56b   : > { %4299 = vmatmul.mubr.bf16.gmra.mxu1 %v3916_v40  ;;  %5249 = vmatprep.subr.bf16.mxu1 %v8590_v39  ;;  %v8614_v22 = vld [vmem:[%s11482_s9 + $0x154] ss:$12 sps:$4 sm:$0xff]  }
 0x56c   : > { %v3823_v53 = vadd.f32 %v10095_v31, %v3746_v43  ;;  %v3886_v14 = vmax.f32 %v3822_v19, 0.0  ;;  %v8588_v31 = vld [vmem:[%s11482_s9 + $0x90] ss:$12 sps:$4 sm:$0xff]   ;;  %v8631_v19 = vld [vmem:[%s11482_s9 + $0x140] ss:$12 sps:$4 sm:$0xff]  }
 0x56d   : > { %5250 = vmatpush1.bf16.msra.mxu1 %v8588_v31 }
 0x56e   : > { %v3887_v15 = vmax.f32 %v3823_v53, 0.0  ;;  %v3918_v13 = vpack.c.bf16 %v3886_v14, %v3884_v18  ;;  %5251 = vmatprep.subr.bf16.mxu1 %v8593_v27  ;;  %v8612_v53 = vld [vmem:[%s11482_s9 + $0x150] ss:$12 sps:$4 sm:$0xff]  }
 0x570   : > { %v3919_v20 = vpack.c.bf16 %v3887_v15, %v3885_v60  ;;  %v8619_v15 = vld [vmem:[%s11482_s9 + $0x13c] ss:$12 sps:$4 sm:$0xff]  }
 0x571   : > { %5252 = vmatpush1.bf16.msra.mxu1 %v8591_v6  ;;  %v8617_v6 = vld [vmem:[%s11482_s9 + $0x138] ss:$12 sps:$4 sm:$0xff]  }
 0x572   : > { %4308 = vmatprep.mubr.bf16.mxu1 %v3919_v20  ;;  %5253 = vmatprep.subr.bf16.mxu1 %v8596_v23  ;;  %v8632_v20 = vld [vmem:[%s11482_s9 + $0x80] ss:$12 sps:$4 sm:$0xff]   ;;  %v8622_v23 = vld [vmem:[%s11482_s9 + $0x124] ss:$12 sps:$4 sm:$0xff]  }
 0x573   : > { %4309 = vmatmul.mubr.bf16.gmra.mxu1 %v3918_v13 }
 0x575   : > { %5254 = vmatpush1.bf16.msra.mxu1 %v8594_v50 }
 0x576   : > { %5255 = vmatprep.subr.bf16.mxu1 %v8599_v58  ;;  %v8634_v58 = vld [vmem:[%s11482_s9 + $0x68] ss:$12 sps:$4 sm:$0xff]  }
 0x579   : > { %5256 = vmatpush1.bf16.msra.mxu1 %v8597_v21 }
 0x57a   : > { %5257 = vmatprep.subr.bf16.mxu1 %v8602_v56 }
 0x57d   : > { %5258 = vmatpush1.bf16.msra.mxu1 %v8600_v17  ;;  %v8638_v17 = vld [vmem:[%s11482_s9 + $0x110] ss:$12 sps:$4 sm:$0xff]  }
 0x57e   : > { %5259 = vmatprep.subr.bf16.mxu1 %v8605_v38 }
 0x581   : > { %5260 = vmatpush1.bf16.msra.mxu1 %v8603_v29  ;;  %v8639_v29 = vld [vmem:[%s11482_s9 + $0x50] ss:$12 sps:$4 sm:$0xff]  }
 0x582   : > { %5261 = vmatprep.subr.bf16.mxu1 %v8608_v16 }
 0x585   : > { %5262 = vmatpush1.bf16.msra.mxu1 %v8606_v33  ;;  %v8630_v33 = vld [vmem:[%s11482_s9 + $0xf4] ss:$12 sps:$4 sm:$0xff]  }
 0x586   : > { %5263 = vmatprep.subr.bf16.mxu1 %v8611_v47 }
 0x589   : > { %5264 = vmatpush2.bf16.msra.mxu1 %v8609_v52 }
 0x58a   : > { %5265 = vmatprep.subr.bf16.mxu1 %v8614_v22  ;;  %v8635_v22 = vld [vmem:[%s11482_s9 + $0xd8] ss:$12 sps:$4 sm:$0xff]  }
 0x58d   : > { %5266 = vmatpush2.bf16.msra.mxu1 %v8612_v53 }
 0x58e   : > { %5267 = vmatprep.subr.bf16.mxu1 %v8619_v15 }
 0x591   : > { %5268 = vmatpush2.bf16.msra.mxu1 %v8617_v6 }
 0x592   : > { %5269 = vmatprep.subr.bf16.mxu1 %v8622_v23 }
 0x5bb   : > { %v4160_v30 = vpop.f32.mrf.mxu1 }
 0x5bc   : > { %v4161_v44 = vadd.f32 %v4160_v30, %v10371_v62 }
 0x5bd   : > { %v4162_v46 = vpop.f32.mrf.mxu1 }
 0x5be   : > { %v4163_v34 = vadd.f32 %v4162_v46, %v10362_v32  ;;  %v4319_v28 = vmax.f32 %v4161_v44, 0.0  ;;  %v8627_v44 = vld [vmem:[%s11482_s9 + $0x10c] ss:$12 sps:$4 sm:$0xff]  }
 0x5bf   : > { %v4164_v37 = vpop.f32.mrf.mxu1 }
 0x5c0   : > { %v4165_v54 = vadd.f32 %v4164_v37, %v10371_v62  ;;  %v4320_v0 = vmax.f32 %v4163_v34, 0.0  ;;  %v8620_v37 = vld [vmem:[%s11482_s9 + $0x120] ss:$12 sps:$4 sm:$0xff]  }
 0x5c1   : > { %v4166_v41 = vpop.f32.mrf.mxu1  ;;  %5270 = vmatpush2.bf16.msra.mxu1 %v8620_v37 }
 0x5c2   : > { %v4167_v9 = vadd.f32 %v4166_v41, %v10362_v32  ;;  %v4321_v42 = vmax.f32 %v4165_v54, 0.0  ;;  %5271 = vmatprep.subr.bf16.mxu1 %v8627_v44 }
 0x5c3   : > { %v4170_v5 = vpop.f32.mrf.mxu1 }
 0x5c4   : > { %v4322_v45 = vmax.f32 %v4167_v9, 0.0  ;;  %v4383_v49 = vpack.c.bf16 %v4321_v42, %v4319_v28  ;;  %v4171_v1 = vadd.f32 %v4170_v5, %v10371_v62  ;;  %v8625_v5 = vld [vmem:[%s11482_s9 + $0x108] ss:$12 sps:$4 sm:$0xff]  }
 0x5c5   : > { %v4172_v36 = vpop.f32.mrf.mxu1  ;;  %5272 = vmatpush2.bf16.msra.mxu1 %v8625_v5 }
 0x5c6   : > { %v4384_v55 = vpack.c.bf16 %v4322_v45, %v4320_v0  ;;  %v4173_v12 = vadd.f32 %v4172_v36, %v10362_v32  ;;  %v4323_v14 = vmax.f32 %v4171_v1, 0.0  ;;  %5273 = vmatprep.subr.bf16.mxu1 %v8630_v33 }
 0x5c7   : > { %v4174_v51 = vpop.f32.mrf.mxu1 }
 0x5c8   : > { %v4175_v24 = vadd.f32 %v4174_v51, %v10371_v62  ;;  %4653 = vmatprep.mubr.bf16.mxu0 %v4384_v55  ;;  %v4324_v43 = vmax.f32 %v4173_v12, 0.0 }
 0x5c9   : > { %v4176_v48 = vpop.f32.mrf.mxu1  ;;  %4654 = vmatmul.mubr.bf16.vlgmr.msra.gmra.mxu0 %v4383_v49 }
 0x5ca   : > { %v4177_v40 = vadd.f32 %v4176_v48, %v10362_v32  ;;  %7889 = vmatpush3.bf16.msra.mxu0 %v8616_v57  ;;  %v4325_v10 = vmax.f32 %v4175_v24, 0.0  ;;  %v8628_v57 = vld [vmem:[%s11482_s9 + $0xf0] ss:$12 sps:$4 sm:$0xff]  }
 0x5cb   : > { %v4180_v63 = vpop.f32.mrf.mxu1  ;;  %7890 = vmatprep.subr.bf16.mxu0 %v8623_v35  ;;  %v8637_v35 = vld [vmem:[%s11482_s9 + $0xdc] ss:$12 sps:$4 sm:$0xff]   ;;  %5274 = vmatpush2.bf16.msra.mxu1 %v8628_v57 }
 0x5cc   : > { %v4326_v59 = vmax.f32 %v4177_v40, 0.0  ;;  %v4385_v13 = vpack.c.bf16 %v4325_v10, %v4323_v14  ;;  %v4181_v27 = vadd.f32 %v4180_v63, %v10371_v62  ;;  %5275 = vmatprep.subr.bf16.mxu1 %v8637_v35 }
 0x5cd   : > { %v4182_v60 = vpop.f32.mrf.mxu1 }
 0x5ce   : > { %v4386_v18 = vpack.c.bf16 %v4326_v59, %v4324_v43  ;;  %7891 = vmatpush3.bf16.msra.mxu0 %v8624_v11  ;;  %v4183_v31 = vadd.f32 %v4182_v60, %v10362_v32  ;;  %v4327_v34 = vmax.f32 %v4181_v27, 0.0 }
 0x5cf   : > { %v4184_v61 = vpop.f32.mrf.mxu1  ;;  %7892 = vmatprep.subr.bf16.mxu0 %v8631_v19  ;;  %5276 = vmatpush2.bf16.msra.mxu1 %v8635_v22 }
 0x5d0   : > { %v4185_v39 = vadd.f32 %v4184_v61, %v10371_v62  ;;  %4663 = vmatprep.mubr.bf16.mxu0 %v4386_v18  ;;  %v4328_v56 = vmax.f32 %v4183_v31, 0.0 }
 0x5d1   : > { %v4186_v50 = vpop.f32.mrf.mxu1  ;;  %4664 = vmatmul.mubr.bf16.gmra.mxu0 %v4385_v13 }
 0x5d2   : > { %v4187_v21 = vadd.f32 %v4186_v50, %v10362_v32  ;;  %7893 = vmatpush3.bf16.msra.mxu0 %v8632_v20  ;;  %v4329_v25 = vmax.f32 %v4185_v39, 0.0 }
 0x5d3   : > { %v4190_v30 = vpop.f32.mrf.mxu1  ;;  %7894 = vmatprep.subr.bf16.mxu0 %v8633_v26 }
 0x5d4   : > { %v4330_v46 = vmax.f32 %v4187_v21, 0.0  ;;  %v4387_v38 = vpack.c.bf16 %v4329_v25, %v4327_v34  ;;  %v4191_v0 = vadd.f32 %v4190_v30, %v10371_v62 }
 0x5d5   : > { %v4192_v54 = vpop.f32.mrf.mxu1 }
 0x5d6   : > { %v4388_v41 = vpack.c.bf16 %v4330_v46, %v4328_v56  ;;  %7895 = vmatpush3.bf16.msra.mxu0 %v8634_v58  ;;  %v4193_v16 = vadd.f32 %v4192_v54, %v10362_v32  ;;  %v4331_v49 = vmax.f32 %v4191_v0, 0.0 }
 0x5d7   : > { %v4194_v9 = vpop.f32.mrf.mxu1  ;;  %7896 = vmatprep.subr.bf16.mxu0 %v8638_v17 }
 0x5d8   : > { %v4195_v42 = vadd.f32 %v4194_v9, %v10371_v62  ;;  %4673 = vmatprep.mubr.bf16.mxu0 %v4388_v41  ;;  %v4332_v47 = vmax.f32 %v4193_v16, 0.0 }
 0x5d9   : > { %v4196_v45 = vpop.f32.mrf.mxu1  ;;  %4674 = vmatmul.mubr.bf16.gmra.mxu0 %v4387_v38 }
 0x5da   : > { %v4197_v8 = vadd.f32 %v4196_v45, %v10362_v32  ;;  %7897 = vmatpush3.bf16.msra.mxu0 %v8639_v29  ;;  %v4333_v28 = vmax.f32 %v4195_v42, 0.0 }
 0x5db   : > { %v4200_v36 = vpop.f32.mrf.mxu1 }
 0x5dc   : > { %v4334_v55 = vmax.f32 %v4197_v8, 0.0  ;;  %v4389_v24 = vpack.c.bf16 %v4333_v28, %v4331_v49  ;;  %v4201_v40 = vadd.f32 %v4200_v36, %v10371_v62 }
 0x5dd   : > { %v4202_v51 = vpop.f32.mrf.mxu1 }
 0x5de   : > { %v4390_v12 = vpack.c.bf16 %v4334_v55, %v4332_v47  ;;  %v4203_v1 = vadd.f32 %v4202_v51, %v10362_v32  ;;  %v4335_v53 = vmax.f32 %v4201_v40, 0.0 }
 0x5df   : > { %v4204_v52 = vpop.f32.mrf.mxu1 }
 0x5e0   : > { %v4205_v48 = vadd.f32 %v4204_v52, %v10371_v62  ;;  %4683 = vmatprep.mubr.bf16.mxu0 %v4390_v12  ;;  %v4336_v43 = vmax.f32 %v4203_v1, 0.0 }
 0x5e1   : > { %v4206_v11 = vpop.f32.mrf.mxu1  ;;  %4684 = vmatmul.mubr.bf16.gmra.mxu0 %v4389_v24 }
 0x5e2   : > { %v4207_v10 = vadd.f32 %v4206_v11, %v10362_v32  ;;  %v4337_v63 = vmax.f32 %v4205_v48, 0.0 }
 0x5e3   : > { %v4210_v19 = vpop.f32.mrf.mxu1 }
 0x5e4   : > { %v4338_v59 = vmax.f32 %v4207_v10, 0.0  ;;  %v4391_v15 = vpack.c.bf16 %v4337_v63, %v4335_v53  ;;  %v4211_v61 = vadd.f32 %v4210_v19, %v10371_v62 }
 0x5e5   : > { %v4212_v14 = vpop.f32.mrf.mxu1 }
 0x5e6   : > { %v4392_v60 = vpack.c.bf16 %v4338_v59, %v4336_v43  ;;  %v4213_v20 = vadd.f32 %v4212_v14, %v10362_v32  ;;  %v4339_v23 = vmax.f32 %v4211_v61, 0.0  ;;  %v8640_v61 = vld [vmem:[%s11482_s9 + $0xf8] ss:$12 sps:$4 sm:$0xff]  }
 0x5e7   : > { %v4214_v18 = vpop.f32.mrf.mxu1  ;;  %7898 = vmatprep.subr.bf16.mxu0 %v8640_v61 }
 0x5e8   : > { %v4215_v13 = vadd.f32 %v4214_v18, %v10371_v62  ;;  %4693 = vmatprep.mubr.bf16.mxu0 %v4392_v60  ;;  %v4340_v27 = vmax.f32 %v4213_v20, 0.0 }
 0x5e9   : > { %v4216_v26 = vpop.f32.mrf.mxu1  ;;  %4694 = vmatmul.mubr.bf16.gmra.mxu0 %v4391_v15 }
 0x5ea   : > { %v4217_v31 = vadd.f32 %v4216_v26, %v10362_v32  ;;  %v4341_v39 = vmax.f32 %v4215_v13, 0.0 }
 0x5eb   : > { %v4220_v6 = vpop.f32.mrf.mxu1 }
 0x5ec   : > { %v4342_v50 = vmax.f32 %v4217_v31, 0.0  ;;  %v4393_v25 = vpack.c.bf16 %v4341_v39, %v4339_v23  ;;  %v4221_v46 = vadd.f32 %v4220_v6, %v10371_v62  ;;  %v8641_v31 = vld [vmem:[%s11482_s9 + $0x38] ss:$12 sps:$4 sm:$0xff]  }
 0x5ed   : > { %v4222_v21 = vpop.f32.mrf.mxu1  ;;  %7899 = vmatpush3.bf16.msra.mxu0 %v8641_v31 }
 0x5ee   : > { %v4394_v58 = vpack.c.bf16 %v4342_v50, %v4340_v27  ;;  %v4223_v17 = vadd.f32 %v4222_v21, %v10362_v32  ;;  %v4343_v38 = vmax.f32 %v4221_v46, 0.0 }
 0x5ef   : > { %v4224_v30 = vpop.f32.mrf.mxu1 }
 0x5f0   : > { %v4225_v56 = vadd.f32 %v4224_v30, %v10371_v62  ;;  %4703 = vmatprep.mubr.bf16.mxu0 %v4394_v58  ;;  %v4344_v41 = vmax.f32 %v4223_v17, 0.0  ;;  %v8645_v58 = vld [vmem:[%s11482_s9 + $0xe0] ss:$12 sps:$4 sm:$0xff]  }
 0x5f1   : > { %v4226_v37 = vpop.f32.mrf.mxu1  ;;  %4704 = vmatmul.mubr.bf16.gmra.mxu0 %v4393_v25  ;;  %v8646_v30 = vld [vmem:[%s11482_s9 + $0x20] ss:$12 sps:$4 sm:$0xff]   ;;  %7900 = vmatprep.subr.bf16.mxu0 %v8645_v58 }
 0x5f2   : > { %v4227_v34 = vadd.f32 %v4226_v37, %v10362_v32  ;;  %v4345_v54 = vmax.f32 %v4225_v56, 0.0  ;;  %7901 = vmatpush3.bf16.msra.mxu0 %v8646_v30 }
 0x5f3   : > { %v4230_v44 = vpop.f32.mrf.mxu1 }
 0x5f4   : > { %v4346_v29 = vmax.f32 %v4227_v34, 0.0  ;;  %v4395_v42 = vpack.c.bf16 %v4345_v54, %v4343_v38  ;;  %v4231_v33 = vadd.f32 %v4230_v44, %v10371_v62  ;;  %v8644_v44 = vld [vmem:[%s11482_s9 + $0xc4] ss:$12 sps:$4 sm:$0xff]   ;;  %v8642_v38 = vld [vmem:[%s11482_s9 + $0xc0] ss:$12 sps:$4 sm:$0xff]  }
 0x5f5   : > { %v4232_v9 = vpop.f32.mrf.mxu1  ;;  %5277 = vmatprep.subr.bf16.mxu1 %v8644_v44 }
 0x5f6   : > { %v4396_v16 = vpack.c.bf16 %v4346_v29, %v4344_v41  ;;  %v4233_v0 = vadd.f32 %v4232_v9, %v10362_v32  ;;  %v4347_v49 = vmax.f32 %v4231_v33, 0.0  ;;  %v8647_v41 = vld [vmem:[%s11482_s9 + $0xc8] ss:$12 sps:$4 sm:$0xff]   ;;  %5278 = vmatpush2.bf16.msra.mxu1 %v8642_v38 }
 0x5f7   : > { %v4234_v5 = vpop.f32.mrf.mxu1  ;;  %v8648_v9 = vld [vmem:[%s11482_s9 + $0x8] ss:$12 sps:$4 sm:$0xff]   ;;  %7902 = vmatprep.subr.bf16.mxu0 %v8647_v41 }
 0x5f8   : > { %v4235_v45 = vadd.f32 %v4234_v5, %v10371_v62  ;;  %4713 = vmatprep.mubr.bf16.mxu0 %v4396_v16  ;;  %v4348_v55 = vmax.f32 %v4233_v0, 0.0  ;;  %7903 = vmatpush3.bf16.msra.mxu0 %v8648_v9 }
 0x5f9   : > { %v4236_v8 = vpop.f32.mrf.mxu1  ;;  %4714 = vmatmul.mubr.bf16.gmra.mxu0 %v4395_v42 }
 0x5fa   : > { %v4237_v28 = vadd.f32 %v4236_v8, %v10362_v32  ;;  %v4349_v36 = vmax.f32 %v4235_v45, 0.0 }
 0x5fb   : > { %v4240_v47 = vpop.f32.mrf.mxu1 }
 0x5fc   : > { %v4350_v57 = vmax.f32 %v4237_v28, 0.0  ;;  %v4397_v12 = vpack.c.bf16 %v4349_v36, %v4347_v49  ;;  %v4241_v48 = vadd.f32 %v4240_v47, %v10371_v62 }
 0x5fd   : > { %v4242_v51 = vpop.f32.mrf.mxu1 }
 0x5fe   : > { %v4398_v35 = vpack.c.bf16 %v4350_v57, %v4348_v55  ;;  %v4243_v52 = vadd.f32 %v4242_v51, %v10362_v32  ;;  %v4351_v43 = vmax.f32 %v4241_v48, 0.0 }
 0x5ff   : > { %v4244_v24 = vpop.f32.mrf.mxu1 }
 0x600   : > { %v4245_v1 = vadd.f32 %v4244_v24, %v10371_v62  ;;  %4723 = vmatprep.mubr.bf16.mxu0 %v4398_v35  ;;  %v4352_v63 = vmax.f32 %v4243_v52, 0.0 }
 0x601   : > { %v4246_v22 = vpop.f32.mrf.mxu1  ;;  %4724 = vmatmul.mubr.bf16.gmra.mxu0 %v4397_v12 }
 0x602   : > { %v4247_v40 = vadd.f32 %v4246_v22, %v10362_v32  ;;  %v4353_v11 = vmax.f32 %v4245_v1, 0.0 }
 0x603   : > { %v4250_v10 = vpop.f32.mrf.mxu1 }
 0x604   : > { %v4354_v19 = vmax.f32 %v4247_v40, 0.0  ;;  %v4399_v14 = vpack.c.bf16 %v4353_v11, %v4351_v43  ;;  %v4251_v20 = vadd.f32 %v4250_v10, %v10371_v62 }
 0x605   : > { %v4252_v59 = vpop.f32.mrf.mxu1 }
 0x606   : > { %v4400_v53 = vpack.c.bf16 %v4354_v19, %v4352_v63  ;;  %v4253_v15 = vadd.f32 %v4252_v59, %v10362_v32  ;;  %v4355_v23 = vmax.f32 %v4251_v20, 0.0 }
 0x607   : > { %v4254_v60 = vpop.f32.mrf.mxu1 }
 0x608   : > { %v4255_v18 = vadd.f32 %v4254_v60, %v10371_v62  ;;  %4733 = vmatprep.mubr.bf16.mxu0 %v4400_v53  ;;  %v4356_v27 = vmax.f32 %v4253_v15, 0.0 }
 0x609   : > { %v4256_v13 = vpop.f32.mrf.mxu1  ;;  %4734 = vmatmul.mubr.bf16.gmra.mxu0 %v4399_v14 }
 0x60a   : > { %v4257_v26 = vadd.f32 %v4256_v13, %v10362_v32  ;;  %v4357_v39 = vmax.f32 %v4255_v18, 0.0 }
 0x60b   : > { %v4260_v6 = vpop.f32.mrf.mxu1 }
 0x60c   : > { %v4358_v50 = vmax.f32 %v4257_v26, 0.0  ;;  %v4401_v17 = vpack.c.bf16 %v4357_v39, %v4355_v23  ;;  %v4261_v34 = vadd.f32 %v4260_v6, %v10371_v62 }
 0x60d   : > { %v4262_v21 = vpop.f32.mrf.mxu1 }
 0x60e   : > { %v4402_v25 = vpack.c.bf16 %v4358_v50, %v4356_v27  ;;  %v4263_v46 = vadd.f32 %v4262_v21, %v10362_v32  ;;  %v4359_v45 = vmax.f32 %v4261_v34, 0.0 }
 0x60f   : > { %v4264_v56 = vpop.f32.mrf.mxu1 }
 0x610   : > { %v4265_v37 = vadd.f32 %v4264_v56, %v10371_v62  ;;  %4743 = vmatprep.mubr.bf16.mxu0 %v4402_v25  ;;  %v4360_v5 = vmax.f32 %v4263_v46, 0.0 }
 0x611   : > { %v4266_v54 = vpop.f32.mrf.mxu1  ;;  %4744 = vmatmul.mubr.bf16.gmra.mxu0 %v4401_v17 }
 0x612   : > { %v4267_v29 = vadd.f32 %v4266_v54, %v10362_v32  ;;  %v4361_v16 = vmax.f32 %v4265_v37, 0.0 }
 0x613   : > { %v4270_v42 = vpop.f32.mrf.mxu1 }
 0x614   : > { %v4362_v0 = vmax.f32 %v4267_v29, 0.0  ;;  %v4403_v28 = vpack.c.bf16 %v4361_v16, %v4359_v45  ;;  %v4271_v57 = vadd.f32 %v4270_v42, %v10371_v62 }
 0x615   : > { %v4272_v33 = vpop.f32.mrf.mxu1 }
 0x616   : > { %v4404_v8 = vpack.c.bf16 %v4362_v0, %v4360_v5  ;;  %v4273_v47 = vadd.f32 %v4272_v33, %v10362_v32  ;;  %v4363_v1 = vmax.f32 %v4271_v57, 0.0 }
 0x617   : > { %v4274_v36 = vpop.f32.mrf.mxu1 }
 0x618   : > { %v4275_v55 = vadd.f32 %v4274_v36, %v10371_v62  ;;  %4753 = vmatprep.mubr.bf16.mxu0 %v4404_v8  ;;  %v4364_v24 = vmax.f32 %v4273_v47, 0.0 }
 0x619   : > { %v4276_v49 = vpop.f32.mrf.mxu1  ;;  %4754 = vmatmul.mubr.bf16.gmra.mxu0 %v4403_v28 }
 0x61a   : > { %v4277_v51 = vadd.f32 %v4276_v49, %v10362_v32  ;;  %v4365_v35 = vmax.f32 %v4275_v55, 0.0 }
 0x61b   : > { %v4280_v12 = vpop.f32.mrf.mxu1 }
 0x61c   : > { %v4366_v52 = vmax.f32 %v4277_v51, 0.0  ;;  %v4405_v40 = vpack.c.bf16 %v4365_v35, %v4363_v1  ;;  %v4281_v19 = vadd.f32 %v4280_v12, %v10371_v62  ;;  %v8651_v1 = vld [vmem:[%s11485_s12 + $0x74] ss:$8 sps:$4 sm:$0xff]  }
 0x61d   : > { %v4282_v48 = vpop.f32.mrf.mxu1  ;;  %5857 = vmatprep.subr.bf16.mxu1 %v8651_v1 }
 0x61e   : > { %v4406_v22 = vpack.c.bf16 %v4366_v52, %v4364_v24  ;;  %v4283_v10 = vadd.f32 %v4282_v48, %v10362_v32  ;;  %v4367_v18 = vmax.f32 %v4281_v19, 0.0 }
 0x61f   : > { %v4284_v11 = vpop.f32.mrf.mxu1 }
 0x620   : > { %v4285_v63 = vadd.f32 %v4284_v11, %v10371_v62  ;;  %4763 = vmatprep.mubr.bf16.mxu0 %v4406_v22  ;;  %v4368_v60 = vmax.f32 %v4283_v10, 0.0 }
 0x621   : > { %v4286_v43 = vpop.f32.mrf.mxu1  ;;  %4764 = vmatmul.mubr.bf16.gmra.mxu0 %v4405_v40 }
 0x622   : > { %v4287_v59 = vadd.f32 %v4286_v43, %v10362_v32  ;;  %v4369_v53 = vmax.f32 %v4285_v63, 0.0 }
 0x623   : > { %v4290_v14 = vpop.f32.mrf.mxu1 }
 0x624   : > { %v4370_v15 = vmax.f32 %v4287_v59, 0.0  ;;  %v4407_v61 = vpack.c.bf16 %v4369_v53, %v4367_v18  ;;  %v4291_v6 = vadd.f32 %v4290_v14, %v10371_v62 }
 0x625   : > { %v4292_v20 = vpop.f32.mrf.mxu1 }
 0x626   : > { %v4408_v13 = vpack.c.bf16 %v4370_v15, %v4368_v60  ;;  %v4293_v31 = vadd.f32 %v4292_v20, %v10362_v32  ;;  %v4371_v30 = vmax.f32 %v4291_v6, 0.0 }
 0x627   : > { %v4294_v26 = vpop.f32.mrf.mxu1 }
 0x628   : > { %v4295_v39 = vadd.f32 %v4294_v26, %v10371_v62  ;;  %4773 = vmatprep.mubr.bf16.mxu0 %v4408_v13  ;;  %v4372_v58 = vmax.f32 %v4293_v31, 0.0  ;;  %v8649_v26 = vld [vmem:[%s11485_s12 + $0x70] ss:$8 sps:$4 sm:$0xff]  }
 0x629   : > { %v4296_v27 = vpop.f32.mrf.mxu1  ;;  %4774 = vmatmul.mubr.bf16.gmra.mxu0 %v4407_v61  ;;  %v8652_v31 = vld [vmem:[%s11484_s11 + $0x70] ss:$8 sps:$4 sm:$0xff]  }
 0x62a   : > { %v4297_v50 = vadd.f32 %v4296_v27, %v10362_v32  ;;  %v4373_v23 = vmax.f32 %v4295_v39, 0.0  ;;  %v8657_v27 = vld [vmem:[%s11484_s11 + $0x64] ss:$8 sps:$4 sm:$0xff]  }
 0x62b   : > { %v4300_v21 = vpop.f32.mrf.mxu1 }
 0x62c   : > { %v4374_v25 = vmax.f32 %v4297_v50, 0.0  ;;  %v4409_v46 = vpack.c.bf16 %v4373_v23, %v4371_v30  ;;  %v4301_v44 = vadd.f32 %v4300_v21, %v10371_v62  ;;  %v8660_v50 = vld [vmem:[%s11485_s12 + $0x64] ss:$8 sps:$4 sm:$0xff]  }
 0x62d   : > { %v4302_v17 = vpop.f32.mrf.mxu1 }
 0x62e   : > { %v4410_v56 = vpack.c.bf16 %v4374_v25, %v4372_v58  ;;  %v4303_v34 = vadd.f32 %v4302_v17, %v10362_v32  ;;  %v4375_v5 = vmax.f32 %v4301_v44, 0.0  ;;  %v8655_v17 = vld [vmem:[%s11484_s11 + $0x60] ss:$8 sps:$4 sm:$0xff]  }
 0x62f   : > { %v4304_v37 = vpop.f32.mrf.mxu1 }
 0x630   : > { %v4305_v54 = vadd.f32 %v4304_v37, %v10371_v62  ;;  %4783 = vmatprep.mubr.bf16.mxu0 %v4410_v56  ;;  %v4376_v16 = vmax.f32 %v4303_v34, 0.0  ;;  %v8658_v56 = vld [vmem:[%s11485_s12 + $0x60] ss:$8 sps:$4 sm:$0xff]   ;;  %v8663_v34 = vld [vmem:[%s11484_s11 + $0x54] ss:$8 sps:$4 sm:$0xff]  }
 0x631   : > { %v4306_v41 = vpop.f32.mrf.mxu1  ;;  %4784 = vmatmul.mubr.bf16.gmra.mxu0 %v4409_v46 }
 0x632   : > { %v4307_v29 = vadd.f32 %v4306_v41, %v10362_v32  ;;  %v4377_v38 = vmax.f32 %v4305_v54, 0.0  ;;  %v8669_v54 = vld [vmem:[%s11485_s12 + $0x54] ss:$8 sps:$4 sm:$0xff]  }
 0x633   : > { %v4310_v9 = vpop.f32.mrf.mxu1 }
 0x634   : > { %v4378_v42 = vmax.f32 %v4307_v29, 0.0  ;;  %v4411_v33 = vpack.c.bf16 %v4377_v38, %v4375_v5  ;;  %v4311_v47 = vadd.f32 %v4310_v9, %v10371_v62 }
 0x635   : > { %v4312_v0 = vpop.f32.mrf.mxu1 }
 0x636   : > { %v4412_v45 = vpack.c.bf16 %v4378_v42, %v4376_v16  ;;  %v4313_v28 = vadd.f32 %v4312_v0, %v10362_v32  ;;  %v4379_v12 = vmax.f32 %v4311_v47, 0.0  ;;  %v8661_v16 = vld [vmem:[%s11484_s11 + $0x50] ss:$8 sps:$4 sm:$0xff]  }
 0x637   : > { %v4314_v8 = vpop.f32.mrf.mxu1  ;;  %v8667_v42 = vld [vmem:[%s11485_s12 + $0x50] ss:$8 sps:$4 sm:$0xff]  }
 0x638   : > { %v4315_v36 = vadd.f32 %v4314_v8, %v10371_v62  ;;  %4793 = vmatprep.mubr.bf16.mxu0 %v4412_v45  ;;  %v4380_v51 = vmax.f32 %v4313_v28, 0.0  ;;  %v8654_v62 = vld [vmem:[%s11484_s11 + $0x74] ss:$8 sps:$4 sm:$0xff]   ;;  %v8666_v45 = vld [vmem:[%s11484_s11 + $0x44] ss:$8 sps:$4 sm:$0xff]  }
 0x639   : > { %v4316_v55 = vpop.f32.mrf.mxu1  ;;  %4794 = vmatmul.mubr.bf16.gmra.mxu0 %v4411_v33  ;;  %6210 = vmatprep.subr.bf16.mxu0 %v8654_v62  ;;  %v8678_v33 = vld [vmem:[%s11485_s12 + $0x44] ss:$8 sps:$4 sm:$0xff]  }
 0x63a   : > { %v4317_v57 = vadd.f32 %v4316_v55, %v10362_v32  ;;  %v4381_v49 = vmax.f32 %v4315_v36, 0.0  ;;  %v7715_v32 = vld [vmem:[%s11478_s5 + $0xa] sm:$0x3] }
 0x63b   : > { %v10555_v22 = vrot.slane %v7715_v32, %v9102_v4  ;;  %v10558_v40 = vrot.slane %v7715_v32, %v9111_v7 }
 0x63c   : > { %v4382_v35 = vmax.f32 %v4317_v57, 0.0  ;;  %v4413_v52 = vpack.c.bf16 %v4381_v49, %v4379_v12  ;;  %v8664_v57 = vld [vmem:[%s11484_s11 + $0x40] ss:$8 sps:$4 sm:$0xff]   ;;  %v8672_v12 = vld [vmem:[%s11484_s11 + $0x34] ss:$8 sps:$4 sm:$0xff]  }
 0x63d   : > { %v8676_v49 = vld [vmem:[%s11485_s12 + $0x40] ss:$8 sps:$4 sm:$0xff]  }
 0x63e   : > { %v4414_v24 = vpack.c.bf16 %v4382_v35, %v4380_v51 }
 0x640   : > { %4803 = vmatprep.mubr.bf16.mxu0 %v4414_v24  ;;  %v8687_v24 = vld [vmem:[%s11485_s12 + $0x34] ss:$8 sps:$4 sm:$0xff]  }
 0x641   : > { %4804 = vmatmul.mubr.bf16.gmra.mxu0 %v4413_v52 }
 0x689   : > { %v4655_v48 = vpop.f32.mrf.mxu0 }
 0x68a   : > { %v4656_v43 = vadd.f32 %v4655_v48, %v10558_v40 }
 0x68b   : > { %v4657_v11 = vpop.f32.mrf.mxu0 }
 0x68c   : > { %v4658_v63 = vadd.f32 %v4657_v11, %v10555_v22  ;;  %v4814_v20 = vmax.f32 %v4656_v43, 0.0  ;;  %v8670_v11 = vld [vmem:[%s11484_s11 + $0x30] ss:$8 sps:$4 sm:$0xff]   ;;  %v8675_v43 = vld [vmem:[%s11484_s11 + $0x24] ss:$8 sps:$4 sm:$0xff]  }
 0x68d   : > { %v4659_v10 = vpop.f32.mrf.mxu0 }
 0x68e   : > { %v4660_v19 = vadd.f32 %v4659_v10, %v10558_v40  ;;  %v4815_v15 = vmax.f32 %v4658_v63, 0.0  ;;  %v8685_v10 = vld [vmem:[%s11485_s12 + $0x30] ss:$8 sps:$4 sm:$0xff]  }
 0x68f   : > { %v4661_v59 = vpop.f32.mrf.mxu0 }
 0x690   : > { %v4662_v53 = vadd.f32 %v4661_v59, %v10555_v22  ;;  %v4816_v14 = vmax.f32 %v4660_v19, 0.0  ;;  %v8696_v59 = vld [vmem:[%s11485_s12 + $0x24] ss:$8 sps:$4 sm:$0xff]  }
 0x691   : > { %v4665_v60 = vpop.f32.mrf.mxu0 }
 0x692   : > { %v4817_v18 = vmax.f32 %v4662_v53, 0.0  ;;  %v4878_v39 = vpack.c.bf16 %v4816_v14, %v4814_v20  ;;  %v4666_v58 = vadd.f32 %v4665_v60, %v10558_v40  ;;  %v8673_v20 = vld [vmem:[%s11484_s11 + $0x20] ss:$8 sps:$4 sm:$0xff]  }
 0x693   : > { %v4667_v13 = vpop.f32.mrf.mxu0 }
 0x694   : > { %v4879_v61 = vpack.c.bf16 %v4817_v18, %v4815_v15  ;;  %v4668_v23 = vadd.f32 %v4667_v13, %v10555_v22  ;;  %v4818_v29 = vmax.f32 %v4666_v58, 0.0  ;;  %v8694_v13 = vld [vmem:[%s11485_s12 + $0x20] ss:$8 sps:$4 sm:$0xff]   ;;  %v8679_v58 = vld [vmem:[%s11484_s11 + $0x10] ss:$8 sps:$4 sm:$0xff]  }
 0x695   : > { %v4669_v6 = vpop.f32.mrf.mxu0 }
 0x696   : > { %v4670_v21 = vadd.f32 %v4669_v6, %v10558_v40  ;;  %5279 = vmatprep.mubr.bf16.mxu1 %v4879_v61  ;;  %5472 = vmatprep.mubr.bf16.mxu0 %v4879_v61  ;;  %v4819_v44 = vmax.f32 %v4668_v23, 0.0 }
 0x697   : > { %v4671_v25 = vpop.f32.mrf.mxu0  ;;  %5280 = vmatmul.mubr.bf16.vlgmr.msra.gmra.mxu1 %v4878_v39  ;;  %5473 = vmatmul.mubr.bf16.vlgmr.msra.gmra.mxu0 %v4878_v39  ;;  %v8705_v39 = vld [vmem:[%s11485_s12 + $0x14] ss:$8 sps:$4 sm:$0xff]  }
 0x698   : > { %v4672_v30 = vadd.f32 %v4671_v25, %v10555_v22  ;;  %5858 = vmatpush1.bf16.msra.mxu1 %v8649_v26  ;;  %6211 = vmatpush1.bf16.msra.mxu0 %v8652_v31  ;;  %v4820_v46 = vmax.f32 %v4670_v21, 0.0  ;;  %v8681_v31 = vld [vmem:[%s11484_s11 + $0x14] ss:$8 sps:$4 sm:$0xff]   ;;  %v8703_v25 = vld [vmem:[%s11485_s12 + $0x10] ss:$8 sps:$4 sm:$0xff]  }
 0x699   : > { %v4675_v37 = vpop.f32.mrf.mxu0  ;;  %6212 = vmatprep.subr.bf16.mxu0 %v8657_v27  ;;  %5859 = vmatprep.subr.bf16.mxu1 %v8660_v50 }
 0x69a   : > { %v4821_v41 = vmax.f32 %v4672_v30, 0.0  ;;  %v4880_v5 = vpack.c.bf16 %v4820_v46, %v4818_v29  ;;  %v4676_v36 = vadd.f32 %v4675_v37, %v10558_v40  ;;  %v8714_v46 = vld [vmem:[%s11485_s12 + $0x4] ss:$8 sps:$4 sm:$0xff]   ;;  %v8682_v29 = vld [vmem:[%s11484_s11] ss:$8 sps:$4 sm:$0xff]  }
 0x69b   : > { %v4677_v38 = vpop.f32.mrf.mxu0 }
 0x69c   : > { %v4881_v9 = vpack.c.bf16 %v4821_v41, %v4819_v44  ;;  %6213 = vmatpush1.bf16.msra.mxu0 %v8655_v17  ;;  %5860 = vmatpush1.bf16.msra.mxu1 %v8658_v56  ;;  %v4678_v8 = vadd.f32 %v4677_v38, %v10555_v22  ;;  %v4822_v62 = vmax.f32 %v4676_v36, 0.0  ;;  %v8684_v56 = vld [vmem:[%s11484_s11 + $0x4] ss:$8 sps:$4 sm:$0xff]   ;;  %v8712_v38 = vld [vmem:[%s11485_s12] ss:$8 sps:$4 sm:$0xff]  }
 0x69d   : > { %v4679_v0 = vpop.f32.mrf.mxu0  ;;  %6214 = vmatprep.subr.bf16.mxu0 %v8663_v34  ;;  %5861 = vmatprep.subr.bf16.mxu1 %v8669_v54 }
 0x69e   : > { %v4680_v28 = vadd.f32 %v4679_v0, %v10558_v40  ;;  %5289 = vmatprep.mubr.bf16.mxu1 %v4881_v9  ;;  %5480 = vmatprep.mubr.bf16.mxu0 %v4881_v9  ;;  %v4823_v52 = vmax.f32 %v4678_v8, 0.0 }
 0x69f   : > { %v4681_v47 = vpop.f32.mrf.mxu0  ;;  %5290 = vmatmul.mubr.bf16.gmra.mxu1 %v4880_v5  ;;  %5481 = vmatmul.mubr.bf16.gmra.mxu0 %v4880_v5 }
 0x6a0   : > { %v4682_v55 = vadd.f32 %v4681_v47, %v10555_v22  ;;  %6215 = vmatpush1.bf16.msra.mxu0 %v8661_v16  ;;  %5862 = vmatpush1.bf16.msra.mxu1 %v8667_v42  ;;  %v4824_v51 = vmax.f32 %v4680_v28, 0.0  ;;  %v8690_v42 = vld [vmem:[%s11484_s11 + $0xf4] ss:$8 sps:$4 sm:$0xff]   ;;  %v8688_v28 = vld [vmem:[%s11484_s11 + $0xf0] ss:$8 sps:$4 sm:$0xff]  }
 0x6a1   : > { %v4685_v35 = vpop.f32.mrf.mxu0  ;;  %6216 = vmatprep.subr.bf16.mxu0 %v8666_v45  ;;  %5863 = vmatprep.subr.bf16.mxu1 %v8678_v33 }
 0x6a2   : > { %v4825_v1 = vmax.f32 %v4682_v55, 0.0  ;;  %v4882_v63 = vpack.c.bf16 %v4824_v51, %v4822_v62  ;;  %v4686_v60 = vadd.f32 %v4685_v35, %v10558_v40  ;;  %v8693_v55 = vld [vmem:[%s11484_s11 + $0xe4] ss:$8 sps:$4 sm:$0xff]   ;;  %v8699_v62 = vld [vmem:[%s11484_s11 + $0xd4] ss:$8 sps:$4 sm:$0xff]  }
 0x6a3   : > { %v4687_v32 = vpop.f32.mrf.mxu0 }
 0x6a4   : > { %v4883_v48 = vpack.c.bf16 %v4825_v1, %v4823_v52  ;;  %6217 = vmatpush1.bf16.msra.mxu0 %v8664_v57  ;;  %5864 = vmatpush1.bf16.msra.mxu1 %v8676_v49  ;;  %v4688_v53 = vadd.f32 %v4687_v32, %v10555_v22  ;;  %v4826_v50 = vmax.f32 %v4686_v60, 0.0 }
 0x6a5   : > { %v4689_v19 = vpop.f32.mrf.mxu0  ;;  %6218 = vmatprep.subr.bf16.mxu0 %v8672_v12  ;;  %5865 = vmatprep.subr.bf16.mxu1 %v8687_v24  ;;  %v8691_v24 = vld [vmem:[%s11484_s11 + $0xe0] ss:$8 sps:$4 sm:$0xff]  }
 0x6a6   : > { %v4690_v14 = vadd.f32 %v4689_v19, %v10558_v40  ;;  %5299 = vmatprep.mubr.bf16.mxu1 %v4883_v48  ;;  %5488 = vmatprep.mubr.bf16.mxu0 %v4883_v48  ;;  %v4827_v6 = vmax.f32 %v4688_v53, 0.0  ;;  %v8697_v19 = vld [vmem:[%s11484_s11 + $0xd0] ss:$8 sps:$4 sm:$0xff]   ;;  %v8702_v53 = vld [vmem:[%s11484_s11 + $0xc4] ss:$8 sps:$4 sm:$0xff]  }
 0x6a7   : > { %v4691_v15 = vpop.f32.mrf.mxu0  ;;  %5300 = vmatmul.mubr.bf16.gmra.mxu1 %v4882_v63  ;;  %5489 = vmatmul.mubr.bf16.gmra.mxu0 %v4882_v63 }
 0x6a8   : > { %v4692_v18 = vadd.f32 %v4691_v15, %v10555_v22  ;;  %6219 = vmatpush1.bf16.msra.mxu0 %v8670_v11  ;;  %5866 = vmatpush1.bf16.msra.mxu1 %v8685_v10  ;;  %v4828_v61 = vmax.f32 %v4690_v14, 0.0 }
 0x6a9   : > { %v4695_v26 = vpop.f32.mrf.mxu0  ;;  %6220 = vmatprep.subr.bf16.mxu0 %v8675_v43  ;;  %5867 = vmatprep.subr.bf16.mxu1 %v8696_v59 }
 0x6aa   : > { %v4829_v27 = vmax.f32 %v4692_v18, 0.0  ;;  %v4884_v30 = vpack.c.bf16 %v4828_v61, %v4826_v50  ;;  %v4696_v54 = vadd.f32 %v4695_v26, %v10558_v40 }
 0x6ab   : > { %v4697_v23 = vpop.f32.mrf.mxu0 }
 0x6ac   : > { %v4885_v21 = vpack.c.bf16 %v4829_v27, %v4827_v6  ;;  %6221 = vmatpush1.bf16.msra.mxu0 %v8673_v20  ;;  %5868 = vmatpush1.bf16.msra.mxu1 %v8694_v13  ;;  %v4698_v37 = vadd.f32 %v4697_v23, %v10555_v22  ;;  %v4830_v45 = vmax.f32 %v4696_v54, 0.0  ;;  %v8700_v13 = vld [vmem:[%s11484_s11 + $0xc0] ss:$8 sps:$4 sm:$0xff]  }
 0x6ad   : > { %v4699_v17 = vpop.f32.mrf.mxu0  ;;  %6222 = vmatprep.subr.bf16.mxu0 %v8681_v31  ;;  %5869 = vmatprep.subr.bf16.mxu1 %v8705_v39  ;;  %v8708_v31 = vld [vmem:[%s11484_s11 + $0xb4] ss:$8 sps:$4 sm:$0xff]   ;;  %v8709_v54 = vld [vmem:[%s11484_s11 + $0xa0] ss:$8 sps:$4 sm:$0xff]  }
 0x6ae   : > { %v4700_v34 = vadd.f32 %v4699_v17, %v10558_v40  ;;  %5309 = vmatprep.mubr.bf16.mxu1 %v4885_v21  ;;  %5496 = vmatprep.mubr.bf16.mxu0 %v4885_v21  ;;  %v4831_v5 = vmax.f32 %v4698_v37, 0.0  ;;  %v8706_v21 = vld [vmem:[%s11484_s11 + $0xb0] ss:$8 sps:$4 sm:$0xff]  }
 0x6af   : > { %v4701_v44 = vpop.f32.mrf.mxu0  ;;  %5310 = vmatmul.mubr.bf16.gmra.mxu1 %v4884_v30  ;;  %5497 = vmatmul.mubr.bf16.gmra.mxu0 %v4884_v30  ;;  %v8711_v30 = vld [vmem:[%s11484_s11 + $0xa4] ss:$8 sps:$4 sm:$0xff]  }
 0x6b0   : > { %v4702_v41 = vadd.f32 %v4701_v44, %v10555_v22  ;;  %6223 = vmatpush1.bf16.msra.mxu0 %v8679_v58  ;;  %5870 = vmatpush1.bf16.msra.mxu1 %v8703_v25  ;;  %v4832_v9 = vmax.f32 %v4700_v34, 0.0 }
 0x6b1   : > { %v4705_v16 = vpop.f32.mrf.mxu0  ;;  %6224 = vmatprep.subr.bf16.mxu0 %v8684_v56  ;;  %5871 = vmatprep.subr.bf16.mxu1 %v8714_v46 }
 0x6b2   : > { %v4833_v0 = vmax.f32 %v4702_v41, 0.0  ;;  %v4886_v36 = vpack.c.bf16 %v4832_v9, %v4830_v45  ;;  %v4706_v51 = vadd.f32 %v4705_v16, %v10558_v40 }
 0x6b3   : > { %v4707_v33 = vpop.f32.mrf.mxu0 }
 0x6b4   : > { %v4887_v8 = vpack.c.bf16 %v4833_v0, %v4831_v5  ;;  %6225 = vmatpush1.bf16.msra.mxu0 %v8682_v29  ;;  %5872 = vmatpush1.bf16.msra.mxu1 %v8712_v38  ;;  %v4708_v57 = vadd.f32 %v4707_v33, %v10555_v22  ;;  %v4834_v11 = vmax.f32 %v4706_v51, 0.0  ;;  %v8717_v29 = vld [vmem:[%s11484_s11 + $0x94] ss:$8 sps:$4 sm:$0xff]   ;;  %v8715_v0 = vld [vmem:[%s11484_s11 + $0x90] ss:$8 sps:$4 sm:$0xff]  }
 0x6b5   : > { %v4709_v47 = vpop.f32.mrf.mxu0  ;;  %6226 = vmatprep.subr.bf16.mxu0 %v8690_v42 }
 0x6b6   : > { %v4710_v49 = vadd.f32 %v4709_v47, %v10558_v40  ;;  %5319 = vmatprep.mubr.bf16.mxu1 %v4887_v8  ;;  %5504 = vmatprep.mubr.bf16.mxu0 %v4887_v8  ;;  %v4835_v32 = vmax.f32 %v4708_v57, 0.0 }
 0x6b7   : > { %v4711_v35 = vpop.f32.mrf.mxu0  ;;  %5320 = vmatmul.mubr.bf16.gmra.mxu1 %v4886_v36  ;;  %5505 = vmatmul.mubr.bf16.gmra.mxu0 %v4886_v36 }
 0x6b8   : > { %v4712_v12 = vadd.f32 %v4711_v35, %v10555_v22  ;;  %6227 = vmatpush2.bf16.msra.mxu0 %v8688_v28  ;;  %v4836_v52 = vmax.f32 %v4710_v49, 0.0 }
 0x6b9   : > { %v4715_v1 = vpop.f32.mrf.mxu0  ;;  %6228 = vmatprep.subr.bf16.mxu0 %v8693_v55 }
 0x6ba   : > { %v4837_v48 = vmax.f32 %v4712_v12, 0.0  ;;  %v4888_v43 = vpack.c.bf16 %v4836_v52, %v4834_v11  ;;  %v4716_v15 = vadd.f32 %v4715_v1, %v10558_v40 }
 0x6bb   : > { %v4717_v10 = vpop.f32.mrf.mxu0 }
 0x6bc   : > { %v4889_v63 = vpack.c.bf16 %v4837_v48, %v4835_v32  ;;  %6229 = vmatpush2.bf16.msra.mxu0 %v8691_v24  ;;  %v4718_v14 = vadd.f32 %v4717_v10, %v10555_v22  ;;  %v4838_v27 = vmax.f32 %v4716_v15, 0.0 }
 0x6bd   : > { %v4719_v59 = vpop.f32.mrf.mxu0  ;;  %6230 = vmatprep.subr.bf16.mxu0 %v8699_v62 }
 0x6be   : > { %v4720_v60 = vadd.f32 %v4719_v59, %v10558_v40  ;;  %5329 = vmatprep.mubr.bf16.mxu1 %v4889_v63  ;;  %5512 = vmatprep.mubr.bf16.mxu0 %v4889_v63  ;;  %v4839_v39 = vmax.f32 %v4718_v14, 0.0 }
 0x6bf   : > { %v4721_v18 = vpop.f32.mrf.mxu0  ;;  %5330 = vmatmul.mubr.bf16.gmra.mxu1 %v4888_v43  ;;  %5513 = vmatmul.mubr.bf16.gmra.mxu0 %v4888_v43 }
 0x6c0   : > { %v4722_v20 = vadd.f32 %v4721_v18, %v10555_v22  ;;  %6231 = vmatpush2.bf16.msra.mxu0 %v8697_v19  ;;  %v4840_v61 = vmax.f32 %v4720_v60, 0.0  ;;  %v8720_v18 = vld [vmem:[%s11484_s11 + $0x84] ss:$8 sps:$4 sm:$0xff]  }
 0x6c1   : > { %v4725_v26 = vpop.f32.mrf.mxu0  ;;  %6232 = vmatprep.subr.bf16.mxu0 %v8702_v53 }
 0x6c2   : > { %v4841_v6 = vmax.f32 %v4722_v20, 0.0  ;;  %v4890_v58 = vpack.c.bf16 %v4840_v61, %v4838_v27  ;;  %v4726_v46 = vadd.f32 %v4725_v26, %v10558_v40  ;;  %v8718_v61 = vld [vmem:[%s11484_s11 + $0x80] ss:$8 sps:$4 sm:$0xff]  }
 0x6c3   : > { %v4727_v50 = vpop.f32.mrf.mxu0 }
 0x6c4   : > { %v4891_v23 = vpack.c.bf16 %v4841_v6, %v4839_v39  ;;  %6233 = vmatpush2.bf16.msra.mxu0 %v8700_v13  ;;  %v4728_v17 = vadd.f32 %v4727_v50, %v10555_v22  ;;  %v4842_v16 = vmax.f32 %v4726_v46, 0.0 }
 0x6c5   : > { %v4729_v25 = vpop.f32.mrf.mxu0  ;;  %6234 = vmatprep.subr.bf16.mxu0 %v8708_v31 }
 0x6c6   : > { %v4730_v56 = vadd.f32 %v4729_v25, %v10558_v40  ;;  %5339 = vmatprep.mubr.bf16.mxu1 %v4891_v23  ;;  %5520 = vmatprep.mubr.bf16.mxu0 %v4891_v23  ;;  %v4843_v38 = vmax.f32 %v4728_v17, 0.0 }
 0x6c7   : > { %v4731_v37 = vpop.f32.mrf.mxu0  ;;  %5340 = vmatmul.mubr.bf16.gmra.mxu1 %v4890_v58  ;;  %5521 = vmatmul.mubr.bf16.gmra.mxu0 %v4890_v58 }
 0x6c8   : > { %v4732_v34 = vadd.f32 %v4731_v37, %v10555_v22  ;;  %6235 = vmatpush2.bf16.msra.mxu0 %v8706_v21  ;;  %v4844_v44 = vmax.f32 %v4730_v56, 0.0 }
 0x6c9   : > { %v4735_v41 = vpop.f32.mrf.mxu0  ;;  %6236 = vmatprep.subr.bf16.mxu0 %v8711_v30 }
 0x6ca   : > { %v4845_v9 = vmax.f32 %v4732_v34, 0.0  ;;  %v4892_v45 = vpack.c.bf16 %v4844_v44, %v4842_v16  ;;  %v4736_v36 = vadd.f32 %v4735_v41, %v10558_v40 }
 0x6cb   : > { %v4737_v42 = vpop.f32.mrf.mxu0 }
 0x6cc   : > { %v4893_v5 = vpack.c.bf16 %v4845_v9, %v4843_v38  ;;  %6237 = vmatpush2.bf16.msra.mxu0 %v8709_v54  ;;  %v4738_v8 = vadd.f32 %v4737_v42, %v10555_v22  ;;  %v4846_v12 = vmax.f32 %v4736_v36, 0.0 }
 0x6cd   : > { %v4739_v33 = vpop.f32.mrf.mxu0  ;;  %6238 = vmatprep.subr.bf16.mxu0 %v8717_v29 }
 0x6ce   : > { %v4740_v28 = vadd.f32 %v4739_v33, %v10558_v40  ;;  %5349 = vmatprep.mubr.bf16.mxu1 %v4893_v5  ;;  %5528 = vmatprep.mubr.bf16.mxu0 %v4893_v5  ;;  %v4847_v51 = vmax.f32 %v4738_v8, 0.0 }
 0x6cf   : > { %v4741_v47 = vpop.f32.mrf.mxu0  ;;  %5350 = vmatmul.mubr.bf16.gmra.mxu1 %v4892_v45  ;;  %5529 = vmatmul.mubr.bf16.gmra.mxu0 %v4892_v45 }
 0x6d0   : > { %v4742_v55 = vadd.f32 %v4741_v47, %v10555_v22  ;;  %6239 = vmatpush2.bf16.msra.mxu0 %v8715_v0  ;;  %v4848_v57 = vmax.f32 %v4740_v28, 0.0 }
 0x6d1   : > { %v4745_v49 = vpop.f32.mrf.mxu0  ;;  %6240 = vmatprep.subr.bf16.mxu0 %v8720_v18 }
 0x6d2   : > { %v4849_v35 = vmax.f32 %v4742_v55, 0.0  ;;  %v4894_v1 = vpack.c.bf16 %v4848_v57, %v4846_v12  ;;  %v4746_v11 = vadd.f32 %v4745_v49, %v10558_v40 }
 0x6d3   : > { %v4747_v24 = vpop.f32.mrf.mxu0 }
 0x6d4   : > { %v4895_v52 = vpack.c.bf16 %v4849_v35, %v4847_v51  ;;  %v4748_v32 = vadd.f32 %v4747_v24, %v10555_v22  ;;  %v4850_v14 = vmax.f32 %v4746_v11, 0.0  ;;  %6241 = vmatpush2.bf16.msra.mxu0 %v8718_v61 }
 0x6d5   : > { %v4749_v62 = vpop.f32.mrf.mxu0 }
 0x6d6   : > { %v4750_v48 = vadd.f32 %v4749_v62, %v10558_v40  ;;  %5359 = vmatprep.mubr.bf16.mxu1 %v4895_v52  ;;  %5536 = vmatprep.mubr.bf16.mxu0 %v4895_v52  ;;  %v4851_v59 = vmax.f32 %v4748_v32, 0.0 }
 0x6d7   : > { %v4751_v10 = vpop.f32.mrf.mxu0  ;;  %5360 = vmatmul.mubr.bf16.gmra.mxu1 %v4894_v1  ;;  %5537 = vmatmul.mubr.bf16.gmra.mxu0 %v4894_v1 }
 0x6d8   : > { %v4752_v63 = vadd.f32 %v4751_v10, %v10555_v22  ;;  %v4852_v19 = vmax.f32 %v4750_v48, 0.0 }
 0x6d9   : > { %v4755_v43 = vpop.f32.mrf.mxu0 }
 0x6da   : > { %v4853_v53 = vmax.f32 %v4752_v63, 0.0  ;;  %v4896_v20 = vpack.c.bf16 %v4852_v19, %v4850_v14  ;;  %v4756_v39 = vadd.f32 %v4755_v43, %v10558_v40 }
 0x6db   : > { %v4757_v60 = vpop.f32.mrf.mxu0 }
 0x6dc   : > { %v4897_v15 = vpack.c.bf16 %v4853_v53, %v4851_v59  ;;  %v4758_v26 = vadd.f32 %v4757_v60, %v10555_v22  ;;  %v4854_v25 = vmax.f32 %v4756_v39, 0.0 }
 0x6dd   : > { %v4759_v13 = vpop.f32.mrf.mxu0 }
 0x6de   : > { %v4760_v31 = vadd.f32 %v4759_v13, %v10558_v40  ;;  %5369 = vmatprep.mubr.bf16.mxu1 %v4897_v15  ;;  %5544 = vmatprep.mubr.bf16.mxu0 %v4897_v15  ;;  %v4855_v21 = vmax.f32 %v4758_v26, 0.0 }
 0x6df   : > { %v4761_v6 = vpop.f32.mrf.mxu0  ;;  %5370 = vmatmul.mubr.bf16.gmra.mxu1 %v4896_v20  ;;  %5545 = vmatmul.mubr.bf16.gmra.mxu0 %v4896_v20 }
 0x6e0   : > { %v4762_v27 = vadd.f32 %v4761_v6, %v10555_v22  ;;  %v4856_v50 = vmax.f32 %v4760_v31, 0.0 }
 0x6e1   : > { %v4765_v23 = vpop.f32.mrf.mxu0 }
 0x6e2   : > { %v4857_v58 = vmax.f32 %v4762_v27, 0.0  ;;  %v4898_v56 = vpack.c.bf16 %v4856_v50, %v4854_v25  ;;  %v4766_v54 = vadd.f32 %v4765_v23, %v10558_v40 }
 0x6e3   : > { %v4767_v30 = vpop.f32.mrf.mxu0 }
 0x6e4   : > { %v4899_v17 = vpack.c.bf16 %v4857_v58, %v4855_v21  ;;  %v4768_v37 = vadd.f32 %v4767_v30, %v10555_v22  ;;  %v4858_v42 = vmax.f32 %v4766_v54, 0.0 }
 0x6e5   : > { %v4769_v46 = vpop.f32.mrf.mxu0 }
 0x6e6   : > { %v4770_v34 = vadd.f32 %v4769_v46, %v10558_v40  ;;  %5379 = vmatprep.mubr.bf16.mxu1 %v4899_v17  ;;  %5552 = vmatprep.mubr.bf16.mxu0 %v4899_v17  ;;  %v4859_v9 = vmax.f32 %v4768_v37, 0.0 }
 0x6e7   : > { %v4771_v44 = vpop.f32.mrf.mxu0  ;;  %5380 = vmatmul.mubr.bf16.gmra.mxu1 %v4898_v56  ;;  %5553 = vmatmul.mubr.bf16.gmra.mxu0 %v4898_v56 }
 0x6e8   : > { %v4772_v41 = vadd.f32 %v4771_v44, %v10555_v22  ;;  %v4860_v29 = vmax.f32 %v4770_v34, 0.0 }
 0x6e9   : > { %v4775_v38 = vpop.f32.mrf.mxu0 }
 0x6ea   : > { %v4861_v16 = vmax.f32 %v4772_v41, 0.0  ;;  %v4900_v45 = vpack.c.bf16 %v4860_v29, %v4858_v42  ;;  %v4776_v36 = vadd.f32 %v4775_v38, %v10558_v40  ;;  %v8723_v42 = vld [vmem:[%s9073_s2 + $0x10] sm:$0xff]  }
 0x6eb   : > { %v4777_v5 = vpop.f32.mrf.mxu0 }
 0x6ec   : > { %v4901_v0 = vpack.c.bf16 %v4861_v16, %v4859_v9  ;;  %v4778_v8 = vadd.f32 %v4777_v5, %v10555_v22  ;;  %v4862_v12 = vmax.f32 %v4776_v36, 0.0  ;;  %v8724_v5 = vld [vmem:[%s9073_s2 + $0x18] sm:$0xff]   ;;  %v8736_v36 = vld [vmem:[%s11487_s14 + $0x70] sm:$0xff]  }
 0x6ed   : > { %v4779_v33 = vpop.f32.mrf.mxu0 }
 0x6ee   : > { %v4780_v28 = vadd.f32 %v4779_v33, %v10558_v40  ;;  %5389 = vmatprep.mubr.bf16.mxu1 %v4901_v0  ;;  %5560 = vmatprep.mubr.bf16.mxu0 %v4901_v0  ;;  %v4863_v51 = vmax.f32 %v4778_v8, 0.0  ;;  %v8725_v0 = vld [vmem:[%s9073_s2 + $0x20] sm:$0xff]   ;;  %v8733_v33 = vld [vmem:[%s11487_s14 + $0x38] sm:$0xff]   ;;  %v8726_v8 = vld [vmem:[%s9073_s2 + $0x28] sm:$0xff]  }
 0x6ef   : > { %v4781_v47 = vpop.f32.mrf.mxu0  ;;  %5390 = vmatmul.mubr.bf16.gmra.mxu1 %v4900_v45  ;;  %5561 = vmatmul.mubr.bf16.gmra.mxu0 %v4900_v45  ;;  %v8732_v45 = vld [vmem:[%s11487_s14 + $0x78] sm:$0xff]  }
 0x6f0   : > { %v4782_v55 = vadd.f32 %v4781_v47, %v10555_v22  ;;  %v4864_v57 = vmax.f32 %v4780_v28, 0.0  ;;  %8000 = vmatprep.subr.bf16.mxu1 %v8732_v45  ;;  %v8727_v28 = vld [vmem:[%s9073_s2 + $0x30] sm:$0xff]  }
 0x6f1   : > { %v4785_v49 = vpop.f32.mrf.mxu0  ;;  %v8737_v47 = vld [vmem:[%s11487_s14 + $0x30] sm:$0xff]  }
 0x6f2   : > { %v4865_v35 = vmax.f32 %v4782_v55, 0.0  ;;  %v4902_v1 = vpack.c.bf16 %v4864_v57, %v4862_v12  ;;  %v4786_v11 = vadd.f32 %v4785_v49, %v10558_v40  ;;  %v8728_v55 = vld [vmem:[%s9073_s2 + $0x38] sm:$0xff]   ;;  %v8729_v57 = vld [vmem:[%s9073_s2 + $0x40] sm:$0xff]   ;;  %v8740_v49 = vld [vmem:[%s11487_s14 + $0x68] sm:$0xff]  }
 0x6f3   : > { %v4787_v24 = vpop.f32.mrf.mxu0 }
 0x6f4   : > { %v4903_v52 = vpack.c.bf16 %v4865_v35, %v4863_v51  ;;  %v4788_v32 = vadd.f32 %v4787_v24, %v10555_v22  ;;  %v4866_v14 = vmax.f32 %v4786_v11, 0.0  ;;  %v8741_v51 = vld [vmem:[%s11487_s14 + $0x28] sm:$0xff]   ;;  %v4974_v24 = vld [vmem:[%s11483_s10] sm:$0x7] }
 0x6f5   : > { %v4789_v62 = vpop.f32.mrf.mxu0  ;;  %v10809_v11 = vrot.slane %v4974_v24, %v9111_v7 }
 0x6f6   : > { %v4790_v48 = vadd.f32 %v4789_v62, %v10558_v40  ;;  %5399 = vmatprep.mubr.bf16.mxu1 %v4903_v52  ;;  %5568 = vmatprep.mubr.bf16.mxu0 %v4903_v52  ;;  %v4867_v59 = vmax.f32 %v4788_v32, 0.0  ;;  %v10803_v62 = vrot.slane %v4974_v24, %v9102_v4 }
 0x6f7   : > { %v4791_v10 = vpop.f32.mrf.mxu0  ;;  %5400 = vmatmul.mubr.bf16.gmra.mxu1 %v4902_v1  ;;  %5569 = vmatmul.mubr.bf16.gmra.mxu0 %v4902_v1 }
 0x6f8   : > { %v4792_v63 = vadd.f32 %v4791_v10, %v10555_v22  ;;  %v4868_v19 = vmax.f32 %v4790_v48, 0.0  ;;  %v8730_v48 = vld [vmem:[%s9073_s2 + $0x48] sm:$0xff]  }
 0x6f9   : > { %v4795_v43 = vpop.f32.mrf.mxu0 }
 0x6fa   : > { %v4869_v53 = vmax.f32 %v4792_v63, 0.0  ;;  %v4904_v18 = vpack.c.bf16 %v4868_v19, %v4866_v14  ;;  %v4796_v26 = vadd.f32 %v4795_v43, %v10558_v40  ;;  %v8743_v19 = vld [vmem:[%s11487_s14 + $0x60] sm:$0xff]  }
 0x6fb   : > { %v4797_v60 = vpop.f32.mrf.mxu0  ;;  %v8744_v43 = vld [vmem:[%s11487_s14 + $0x20] sm:$0xff]  }
 0x6fc   : > { %v4905_v15 = vpack.c.bf16 %v4869_v53, %v4867_v59  ;;  %v4798_v13 = vadd.f32 %v4797_v60, %v10555_v22  ;;  %v4870_v21 = vmax.f32 %v4796_v26, 0.0  ;;  %v8745_v59 = vld [vmem:[%s11487_s14 + $0x58] sm:$0xff]  }
 0x6fd   : > { %v4799_v20 = vpop.f32.mrf.mxu0 }
 0x6fe   : > { %v4800_v61 = vadd.f32 %v4799_v20, %v10558_v40  ;;  %5409 = vmatprep.mubr.bf16.mxu1 %v4905_v15  ;;  %5576 = vmatprep.mubr.bf16.mxu0 %v4905_v15  ;;  %v4871_v50 = vmax.f32 %v4798_v13, 0.0  ;;  %v8746_v20 = vld [vmem:[%s11487_s14 + $0x18] sm:$0xff]  }
 0x6ff   : > { %v4801_v31 = vpop.f32.mrf.mxu0  ;;  %5410 = vmatmul.mubr.bf16.gmra.mxu1 %v4904_v18  ;;  %5577 = vmatmul.mubr.bf16.gmra.mxu0 %v4904_v18 }
 0x700   : > { %v4802_v39 = vadd.f32 %v4801_v31, %v10555_v22  ;;  %v4872_v6 = vmax.f32 %v4800_v61, 0.0  ;;  %v8747_v31 = vld [vmem:[%s11487_s14 + $0x50] sm:$0xff]  }
 0x701   : > { %v4805_v27 = vpop.f32.mrf.mxu0 }
 0x702   : > { %v4873_v23 = vmax.f32 %v4802_v39, 0.0  ;;  %v4906_v30 = vpack.c.bf16 %v4872_v6, %v4870_v21  ;;  %v4806_v37 = vadd.f32 %v4805_v27, %v10558_v40  ;;  %v8748_v21 = vld [vmem:[%s11487_s14 + $0x10] sm:$0xff]  }
 0x703   : > { %v4807_v58 = vpop.f32.mrf.mxu0 }
 0x704   : > { %v4907_v25 = vpack.c.bf16 %v4873_v23, %v4871_v50  ;;  %v4808_v56 = vadd.f32 %v4807_v58, %v10555_v22  ;;  %v4874_v38 = vmax.f32 %v4806_v37, 0.0 }
 0x705   : > { %v4809_v17 = vpop.f32.mrf.mxu0 }
 0x706   : > { %v4810_v46 = vadd.f32 %v4809_v17, %v10558_v40  ;;  %5419 = vmatprep.mubr.bf16.mxu1 %v4907_v25  ;;  %5584 = vmatprep.mubr.bf16.mxu0 %v4907_v25  ;;  %v4875_v41 = vmax.f32 %v4808_v56, 0.0  ;;  %v8721_v40 = vld [vmem:[%s9073_s2] sm:$0xff]   ;;  %v8749_v17 = vld [vmem:[%s11487_s14 + $0x48] sm:$0xff]  }
 0x707   : > { %v4811_v34 = vpop.f32.mrf.mxu0  ;;  %5420 = vmatmul.mubr.bf16.gmra.mxu1 %v4906_v30  ;;  %5585 = vmatmul.mubr.bf16.gmra.mxu0 %v4906_v30  ;;  %v8731_v30 = vld [vmem:[%s9073_s2 + $0x50] sm:$0xff]  }
 0x708   : > { %v4812_v54 = vadd.f32 %v4811_v34, %v10555_v22  ;;  %v4876_v44 = vmax.f32 %v4810_v46, 0.0  ;;  %v8722_v22 = vld [vmem:[%s9073_s2 + $0x8] sm:$0xff]  }
 0x70a   : > { %v4877_v29 = vmax.f32 %v4812_v54, 0.0  ;;  %v4908_v16 = vpack.c.bf16 %v4876_v44, %v4874_v38  ;;  %v8750_v44 = vld [vmem:[%s11487_s14 + $0x8] sm:$0xff]  }
 0x70c   : > { %v4909_v9 = vpack.c.bf16 %v4877_v29, %v4875_v41 }
 0x70e   : > { %5429 = vmatprep.mubr.bf16.mxu1 %v4909_v9  ;;  %5592 = vmatprep.mubr.bf16.mxu0 %v4909_v9  ;;  %v8751_v9 = vld [vmem:[%s11487_s14 + $0x40] sm:$0xff]  }
 0x70f   : > { %5430 = vmatmul.mubr.bf16.gmra.mxu1 %v4908_v16  ;;  %5593 = vmatmul.mubr.bf16.gmra.mxu0 %v4908_v16 }
 0x710   : > { %5889 = vmatprep.mubr.bf16.mxu1 %v8786_v2 }
 0x717   : > { %5890 = vmatmul.mubr.bf16.vlgmr.msra.gmra.mxu1 %v8721_v40 }
 0x718   : > { %5899 = vmatprep.mubr.bf16.mxu1 %v8786_v2  ;;  %8001 = vmatpush3.bf16.msra.mxu1 %v8733_v33  ;;  %v8734_v33 = vld [vmem:[%s9073_s2 + $0x58] sm:$0xff]  }
 0x719   : > { %8002 = vmatprep.subr.bf16.mxu1 %v8736_v36 }
 0x71c   : > { %8003 = vmatpush3.bf16.msra.mxu1 %v8737_v47 }
 0x71d   : > { %8004 = vmatprep.subr.bf16.mxu1 %v8740_v49 }
 0x71f   : > { %5900 = vmatmul.mubr.bf16.gmra.mxu1 %v8722_v22 }
 0x720   : > { %5909 = vmatprep.mubr.bf16.mxu1 %v8786_v2  ;;  %8005 = vmatpush3.bf16.msra.mxu1 %v8741_v51 }
 0x721   : > { %8006 = vmatprep.subr.bf16.mxu1 %v8743_v19  ;;  %v8735_v19 = vld [vmem:[%s9073_s2 + $0x60] sm:$0xff]  }
 0x724   : > { %8007 = vmatpush3.bf16.msra.mxu1 %v8744_v43 }
 0x725   : > { %8008 = vmatprep.subr.bf16.mxu1 %v8745_v59 }
 0x727   : > { %5910 = vmatmul.mubr.bf16.gmra.mxu1 %v8723_v42 }
 0x728   : > { %5919 = vmatprep.mubr.bf16.mxu1 %v8786_v2  ;;  %8009 = vmatpush3.bf16.msra.mxu1 %v8746_v20 }
 0x729   : > { %8010 = vmatprep.subr.bf16.mxu1 %v8747_v31 }
 0x72c   : > { %8011 = vmatpush3.bf16.msra.mxu1 %v8748_v21  ;;  %v8738_v21 = vld [vmem:[%s9073_s2 + $0x68] sm:$0xff]  }
 0x72d   : > { %8012 = vmatprep.subr.bf16.mxu1 %v8749_v17 }
 0x72f   : > { %5920 = vmatmul.mubr.bf16.gmra.mxu1 %v8724_v5 }
 0x730   : > { %5929 = vmatprep.mubr.bf16.mxu1 %v8786_v2  ;;  %8013 = vmatpush3.bf16.msra.mxu1 %v8750_v44 }
 0x731   : > { %8014 = vmatprep.subr.bf16.mxu1 %v8751_v9 }
 0x737   : > { %5930 = vmatmul.mubr.bf16.gmra.mxu1 %v8725_v0 }
 0x738   : > { %5939 = vmatprep.mubr.bf16.mxu1 %v8786_v2 }
 0x73f   : > { %5940 = vmatmul.mubr.bf16.gmra.mxu1 %v8726_v8 }
 0x740   : > { %5949 = vmatprep.mubr.bf16.mxu1 %v8786_v2 }
 0x747   : > { %5950 = vmatmul.mubr.bf16.gmra.mxu1 %v8727_v28 }
 0x748   : > { %5959 = vmatprep.mubr.bf16.mxu1 %v8786_v2 }
 0x74f   : > { %5960 = vmatmul.mubr.bf16.gmra.mxu1 %v8728_v55 }
 0x750   : > { %5969 = vmatprep.mubr.bf16.mxu1 %v8786_v2 }
 0x757   : > { %v5281_v35 = vpop.f32.mrf.mxu1  ;;  %v7904_v12 = vpop.f32.mrf.mxu0  ;;  %5970 = vmatmul.mubr.bf16.gmra.mxu1 %v8729_v57 }
 0x758   : > { %5979 = vmatprep.mubr.bf16.mxu1 %v8786_v2  ;;  %v5282_v13 = vadd.f32 %v5281_v35, %v10809_v11 }
 0x759   : > { %v5283_v52 = vpop.f32.mrf.mxu1  ;;  %v7905_v1 = vpop.f32.mrf.mxu0 }
 0x75a   : > { %v10805_v32 = vadd.f32 %v7905_v1, %v7904_v12  ;;  %v5284_v15 = vadd.f32 %v5283_v52, %v10803_v62 }
 0x75b   : > { %v5285_v10 = vpop.f32.mrf.mxu1  ;;  %v10811_v63 = vpop.f32.mrf.mxu0 }
 0x75c   : > { %v5286_v53 = vadd.f32 %v5285_v10, %v10809_v11 }
 0x75d   : > { %v5287_v14 = vpop.f32.mrf.mxu1  ;;  %v10823_v60 = vpop.f32.mrf.mxu0 }
 0x75e   : > { %v5288_v18 = vadd.f32 %v5287_v14, %v10803_v62  ;;  %v5601_v6 = vpack.c.bf16 %v5286_v53, %v5282_v13 }
 0x75f   : > { %v5291_v61 = vpop.f32.mrf.mxu1  ;;  %v7910_v26 = vpop.f32.mrf.mxu0  ;;  %5980 = vmatmul.mubr.bf16.gmra.mxu1 %v8730_v48 }
 0x760   : > { %v5602_v39 = vpack.c.bf16 %v5288_v18, %v5284_v15  ;;  %5989 = vmatprep.mubr.bf16.mxu1 %v8786_v2  ;;  %v5292_v41 = vadd.f32 %v5291_v61, %v10809_v11 }
 0x761   : > { %v5293_v27 = vpop.f32.mrf.mxu1  ;;  %v7911_v50 = vpop.f32.mrf.mxu0 }
 0x762   : > { %v10835_v23 = vadd.f32 %v7911_v50, %v7910_v26  ;;  %6242 = vmatprep.mubr.bf16.mxu0 %v5602_v39  ;;  %v5294_v34 = vadd.f32 %v5293_v27, %v10803_v62 }
 0x763   : > { %v5295_v58 = vpop.f32.mrf.mxu1  ;;  %v10840_v25 = vpop.f32.mrf.mxu0  ;;  %6243 = vmatmul.mubr.bf16.vlgmr.msra.gmra.mxu0 %v5601_v6 }
 0x764   : > { %v5296_v56 = vadd.f32 %v5295_v58, %v10809_v11 }
 0x765   : > { %v5297_v46 = vpop.f32.mrf.mxu1  ;;  %v10847_v37 = vpop.f32.mrf.mxu0 }
 0x766   : > { %v5298_v54 = vadd.f32 %v5297_v46, %v10803_v62  ;;  %v5603_v40 = vpack.c.bf16 %v5296_v56, %v5292_v41 }
 0x767   : > { %v5301_v29 = vpop.f32.mrf.mxu1  ;;  %v7916_v38 = vpop.f32.mrf.mxu0  ;;  %5990 = vmatmul.mubr.bf16.gmra.mxu1 %v8731_v30 }
 0x768   : > { %v5604_v16 = vpack.c.bf16 %v5298_v54, %v5294_v34  ;;  %5999 = vmatprep.mubr.bf16.mxu1 %v8786_v2  ;;  %v5302_v57 = vadd.f32 %v5301_v29, %v10809_v11 }
 0x769   : > { %v5303_v22 = vpop.f32.mrf.mxu1  ;;  %v7917_v42 = vpop.f32.mrf.mxu0 }
 0x76a   : > { %v10859_v5 = vadd.f32 %v7917_v42, %v7916_v38  ;;  %6252 = vmatprep.mubr.bf16.mxu0 %v5604_v16  ;;  %v5304_v47 = vadd.f32 %v5303_v22, %v10803_v62  ;;  %v8739_v42 = vld [vmem:[%s9073_s2 + $0x70] sm:$0xff]  }
 0x76b   : > { %v5305_v0 = vpop.f32.mrf.mxu1  ;;  %v10861_v45 = vpop.f32.mrf.mxu0  ;;  %6253 = vmatmul.mubr.bf16.gmra.mxu0 %v5603_v40 }
 0x76c   : > { %11502 = vst [vmem:[#allocation3_spill] sm:$0xff] %v10859_v5  ;;  %11503 = vst [vmem:[#allocation4_spill] sm:$0xff] %v10861_v45  ;;  %v5306_v8 = vadd.f32 %v5305_v0, %v10809_v11 }
 0x76d   : > { %v5307_v28 = vpop.f32.mrf.mxu1  ;;  %v10865_v36 = vpop.f32.mrf.mxu0 }
 0x76e   : > { %11504 = vst [vmem:[#allocation5_spill] sm:$0xff] %v10865_v36  ;;  %v5308_v55 = vadd.f32 %v5307_v28, %v10803_v62  ;;  %v5605_v12 = vpack.c.bf16 %v5306_v8, %v5302_v57 }
 0x76f   : > { %v5311_v49 = vpop.f32.mrf.mxu1  ;;  %v7922_v51 = vpop.f32.mrf.mxu0  ;;  %6000 = vmatmul.mubr.bf16.gmra.mxu1 %v8734_v33 }
 0x770   : > { %v5606_v35 = vpack.c.bf16 %v5308_v55, %v5304_v47  ;;  %6009 = vmatprep.mubr.bf16.mxu1 %v8786_v2  ;;  %v5312_v18 = vadd.f32 %v5311_v49, %v10809_v11 }
 0x771   : > { %v5313_v24 = vpop.f32.mrf.mxu1  ;;  %v7923_v52 = vpop.f32.mrf.mxu0 }
 0x772   : > { %v10871_v1 = vadd.f32 %v7923_v52, %v7922_v51  ;;  %6262 = vmatprep.mubr.bf16.mxu0 %v5606_v35  ;;  %v5314_v14 = vadd.f32 %v5313_v24, %v10803_v62 }
 0x773   : > { %v5315_v48 = vpop.f32.mrf.mxu1  ;;  %v10873_v10 = vpop.f32.mrf.mxu0  ;;  %6263 = vmatmul.mubr.bf16.gmra.mxu0 %v5605_v12 }
 0x774   : > { %v5316_v43 = vadd.f32 %v5315_v48, %v10809_v11 }
 0x775   : > { %v5317_v59 = vpop.f32.mrf.mxu1  ;;  %v10877_v53 = vpop.f32.mrf.mxu0 }
 0x776   : > { %v5318_v15 = vadd.f32 %v5317_v59, %v10803_v62  ;;  %v5607_v26 = vpack.c.bf16 %v5316_v43, %v5312_v18  ;;  %v8742_v43 = vld [vmem:[%s9073_s2 + $0x78] sm:$0xff]  }
 0x777   : > { %v5321_v20 = vpop.f32.mrf.mxu1  ;;  %v7928_v13 = vpop.f32.mrf.mxu0  ;;  %6010 = vmatmul.mubr.bf16.gmra.mxu1 %v8735_v19 }
 0x778   : > { %v5608_v61 = vpack.c.bf16 %v5318_v15, %v5314_v14  ;;  %6019 = vmatprep.mubr.bf16.mxu1 %v8786_v2  ;;  %v5322_v34 = vadd.f32 %v5321_v20, %v10809_v11 }
 0x779   : > { %v5323_v31 = vpop.f32.mrf.mxu1  ;;  %v7929_v39 = vpop.f32.mrf.mxu0 }
 0x77a   : > { %v10883_v6 = vadd.f32 %v7929_v39, %v7928_v13  ;;  %6272 = vmatprep.mubr.bf16.mxu0 %v5608_v61  ;;  %v5324_v56 = vadd.f32 %v5323_v31, %v10803_v62 }
 0x77b   : > { %v5325_v27 = vpop.f32.mrf.mxu1  ;;  %v10885_v50 = vpop.f32.mrf.mxu0  ;;  %6273 = vmatmul.mubr.bf16.gmra.mxu0 %v5607_v26 }
 0x77c   : > { %11505 = vst [vmem:[#allocation6_spill] sm:$0xff] %v10883_v6  ;;  %11506 = vst [vmem:[#allocation7_spill] sm:$0xff] %v10885_v50  ;;  %v5326_v58 = vadd.f32 %v5325_v27, %v10809_v11 }
 0x77d   : > { %v5327_v30 = vpop.f32.mrf.mxu1  ;;  %v10889_v17 = vpop.f32.mrf.mxu0 }
 0x77e   : > { %11507 = vst [vmem:[#allocation8_spill] sm:$0xff] %v10889_v17  ;;  %v5328_v46 = vadd.f32 %v5327_v30, %v10803_v62  ;;  %v5609_v29 = vpack.c.bf16 %v5326_v58, %v5322_v34 }
 0x77f   : > { %v5331_v54 = vpop.f32.mrf.mxu1  ;;  %v7934_v44 = vpop.f32.mrf.mxu0  ;;  %6020 = vmatmul.mubr.bf16.gmra.mxu1 %v8738_v21 }
 0x780   : > { %v5610_v41 = vpack.c.bf16 %v5328_v46, %v5324_v56  ;;  %6029 = vmatprep.mubr.bf16.mxu1 %v8786_v2  ;;  %v5332_v55 = vadd.f32 %v5331_v54, %v10809_v11 }
 0x781   : > { %v5333_v38 = vpop.f32.mrf.mxu1  ;;  %v7935_v9 = vpop.f32.mrf.mxu0 }
 0x782   : > { %v10895_v16 = vadd.f32 %v7935_v9, %v7934_v44  ;;  %6282 = vmatprep.mubr.bf16.mxu0 %v5610_v41  ;;  %v5334_v28 = vadd.f32 %v5333_v38, %v10803_v62 }
 0x783   : > { %v5335_v40 = vpop.f32.mrf.mxu1  ;;  %v10897_v22 = vpop.f32.mrf.mxu0  ;;  %6283 = vmatmul.mubr.bf16.gmra.mxu0 %v5609_v29 }
 0x784   : > { %11508 = vst [vmem:[#allocation9_spill] sm:$0xff] %v10895_v16  ;;  %11509 = vst [vmem:[#allocation10_spill] sm:$0xff] %v10897_v22  ;;  %v5336_v0 = vadd.f32 %v5335_v40, %v10809_v11 }
 0x785   : > { %v5337_v33 = vpop.f32.mrf.mxu1  ;;  %v10901_v8 = vpop.f32.mrf.mxu0 }
 0x786   : > { %11510 = vst [vmem:[#allocation11_spill] sm:$0xff] %v10901_v8  ;;  %v5338_v47 = vadd.f32 %v5337_v33, %v10803_v62  ;;  %v5611_v35 = vpack.c.bf16 %v5336_v0, %v5332_v55 }
 0x787   : > { %v5341_v57 = vpop.f32.mrf.mxu1  ;;  %v7940_v49 = vpop.f32.mrf.mxu0  ;;  %6030 = vmatmul.mubr.bf16.gmra.mxu1 %v8739_v42 }
 0x788   : > { %v5612_v51 = vpack.c.bf16 %v5338_v47, %v5334_v28  ;;  %6039 = vmatprep.mubr.bf16.mxu1 %v8786_v2  ;;  %v5342_v20 = vadd.f32 %v5341_v57, %v10809_v11 }
 0x789   : > { %v5343_v12 = vpop.f32.mrf.mxu1  ;;  %v7941_v24 = vpop.f32.mrf.mxu0 }
 0x78a   : > { %v10907_v52 = vadd.f32 %v7941_v24, %v7940_v49  ;;  %6292 = vmatprep.mubr.bf16.mxu0 %v5612_v51  ;;  %v5344_v18 = vadd.f32 %v5343_v12, %v10803_v62 }
 0x78b   : > { %v5345_v48 = vpop.f32.mrf.mxu1  ;;  %v10909_v19 = vpop.f32.mrf.mxu0  ;;  %6293 = vmatmul.mubr.bf16.gmra.mxu0 %v5611_v35 }
 0x78c   : > { %11511 = vst [vmem:[#allocation12_spill] sm:$0xff] %v10907_v52  ;;  %11512 = vst [vmem:[#allocation13_spill] sm:$0xff] %v10909_v19  ;;  %v5346_v59 = vadd.f32 %v5345_v48, %v10809_v11 }
 0x78d   : > { %v5347_v14 = vpop.f32.mrf.mxu1  ;;  %v10913_v15 = vpop.f32.mrf.mxu0 }
 0x78e   : > { %11513 = vst [vmem:[#allocation14_spill] sm:$0xff] %v10913_v15  ;;  %v5348_v2 = vadd.f32 %v5347_v14, %v10803_v62  ;;  %v5613_v31 = vpack.c.bf16 %v5346_v59, %v5342_v20 }
 0x78f   : > { %v5351_v13 = vpop.f32.mrf.mxu1  ;;  %v7946_v61 = vpop.f32.mrf.mxu0  ;;  %6040 = vmatmul.mubr.bf16.gmra.mxu1 %v8742_v43 }
 0x790   : > { %v5614_v26 = vpack.c.bf16 %v5348_v2, %v5344_v18  ;;  %v5352_v41 = vadd.f32 %v5351_v13, %v10809_v11 }
 0x791   : > { %v5353_v39 = vpop.f32.mrf.mxu1  ;;  %v7947_v27 = vpop.f32.mrf.mxu0 }
 0x792   : > { %v10918_v21 = vadd.f32 %v7947_v27, %v7946_v61  ;;  %6302 = vmatprep.mubr.bf16.mxu0 %v5614_v26  ;;  %v5354_v54 = vadd.f32 %v5353_v39, %v10803_v62 }
 0x793   : > { %v5355_v58 = vpop.f32.mrf.mxu1  ;;  %v10920_v30 = vpop.f32.mrf.mxu0  ;;  %6303 = vmatmul.mubr.bf16.gmra.mxu0 %v5613_v31 }
 0x794   : > { %11514 = vst [vmem:[#allocation15_spill] sm:$0xff] %v10918_v21  ;;  %11515 = vst [vmem:[#allocation16_spill] sm:$0xff] %v10920_v30  ;;  %v5356_v56 = vadd.f32 %v5355_v58, %v10809_v11 }
 0x795   : > { %v5357_v46 = vpop.f32.mrf.mxu1  ;;  %v10923_v34 = vpop.f32.mrf.mxu0 }
 0x796   : > { %11516 = vst [vmem:[#allocation17_spill] sm:$0xff] %v10923_v34  ;;  %v5358_v44 = vadd.f32 %v5357_v46, %v10803_v62  ;;  %v5615_v40 = vpack.c.bf16 %v5356_v56, %v5352_v41 }
 0x797   : > { %v5361_v29 = vpop.f32.mrf.mxu1  ;;  %v7952_v38 = vpop.f32.mrf.mxu0 }
 0x798   : > { %v5616_v9 = vpack.c.bf16 %v5358_v44, %v5354_v54  ;;  %v5362_v12 = vadd.f32 %v5361_v29, %v10809_v11  ;;  %v8752_v44 = vld [vmem:[%s11487_s14] sm:$0xff]  }
 0x799   : > { %v5363_v42 = vpop.f32.mrf.mxu1  ;;  %v7953_v0 = vpop.f32.mrf.mxu0  ;;  %8015 = vmatpush3.bf16.msra.mxu1 %v8752_v44 }
 0x79a   : > { %v10928_v33 = vadd.f32 %v7953_v0, %v7952_v38  ;;  %6312 = vmatprep.mubr.bf16.mxu0 %v5616_v9  ;;  %v5364_v51 = vadd.f32 %v5363_v42, %v10803_v62 }
 0x79b   : > { %v5365_v28 = vpop.f32.mrf.mxu1  ;;  %v10930_v47 = vpop.f32.mrf.mxu0  ;;  %6313 = vmatmul.mubr.bf16.gmra.mxu0 %v5615_v40 }
 0x79c   : > { %11517 = vst [vmem:[#allocation18_spill] sm:$0xff] %v10928_v33  ;;  %11518 = vst [vmem:[#allocation19_spill] sm:$0xff] %v10930_v47  ;;  %v5366_v55 = vadd.f32 %v5365_v28, %v10809_v11 }
 0x79d   : > { %v5367_v57 = vpop.f32.mrf.mxu1  ;;  %v10933_v49 = vpop.f32.mrf.mxu0 }
 0x79e   : > { %11519 = vst [vmem:[#allocation20_spill] sm:$0xff] %v10933_v49  ;;  %v5368_v35 = vadd.f32 %v5367_v57, %v10803_v62  ;;  %v5617_v59 = vpack.c.bf16 %v5366_v55, %v5362_v12 }
 0x79f   : > { %v5371_v24 = vpop.f32.mrf.mxu1  ;;  %v7958_v48 = vpop.f32.mrf.mxu0 }
 0x7a0   : > { %v5618_v43 = vpack.c.bf16 %v5368_v35, %v5364_v51  ;;  %v5372_v58 = vadd.f32 %v5371_v24, %v10809_v11 }
 0x7a1   : > { %v5373_v14 = vpop.f32.mrf.mxu1  ;;  %v7959_v18 = vpop.f32.mrf.mxu0 }
 0x7a2   : > { %v10938_v2 = vadd.f32 %v7959_v18, %v7958_v48  ;;  %6322 = vmatprep.mubr.bf16.mxu0 %v5618_v43  ;;  %v5374_v39 = vadd.f32 %v5373_v14, %v10803_v62 }
 0x7a3   : > { %v5375_v20 = vpop.f32.mrf.mxu1  ;;  %v10940_v13 = vpop.f32.mrf.mxu0  ;;  %6323 = vmatmul.mubr.bf16.gmra.mxu0 %v5617_v59 }
 0x7a4   : > { %11520 = vst [vmem:[#allocation21_spill] sm:$0xff] %v10938_v2  ;;  %11521 = vst [vmem:[#allocation22_spill] sm:$0xff] %v10940_v13  ;;  %v5376_v61 = vadd.f32 %v5375_v20, %v10809_v11  ;;  %v6403_v13 = vld [vmem:[%s11486_s13] sm:$0x3] }
 0x7a5   : > { %v5377_v26 = vpop.f32.mrf.mxu1  ;;  %v10943_v31 = vpop.f32.mrf.mxu0  ;;  %v11059_v52 = vrot.slane %v6403_v13, %v9102_v4  ;;  %v8753_v4 = vld [vmem:[%s11489_s16 + $0x38] sm:$0xff]  }
 0x7a6   : > { %11522 = vst [vmem:[#allocation23_spill] sm:$0xff] %v10943_v31  ;;  %v5378_v27 = vadd.f32 %v5377_v26, %v10803_v62  ;;  %v5619_v41 = vpack.c.bf16 %v5376_v61, %v5372_v58  ;;  %8136 = vmatprep.subr.bf16.mxu0 %v8753_v4  ;;  %8184 = vmatprep.subr.bf16.mxu1 %v8753_v4 }
 0x7a7   : > { %v5381_v56 = vpop.f32.mrf.mxu1  ;;  %v7964_v46 = vpop.f32.mrf.mxu0  ;;  %8137 = vmatpush3.bf16.msra.mxu0 %v8753_v4 }
 0x7a8   : > { %v5620_v54 = vpack.c.bf16 %v5378_v27, %v5374_v39  ;;  %v5382_v35 = vadd.f32 %v5381_v56, %v10809_v11 }
 0x7a9   : > { %v5383_v29 = vpop.f32.mrf.mxu1  ;;  %v7965_v38 = vpop.f32.mrf.mxu0 }
 0x7aa   : > { %v10951_v9 = vadd.f32 %v7965_v38, %v7964_v46  ;;  %6332 = vmatprep.mubr.bf16.mxu0 %v5620_v54  ;;  %v5384_v57 = vadd.f32 %v5383_v29, %v10803_v62 }
 0x7ab   : > { %v5385_v40 = vpop.f32.mrf.mxu1  ;;  %v10953_v42 = vpop.f32.mrf.mxu0  ;;  %6333 = vmatmul.mubr.bf16.gmra.mxu0 %v5619_v41 }
 0x7ac   : > { %11523 = vst [vmem:[#allocation24_spill] sm:$0xff] %v10951_v9  ;;  %11524 = vst [vmem:[#allocation25_spill] sm:$0xff] %v10953_v42  ;;  %v5386_v0 = vadd.f32 %v5385_v40, %v10809_v11 }
 0x7ad   : > { %v5387_v28 = vpop.f32.mrf.mxu1  ;;  %v10956_v55 = vpop.f32.mrf.mxu0 }
 0x7ae   : > { %11525 = vst [vmem:[#allocation26_spill] sm:$0xff] %v10956_v55  ;;  %v5388_v51 = vadd.f32 %v5387_v28, %v10803_v62  ;;  %v5621_v43 = vpack.c.bf16 %v5386_v0, %v5382_v35 }
 0x7af   : > { %v5391_v12 = vpop.f32.mrf.mxu1  ;;  %v7970_v24 = vpop.f32.mrf.mxu0 }
 0x7b0   : > { %v5622_v48 = vpack.c.bf16 %v5388_v51, %v5384_v57  ;;  %v5392_v54 = vadd.f32 %v5391_v12, %v10809_v11 }
 0x7b1   : > { %v5393_v59 = vpop.f32.mrf.mxu1  ;;  %v7971_v14 = vpop.f32.mrf.mxu0 }
 0x7b2   : > { %v10961_v18 = vadd.f32 %v7971_v14, %v7970_v24  ;;  %6342 = vmatprep.mubr.bf16.mxu0 %v5622_v48  ;;  %v5394_v58 = vadd.f32 %v5393_v59, %v10803_v62 }
 0x7b3   : > { %v5395_v20 = vpop.f32.mrf.mxu1  ;;  %v7973_v61 = vpop.f32.mrf.mxu0  ;;  %6343 = vmatmul.mubr.bf16.gmra.mxu0 %v5621_v43 }
 0x7b4   : > { %11526 = vst [vmem:[#allocation27_spill] sm:$0xff] %v10961_v18  ;;  %v5396_v26 = vadd.f32 %v5395_v20, %v10809_v11 }
 0x7b5   : > { %v5397_v39 = vpop.f32.mrf.mxu1  ;;  %v7974_v27 = vpop.f32.mrf.mxu0 }
 0x7b6   : > { %v5398_v56 = vadd.f32 %v5397_v39, %v10803_v62  ;;  %v10966_v46 = vadd.f32 %v7974_v27, %v7973_v61  ;;  %v5623_v38 = vpack.c.bf16 %v5396_v26, %v5392_v54 }
 0x7b7   : > { %v5401_v44 = vpop.f32.mrf.mxu1  ;;  %v7976_v41 = vpop.f32.mrf.mxu0 }
 0x7b8   : > { %11527 = vst [vmem:[#allocation28_spill] sm:$0xff] %v10966_v46  ;;  %v5624_v29 = vpack.c.bf16 %v5398_v56, %v5394_v58  ;;  %v5402_v14 = vadd.f32 %v5401_v44, %v10809_v11 }
 0x7b9   : > { %v5403_v40 = vpop.f32.mrf.mxu1  ;;  %v7977_v0 = vpop.f32.mrf.mxu0 }
 0x7ba   : > { %v10969_v28 = vadd.f32 %v7977_v0, %v7976_v41  ;;  %6352 = vmatprep.mubr.bf16.mxu0 %v5624_v29  ;;  %v5404_v43 = vadd.f32 %v5403_v40, %v10803_v62 }
 0x7bb   : > { %v5405_v57 = vpop.f32.mrf.mxu1  ;;  %v7979_v51 = vpop.f32.mrf.mxu0  ;;  %6353 = vmatmul.mubr.bf16.gmra.mxu0 %v5623_v38 }
 0x7bc   : > { %11528 = vst [vmem:[#allocation29_spill] sm:$0xff] %v10969_v28  ;;  %v5406_v35 = vadd.f32 %v5405_v57, %v10809_v11 }
 0x7bd   : > { %v5407_v24 = vpop.f32.mrf.mxu1  ;;  %v7980_v48 = vpop.f32.mrf.mxu0 }
 0x7be   : > { %v5408_v12 = vadd.f32 %v5407_v24, %v10803_v62  ;;  %v10974_v59 = vadd.f32 %v7980_v48, %v7979_v51  ;;  %v5625_v39 = vpack.c.bf16 %v5406_v35, %v5402_v14 }
 0x7bf   : > { %v5411_v20 = vpop.f32.mrf.mxu1  ;;  %v7982_v61 = vpop.f32.mrf.mxu0 }
 0x7c0   : > { %11529 = vst [vmem:[#allocation30_spill] sm:$0xff] %v10974_v59  ;;  %v5626_v26 = vpack.c.bf16 %v5408_v12, %v5404_v43  ;;  %v5412_v51 = vadd.f32 %v5411_v20, %v10809_v11 }
 0x7c1   : > { %v5413_v27 = vpop.f32.mrf.mxu1  ;;  %v7983_v58 = vpop.f32.mrf.mxu0 }
 0x7c2   : > { %v10977_v56 = vadd.f32 %v7983_v58, %v7982_v61  ;;  %6362 = vmatprep.mubr.bf16.mxu0 %v5626_v26  ;;  %v5414_v0 = vadd.f32 %v5413_v27, %v10803_v62 }
 0x7c3   : > { %v5415_v54 = vpop.f32.mrf.mxu1  ;;  %v7985_v41 = vpop.f32.mrf.mxu0  ;;  %6363 = vmatmul.mubr.bf16.gmra.mxu0 %v5625_v39 }
 0x7c4   : > { %11530 = vst [vmem:[#allocation31_spill] sm:$0xff] %v10977_v56  ;;  %v5416_v29 = vadd.f32 %v5415_v54, %v10809_v11 }
 0x7c5   : > { %v5417_v38 = vpop.f32.mrf.mxu1  ;;  %v7986_v40 = vpop.f32.mrf.mxu0 }
 0x7c6   : > { %v5418_v44 = vadd.f32 %v5417_v38, %v10803_v62  ;;  %v10982_v57 = vadd.f32 %v7986_v40, %v7985_v41  ;;  %v5627_v43 = vpack.c.bf16 %v5416_v29, %v5412_v51 }
 0x7c7   : > { %v5421_v35 = vpop.f32.mrf.mxu1  ;;  %v7988_v24 = vpop.f32.mrf.mxu0 }
 0x7c8   : > { %11531 = vst [vmem:[#allocation32_spill] sm:$0xff] %v10982_v57  ;;  %v5628_v48 = vpack.c.bf16 %v5418_v44, %v5414_v0  ;;  %v5422_v29 = vadd.f32 %v5421_v35, %v10809_v11 }
 0x7c9   : > { %v5423_v12 = vpop.f32.mrf.mxu1  ;;  %v7989_v14 = vpop.f32.mrf.mxu0 }
 0x7ca   : > { %v10985_v61 = vadd.f32 %v7989_v14, %v7988_v24  ;;  %6372 = vmatprep.mubr.bf16.mxu0 %v5628_v48  ;;  %v5424_v41 = vadd.f32 %v5423_v12, %v10803_v62 }
 0x7cb   : > { %v5425_v26 = vpop.f32.mrf.mxu1  ;;  %v7991_v39 = vpop.f32.mrf.mxu0  ;;  %6373 = vmatmul.mubr.bf16.gmra.mxu0 %v5627_v43 }
 0x7cc   : > { %11532 = vst [vmem:[#allocation33_spill] sm:$0xff] %v10985_v61  ;;  %v5426_v27 = vadd.f32 %v5425_v26, %v10809_v11 }
 0x7cd   : > { %v5427_v58 = vpop.f32.mrf.mxu1  ;;  %v7992_v54 = vpop.f32.mrf.mxu0 }
 0x7ce   : > { %v5428_v20 = vadd.f32 %v5427_v58, %v10803_v62  ;;  %v10990_v38 = vadd.f32 %v7992_v54, %v7991_v39  ;;  %v5629_v51 = vpack.c.bf16 %v5426_v27, %v5422_v29 }
 0x7cf   : > { %v5431_v40 = vpop.f32.mrf.mxu1  ;;  %v7994_v0 = vpop.f32.mrf.mxu0 }
 0x7d0   : > { %11533 = vst [vmem:[#allocation34_spill] sm:$0xff] %v10990_v38  ;;  %v5630_v44 = vpack.c.bf16 %v5428_v20, %v5424_v41  ;;  %v5432_v35 = vadd.f32 %v5431_v40, %v10809_v11 }
 0x7d1   : > { %v5433_v24 = vpop.f32.mrf.mxu1  ;;  %v7995_v48 = vpop.f32.mrf.mxu0 }
 0x7d2   : > { %v10993_v14 = vadd.f32 %v7995_v48, %v7994_v0  ;;  %6382 = vmatprep.mubr.bf16.mxu0 %v5630_v44  ;;  %v5434_v58 = vadd.f32 %v5433_v24, %v10803_v62 }
 0x7d3   : > { %v5435_v43 = vpop.f32.mrf.mxu1  ;;  %6383 = vmatmul.mubr.bf16.gmra.mxu0 %v5629_v51  ;;  %v11045_v18 = vpop.f32.mrf.mxu0 }
 0x7d4   : > { %11534 = vst [vmem:[#allocation35_spill] sm:$0xff] %v10993_v14  ;;  %v5436_v26 = vadd.f32 %v5435_v43, %v10809_v11  ;;  %11535 = vst [vmem:[#allocation36_spill] sm:$0xff] %v11045_v18  ;;  %v11062_v18 = vrot.slane %v6403_v13, %v9111_v7  ;;  %v8754_v7 = vld [vmem:[%s11489_s16 + $0x30] sm:$0xff]  }
 0x7d5   : > { %v5437_v12 = vpop.f32.mrf.mxu1  ;;  %v11049_v47 = vpop.f32.mrf.mxu0  ;;  %8138 = vmatprep.subr.bf16.mxu0 %v8754_v7 }
 0x7d6   : > { %v5438_v39 = vadd.f32 %v5437_v12, %v10803_v62  ;;  %v5631_v41 = vpack.c.bf16 %v5436_v26, %v5432_v35  ;;  %11536 = vst [vmem:[#allocation37_spill] sm:$0xff] %v11049_v47  ;;  %8139 = vmatpush3.bf16.msra.mxu0 %v8754_v7 }
 0x7d7   : > { %v5891_v54 = vpop.f32.mrf.mxu1 }
 0x7d8   : > { %v5632_v38 = vpack.c.bf16 %v5438_v39, %v5434_v58 }
 0x7d9   : > { %v5893_v27 = vpop.f32.mrf.mxu1 }
 0x7da   : > { %6392 = vmatprep.mubr.bf16.mxu0 %v5632_v38 }
 0x7db   : > { %6393 = vmatmul.mubr.bf16.gmra.mxu0 %v5631_v41  ;;  %v5895_v20 = vpop.f32.mrf.mxu1 }
 0x7dd   : > { %v5897_v29 = vpop.f32.mrf.mxu1 }
 0x7df   : > { %v5901_v0 = vpop.f32.mrf.mxu1 }
 0x7e1   : > { %v5903_v44 = vpop.f32.mrf.mxu1 }
 0x7e3   : > { %v5905_v51 = vpop.f32.mrf.mxu1 }
 0x7e5   : > { %v10999_v48 = vpop.f32.mrf.mxu1 }
 0x7e7   : > { %v11001_v43 = vpop.f32.mrf.mxu1 }
 0x7e9   : > { %v11003_v24 = vpop.f32.mrf.mxu1 }
 0x7eb   : > { %v11005_v62 = vpop.f32.mrf.mxu1 }
 0x7ed   : > { %v11007_v11 = vpop.f32.mrf.mxu1 }
 0x7ef   : > { %v11009_v40 = vpop.f32.mrf.mxu1 }
 0x7f1   : > { %v11011_v26 = vpop.f32.mrf.mxu1 }
 0x7f3   : > { %v11013_v38 = vpop.f32.mrf.mxu1 }
 0x7f5   : > { %v11015_v12 = vpop.f32.mrf.mxu1 }
 0x7f7   : > { %v11017_v58 = vpop.f32.mrf.mxu1 }
 0x7f9   : > { %v11019_v39 = vpop.f32.mrf.mxu1 }
 0x7fb   : > { %v11021_v35 = vpop.f32.mrf.mxu1 }
 0x7fd   : > { %v11023_v41 = vpop.f32.mrf.mxu1 }
 0x7ff   : > { %v11025_v61 = vpop.f32.mrf.mxu1 }
 0x801   : > { %v11027_v14 = vpop.f32.mrf.mxu1 }
 0x803   : > { %v11029_v59 = vpop.f32.mrf.mxu1 }
 0x805   : > { %v11031_v57 = vpop.f32.mrf.mxu1 }
 0x807   : > { %v11033_v28 = vpop.f32.mrf.mxu1 }
 0x809   : > { %v11035_v56 = vpop.f32.mrf.mxu1 }
 0x80b   : > { %v11037_v46 = vpop.f32.mrf.mxu1 }
 0x80d   : > { %v11039_v55 = vpop.f32.mrf.mxu1 }
 0x80f   : > { %v11041_v42 = vpop.f32.mrf.mxu1 }
 0x811   : > { %v11043_v9 = vpop.f32.mrf.mxu1 }
 0x813   : > { %v11047_v49 = vpop.f32.mrf.mxu1 }
 0x815   : > { %v11051_v33 = vpop.f32.mrf.mxu1 }
 0x817   : > { %v11056_v15 = vpop.f32.mrf.mxu1 }
 0x819   : > { %v11064_v17 = vpop.f32.mrf.mxu1 }
 0x823   : > { %v6244_v31 = vpop.f32.mrf.mxu0 }
 0x824   : > { %v6245_v34 = vadd.f32 %v6244_v31, %v5891_v54  ;;  %v11076_v54 = vpop.f32.mrf.mxu1 }
 0x825   : > { %v6246_v2 = vpop.f32.mrf.mxu0 }
 0x826   : > { %v6247_v19 = vadd.f32 %v6246_v2, %v5893_v27  ;;  %v6415_v22 = vadd.f32 %v11062_v18, %v6245_v34  ;;  %v11081_v45 = vpop.f32.mrf.mxu1 }
 0x827   : > { %v6248_v30 = vpop.f32.mrf.mxu0 }
 0x828   : > { %v6249_v47 = vadd.f32 %v6248_v30, %v5895_v20  ;;  %v6416_v50 = vadd.f32 %v11059_v52, %v6247_v19 }
 0x829   : > { %v6250_v21 = vpop.f32.mrf.mxu0 }
 0x82a   : > { %v6417_v6 = vadd.f32 %v11062_v18, %v6249_v47  ;;  %v6251_v8 = vadd.f32 %v6250_v21, %v5897_v29  ;;  %v6480_v19 = vmax.f32 %v6416_v50, 0.0  ;;  %v6479_v47 = vmax.f32 %v6415_v22, 0.0  ;;  %v8755_v29 = vld [vmem:[%s11489_s16 + $0x28] sm:$0xff]  }
 0x82b   : > { %v6254_v2 = vpop.f32.mrf.mxu0  ;;  %8140 = vmatprep.subr.bf16.mxu0 %v8755_v29 }
 0x82c   : > { %v6418_v30 = vadd.f32 %v11059_v52, %v6251_v8  ;;  %v6481_v13 = vmax.f32 %v6417_v6, 0.0  ;;  %v6255_v27 = vadd.f32 %v6254_v2, %v5901_v0  ;;  %8141 = vmatpush3.bf16.msra.mxu0 %v8755_v29 }
 0x82d   : > { %v6256_v31 = vpop.f32.mrf.mxu0 }
 0x82e   : > { %v6482_v21 = vmax.f32 %v6418_v30, 0.0  ;;  %v6257_v34 = vadd.f32 %v6256_v31, %v5903_v44  ;;  %v6543_v6 = vpack.c.bf16 %v6481_v13, %v6479_v47  ;;  %v6419_v22 = vadd.f32 %v11062_v18, %v6255_v27  ;;  %v11088_v13 = vpop.f32.mrf.mxu1 }
 0x82f   : > { %v6258_v20 = vpop.f32.mrf.mxu0 }
 0x830   : > { %v6259_v16 = vadd.f32 %v6258_v20, %v5905_v51  ;;  %v6544_v8 = vpack.c.bf16 %v6482_v21, %v6480_v19  ;;  %v6420_v5 = vadd.f32 %v11059_v52, %v6257_v34  ;;  %v11093_v20 = vpop.f32.mrf.mxu1 }
 0x831   : > { %v6260_v36 = vpop.f32.mrf.mxu0 }
 0x832   : > { %v6421_v50 = vadd.f32 %v11062_v18, %v6259_v16  ;;  %v6261_v44 = vadd.f32 %v6260_v36, %v10999_v48  ;;  %6742 = vmatprep.mubr.bf16.mxu1 %v6544_v8  ;;  %v6484_v31 = vmax.f32 %v6420_v5, 0.0  ;;  %v6483_v36 = vmax.f32 %v6419_v22, 0.0 }
 0x833   : > { %v6264_v0 = vpop.f32.mrf.mxu0  ;;  %6743 = vmatmul.mubr.bf16.vlgmr.msra.gmra.mxu1 %v6543_v6 }
 0x834   : > { %v6422_v51 = vadd.f32 %v11059_v52, %v6261_v44  ;;  %8192 = vmatpush3.bf16.msra.mxu1 %v8753_v4  ;;  %v6485_v2 = vmax.f32 %v6421_v50, 0.0  ;;  %v6265_v48 = vadd.f32 %v6264_v0, %v11001_v43  ;;  %v11100_v44 = vpop.f32.mrf.mxu1 }
 0x835   : > { %v6266_v30 = vpop.f32.mrf.mxu0  ;;  %8185 = vmatprep.subr.bf16.mxu1 %v8754_v7 }
 0x836   : > { %v6486_v19 = vmax.f32 %v6422_v51, 0.0  ;;  %v6267_v16 = vadd.f32 %v6266_v30, %v11003_v24  ;;  %v6545_v27 = vpack.c.bf16 %v6485_v2, %v6483_v36  ;;  %v6423_v6 = vadd.f32 %v11062_v18, %v6265_v48  ;;  %v11105_v48 = vpop.f32.mrf.mxu1 }
 0x837   : > { %v6268_v21 = vpop.f32.mrf.mxu0 }
 0x838   : > { %v6269_v34 = vadd.f32 %v6268_v21, %v11005_v62  ;;  %v6546_v47 = vpack.c.bf16 %v6486_v19, %v6484_v31  ;;  %8193 = vmatpush3.bf16.msra.mxu1 %v8754_v7  ;;  %v6424_v8 = vadd.f32 %v11059_v52, %v6267_v16  ;;  %v6487_v2 = vmax.f32 %v6423_v6, 0.0 }
 0x839   : > { %v6270_v4 = vpop.f32.mrf.mxu0  ;;  %8186 = vmatprep.subr.bf16.mxu1 %v8755_v29 }
 0x83a   : > { %v6425_v5 = vadd.f32 %v11062_v18, %v6269_v34  ;;  %v6271_v24 = vadd.f32 %v6270_v4, %v11007_v11  ;;  %6750 = vmatprep.mubr.bf16.mxu1 %v6546_v47  ;;  %v6488_v22 = vmax.f32 %v6424_v8, 0.0  ;;  %v11112_v4 = vpop.f32.mrf.mxu1 }
 0x83b   : > { %v6274_v43 = vpop.f32.mrf.mxu0  ;;  %6751 = vmatmul.mubr.bf16.gmra.mxu1 %v6545_v27 }
 0x83c   : > { %v6426_v62 = vadd.f32 %v11059_v52, %v6271_v24  ;;  %8194 = vmatpush3.bf16.msra.mxu1 %v8755_v29  ;;  %v6489_v7 = vmax.f32 %v6425_v5, 0.0  ;;  %v6275_v30 = vadd.f32 %v6274_v43, %v11009_v40 }
 0x83d   : > { %v6276_v50 = vpop.f32.mrf.mxu0 }
 0x83e   : > { %v6490_v0 = vmax.f32 %v6426_v62, 0.0  ;;  %v6277_v51 = vadd.f32 %v6276_v50, %v11011_v26  ;;  %v6547_v16 = vpack.c.bf16 %v6489_v7, %v6487_v2  ;;  %v6427_v26 = vadd.f32 %v11062_v18, %v6275_v30 }
 0x83f   : > { %v6278_v11 = vpop.f32.mrf.mxu0 }
 0x840   : > { %v6279_v31 = vadd.f32 %v6278_v11, %v11013_v38  ;;  %v6548_v19 = vpack.c.bf16 %v6490_v0, %v6488_v22  ;;  %v6428_v29 = vadd.f32 %v11059_v52, %v6277_v51  ;;  %v6491_v6 = vmax.f32 %v6427_v26, 0.0  ;;  %v11117_v0 = vpop.f32.mrf.mxu1 }
 0x841   : > { %v6280_v36 = vpop.f32.mrf.mxu0 }
 0x842   : > { %v6429_v21 = vadd.f32 %v11062_v18, %v6279_v31  ;;  %v6281_v34 = vadd.f32 %v6280_v36, %v11015_v12  ;;  %6758 = vmatprep.mubr.bf16.mxu1 %v6548_v19  ;;  %v6492_v8 = vmax.f32 %v6428_v29, 0.0  ;;  %v11124_v19 = vpop.f32.mrf.mxu1 }
 0x843   : > { %v6284_v47 = vpop.f32.mrf.mxu0  ;;  %6759 = vmatmul.mubr.bf16.gmra.mxu1 %v6547_v16 }
 0x844   : > { %v6430_v40 = vadd.f32 %v11059_v52, %v6281_v34  ;;  %v6493_v27 = vmax.f32 %v6429_v21, 0.0  ;;  %v6285_v43 = vadd.f32 %v6284_v47, %v11017_v58 }
 0x845   : > { %v6286_v38 = vpop.f32.mrf.mxu0 }
 0x846   : > { %v6494_v5 = vmax.f32 %v6430_v40, 0.0  ;;  %v6287_v24 = vadd.f32 %v6286_v38, %v11019_v39  ;;  %v6549_v50 = vpack.c.bf16 %v6493_v27, %v6491_v6  ;;  %v6431_v39 = vadd.f32 %v11062_v18, %v6285_v43  ;;  %v11129_v38 = vpop.f32.mrf.mxu1 }
 0x847   : > { %v6288_v62 = vpop.f32.mrf.mxu0 }
 0x848   : > { %v6289_v12 = vadd.f32 %v6288_v62, %v11021_v35  ;;  %v6550_v7 = vpack.c.bf16 %v6494_v5, %v6492_v8  ;;  %v6432_v51 = vadd.f32 %v11059_v52, %v6287_v24  ;;  %v6495_v21 = vmax.f32 %v6431_v39, 0.0  ;;  %v11136_v62 = vpop.f32.mrf.mxu1 }
 0x849   : > { %v6290_v22 = vpop.f32.mrf.mxu0 }
 0x84a   : > { %v6433_v2 = vadd.f32 %v11062_v18, %v6289_v12  ;;  %v6291_v30 = vadd.f32 %v6290_v22, %v11023_v41  ;;  %6766 = vmatprep.mubr.bf16.mxu1 %v6550_v7  ;;  %v6496_v16 = vmax.f32 %v6432_v51, 0.0 }
 0x84b   : > { %v6294_v11 = vpop.f32.mrf.mxu0  ;;  %6767 = vmatmul.mubr.bf16.gmra.mxu1 %v6549_v50 }
 0x84c   : > { %v6434_v58 = vadd.f32 %v11059_v52, %v6291_v30  ;;  %v6497_v31 = vmax.f32 %v6433_v2, 0.0  ;;  %v6295_v34 = vadd.f32 %v6294_v11, %v11025_v61 }
 0x84d   : > { %v6296_v35 = vpop.f32.mrf.mxu0 }
 0x84e   : > { %v6498_v36 = vmax.f32 %v6434_v58, 0.0  ;;  %v6297_v29 = vadd.f32 %v6296_v35, %v11027_v14  ;;  %v6551_v40 = vpack.c.bf16 %v6497_v31, %v6495_v21  ;;  %v6435_v14 = vadd.f32 %v11062_v18, %v6295_v34  ;;  %v11141_v58 = vpop.f32.mrf.mxu1 }
 0x84f   : > { %v6298_v26 = vpop.f32.mrf.mxu0 }
 0x850   : > { %v6299_v41 = vadd.f32 %v6298_v26, %v11029_v59  ;;  %v6552_v47 = vpack.c.bf16 %v6498_v36, %v6496_v16  ;;  %v6436_v8 = vadd.f32 %v11059_v52, %v6297_v29  ;;  %v6499_v22 = vmax.f32 %v6435_v14, 0.0  ;;  %v11148_v21 = vpop.f32.mrf.mxu1 }
 0x851   : > { %v6300_v27 = vpop.f32.mrf.mxu0 }
 0x852   : > { %v6437_v5 = vadd.f32 %v11062_v18, %v6299_v41  ;;  %v6301_v24 = vadd.f32 %v6300_v27, %v11031_v57  ;;  %6774 = vmatprep.mubr.bf16.mxu1 %v6552_v47  ;;  %v6500_v12 = vmax.f32 %v6436_v8, 0.0  ;;  %v11153_v14 = vpop.f32.mrf.mxu1 }
 0x853   : > { %v6304_v6 = vpop.f32.mrf.mxu0  ;;  %6775 = vmatmul.mubr.bf16.gmra.mxu1 %v6551_v40 }
 0x854   : > { %v6438_v61 = vadd.f32 %v11059_v52, %v6301_v24  ;;  %v6501_v43 = vmax.f32 %v6437_v5, 0.0  ;;  %v6305_v51 = vadd.f32 %v6304_v6, %v11033_v28 }
 0x855   : > { %v6306_v59 = vpop.f32.mrf.mxu0 }
 0x856   : > { %v6502_v7 = vmax.f32 %v6438_v61, 0.0  ;;  %v6307_v50 = vadd.f32 %v6306_v59, %v11035_v56  ;;  %v6553_v39 = vpack.c.bf16 %v6501_v43, %v6499_v22  ;;  %v6439_v56 = vadd.f32 %v11062_v18, %v6305_v51 }
 0x857   : > { %v6308_v2 = vpop.f32.mrf.mxu0 }
 0x858   : > { %v6309_v57 = vadd.f32 %v6308_v2, %v11037_v46  ;;  %v6554_v30 = vpack.c.bf16 %v6502_v7, %v6500_v12  ;;  %v6440_v31 = vadd.f32 %v11059_v52, %v6307_v50  ;;  %v6503_v47 = vmax.f32 %v6439_v56, 0.0  ;;  %v11160_v7 = vpop.f32.mrf.mxu1 }
 0x859   : > { %v6310_v11 = vpop.f32.mrf.mxu0 }
 0x85a   : > { %v6441_v35 = vadd.f32 %v11062_v18, %v6309_v57  ;;  %v6311_v16 = vadd.f32 %v6310_v11, %v11039_v55  ;;  %6782 = vmatprep.mubr.bf16.mxu1 %v6554_v30  ;;  %v6504_v34 = vmax.f32 %v6440_v31, 0.0 }
 0x85b   : > { %v6314_v36 = vpop.f32.mrf.mxu0  ;;  %6783 = vmatmul.mubr.bf16.gmra.mxu1 %v6553_v39 }
 0x85c   : > { %v6442_v28 = vadd.f32 %v11059_v52, %v6311_v16  ;;  %v6505_v29 = vmax.f32 %v6441_v35, 0.0  ;;  %v6315_v40 = vadd.f32 %v6314_v36, %v11041_v42  ;;  %v11165_v35 = vpop.f32.mrf.mxu1 }
 0x85d   : > { %v6316_v46 = vpop.f32.mrf.mxu0 }
 0x85e   : > { %v6506_v26 = vmax.f32 %v6442_v28, 0.0  ;;  %v6317_v41 = vadd.f32 %v6316_v46, %v11043_v9  ;;  %v6555_v5 = vpack.c.bf16 %v6505_v29, %v6503_v47  ;;  %v6443_v9 = vadd.f32 %v11062_v18, %v6315_v40  ;;  %v11172_v46 = vpop.f32.mrf.mxu1 }
 0x85f   : > { %v6318_v27 = vpop.f32.mrf.mxu0 }
 0x860   : > { %v6319_v55 = vadd.f32 %v6318_v27, %v11047_v49  ;;  %v6556_v8 = vpack.c.bf16 %v6506_v26, %v6504_v34  ;;  %v6444_v6 = vadd.f32 %v11059_v52, %v6317_v41  ;;  %v6507_v2 = vmax.f32 %v6443_v9, 0.0 }
 0x861   : > { %v6320_v24 = vpop.f32.mrf.mxu0 }
 0x862   : > { %v6445_v61 = vadd.f32 %v11062_v18, %v6319_v55  ;;  %v6321_v43 = vadd.f32 %v6320_v24, %v11051_v33  ;;  %6790 = vmatprep.mubr.bf16.mxu1 %v6556_v8  ;;  %v6508_v50 = vmax.f32 %v6444_v6, 0.0  ;;  %v11177_v24 = vpop.f32.mrf.mxu1 }
 0x863   : > { %v6324_v59 = vpop.f32.mrf.mxu0  ;;  %6791 = vmatmul.mubr.bf16.gmra.mxu1 %v6555_v5 }
 0x864   : > { %v6446_v42 = vadd.f32 %v11059_v52, %v6321_v43  ;;  %v6509_v12 = vmax.f32 %v6445_v61, 0.0  ;;  %v6325_v57 = vadd.f32 %v6324_v59, %v11056_v15 }
 0x865   : > { %v6326_v49 = vpop.f32.mrf.mxu0 }
 0x866   : > { %v6510_v22 = vmax.f32 %v6446_v42, 0.0  ;;  %v6327_v51 = vadd.f32 %v6326_v49, %v11064_v17  ;;  %v6557_v11 = vpack.c.bf16 %v6509_v12, %v6507_v2  ;;  %v6447_v17 = vadd.f32 %v11062_v18, %v6325_v57  ;;  %v11187_v12 = vpop.f32.mrf.mxu1 }
 0x867   : > { %v6328_v30 = vpop.f32.mrf.mxu0 }
 0x868   : > { %v6329_v33 = vadd.f32 %v6328_v30, %v11076_v54  ;;  %v6558_v39 = vpack.c.bf16 %v6510_v22, %v6508_v50  ;;  %v6448_v16 = vadd.f32 %v11059_v52, %v6327_v51  ;;  %v6511_v47 = vmax.f32 %v6447_v17, 0.0  ;;  %v8758_v17 = vld [vmem:[%s11489_s16 + $0x10] sm:$0xff]  }
 0x869   : > { %v6330_v31 = vpop.f32.mrf.mxu0 }
 0x86a   : > { %v6449_v56 = vadd.f32 %v11062_v18, %v6329_v33  ;;  %v6331_v36 = vadd.f32 %v6330_v31, %v11081_v45  ;;  %6798 = vmatprep.mubr.bf16.mxu1 %v6558_v39  ;;  %v6512_v34 = vmax.f32 %v6448_v16, 0.0  ;;  %v8757_v33 = vld [vmem:[%s11489_s16 + $0x18] sm:$0xff]   ;;  %v11195_v31 = vpop.f32.mrf.mxu1 }
 0x86b   : > { %v6334_v28 = vpop.f32.mrf.mxu0  ;;  %6799 = vmatmul.mubr.bf16.gmra.mxu1 %v6557_v11 }
 0x86c   : > { %v6450_v15 = vadd.f32 %v11059_v52, %v6331_v36  ;;  %v6513_v29 = vmax.f32 %v6449_v56, 0.0  ;;  %v6335_v40 = vadd.f32 %v6334_v28, %v11088_v13 }
 0x86d   : > { %v6336_v54 = vpop.f32.mrf.mxu0 }
 0x86e   : > { %v6514_v26 = vmax.f32 %v6450_v15, 0.0  ;;  %v6337_v41 = vadd.f32 %v6336_v54, %v11093_v20  ;;  %v6559_v8 = vpack.c.bf16 %v6513_v29, %v6511_v47  ;;  %v6451_v20 = vadd.f32 %v11062_v18, %v6335_v40  ;;  %v11205_v29 = vpop.f32.mrf.mxu1 }
 0x86f   : > { %v6338_v27 = vpop.f32.mrf.mxu0 }
 0x870   : > { %v6339_v45 = vadd.f32 %v6338_v27, %v11100_v44  ;;  %v6560_v55 = vpack.c.bf16 %v6514_v26, %v6512_v34  ;;  %v6452_v6 = vadd.f32 %v11059_v52, %v6337_v41  ;;  %v8756_v44 = vld [vmem:[%s11489_s16 + $0x20] sm:$0xff]  }
 0x871   : > { %v6340_v5 = vpop.f32.mrf.mxu0  ;;  %8142 = vmatprep.subr.bf16.mxu0 %v8756_v44  ;;  %8187 = vmatprep.subr.bf16.mxu1 %v8756_v44 }
 0x872   : > { %v6453_v61 = vadd.f32 %v11062_v18, %v6339_v45  ;;  %v6341_v43 = vadd.f32 %v6340_v5, %v11105_v48  ;;  %6806 = vmatprep.mubr.bf16.mxu1 %v6560_v55  ;;  %v6516_v49 = vmax.f32 %v6452_v6, 0.0  ;;  %v6515_v48 = vmax.f32 %v6451_v20, 0.0  ;;  %8143 = vmatpush3.bf16.msra.mxu0 %v8756_v44  ;;  %v8759_v45 = vld [vmem:[%s11489_s16 + $0x8] sm:$0xff]   ;;  %v6027_v5 = vpop.f32.mrf.mxu1  ;;  %v8760_v20 = vld [vmem:[%s11489_s16] sm:$0xff]  }
 0x873   : > { %v6344_v9 = vpop.f32.mrf.mxu0  ;;  %6807 = vmatmul.mubr.bf16.gmra.mxu1 %v6559_v8  ;;  %8144 = vmatprep.subr.bf16.mxu0 %v8757_v33 }
 0x874   : > { %v6454_v13 = vadd.f32 %v11059_v52, %v6341_v43  ;;  %v6517_v59 = vmax.f32 %v6453_v61, 0.0  ;;  %v6345_v51 = vadd.f32 %v6344_v9, %v11112_v4  ;;  %8195 = vmatpush3.bf16.msra.mxu1 %v8756_v44  ;;  %v6031_v44 = vpop.f32.mrf.mxu1 }
 0x875   : > { %v6346_v42 = vpop.f32.mrf.mxu0  ;;  %8188 = vmatprep.subr.bf16.mxu1 %v8757_v33 }
 0x876   : > { %v6518_v50 = vmax.f32 %v6454_v13, 0.0  ;;  %v6347_v22 = vadd.f32 %v6346_v42, %v11117_v0  ;;  %v6561_v39 = vpack.c.bf16 %v6517_v59, %v6515_v48  ;;  %v6455_v56 = vadd.f32 %v11062_v18, %v6345_v51  ;;  %8145 = vmatpush3.bf16.msra.mxu0 %v8757_v33 }
 0x877   : > { %v6348_v2 = vpop.f32.mrf.mxu0  ;;  %8146 = vmatprep.subr.bf16.mxu0 %v8758_v17 }
 0x878   : > { %v6349_v57 = vadd.f32 %v6348_v2, %v11124_v19  ;;  %v6562_v30 = vpack.c.bf16 %v6518_v50, %v6516_v49  ;;  %v6456_v0 = vadd.f32 %v11059_v52, %v6347_v22  ;;  %8196 = vmatpush3.bf16.msra.mxu1 %v8757_v33  ;;  %v6519_v26 = vmax.f32 %v6455_v56, 0.0 }
 0x879   : > { %v6350_v11 = vpop.f32.mrf.mxu0  ;;  %8189 = vmatprep.subr.bf16.mxu1 %v8758_v17 }
 0x87a   : > { %v6457_v16 = vadd.f32 %v11062_v18, %v6349_v57  ;;  %v6351_v4 = vadd.f32 %v6350_v11, %v11129_v38  ;;  %6814 = vmatprep.mubr.bf16.mxu1 %v6562_v30  ;;  %v6520_v38 = vmax.f32 %v6456_v0, 0.0  ;;  %8147 = vmatpush3.bf16.msra.mxu0 %v8758_v17  ;;  %v6033_v30 = vpop.f32.mrf.mxu1 }
 0x87b   : > { %v6354_v19 = vpop.f32.mrf.mxu0  ;;  %6815 = vmatmul.mubr.bf16.gmra.mxu1 %v6561_v39  ;;  %8148 = vmatprep.subr.bf16.mxu0 %v8759_v45 }
 0x87c   : > { %v6458_v36 = vadd.f32 %v11059_v52, %v6351_v4  ;;  %v6521_v28 = vmax.f32 %v6457_v16, 0.0  ;;  %v6355_v41 = vadd.f32 %v6354_v19, %v11136_v62  ;;  %8197 = vmatpush3.bf16.msra.mxu1 %v8758_v17  ;;  %v6035_v4 = vpop.f32.mrf.mxu1 }
 0x87d   : > { %v6356_v15 = vpop.f32.mrf.mxu0  ;;  %8190 = vmatprep.subr.bf16.mxu1 %v8759_v45 }
 0x87e   : > { %v6522_v54 = vmax.f32 %v6458_v36, 0.0  ;;  %v6357_v34 = vadd.f32 %v6356_v15, %v11141_v58  ;;  %v6563_v55 = vpack.c.bf16 %v6521_v28, %v6519_v26  ;;  %v6459_v62 = vadd.f32 %v11062_v18, %v6355_v41  ;;  %8149 = vmatpush3.bf16.msra.mxu0 %v8759_v45  ;;  %v6037_v26 = vpop.f32.mrf.mxu1 }
 0x87f   : > { %v6358_v47 = vpop.f32.mrf.mxu0  ;;  %8150 = vmatprep.subr.bf16.mxu0 %v8760_v20 }
 0x880   : > { %v6359_v40 = vadd.f32 %v6358_v47, %v11148_v21  ;;  %v6564_v27 = vpack.c.bf16 %v6522_v54, %v6520_v38  ;;  %v6460_v58 = vadd.f32 %v11059_v52, %v6357_v34  ;;  %8198 = vmatpush3.bf16.msra.mxu1 %v8759_v45  ;;  %v6523_v49 = vmax.f32 %v6459_v62, 0.0 }
 0x881   : > { %v6360_v8 = vpop.f32.mrf.mxu0  ;;  %8191 = vmatprep.subr.bf16.mxu1 %v8760_v20 }
 0x882   : > { %v6461_v6 = vadd.f32 %v11062_v18, %v6359_v40  ;;  %v6361_v61 = vadd.f32 %v6360_v8, %v11153_v14  ;;  %6822 = vmatprep.mubr.bf16.mxu1 %v6564_v27  ;;  %v6524_v59 = vmax.f32 %v6460_v58, 0.0  ;;  %8151 = vmatpush3.bf16.msra.mxu0 %v8760_v20 }
 0x883   : > { %v6364_v21 = vpop.f32.mrf.mxu0  ;;  %6823 = vmatmul.mubr.bf16.gmra.mxu1 %v6563_v55  ;;  %v6041_v55 = vpop.f32.mrf.mxu1 }
 0x884   : > { %v6462_v43 = vadd.f32 %v11059_v52, %v6361_v61  ;;  %v6525_v9 = vmax.f32 %v6461_v6, 0.0  ;;  %v6365_v50 = vadd.f32 %v6364_v21, %v11160_v7  ;;  %8199 = vmatpush3.bf16.msra.mxu1 %v8760_v20 }
 0x885   : > { %v6366_v13 = vpop.f32.mrf.mxu0 }
 0x886   : > { %v6526_v14 = vmax.f32 %v6462_v43, 0.0  ;;  %v6367_v42 = vadd.f32 %v6366_v13, %v11165_v35  ;;  %v6565_v2 = vpack.c.bf16 %v6525_v9, %v6523_v49  ;;  %v6463_v11 = vadd.f32 %v11062_v18, %v6365_v50 }
 0x887   : > { %v6368_v22 = vpop.f32.mrf.mxu0 }
 0x888   : > { %v6369_v48 = vadd.f32 %v6368_v22, %v11172_v46  ;;  %v6566_v51 = vpack.c.bf16 %v6526_v14, %v6524_v59  ;;  %v6464_v33 = vadd.f32 %v11059_v52, %v6367_v42  ;;  %v6527_v17 = vmax.f32 %v6463_v11, 0.0 }
 0x889   : > { %v6370_v57 = vpop.f32.mrf.mxu0 }
 0x88a   : > { %v6465_v39 = vadd.f32 %v11062_v18, %v6369_v48  ;;  %v6371_v35 = vadd.f32 %v6370_v57, %v11177_v24  ;;  %6830 = vmatprep.mubr.bf16.mxu1 %v6566_v51  ;;  %v6528_v56 = vmax.f32 %v6464_v33, 0.0 }
 0x88b   : > { %v6374_v0 = vpop.f32.mrf.mxu0  ;;  %6831 = vmatmul.mubr.bf16.gmra.mxu1 %v6565_v2 }
 0x88c   : > { %v6466_v7 = vadd.f32 %v11059_v52, %v6371_v35  ;;  %v6529_v16 = vmax.f32 %v6465_v39, 0.0  ;;  %v6375_v28 = vadd.f32 %v6374_v0, %v11187_v12 }
 0x88d   : > { %v6376_v46 = vpop.f32.mrf.mxu0 }
 0x88e   : > { %v6530_v19 = vmax.f32 %v6466_v7, 0.0  ;;  %v6377_v36 = vadd.f32 %v6376_v46, %v11195_v31  ;;  %v6567_v54 = vpack.c.bf16 %v6529_v16, %v6527_v17  ;;  %v6467_v27 = vadd.f32 %v11062_v18, %v6375_v28 }
 0x88f   : > { %v6378_v15 = vpop.f32.mrf.mxu0 }
 0x890   : > { %v6379_v24 = vadd.f32 %v6378_v15, %v11205_v29  ;;  %v6568_v38 = vpack.c.bf16 %v6530_v19, %v6528_v56  ;;  %v6468_v41 = vadd.f32 %v11059_v52, %v6377_v36  ;;  %v6531_v61 = vmax.f32 %v6467_v27, 0.0 }
 0x891   : > { %v6380_v34 = vpop.f32.mrf.mxu0 }
 0x892   : > { %v6469_v47 = vadd.f32 %v11062_v18, %v6379_v24  ;;  %v6381_v40 = vadd.f32 %v6380_v34, %v6027_v5  ;;  %6838 = vmatprep.mubr.bf16.mxu1 %v6568_v38  ;;  %v6532_v29 = vmax.f32 %v6468_v41, 0.0  ;;  %v6043_v5 = vpop.f32.mrf.mxu1 }
 0x893   : > { %v6384_v45 = vpop.f32.mrf.mxu0  ;;  %6839 = vmatmul.mubr.bf16.gmra.mxu1 %v6567_v54 }
 0x894   : > { %v6470_v31 = vadd.f32 %v11059_v52, %v6381_v40  ;;  %v6533_v12 = vmax.f32 %v6469_v47, 0.0  ;;  %v6385_v62 = vadd.f32 %v6384_v45, %v6031_v44  ;;  %v6045_v44 = vpop.f32.mrf.mxu1  ;;  %v11247_v40 = vld [vmem:[%s11488_s15] ss:$0 sm:$0xff] }
 0x895   : > { %v6386_v8 = vpop.f32.mrf.mxu0 }
 0x896   : > { %v6534_v58 = vmax.f32 %v6470_v31, 0.0  ;;  %v6387_v6 = vadd.f32 %v6386_v8, %v6033_v30  ;;  %v6569_v9 = vpack.c.bf16 %v6533_v12, %v6531_v61  ;;  %v6471_v49 = vadd.f32 %v11062_v18, %v6385_v62  ;;  %v6047_v16 = vpop.f32.mrf.mxu1 }
 0x897   : > { %v6388_v21 = vpop.f32.mrf.mxu0 }
 0x898   : > { %v6389_v43 = vadd.f32 %v6388_v21, %v6035_v4  ;;  %v6570_v20 = vpack.c.bf16 %v6534_v58, %v6532_v29  ;;  %v6472_v59 = vadd.f32 %v11059_v52, %v6387_v6  ;;  %v6535_v33 = vmax.f32 %v6471_v49, 0.0 }
 0x899   : > { %v6390_v13 = vpop.f32.mrf.mxu0 }
 0x89a   : > { %v6473_v14 = vadd.f32 %v11062_v18, %v6389_v43  ;;  %v6391_v42 = vadd.f32 %v6390_v13, %v6037_v26  ;;  %6846 = vmatprep.mubr.bf16.mxu1 %v6570_v20  ;;  %v6536_v2 = vmax.f32 %v6472_v59, 0.0 }
 0x89b   : > { %v6394_v50 = vpop.f32.mrf.mxu0  ;;  %6847 = vmatmul.mubr.bf16.gmra.mxu1 %v6569_v9 }
 0x89c   : > { %v6474_v22 = vadd.f32 %v11059_v52, %v6391_v42  ;;  %v6537_v48 = vmax.f32 %v6473_v14, 0.0  ;;  %v6395_v39 = vadd.f32 %v6394_v50, %v6041_v55 }
 0x89d   : > { %v6396_v51 = vpop.f32.mrf.mxu0 }
 0x89e   : > { %v6538_v57 = vmax.f32 %v6474_v22, 0.0  ;;  %v6397_v30 = vadd.f32 %v6396_v51, %v6043_v5  ;;  %v6571_v7 = vpack.c.bf16 %v6537_v48, %v6535_v33  ;;  %v6475_v36 = vadd.f32 %v11062_v18, %v6395_v39 }
 0x89f   : > { %v6398_v35 = vpop.f32.mrf.mxu0 }
 0x8a0   : > { %v6399_v11 = vadd.f32 %v6398_v35, %v6045_v44  ;;  %v6572_v0 = vpack.c.bf16 %v6538_v57, %v6536_v2  ;;  %v6476_v4 = vadd.f32 %v11059_v52, %v6397_v30  ;;  %v6539_v38 = vmax.f32 %v6475_v36, 0.0 }
 0x8a1   : > { %v6400_v46 = vpop.f32.mrf.mxu0 }
 0x8a2   : > { %v6477_v56 = vadd.f32 %v11062_v18, %v6399_v11  ;;  %v6401_v19 = vadd.f32 %v6400_v46, %v6047_v16  ;;  %6854 = vmatprep.mubr.bf16.mxu1 %v6572_v0  ;;  %v6540_v15 = vmax.f32 %v6476_v4, 0.0 }
 0x8a3   : > { %6855 = vmatmul.mubr.bf16.gmra.mxu1 %v6571_v7 }
 0x8a4   : > { %v6478_v17 = vadd.f32 %v11059_v52, %v6401_v19  ;;  %v6541_v28 = vmax.f32 %v6477_v56, 0.0 }
 0x8a6   : > { %v6542_v24 = vmax.f32 %v6478_v17, 0.0  ;;  %v6573_v34 = vpack.c.bf16 %v6541_v28, %v6539_v38 }
 0x8a8   : > { %v6574_v54 = vpack.c.bf16 %v6542_v24, %v6540_v15 }
 0x8aa   : > { %6862 = vmatprep.mubr.bf16.mxu1 %v6574_v54 }
 0x8ab   : > { %6863 = vmatmul.mubr.bf16.gmra.mxu1 %v6573_v34 }
 0x8f3   : > { %v8016_v26 = vpop.f32.mrf.mxu1 }
 0x8f5   : > { %v8017_v41 = vpop.f32.mrf.mxu1 }
 0x8f6   : > { %v8018_v47 = vadd.f32 %v8017_v41, %v8016_v26 }
 0x8f7   : > { %v8019_v18 = vpop.f32.mrf.mxu1 }
 0x8f8   : > { %v6745_v52 = vadd.f32 %v8018_v47, %v11247_v40 }
 0x8f9   : > { %v8020_v27 = vpop.f32.mrf.mxu1 }
 0x8fa   : > { %v8021_v45 = vadd.f32 %v8020_v27, %v8019_v18  ;;  %v6871_v8 = vmax.f32 %v6745_v52, 0.0 }
 0x8fb   : > { %v8022_v31 = vpop.f32.mrf.mxu1 }
 0x8fc   : > { %v6748_v12 = vadd.f32 %v8021_v45, %v11247_v40 }
 0x8fd   : > { %v8023_v55 = vpop.f32.mrf.mxu1 }
 0x8fe   : > { %v6872_v29 = vmax.f32 %v6748_v12, 0.0  ;;  %v8024_v58 = vadd.f32 %v8023_v55, %v8022_v31 }
 0x8ff   : > { %v8025_v6 = vpop.f32.mrf.mxu1 }
 0x900   : > { %v6903_v61 = vpack.c.bf16 %v6872_v29, %v6871_v8  ;;  %v6753_v21 = vadd.f32 %v8024_v58, %v11247_v40 }
 0x901   : > { %v8026_v62 = vpop.f32.mrf.mxu1 }
 0x902   : > { %v8027_v43 = vadd.f32 %v8026_v62, %v8025_v6  ;;  %8152 = vmatprep.mubr.bf16.mxu0 %v6903_v61  ;;  %v6873_v13 = vmax.f32 %v6753_v21, 0.0 }
 0x903   : > { %v8028_v20 = vpop.f32.mrf.mxu1 }
 0x904   : > { %v6756_v9 = vadd.f32 %v8027_v43, %v11247_v40 }
 0x905   : > { %v8029_v5 = vpop.f32.mrf.mxu1 }
 0x906   : > { %v6874_v59 = vmax.f32 %v6756_v9, 0.0  ;;  %v8030_v14 = vadd.f32 %v8029_v5, %v8028_v20 }
 0x907   : > { %v8031_v42 = vpop.f32.mrf.mxu1 }
 0x908   : > { %v6904_v49 = vpack.c.bf16 %v6874_v59, %v6873_v13  ;;  %v6761_v22 = vadd.f32 %v8030_v14, %v11247_v40 }
 0x909   : > { %v8032_v50 = vpop.f32.mrf.mxu1 }
 0x90a   : > { %v8033_v48 = vadd.f32 %v8032_v50, %v8031_v42  ;;  %8153 = vmatmul.mubr.bf16.vlgmr.msra.gmra.mxu0 %v6904_v49  ;;  %v6875_v57 = vmax.f32 %v6761_v22, 0.0 }
 0x90b   : > { %v8034_v44 = vpop.f32.mrf.mxu1 }
 0x90c   : > { %v6764_v51 = vadd.f32 %v8033_v48, %v11247_v40 }
 0x90d   : > { %v8035_v2 = vpop.f32.mrf.mxu1 }
 0x90e   : > { %v6876_v30 = vmax.f32 %v6764_v51, 0.0  ;;  %v8036_v33 = vadd.f32 %v8035_v2, %v8034_v44 }
 0x90f   : > { %v8037_v39 = vpop.f32.mrf.mxu1 }
 0x910   : > { %v6905_v35 = vpack.c.bf16 %v6876_v30, %v6875_v57  ;;  %v6769_v0 = vadd.f32 %v8036_v33, %v11247_v40 }
 0x911   : > { %v8038_v11 = vpop.f32.mrf.mxu1 }
 0x912   : > { %v8039_v7 = vadd.f32 %v8038_v11, %v8037_v39  ;;  %8156 = vmatprep.mubr.bf16.mxu0 %v6905_v35  ;;  %v6877_v56 = vmax.f32 %v6769_v0, 0.0 }
 0x913   : > { %v8040_v16 = vpop.f32.mrf.mxu1 }
 0x914   : > { %v6772_v46 = vadd.f32 %v8039_v7, %v11247_v40 }
 0x915   : > { %v8041_v4 = vpop.f32.mrf.mxu1 }
 0x916   : > { %v6878_v19 = vmax.f32 %v6772_v46, 0.0  ;;  %v8042_v36 = vadd.f32 %v8041_v4, %v8040_v16 }
 0x917   : > { %v8043_v17 = vpop.f32.mrf.mxu1 }
 0x918   : > { %v6906_v28 = vpack.c.bf16 %v6878_v19, %v6877_v56  ;;  %v6777_v24 = vadd.f32 %v8042_v36, %v11247_v40 }
 0x919   : > { %v8044_v15 = vpop.f32.mrf.mxu1 }
 0x91a   : > { %v8045_v38 = vadd.f32 %v8044_v15, %v8043_v17  ;;  %8157 = vmatmul.mubr.bf16.gmra.mxu0 %v6906_v28  ;;  %v6879_v41 = vmax.f32 %v6777_v24, 0.0 }
 0x91b   : > { %v8046_v54 = vpop.f32.mrf.mxu1 }
 0x91c   : > { %v6780_v34 = vadd.f32 %v8045_v38, %v11247_v40 }
 0x91d   : > { %v8047_v26 = vpop.f32.mrf.mxu1 }
 0x91e   : > { %v6880_v47 = vmax.f32 %v6780_v34, 0.0  ;;  %v8048_v18 = vadd.f32 %v8047_v26, %v8046_v54 }
 0x91f   : > { %v8049_v27 = vpop.f32.mrf.mxu1 }
 0x920   : > { %v6907_v52 = vpack.c.bf16 %v6880_v47, %v6879_v41  ;;  %v6785_v31 = vadd.f32 %v8048_v18, %v11247_v40 }
 0x921   : > { %v8050_v45 = vpop.f32.mrf.mxu1 }
 0x922   : > { %v8051_v12 = vadd.f32 %v8050_v45, %v8049_v27  ;;  %8160 = vmatprep.mubr.bf16.mxu0 %v6907_v52  ;;  %v6881_v58 = vmax.f32 %v6785_v31, 0.0 }
 0x923   : > { %v8052_v55 = vpop.f32.mrf.mxu1 }
 0x924   : > { %v6788_v8 = vadd.f32 %v8051_v12, %v11247_v40 }
 0x925   : > { %v8053_v29 = vpop.f32.mrf.mxu1 }
 0x926   : > { %v6882_v6 = vmax.f32 %v6788_v8, 0.0  ;;  %v8054_v61 = vadd.f32 %v8053_v29, %v8052_v55 }
 0x927   : > { %v8055_v62 = vpop.f32.mrf.mxu1 }
 0x928   : > { %v6908_v21 = vpack.c.bf16 %v6882_v6, %v6881_v58  ;;  %v6793_v20 = vadd.f32 %v8054_v61, %v11247_v40 }
 0x929   : > { %v8056_v43 = vpop.f32.mrf.mxu1 }
 0x92a   : > { %v8057_v9 = vadd.f32 %v8056_v43, %v8055_v62  ;;  %8161 = vmatmul.mubr.bf16.gmra.mxu0 %v6908_v21  ;;  %v6883_v14 = vmax.f32 %v6793_v20, 0.0 }
 0x92b   : > { %v8058_v5 = vpop.f32.mrf.mxu1 }
 0x92c   : > { %v6796_v13 = vadd.f32 %v8057_v9, %v11247_v40 }
 0x92d   : > { %v8059_v59 = vpop.f32.mrf.mxu1 }
 0x92e   : > { %v6884_v42 = vmax.f32 %v6796_v13, 0.0  ;;  %v8060_v49 = vadd.f32 %v8059_v59, %v8058_v5 }
 0x92f   : > { %v8061_v50 = vpop.f32.mrf.mxu1 }
 0x930   : > { %v6909_v22 = vpack.c.bf16 %v6884_v42, %v6883_v14  ;;  %v6801_v44 = vadd.f32 %v8060_v49, %v11247_v40 }
 0x931   : > { %v8062_v48 = vpop.f32.mrf.mxu1 }
 0x932   : > { %v8063_v51 = vadd.f32 %v8062_v48, %v8061_v50  ;;  %8164 = vmatprep.mubr.bf16.mxu0 %v6909_v22  ;;  %v6885_v33 = vmax.f32 %v6801_v44, 0.0 }
 0x933   : > { %v8064_v2 = vpop.f32.mrf.mxu1 }
 0x934   : > { %v6804_v57 = vadd.f32 %v8063_v51, %v11247_v40 }
 0x935   : > { %v8065_v30 = vpop.f32.mrf.mxu1 }
 0x936   : > { %v6886_v39 = vmax.f32 %v6804_v57, 0.0  ;;  %v8066_v35 = vadd.f32 %v8065_v30, %v8064_v2 }
 0x937   : > { %v8067_v11 = vpop.f32.mrf.mxu1 }
 0x938   : > { %v6910_v0 = vpack.c.bf16 %v6886_v39, %v6885_v33  ;;  %v6809_v16 = vadd.f32 %v8066_v35, %v11247_v40 }
 0x939   : > { %v8068_v7 = vpop.f32.mrf.mxu1 }
 0x93a   : > { %v8069_v46 = vadd.f32 %v8068_v7, %v8067_v11  ;;  %8165 = vmatmul.mubr.bf16.gmra.mxu0 %v6910_v0  ;;  %v6887_v36 = vmax.f32 %v6809_v16, 0.0 }
 0x93b   : > { %v8070_v4 = vpop.f32.mrf.mxu1 }
 0x93c   : > { %v6812_v56 = vadd.f32 %v8069_v46, %v11247_v40 }
 0x93d   : > { %v8071_v19 = vpop.f32.mrf.mxu1 }
 0x93e   : > { %v6888_v17 = vmax.f32 %v6812_v56, 0.0  ;;  %v8072_v28 = vadd.f32 %v8071_v19, %v8070_v4 }
 0x93f   : > { %v8073_v15 = vpop.f32.mrf.mxu1 }
 0x940   : > { %v6911_v24 = vpack.c.bf16 %v6888_v17, %v6887_v36  ;;  %v6817_v54 = vadd.f32 %v8072_v28, %v11247_v40 }
 0x941   : > { %v8074_v38 = vpop.f32.mrf.mxu1 }
 0x942   : > { %v8075_v34 = vadd.f32 %v8074_v38, %v8073_v15  ;;  %8168 = vmatprep.mubr.bf16.mxu0 %v6911_v24  ;;  %v6889_v18 = vmax.f32 %v6817_v54, 0.0 }
 0x943   : > { %v8076_v26 = vpop.f32.mrf.mxu1 }
 0x944   : > { %v6820_v41 = vadd.f32 %v8075_v34, %v11247_v40 }
 0x945   : > { %v8077_v47 = vpop.f32.mrf.mxu1 }
 0x946   : > { %v6890_v27 = vmax.f32 %v6820_v41, 0.0  ;;  %v8078_v52 = vadd.f32 %v8077_v47, %v8076_v26 }
 0x947   : > { %v8079_v45 = vpop.f32.mrf.mxu1 }
 0x948   : > { %v6912_v31 = vpack.c.bf16 %v6890_v27, %v6889_v18  ;;  %v6825_v55 = vadd.f32 %v8078_v52, %v11247_v40 }
 0x949   : > { %v8080_v12 = vpop.f32.mrf.mxu1 }
 0x94a   : > { %v8081_v8 = vadd.f32 %v8080_v12, %v8079_v45  ;;  %8169 = vmatmul.mubr.bf16.gmra.mxu0 %v6912_v31  ;;  %v6891_v61 = vmax.f32 %v6825_v55, 0.0 }
 0x94b   : > { %v8082_v29 = vpop.f32.mrf.mxu1 }
 0x94c   : > { %v6828_v58 = vadd.f32 %v8081_v8, %v11247_v40 }
 0x94d   : > { %v8083_v6 = vpop.f32.mrf.mxu1 }
 0x94e   : > { %v6892_v62 = vmax.f32 %v6828_v58, 0.0  ;;  %v8084_v21 = vadd.f32 %v8083_v6, %v8082_v29 }
 0x94f   : > { %v8085_v43 = vpop.f32.mrf.mxu1 }
 0x950   : > { %v6913_v20 = vpack.c.bf16 %v6892_v62, %v6891_v61  ;;  %v6833_v5 = vadd.f32 %v8084_v21, %v11247_v40 }
 0x951   : > { %v8086_v9 = vpop.f32.mrf.mxu1 }
 0x952   : > { %v8087_v13 = vadd.f32 %v8086_v9, %v8085_v43  ;;  %8172 = vmatprep.mubr.bf16.mxu0 %v6913_v20  ;;  %v6893_v49 = vmax.f32 %v6833_v5, 0.0  ;;  %v4986_v43 = vsub.s32 2, %v9099_v3  ;;  %v11285_v20 = vld [vmem:[%s11490_s17] ss:$0 sm:$0xff] }
 0x953   : > { %v8088_v59 = vpop.f32.mrf.mxu1  ;;  %v8777_v9 = vld [vmem:[%s11483_s10] sm:$0x7] }
 0x954   : > { %v6836_v14 = vadd.f32 %v8087_v13, %v11247_v40  ;;  %v11290_v5 = vrot.slane %v8777_v9, %v4986_v43 }
 0x955   : > { %v8089_v42 = vpop.f32.mrf.mxu1 }
 0x956   : > { %v6894_v50 = vmax.f32 %v6836_v14, 0.0  ;;  %v8090_v22 = vadd.f32 %v8089_v42, %v8088_v59  ;;  %v7915_v59 = vadd.f32 %v10847_v37, %v10840_v25  ;;  %v5475_v42 = vadd.f32 %v10805_v32, %v11290_v5 }
 0x957   : > { %v8091_v48 = vpop.f32.mrf.mxu1 }
 0x958   : > { %v6914_v44 = vpack.c.bf16 %v6894_v50, %v6893_v49  ;;  %v6841_v2 = vadd.f32 %v8090_v22, %v11247_v40  ;;  %v5486_v50 = vadd.f32 %v7915_v59, %v11290_v5  ;;  %v11546_v59 = vld [vmem:[#allocation15_spill] sm:$0xff] }
 0x959   : > { %v8092_v51 = vpop.f32.mrf.mxu1 }
 0x95a   : > { %v8093_v57 = vadd.f32 %v8092_v51, %v8091_v48  ;;  %8173 = vmatmul.mubr.bf16.gmra.mxu0 %v6914_v44  ;;  %v6895_v35 = vmax.f32 %v6841_v2, 0.0 }
 0x95b   : > { %v8094_v30 = vpop.f32.mrf.mxu1 }
 0x95c   : > { %v6844_v33 = vadd.f32 %v8093_v57, %v11247_v40  ;;  %v5499_v57 = vadd.f32 %v10871_v1, %v11290_v5 }
 0x95d   : > { %v8095_v39 = vpop.f32.mrf.mxu1 }
 0x95e   : > { %v6896_v11 = vmax.f32 %v6844_v33, 0.0  ;;  %v8096_v0 = vadd.f32 %v8095_v39, %v8094_v30  ;;  %v7927_v30 = vadd.f32 %v10877_v53, %v10873_v10 }
 0x95f   : > { %v8097_v7 = vpop.f32.mrf.mxu1 }
 0x960   : > { %v6915_v16 = vpack.c.bf16 %v6896_v11, %v6895_v35  ;;  %v6849_v4 = vadd.f32 %v8096_v0, %v11247_v40  ;;  %v11537_v35 = vld [vmem:[#allocation3_spill] sm:$0xff]  ;;  %v11538_v0 = vld [vmem:[#allocation4_spill] sm:$0xff]  ;;  %v5502_v1 = vadd.f32 %v7927_v30, %v11290_v5 }
 0x961   : > { %v8098_v46 = vpop.f32.mrf.mxu1  ;;  %v5491_v11 = vadd.f32 %v11537_v35, %v11290_v5 }
 0x962   : > { %v8099_v56 = vadd.f32 %v8098_v46, %v8097_v7  ;;  %8176 = vmatprep.mubr.bf16.mxu0 %v6915_v16  ;;  %v6897_v28 = vmax.f32 %v6849_v4, 0.0  ;;  %v11539_v7 = vld [vmem:[#allocation5_spill] sm:$0xff] }
 0x963   : > { %v8100_v19 = vpop.f32.mrf.mxu1  ;;  %v7921_v16 = vadd.f32 %v11539_v7, %v11538_v0  ;;  %v11552_v7 = vld [vmem:[#allocation21_spill] sm:$0xff] }
 0x964   : > { %v6852_v36 = vadd.f32 %v8099_v56, %v11247_v40 }
 0x965   : > { %v8101_v17 = vpop.f32.mrf.mxu1 }
 0x966   : > { %v6898_v15 = vmax.f32 %v6852_v36, 0.0  ;;  %v8102_v24 = vadd.f32 %v8101_v17, %v8100_v19  ;;  %v5494_v36 = vadd.f32 %v7921_v16, %v11290_v5  ;;  %v5547_v16 = vadd.f32 %v11552_v7, %v11290_v5 }
 0x967   : > { %v8103_v38 = vpop.f32.mrf.mxu1 }
 0x968   : > { %v6916_v54 = vpack.c.bf16 %v6898_v15, %v6897_v28  ;;  %v6857_v26 = vadd.f32 %v8102_v24, %v11247_v40 }
 0x969   : > { %v8104_v34 = vpop.f32.mrf.mxu1 }
 0x96a   : > { %v8105_v41 = vadd.f32 %v8104_v34, %v8103_v38  ;;  %8177 = vmatmul.mubr.bf16.gmra.mxu0 %v6916_v54  ;;  %v6899_v52 = vmax.f32 %v6857_v26, 0.0  ;;  %v11540_v38 = vld [vmem:[#allocation9_spill] sm:$0xff]  ;;  %v11541_v34 = vld [vmem:[#allocation10_spill] sm:$0xff]  ;;  %v11542_v26 = vld [vmem:[#allocation11_spill] sm:$0xff] }
 0x96b   : > { %v8106_v47 = vpop.f32.mrf.mxu1  ;;  %v5515_v54 = vadd.f32 %v11540_v38, %v11290_v5 }
 0x96c   : > { %v6860_v18 = vadd.f32 %v8105_v41, %v11247_v40  ;;  %v7939_v41 = vadd.f32 %v11542_v26, %v11541_v34 }
 0x96d   : > { %v8107_v27 = vpop.f32.mrf.mxu1 }
 0x96e   : > { %v6900_v45 = vmax.f32 %v6860_v18, 0.0  ;;  %v8108_v31 = vadd.f32 %v8107_v27, %v8106_v47  ;;  %v11543_v27 = vld [vmem:[#allocation6_spill] sm:$0xff] }
 0x96f   : > { %v8109_v12 = vpop.f32.mrf.mxu1 }
 0x970   : > { %v6917_v55 = vpack.c.bf16 %v6900_v45, %v6899_v52  ;;  %v6865_v29 = vadd.f32 %v8108_v31, %v11247_v40  ;;  %v5507_v52 = vadd.f32 %v11543_v27, %v11290_v5  ;;  %v11544_v45 = vld [vmem:[#allocation7_spill] sm:$0xff]  ;;  %v11545_v31 = vld [vmem:[#allocation8_spill] sm:$0xff] }
 0x971   : > { %v8110_v8 = vpop.f32.mrf.mxu1 }
 0x972   : > { %v8111_v58 = vadd.f32 %v8110_v8, %v8109_v12  ;;  %8180 = vmatprep.mubr.bf16.mxu1 %v6917_v55  ;;  %v6901_v61 = vmax.f32 %v6865_v29, 0.0  ;;  %v7933_v12 = vadd.f32 %v11545_v31, %v11544_v45  ;;  %v11558_v31 = vld [vmem:[#allocation27_spill] sm:$0xff] }
 0x974   : > { %v6868_v6 = vadd.f32 %v8111_v58, %v11247_v40  ;;  %v5483_v40 = vadd.f32 %v10835_v23, %v11290_v5  ;;  %v7909_v23 = vadd.f32 %v10823_v60, %v10811_v63  ;;  %v5518_v58 = vadd.f32 %v7939_v41, %v11290_v5 }
 0x976   : > { %v6902_v62 = vmax.f32 %v6868_v6, 0.0  ;;  %v5478_v51 = vadd.f32 %v7909_v23, %v11290_v5 }
 0x978   : > { %v6918_v21 = vpack.c.bf16 %v6902_v62, %v6901_v61 }
 0x97a   : > { %8181 = vmatmul.mubr.bf16.vlgmr.msra.gmra.mxu1 %v6918_v21  ;;  %v5510_v21 = vadd.f32 %v7933_v12, %v11290_v5  ;;  %v5563_v12 = vadd.f32 %v11558_v31, %v11290_v5 }
 0x9ca   : > { %v8154_v13 = vpop.f32.mrf.mxu0 }
 0x9cb   : > { %v7033_v3 = vadd.f32 %v8154_v13, %v11285_v20 }
 0x9cc   : > { %v7024_v14 = vpop.f32.mrf.mxu0 }
 0x9cd   : > { %v7153_v25 = vadd.f32 %v7033_v3, %v5483_v40  ;;  %v7025_v37 = vadd.f32 %v11285_v20, %v7024_v14  ;;  %v5531_v3 = vadd.f32 %v11546_v59, %v11290_v5  ;;  %v11547_v14 = vld [vmem:[#allocation16_spill] sm:$0xff] }
 0x9ce   : > { %v8155_v49 = vpop.f32.mrf.mxu0 }
 0x9cf   : > { %7186 = vst.msk [vmem:[%s11301_s23 + $0x10] sm:$0xff] %vm7183_vm1, %v7153_v25  ;;  %v7151_v22 = vadd.f32 %v7025_v37, %v5475_v42  ;;  %v7036_v48 = vadd.f32 %v8155_v49, %v11285_v20  ;;  %v11548_v42 = vld [vmem:[#allocation17_spill] sm:$0xff]  ;;  %v11549_v49 = vld [vmem:[#allocation12_spill] sm:$0xff] }
 0x9d0   : > { %v7027_v44 = vpop.f32.mrf.mxu0  ;;  %v7951_v23 = vadd.f32 %v11548_v42, %v11547_v14 }
 0x9d1   : > { %7184 = vst.msk [vmem:[%s11301_s23] sm:$0xff] %vm7183_vm1, %v7151_v22  ;;  %v7154_v32 = vadd.f32 %v7036_v48, %v5486_v50  ;;  %v7028_v63 = vadd.f32 %v11285_v20, %v7027_v44  ;;  %v5523_v50 = vadd.f32 %v11549_v49, %v11290_v5  ;;  %v11550_v22 = vld [vmem:[#allocation13_spill] sm:$0xff]  ;;  %v11551_v48 = vld [vmem:[#allocation14_spill] sm:$0xff] }
 0x9d2   : > { %v7945_v44 = vadd.f32 %v11551_v48, %v11550_v22 }
 0x9d3   : > { %7187 = vst.msk [vmem:[%s11301_s23 + $0x18] sm:$0xff] %vm7183_vm1, %v7154_v32  ;;  %v7152_v60 = vadd.f32 %v7028_v63, %v5478_v51 }
 0x9d5   : > { %7185 = vst.msk [vmem:[%s11301_s23 + $0x8] sm:$0xff] %vm7183_vm1, %v7152_v60  ;;  %v5534_v60 = vadd.f32 %v7951_v23, %v11290_v5 }
 0x9da   : > { %v8158_v2 = vpop.f32.mrf.mxu0 }
 0x9db   : > { %v7049_v33 = vadd.f32 %v8158_v2, %v11285_v20 }
 0x9dc   : > { %v7040_v39 = vpop.f32.mrf.mxu0 }
 0x9dd   : > { %v7157_v46 = vadd.f32 %v7049_v33, %v5499_v57  ;;  %v7041_v4 = vadd.f32 %v11285_v20, %v7040_v39  ;;  %v5526_v33 = vadd.f32 %v7945_v44, %v11290_v5 }
 0x9de   : > { %v8159_v56 = vpop.f32.mrf.mxu0 }
 0x9df   : > { %7190 = vst.msk [vmem:[%s11301_s23 + $0x30] sm:$0xff] %vm7183_vm1, %v7157_v46  ;;  %v7155_v10 = vadd.f32 %v7041_v4, %v5491_v11  ;;  %v7052_v53 = vadd.f32 %v8159_v56, %v11285_v20  ;;  %v11553_v46 = vld [vmem:[#allocation22_spill] sm:$0xff]  ;;  %v11554_v4 = vld [vmem:[#allocation23_spill] sm:$0xff] }
 0x9e0   : > { %v7043_v19 = vpop.f32.mrf.mxu0  ;;  %v7963_v56 = vadd.f32 %v11554_v4, %v11553_v46 }
 0x9e1   : > { %7188 = vst.msk [vmem:[%s11301_s23 + $0x20] sm:$0xff] %vm7183_vm1, %v7155_v10  ;;  %v7158_v17 = vadd.f32 %v7052_v53, %v5502_v1  ;;  %v7044_v28 = vadd.f32 %v11285_v20, %v7043_v19  ;;  %v11555_v53 = vld [vmem:[#allocation18_spill] sm:$0xff] }
 0x9e2   : > { %v5539_v19 = vadd.f32 %v11555_v53, %v11290_v5  ;;  %v11569_v53 = vld [vmem:[#allocation37_spill] sm:$0xff] }
 0x9e3   : > { %7191 = vst.msk [vmem:[%s11301_s23 + $0x38] sm:$0xff] %vm7183_vm1, %v7158_v17  ;;  %v7156_v15 = vadd.f32 %v7044_v28, %v5494_v36  ;;  %v11556_v36 = vld [vmem:[#allocation19_spill] sm:$0xff]  ;;  %v11557_v17 = vld [vmem:[#allocation20_spill] sm:$0xff] }
 0x9e4   : > { %v7957_v28 = vadd.f32 %v11557_v17, %v11556_v36 }
 0x9e5   : > { %7189 = vst.msk [vmem:[%s11301_s23 + $0x28] sm:$0xff] %vm7183_vm1, %v7156_v15 }
 0x9ea   : > { %v8162_v24 = vpop.f32.mrf.mxu0 }
 0x9eb   : > { %v7065_v47 = vadd.f32 %v8162_v24, %v11285_v20 }
 0x9ec   : > { %v7056_v18 = vpop.f32.mrf.mxu0 }
 0x9ed   : > { %v7161_v55 = vadd.f32 %v7065_v47, %v5515_v54  ;;  %v7057_v8 = vadd.f32 %v11285_v20, %v7056_v18  ;;  %v5550_v54 = vadd.f32 %v7963_v56, %v11290_v5  ;;  %v5542_v47 = vadd.f32 %v7957_v28, %v11290_v5  ;;  %v11567_v56 = vld [vmem:[#allocation35_spill] sm:$0xff]  ;;  %v11570_v28 = vld [vmem:[#allocation33_spill] sm:$0xff] }
 0x9ee   : > { %v8163_v29 = vpop.f32.mrf.mxu0 }
 0x9ef   : > { %7194 = vst.msk [vmem:[%s11301_s23 + $0x50] sm:$0xff] %vm7183_vm1, %v7161_v55  ;;  %v7159_v6 = vadd.f32 %v7057_v8, %v5507_v52  ;;  %v7068_v61 = vadd.f32 %v8163_v29, %v11285_v20  ;;  %v11559_v29 = vld [vmem:[#allocation24_spill] sm:$0xff] }
 0x9f0   : > { %v7059_v62 = vpop.f32.mrf.mxu0 }
 0x9f1   : > { %7192 = vst.msk [vmem:[%s11301_s23 + $0x40] sm:$0xff] %vm7183_vm1, %v7159_v6  ;;  %v7162_v43 = vadd.f32 %v7068_v61, %v5518_v58  ;;  %v7060_v9 = vadd.f32 %v11285_v20, %v7059_v62  ;;  %v5555_v58 = vadd.f32 %v11559_v29, %v11290_v5  ;;  %v11560_v6 = vld [vmem:[#allocation25_spill] sm:$0xff]  ;;  %v11561_v61 = vld [vmem:[#allocation26_spill] sm:$0xff] }
 0x9f2   : > { %v7969_v62 = vadd.f32 %v11561_v61, %v11560_v6 }
 0x9f3   : > { %7195 = vst.msk [vmem:[%s11301_s23 + $0x58] sm:$0xff] %vm7183_vm1, %v7162_v43  ;;  %v7160_v13 = vadd.f32 %v7060_v9, %v5510_v21 }
 0x9f4   : > { %v5558_v42 = vadd.f32 %v7969_v62, %v11290_v5 }
 0x9f5   : > { %7193 = vst.msk [vmem:[%s11301_s23 + $0x48] sm:$0xff] %vm7183_vm1, %v7160_v13  ;;  %v11562_v13 = vld [vmem:[#allocation28_spill] sm:$0xff] }
 0x9fa   : > { %v8166_v40 = vpop.f32.mrf.mxu0 }
 0x9fb   : > { %v7081_v25 = vadd.f32 %v8166_v40, %v11285_v20  ;;  %v5566_v40 = vadd.f32 %v11562_v13, %v11290_v5 }
 0x9fc   : > { %v7072_v37 = vpop.f32.mrf.mxu0 }
 0x9fd   : > { %v7165_v51 = vadd.f32 %v7081_v25, %v5531_v3  ;;  %v7073_v32 = vadd.f32 %v11285_v20, %v7072_v37 }
 0x9fe   : > { %v8167_v63 = vpop.f32.mrf.mxu0 }
 0x9ff   : > { %7198 = vst.msk [vmem:[%s11301_s23 + $0x70] sm:$0xff] %vm7183_vm1, %v7165_v51  ;;  %v7163_v2 = vadd.f32 %v7073_v32, %v5523_v50  ;;  %v7084_v57 = vadd.f32 %v8167_v63, %v11285_v20  ;;  %v11563_v50 = vld [vmem:[#allocation31_spill] sm:$0xff]  ;;  %v11564_v51 = vld [vmem:[#allocation29_spill] sm:$0xff] }
 0xa00   : > { %v7075_v30 = vpop.f32.mrf.mxu0  ;;  %v5579_v22 = vadd.f32 %v11563_v50, %v11290_v5  ;;  %v5571_v32 = vadd.f32 %v11564_v51, %v11290_v5 }
 0xa01   : > { %7196 = vst.msk [vmem:[%s11301_s23 + $0x60] sm:$0xff] %vm7183_vm1, %v7163_v2  ;;  %v7166_v39 = vadd.f32 %v7084_v57, %v5534_v60  ;;  %v7076_v35 = vadd.f32 %v11285_v20, %v7075_v30  ;;  %v11565_v57 = vld [vmem:[#allocation32_spill] sm:$0xff] }
 0xa02   : > { %v5582_v30 = vadd.f32 %v11565_v57, %v11290_v5 }
 0xa03   : > { %7199 = vst.msk [vmem:[%s11301_s23 + $0x78] sm:$0xff] %vm7183_vm1, %v7166_v39  ;;  %v7164_v11 = vadd.f32 %v7076_v35, %v5526_v33 }
 0xa05   : > { %7197 = vst.msk [vmem:[%s11301_s23 + $0x68] sm:$0xff] %vm7183_vm1, %v7164_v11  ;;  %v11566_v11 = vld [vmem:[#allocation30_spill] sm:$0xff] }
 0xa0a   : > { %v8170_v0 = vpop.f32.mrf.mxu0 }
 0xa0b   : > { %v7097_v1 = vadd.f32 %v8170_v0, %v11285_v20  ;;  %v5574_v0 = vadd.f32 %v11566_v11, %v11290_v5 }
 0xa0c   : > { %v7088_v10 = vpop.f32.mrf.mxu0 }
 0xa0d   : > { %v7169_v15 = vadd.f32 %v7097_v1, %v5547_v16  ;;  %v7089_v24 = vadd.f32 %v11285_v20, %v7088_v10  ;;  %v5595_v1 = vadd.f32 %v11567_v56, %v11290_v5  ;;  %v11568_v10 = vld [vmem:[#allocation36_spill] sm:$0xff] }
 0xa0e   : > { %v8171_v38 = vpop.f32.mrf.mxu0 }
 0xa0f   : > { %7202 = vst.msk [vmem:[%s11301_s23 + $0x90] sm:$0xff] %vm7183_vm1, %v7169_v15  ;;  %v7167_v34 = vadd.f32 %v7089_v24, %v5539_v19  ;;  %v7100_v26 = vadd.f32 %v8171_v38, %v11285_v20  ;;  %v7999_v19 = vadd.f32 %v11569_v53, %v11568_v10  ;;  %v5587_v15 = vadd.f32 %v11570_v28, %v11290_v5 }
 0xa10   : > { %v7091_v41 = vpop.f32.mrf.mxu0 }
 0xa11   : > { %7200 = vst.msk [vmem:[%s11301_s23 + $0x80] sm:$0xff] %vm7183_vm1, %v7167_v34  ;;  %v7170_v18 = vadd.f32 %v7100_v26, %v5550_v54  ;;  %v7092_v27 = vadd.f32 %v11285_v20, %v7091_v41  ;;  %v5598_v34 = vadd.f32 %v7999_v19, %v11290_v5 }
 0xa13   : > { %7203 = vst.msk [vmem:[%s11301_s23 + $0x98] sm:$0xff] %vm7183_vm1, %v7170_v18  ;;  %v7168_v52 = vadd.f32 %v7092_v27, %v5542_v47  ;;  %v11571_v18 = vld [vmem:[#allocation34_spill] sm:$0xff] }
 0xa14   : > { %v5590_v27 = vadd.f32 %v11571_v18, %v11290_v5 }
 0xa15   : > { %7201 = vst.msk [vmem:[%s11301_s23 + $0x88] sm:$0xff] %vm7183_vm1, %v7168_v52 }
 0xa1a   : > { %v8174_v45 = vpop.f32.mrf.mxu0 }
 0xa1b   : > { %v7113_v55 = vadd.f32 %v8174_v45, %v11285_v20 }
 0xa1c   : > { %v7104_v8 = vpop.f32.mrf.mxu0 }
 0xa1d   : > { %v7173_v21 = vadd.f32 %v7113_v55, %v5563_v12  ;;  %v7105_v43 = vadd.f32 %v11285_v20, %v7104_v8 }
 0xa1e   : > { %v8175_v9 = vpop.f32.mrf.mxu0 }
 0xa1f   : > { %7206 = vst.msk [vmem:[%s11301_s23 + $0xb0] sm:$0xff] %vm7183_vm1, %v7173_v21  ;;  %v7171_v59 = vadd.f32 %v7105_v43, %v5555_v58  ;;  %v7116_v3 = vadd.f32 %v8175_v9, %v11285_v20 }
 0xa20   : > { %v7107_v14 = vpop.f32.mrf.mxu0 }
 0xa21   : > { %7204 = vst.msk [vmem:[%s11301_s23 + $0xa0] sm:$0xff] %vm7183_vm1, %v7171_v59  ;;  %v7174_v23 = vadd.f32 %v7116_v3, %v5566_v40  ;;  %v7108_v25 = vadd.f32 %v11285_v20, %v7107_v14 }
 0xa23   : > { %7207 = vst.msk [vmem:[%s11301_s23 + $0xb8] sm:$0xff] %vm7183_vm1, %v7174_v23  ;;  %v7172_v37 = vadd.f32 %v7108_v25, %v5558_v42 }
 0xa25   : > { %7205 = vst.msk [vmem:[%s11301_s23 + $0xa8] sm:$0xff] %vm7183_vm1, %v7172_v37 }
 0xa2a   : > { %v8178_v49 = vpop.f32.mrf.mxu0 }
 0xa2b   : > { %v7129_v48 = vadd.f32 %v8178_v49, %v11285_v20 }
 0xa2c   : > { %v7120_v44 = vpop.f32.mrf.mxu0 }
 0xa2d   : > { %v7177_v63 = vadd.f32 %v7129_v48, %v5579_v22  ;;  %v7121_v60 = vadd.f32 %v11285_v20, %v7120_v44 }
 0xa2e   : > { %v8179_v2 = vpop.f32.mrf.mxu0 }
 0xa2f   : > { %7210 = vst.msk [vmem:[%s11301_s23 + $0xd0] sm:$0xff] %vm7183_vm1, %v7177_v63  ;;  %v7175_v33 = vadd.f32 %v7121_v60, %v5571_v32  ;;  %v7132_v39 = vadd.f32 %v8179_v2, %v11285_v20 }
 0xa30   : > { %v7123_v35 = vpop.f32.mrf.mxu0 }
 0xa31   : > { %7208 = vst.msk [vmem:[%s11301_s23 + $0xc0] sm:$0xff] %vm7183_vm1, %v7175_v33  ;;  %v7178_v7 = vadd.f32 %v7132_v39, %v5582_v30  ;;  %v7124_v16 = vadd.f32 %v11285_v20, %v7123_v35 }
 0xa33   : > { %7211 = vst.msk [vmem:[%s11301_s23 + $0xd8] sm:$0xff] %vm7183_vm1, %v7178_v7  ;;  %v7176_v46 = vadd.f32 %v7124_v16, %v5574_v0 }
 0xa35   : > { %7209 = vst.msk [vmem:[%s11301_s23 + $0xc8] sm:$0xff] %vm7183_vm1, %v7176_v46 }
 0xa3a   : > { %v8182_v4 = vpop.f32.mrf.mxu1 }
 0xa3b   : > { %v7145_v36 = vadd.f32 %v8182_v4, %v11285_v20 }
 0xa3c   : > { %v7136_v17 = vpop.f32.mrf.mxu1 }
 0xa3d   : > { %v7181_v24 = vadd.f32 %v7145_v36, %v5595_v1  ;;  %v7137_v38 = vadd.f32 %v11285_v20, %v7136_v17 }
 0xa3e   : > { %v8183_v54 = vpop.f32.mrf.mxu1 }
 0xa3f   : > { %7214 = vst.msk [vmem:[%s11301_s23 + $0xf0] sm:$0xff] %vm7183_vm1, %v7181_v24  ;;  %v7179_v26 = vadd.f32 %v7137_v38, %v5587_v15  ;;  %v7148_v41 = vadd.f32 %v8183_v54, %v11285_v20 }
 0xa40   : > { %v7139_v47 = vpop.f32.mrf.mxu1 }
 0xa41   : > { %7212 = vst.msk [vmem:[%s11301_s23 + $0xe0] sm:$0xff] %vm7183_vm1, %v7179_v26  ;;  %v7182_v52 = vadd.f32 %v7148_v41, %v5598_v34  ;;  %v7140_v45 = vadd.f32 %v11285_v20, %v7139_v47 }
 0xa43   : > { %7215 = vst.msk [vmem:[%s11301_s23 + $0xf8] sm:$0xff] %vm7183_vm1, %v7182_v52  ;;  %v7180_v31 = vadd.f32 %v7140_v45, %v5590_v27 }
 0xa45   : > { %7213 = vst.msk [vmem:[%s11301_s23 + $0xe8] sm:$0xff] %vm7183_vm1, %v7180_v31 }
 0xa46 PF: > { %s11572_s19 = sld [smem:[#allocation2_spill]] }
 0xa4c   : > { %s28_s27 = sadd.s32 1, %s11572_s19  }
 0xa4d   : > { %p25_p4 = scmp.ge.s32.totalorder %s28_s27, 4  }
 0xa4f   :  { %27 = sbr.rel (!%p25_p4) target bundleno = 4 (0x4), region = 135 }

</bundles_post_ra>
